<compile_context>
chip_gen: v5e
topology: v5e:2x2
jax: 0.10.0
libtpu: 0.0.40
codegen_flags: <defaults>
</compile_context>

<pallas_src>
import math
from functools import lru_cache, partial

import jax
import jax.numpy as jnp
from jax.experimental import pallas as pl
from jax.experimental.pallas import tpu as pltpu

F32 = jnp.float32
BF16 = jnp.bfloat16
BN_EPS = 1e-5
BN_GAMMA = 0.5        # BatchNorm2d.weight filled with 0.5 in the reference __init__
BN_BETA = 0.0         # BatchNorm2d.bias zeroed in the reference __init__
# pre-BN padding value: relu(PAD_NEG * scale + shift) == 0 because scale = gamma*inv_std > 0
PAD_NEG = -1e30


def _round_up(x, m):
    return (x + m - 1) // m * m


@lru_cache(maxsize=None)
def _vmem_limit():
    """Generation-aware scoped-VMEM request (v7x only has 64 MiB per TensorCore)."""
    cap = 64 * 1024 * 1024
    try:
        cap = int(pltpu.get_tpu_info().vmem_capacity_bytes)
    except Exception:
        pass
    return int(min(max(cap // 2, 32 * 1024 * 1024), 96 * 1024 * 1024))


def _cparams(sem):
    return pltpu.CompilerParams(dimension_semantics=sem,
                                vmem_limit_bytes=_vmem_limit())


_TM_CANDIDATES = (1024, 896, 784, 512, 448, 392, 256, 224, 128, 112, 64, 56, 32, 16, 8)


def _pick_tm(m, row_bytes, fixed_bytes=0, budget=16 * 1024 * 1024):
    """Pick a large M tile that fits VMEM, preferring one that divides M exactly."""
    avail = max(budget - fixed_bytes, 1 * 1024 * 1024)
    fit = [t for t in _TM_CANDIDATES if t * row_bytes <= avail]
    if not fit:
        fit = [8]
    for t in fit:
        if m % t == 0:
            return t, m
    t = min(fit[0], _round_up(m, 8))
    return t, _round_up(m, t)


# ----------------------------------------------------------------------------
# Pallas kernel builders (memoized: each unique shape compiles exactly once)
# ----------------------------------------------------------------------------
@lru_cache(maxsize=None)
def _matmul_stats_call(m_pad, k, n, tm, fused):
    """Y = [relu(X*scale+shift)] @ W  (bf16 MXU, f32 acc) + per-tile sum / sum-of-squares."""
    t_steps = m_pad // tm

    def kernel(*refs):
        if fused:
            x_ref, scale_ref, shift_ref, w_ref, y_ref, s_ref, q_ref = refs
        else:
            x_ref, w_ref, y_ref, s_ref, q_ref = refs
        x = x_ref[...]
        if fused:
            xf = jnp.maximum(x.astype(F32) * scale_ref[...] + shift_ref[...], 0.0)
            x = xf.astype(BF16)
        y = jnp.dot(x, w_ref[...], preferred_element_type=F32)
        s_ref[...] = jnp.sum(y, axis=0, keepdims=True)
        q_ref[...] = jnp.sum(y * y, axis=0, keepdims=True)
        y_ref[...] = y.astype(BF16)

    in_specs = [pl.BlockSpec((tm, k), lambda i: (i, 0))]
    if fused:
        in_specs += [pl.BlockSpec((1, k), lambda i: (0, 0)),
                     pl.BlockSpec((1, k), lambda i: (0, 0))]
    in_specs += [pl.BlockSpec((k, n), lambda i: (0, 0))]

    return pl.pallas_call(
        kernel,
        out_shape=(jax.ShapeDtypeStruct((m_pad, n), BF16),
                   jax.ShapeDtypeStruct((t_steps, 1, n), F32),
                   jax.ShapeDtypeStruct((t_steps, 1, n), F32)),
        grid_spec=pltpu.PrefetchScalarGridSpec(
            num_scalar_prefetch=0, grid=(t_steps,),
            in_specs=in_specs,
            out_specs=(pl.BlockSpec((tm, n), lambda i: (i, 0)),
                       pl.BlockSpec((None, 1, n), lambda i: (i, 0, 0)),
                       pl.BlockSpec((None, 1, n), lambda i: (i, 0, 0)))),
        compiler_params=_cparams(("parallel",)),
    )


@lru_cache(maxsize=None)
def _conv3x3_s1_call(nimg, ho, wo, cin, cout, wp):
    """Implicit-im2col 3x3 stride-1 conv, one image per grid step.

    Input is the flattened PAD_NEG-padded pre-BN map (P, cin); the previous BN's
    scale/shift + ReLU is applied on load.  Tap (dh, dw) = pltpu.roll by dw along the
    flattened row axis + a tile-aligned slice starting at dh*wp.  Columns >= wo of each
    padded row are wrap-around garbage: they are masked out of the batch statistics and
    dropped by the caller.
    """
    p = (ho + 3) * wp
    mrow = ho * wp

    def kernel(x_ref, scale_ref, shift_ref, w_ref, y_ref, s_ref, q_ref, acc_ref):
        x = jnp.maximum(x_ref[...].astype(F32) * scale_ref[...] + shift_ref[...], 0.0)
        acc_ref[...] = jnp.zeros_like(acc_ref)
        for dw in range(3):
            xs = (x if dw == 0 else pltpu.roll(x, p - dw, axis=0)).astype(BF16)
            for dh in range(3):
                off = dh * wp
                acc_ref[...] += jnp.dot(xs[off:off + mrow, :], w_ref[dh * 3 + dw],
                                        preferred_element_type=F32)
        acc = acc_ref[...]
        col = jnp.bitwise_and(
            jax.lax.broadcasted_iota(jnp.int32, (mrow, cout), 0), wp - 1)
        valid = col < wo
        s_ref[...] = jnp.sum(jnp.where(valid, acc, 0.0), axis=0, keepdims=True)
        q_ref[...] = jnp.sum(jnp.where(valid, acc * acc, 0.0), axis=0, keepdims=True)
        y_ref[...] = acc.astype(BF16)

    return pl.pallas_call(
        kernel,
        out_shape=(jax.ShapeDtypeStruct((nimg, mrow, cout), BF16),
                   jax.ShapeDtypeStruct((nimg, 1, cout), F32),
                   jax.ShapeDtypeStruct((nimg, 1, cout), F32)),
        grid_spec=pltpu.PrefetchScalarGridSpec(
            num_scalar_prefetch=0, grid=(nimg,),
            in_specs=[pl.BlockSpec((None, p, cin), lambda i: (i, 0, 0)),
                      pl.BlockSpec((1, cin), lambda i: (0, 0)),
                      pl.BlockSpec((1, cin), lambda i: (0, 0)),
                      pl.BlockSpec((9, cin, cout), lambda i: (0, 0, 0))],
            out_specs=(pl.BlockSpec((None, mrow, cout), lambda i: (i, 0, 0)),
                       pl.BlockSpec((None, 1, cout), lambda i: (i, 0, 0)),
                       pl.BlockSpec((None, 1, cout), lambda i: (i, 0, 0))),
            scratch_shapes=[pltpu.VMEM((mrow, cout), F32)]),
        compiler_params=_cparams(("parallel",)),
    )


@lru_cache(maxsize=None)
def _bn_add_relu_call(m_pad, c, tm, ds):
    """out = relu(y*scale+shift + residual); residual is raw, or yd*scaled+shiftd if ds."""

    def kernel(*refs):
        if ds:
            y_ref, s_ref, b_ref, yd_ref, sd_ref, bd_ref, o_ref = refs
            res = yd_ref[...].astype(F32) * sd_ref[...] + bd_ref[...]
        else:
            y_ref, s_ref, b_ref, r_ref, o_ref = refs
            res = r_ref[...].astype(F32)
        out = y_ref[...].astype(F32) * s_ref[...] + b_ref[...] + res
        o_ref[...] = jnp.maximum(out, 0.0).astype(BF16)

    row = pl.BlockSpec((tm, c), lambda i: (i, 0))
    vec = pl.BlockSpec((1, c), lambda i: (0, 0))
    in_specs = [row, vec, vec] + ([row, vec, vec] if ds else [row])

    return pl.pallas_call(
        kernel,
        out_shape=jax.ShapeDtypeStruct((m_pad, c), BF16),
        grid_spec=pltpu.PrefetchScalarGridSpec(
            num_scalar_prefetch=0, grid=(m_pad // tm,),
            in_specs=in_specs, out_specs=row),
        compiler_params=_cparams(("parallel",)),
    )


@lru_cache(maxsize=None)
def _maxpool_bn_call(m_pad, c, tm):
    """out = relu(max(9 windows) * scale + shift)  (stem BN fused; monotone since gamma>0)."""

    def kernel(w0, w1, w2, w3, w4, w5, w6, w7, w8, scale_ref, shift_ref, o_ref):
        m = w0[...]
        for r in (w1, w2, w3, w4, w5, w6, w7, w8):
            m = jnp.maximum(m, r[...])
        out = jnp.maximum(m.astype(F32) * scale_ref[...] + shift_ref[...], 0.0)
        o_ref[...] = out.astype(BF16)

    row = pl.BlockSpec((tm, c), lambda i: (i, 0))
    vec = pl.BlockSpec((1, c), lambda i: (0, 0))
    return pl.pallas_call(
        kernel,
        out_shape=jax.ShapeDtypeStruct((m_pad, c), BF16),
        grid_spec=pltpu.PrefetchScalarGridSpec(
            num_scalar_prefetch=0, grid=(m_pad // tm,),
            in_specs=[row] * 9 + [vec, vec], out_specs=row),
        compiler_params=_cparams(("parallel",)),
    )


@lru_cache(maxsize=None)
def _pool_fc_call(n, m, cin, cout):
    """AvgPool over the full spatial extent (as a tiny pooling matmul) fused with the FC."""

    def kernel(p_ref, x_ref, w_ref, b_ref, o_ref):
        pooled = jnp.dot(p_ref[...], x_ref[...].astype(F32),
                         preferred_element_type=F32)
        o_ref[...] = jnp.dot(pooled.astype(BF16), w_ref[...],
                             preferred_element_type=F32) + b_ref[...]

    return pl.pallas_call(
        kernel,
        out_shape=jax.ShapeDtypeStruct((n, cout), F32),
        grid_spec=pltpu.PrefetchScalarGridSpec(
            num_scalar_prefetch=0, grid=(1,),
            in_specs=[pl.BlockSpec((n, m), lambda i: (0, 0)),
                      pl.BlockSpec((m, cin), lambda i: (0, 0)),
                      pl.BlockSpec((cin, cout), lambda i: (0, 0)),
                      pl.BlockSpec((1, cout), lambda i: (0, 0))],
            out_specs=pl.BlockSpec((n, cout), lambda i: (0, 0))),
        compiler_params=_cparams(("arbitrary",)),
    )


# ----------------------------------------------------------------------------
# Thin JAX wrappers around the kernels
# ----------------------------------------------------------------------------
def _bn_scale_shift(s, q, count):
    mean = s / count
    var = jnp.maximum(q / count - mean * mean, 0.0)      # clamp (f32 cancellation guard)
    inv = jax.lax.rsqrt(var + BN_EPS)
    scale = BN_GAMMA * inv
    shift = BN_BETA - mean * scale
    return scale.reshape(1, -1).astype(F32), shift.reshape(1, -1).astype(F32)


def _matmul_stats(x2d, w, scale=None, shift=None):
    m, k = x2d.shape
    n = w.shape[1]
    fused = scale is not None
    tm, m_pad = _pick_tm(m, 4 * (k + n), fixed_bytes=2 * k * n)
    if m_pad != m:
        x2d = jnp.pad(x2d, ((0, m_pad - m), (0, 0)),
                      constant_values=PAD_NEG if fused else 0.0)
    call = _matmul_stats_call(m_pad, k, n, tm, fused)
    if fused:
        y, ps, pq = call(x2d, scale, shift, w)
    else:
        y, ps, pq = call(x2d, w)
    if m_pad != m:
        y = y[:m]
    return y, ps.sum(axis=(0, 1)), pq.sum(axis=(0, 1))


def _conv3x3_s1(y_img, scale, shift, w9):
    n, h, w, cin = y_img.shape
    cout = w9.shape[-1]
    wp = max(16, pl.next_power_of_2(w + 2))      # power of 2 -> cheap in-kernel column mask
    xp = jnp.pad(y_img, ((0, 0), (1, 2), (1, wp - w - 1), (0, 0)),
                 constant_values=PAD_NEG)
    xp = xp.reshape(n, (h + 3) * wp, cin)
    y, ps, pq = _conv3x3_s1_call(n, h, w, cin, cout, wp)(xp, scale, shift, w9)
    y = y.reshape(n, h, wp, cout)[:, :, :w, :].reshape(n * h * w, cout)
    return y, ps.sum(axis=(0, 1)), pq.sum(axis=(0, 1))


def _im2col_3x3_s2(x):
    """Explicit im2col only for the 3 stride-2 3x3 convs (small maps); PAD_NEG spatial pad."""
    n, h, w, c = x.shape
    ho, wo = (h + 2 - 3) // 2 + 1, (w + 2 - 3) // 2 + 1
    xp = jnp.pad(x, ((0, 0), (1, 1), (1, 1), (0, 0)), constant_values=PAD_NEG)
    patches = [xp[:, dh:dh + 2 * ho:2, dw:dw + 2 * wo:2, :]
               for dh in range(3) for dw in range(3)]
    return jnp.concatenate(patches, axis=-1).reshape(n * ho * wo, 9 * c)


def _bn_add_relu_id(y, sc, sh, res):
    m, c = y.shape
    tm, m_pad = _pick_tm(m, 16 * c)
    if m_pad != m:
        y = jnp.pad(y, ((0, m_pad - m), (0, 0)))
        res = jnp.pad(res, ((0, m_pad - m), (0, 0)))
    out = _bn_add_relu_call(m_pad, c, tm, False)(y, sc, sh, res)
    return out[:m] if m_pad != m else out


def _bn_add_relu_ds(y, sc, sh, yd, scd, shd):
    m, c = y.shape
    tm, m_pad = _pick_tm(m, 16 * c)
    if m_pad != m:
        y = jnp.pad(y, ((0, m_pad - m), (0, 0)))
        yd = jnp.pad(yd, ((0, m_pad - m), (0, 0)))
    out = _bn_add_relu_call(m_pad, c, tm, True)(y, sc, sh, yd, scd, shd)
    return out[:m] if m_pad != m else out


def _maxpool_bn(wins, scale, shift):
    m, c = wins[0].shape
    tm, m_pad = _pick_tm(m, 40 * c)
    if m_pad != m:
        wins = [jnp.pad(wv, ((0, m_pad - m), (0, 0)), constant_values=PAD_NEG)
                for wv in wins]
    out = _maxpool_bn_call(m_pad, c, tm)(*wins, scale, shift)
    return out[:m] if m_pad != m else out


# ----------------------------------------------------------------------------
# Network stages (jitted per distinct shape signature)
# ----------------------------------------------------------------------------
@jax.jit
def _stem_jit(x_nchw, w_stem):
    x = jnp.transpose(x_nchw, (0, 2, 3, 1)).astype(BF16)          # NCHW -> NHWC, bf16
    n, h, w, _ = x.shape
    ho, wo = (h + 6 - 7) // 2 + 1, (w + 6 - 7) // 2 + 1
    # 7x7/s2 stem keeps a small explicit im2col (only 3 input channels).
    xp = jnp.pad(x, ((0, 0), (3, 3), (3, 3), (0, 0)))
    patches = [xp[:, dh:dh + 2 * ho:2, dw:dw + 2 * wo:2, :]
               for dh in range(7) for dw in range(7)]
    cols = jnp.concatenate(patches, axis=-1).reshape(n * ho * wo, 7 * 7 * 3)
    y, s, q = _matmul_stats(cols, w_stem)
    sc, sh = _bn_scale_shift(s, q, n * ho * wo)

    # maxpool(3x3, s2, p1) fused with the stem BN + ReLU (monotone since gamma > 0)
    c = y.shape[-1]
    yi = y.reshape(n, ho, wo, c)
    hp, wpo = (ho + 2 - 3) // 2 + 1, (wo + 2 - 3) // 2 + 1
    ypad = jnp.pad(yi, ((0, 0), (1, 1), (1, 1), (0, 0)), constant_values=PAD_NEG)
    wins = [ypad[:, dh:dh + 2 * hp:2, dw:dw + 2 * wpo:2, :].reshape(n * hp * wpo, c)
            for dh in range(3) for dw in range(3)]
    out = _maxpool_bn(wins, sc, sh)
    return out.reshape(n, hp, wpo, c)


@partial(jax.jit, static_argnums=(5,))
def _bottleneck_jit(x, w1, w2, w3, wd, stride):
    n, h, w, cin = x.shape
    c1, c2, cout = w1.shape[1], w2.shape[2], w3.shape[1]
    m_in = n * h * w
    x2d = x.reshape(m_in, cin)

    # conv1 (1x1) -> batch stats of bn1
    y1, s1, q1 = _matmul_stats(x2d, w1)
    sc1, sh1 = _bn_scale_shift(s1, q1, m_in)

    ho = (h + 2 - 3) // stride + 1
    wo = (w + 2 - 3) // stride + 1
    m_out = n * ho * wo

    # conv2 (3x3, stride) with bn1+relu fused into its input load
    y1_img = y1.reshape(n, h, w, c1)
    if stride == 1:
        y2, s2, q2 = _conv3x3_s1(y1_img, sc1, sh1, w2)
    else:
        cols = _im2col_3x3_s2(y1_img)
        y2, s2, q2 = _matmul_stats(cols, w2.reshape(9 * c1, c2),
                                   jnp.tile(sc1, (1, 9)), jnp.tile(sh1, (1, 9)))
    sc2, sh2 = _bn_scale_shift(s2, q2, m_out)

    # conv3 (1x1) with bn2+relu fused into its input load
    y3, s3, q3 = _matmul_stats(y2.reshape(m_out, c2), w3, sc2, sh2)
    sc3, sh3 = _bn_scale_shift(s3, q3, m_out)

    # residual path, bn3 + add + relu
    if wd is not None:
        xr = x if stride == 1 else x[:, ::stride, ::stride, :]
        yd, sd, qd = _matmul_stats(xr.reshape(m_out, cin), wd)
        scd, shd = _bn_scale_shift(sd, qd, m_out)
        out = _bn_add_relu_ds(y3, sc3, sh3, yd, scd, shd)
    else:
        out = _bn_add_relu_id(y3, sc3, sh3, x2d)
    return out.reshape(n, ho, wo, cout)


@jax.jit
def _head_jit(x, fc_w, fc_b):
    n, h, w, c = x.shape
    hw = h * w
    x2 = x.reshape(n * hw, c)
    img = jnp.repeat(jnp.arange(n), hw)
    pool = (jnp.arange(n)[:, None] == img[None, :]).astype(F32) / float(hw)
    return _pool_fc_call(n, n * hw, c, fc_w.shape[1])(pool, x2, fc_w,
                                                      fc_b.reshape(1, -1))


def resnet101_forward(x_nchw, params):
    x = _stem_jit(x_nchw, params["stem_w"])
    for layer in params["layers"]:
        for blk in layer:
            x = _bottleneck_jit(x, blk["w1"], blk["w2"], blk["w3"],
                                blk["wd"], blk["stride"])
    return _head_jit(x, params["fc_w"], params["fc_b"])


# ----------------------------------------------------------------------------
# Deterministic parameter construction (shapes follow the reference __init__)
# ----------------------------------------------------------------------------
def _kaiming(key, shape, fan_out_elems):
    # kaiming_normal_, mode='fan_out', nonlinearity='relu' -> std = sqrt(2 / (cout*k*k))
    std = math.sqrt(2.0 / fan_out_elems)
    return (jax.random.normal(key, shape, F32) * std).astype(BF16)


def build_params(key):
    cfg = [[64, 64, 64], [256, 64, 64] * 2, [256, 128, 128], [512, 128, 128] * 3,
           [512, 256, 256], [1024, 256, 256] * 22, [1024, 512, 512],
           [2048, 512, 512] * 2, [2048]]
    cfg = [item for sub in cfg for item in sub]
    assert len(cfg) == 100, "Length of cfg_official is not right"

    keys = iter(jax.random.split(key, 256))
    params = {"stem_w": _kaiming(next(keys), (7 * 7 * 3, 64), 64 * 49)}

    layer_defs = [(cfg[0:9], 256, 3, 1), (cfg[9:21], 512, 4, 2),
                  (cfg[21:90], 1024, 23, 2), (cfg[90:99], 2048, 3, 2)]
    inplanes = 64
    layers = []
    for layer_cfg, planes, blocks, stride in layer_defs:
        blks = []
        for b in range(blocks):
            c0, c1, c2 = layer_cfg[3 * b:3 * b + 3]
            s = stride if b == 0 else 1
            need_ds = (b == 0) and (s != 1 or inplanes != planes)
            blks.append({
                "w1": _kaiming(next(keys), (c0, c1), c1),
                "w2": _kaiming(next(keys), (9, c1, c2), c2 * 9),
                "w3": _kaiming(next(keys), (c2, planes), planes),
                "wd": _kaiming(next(keys), (inplanes, planes), planes) if need_ds else None,
                "stride": s,
            })
            inplanes = planes
        layers.append(blks)
    params["layers"] = layers

    fan_in = cfg[-1]                                  # 2048
    bound = 1.0 / math.sqrt(fan_in)                   # PyTorch nn.Linear default init
    params["fc_w"] = jax.random.uniform(next(keys), (fan_in, 1000), F32,
                                        -bound, bound).astype(BF16)
    params["fc_b"] = jax.random.uniform(next(keys), (1000,), F32, -bound, bound)
    return params


if __name__ == "__main__":
    key = jax.random.PRNGKey(0)
    pkey, xkey = jax.random.split(key)
    params = build_params(pkey)

    # 224x224 is required: layer4's output must be 7x7 so AvgPool2d(7) -> 1x1 and the
    # flattened feature size matches the fc's 2048 inputs (as in the reference module).
    x = jax.random.normal(xkey, (2, 3, 224, 224), F32)

    logits = resnet101_forward(x, params)
    logits = jax.block_until_ready(logits)

    assert logits.shape == (2, 1000), logits.shape
    assert bool(jnp.all(jnp.isfinite(logits)))
    print("KERNEL_OK")
</pallas_src>

<mosaic_0001>
module attributes {stable_mosaic.version = 11 : i64} {
  func.func @kernel(%arg0: i32, %arg1: memref<896x147xbf16, #tpu.memory_space<vmem>>, %arg2: memref<147x64xbf16, #tpu.memory_space<vmem>>, %arg3: memref<896x64xbf16, #tpu.memory_space<vmem>>, %arg4: memref<1x1x64xf32, #tpu.memory_space<vmem>>, %arg5: memref<1x1x64xf32, #tpu.memory_space<vmem>>) attributes {dimension_semantics = [#tpu.dimension_semantics<parallel>], iteration_bounds = array<i64: 28>, scalar_prefetch = 0 : i64, scratch_operands = 0 : i64, tpu.core_type = #tpu.core_type<tc>, window_params = [{transform_indices = @transform_0, window_bounds = array<i64: 896, 147>}, {pipeline_mode = #tpu.pipeline_mode<synchronous>, transform_indices = @transform_1, window_bounds = array<i64: 147, 64>}, {transform_indices = @transform_2, window_bounds = array<i64: 896, 64>}, {transform_indices = @transform_3, window_bounds = array<i64: 1, 1, 64>}, {transform_indices = @transform_4, window_bounds = array<i64: 1, 1, 64>}]} {
    %c0 = arith.constant 0 : index
    %c0_0 = arith.constant 0 : index
    %0 = vector.load %arg1[%c0, %c0_0] : memref<896x147xbf16, #tpu.memory_space<vmem>>, vector<896x147xbf16>
    %c0_1 = arith.constant 0 : index
    %c0_2 = arith.constant 0 : index
    %1 = vector.load %arg2[%c0_1, %c0_2] : memref<147x64xbf16, #tpu.memory_space<vmem>>, vector<147x64xbf16>
    %cst = arith.constant dense<0.000000e+00> : vector<896x64xf32>
    %2 = tpu.matmul %0, %1, %cst {dimension_numbers = #tpu.dot_dimension_numbers<[1], [0], [0], [1], [0, 0, 1, 1], [], []>} : vector<896x147xbf16>, vector<147x64xbf16>, vector<896x64xf32> -> vector<896x64xf32>
    %cst_3 = arith.constant dense<0.000000e+00> : vector<64xf32>
    %3 = vector.multi_reduction <add>, %2, %cst_3 [0] : vector<896x64xf32> to vector<64xf32>
    %4 = vector.shape_cast %3 : vector<64xf32> to vector<1x64xf32>
    %c0_4 = arith.constant 0 : index
    %c0_5 = arith.constant 0 : index
    %c0_6 = arith.constant 0 : index
    %5 = vector.load %arg4[%c0_4, %c0_5, %c0_6] : memref<1x1x64xf32, #tpu.memory_space<vmem>>, vector<1x1x64xf32>
    %6 = vector.shape_cast %5 : vector<1x1x64xf32> to vector<1x64xf32>
    %7 = vector.shape_cast %4 : vector<1x64xf32> to vector<1x1x64xf32>
    tpu.vector_store %arg4[%c0_4, %c0_5, %c0_6], %7 {strides = array<i32>} : memref<1x1x64xf32, #tpu.memory_space<vmem>>, vector<1x1x64xf32>,
    %8 = arith.mulf %2, %2 : vector<896x64xf32>
    %cst_7 = arith.constant dense<0.000000e+00> : vector<64xf32>
    %9 = vector.multi_reduction <add>, %8, %cst_7 [0] : vector<896x64xf32> to vector<64xf32>
    %10 = vector.shape_cast %9 : vector<64xf32> to vector<1x64xf32>
    %c0_8 = arith.constant 0 : index
    %c0_9 = arith.constant 0 : index
    %c0_10 = arith.constant 0 : index
    %11 = vector.load %arg5[%c0_8, %c0_9, %c0_10] : memref<1x1x64xf32, #tpu.memory_space<vmem>>, vector<1x1x64xf32>
    %12 = vector.shape_cast %11 : vector<1x1x64xf32> to vector<1x64xf32>
    %13 = vector.shape_cast %10 : vector<1x64xf32> to vector<1x1x64xf32>
    tpu.vector_store %arg5[%c0_8, %c0_9, %c0_10], %13 {strides = array<i32>} : memref<1x1x64xf32, #tpu.memory_space<vmem>>, vector<1x1x64xf32>,
    %14 = arith.truncf %2 : vector<896x64xf32> to vector<896x64xbf16>
    %c0_11 = arith.constant 0 : index
    %c0_12 = arith.constant 0 : index
    %15 = vector.load %arg3[%c0_11, %c0_12] : memref<896x64xbf16, #tpu.memory_space<vmem>>, vector<896x64xbf16>
    tpu.vector_store %arg3[%c0_11, %c0_12], %14 {strides = array<i32>} : memref<896x64xbf16, #tpu.memory_space<vmem>>, vector<896x64xbf16>,
    return
  }
  func.func @transform_0(%arg0: i32) -> (i32, i32) {
    %c0_i32 = arith.constant 0 : i32
    %c0_i32_0 = arith.constant 0 : i32
    return %arg0, %c0_i32 : i32, i32
  }
  func.func @transform_1(%arg0: i32) -> (i32, i32) {
    %c0_i32 = arith.constant 0 : i32
    %c0_i32_0 = arith.constant 0 : i32
    %c0_i32_1 = arith.constant 0 : i32
    return %c0_i32, %c0_i32_0 : i32, i32
  }
  func.func @transform_2(%arg0: i32) -> (i32, i32) {
    %c0_i32 = arith.constant 0 : i32
    %c0_i32_0 = arith.constant 0 : i32
    return %arg0, %c0_i32 : i32, i32
  }
  func.func @transform_3(%arg0: i32) -> (i32, i32, i32) {
    %c0_i32 = arith.constant 0 : i32
    %c0_i32_0 = arith.constant 0 : i32
    %c0_i32_1 = arith.constant 0 : i32
    return %arg0, %c0_i32, %c0_i32_0 : i32, i32, i32
  }
  func.func @transform_4(%arg0: i32) -> (i32, i32, i32) {
    %c0_i32 = arith.constant 0 : i32
    %c0_i32_0 = arith.constant 0 : i32
    %c0_i32_1 = arith.constant 0 : i32
    return %arg0, %c0_i32, %c0_i32_0 : i32, i32, i32
  }
}

module attributes {stable_mosaic.version = 11 : i64} {
  func.func @kernel(%arg0: i32, %arg1: memref<896x64xbf16, #tpu.memory_space<vmem>>, %arg2: memref<896x64xbf16, #tpu.memory_space<vmem>>, %arg3: memref<896x64xbf16, #tpu.memory_space<vmem>>, %arg4: memref<896x64xbf16, #tpu.memory_space<vmem>>, %arg5: memref<896x64xbf16, #tpu.memory_space<vmem>>, %arg6: memref<896x64xbf16, #tpu.memory_space<vmem>>, %arg7: memref<896x64xbf16, #tpu.memory_space<vmem>>, %arg8: memref<896x64xbf16, #tpu.memory_space<vmem>>, %arg9: memref<896x64xbf16, #tpu.memory_space<vmem>>, %arg10: memref<1x64xf32, #tpu.memory_space<vmem>>, %arg11: memref<1x64xf32, #tpu.memory_space<vmem>>, %arg12: memref<896x64xbf16, #tpu.memory_space<vmem>>) attributes {dimension_semantics = [#tpu.dimension_semantics<parallel>], iteration_bounds = array<i64: 7>, scalar_prefetch = 0 : i64, scratch_operands = 0 : i64, tpu.core_type = #tpu.core_type<tc>, window_params = [{transform_indices = @transform_0, window_bounds = array<i64: 896, 64>}, {transform_indices = @transform_1, window_bounds = array<i64: 896, 64>}, {transform_indices = @transform_2, window_bounds = array<i64: 896, 64>}, {transform_indices = @transform_3, window_bounds = array<i64: 896, 64>}, {transform_indices = @transform_4, window_bounds = array<i64: 896, 64>}, {transform_indices = @transform_5, window_bounds = array<i64: 896, 64>}, {transform_indices = @transform_6, window_bounds = array<i64: 896, 64>}, {transform_indices = @transform_7, window_bounds = array<i64: 896, 64>}, {transform_indices = @transform_8, window_bounds = array<i64: 896, 64>}, {pipeline_mode = #tpu.pipeline_mode<synchronous>, transform_indices = @transform_9, window_bounds = array<i64: 1, 64>}, {pipeline_mode = #tpu.pipeline_mode<synchronous>, transform_indices = @transform_10, window_bounds = array<i64: 1, 64>}, {transform_indices = @transform_11, window_bounds = array<i64: 896, 64>}]} {
    %c0 = arith.constant 0 : index
    %c0_0 = arith.constant 0 : index
    %0 = vector.load %arg1[%c0, %c0_0] : memref<896x64xbf16, #tpu.memory_space<vmem>>, vector<896x64xbf16>
    %c0_1 = arith.constant 0 : index
    %c0_2 = arith.constant 0 : index
    %1 = vector.load %arg2[%c0_1, %c0_2] : memref<896x64xbf16, #tpu.memory_space<vmem>>, vector<896x64xbf16>
    %2 = arith.maximumf %0, %1 : vector<896x64xbf16>
    %c0_3 = arith.constant 0 : index
    %c0_4 = arith.constant 0 : index
    %3 = vector.load %arg3[%c0_3, %c0_4] : memref<896x64xbf16, #tpu.memory_space<vmem>>, vector<896x64xbf16>
    %4 = arith.maximumf %2, %3 : vector<896x64xbf16>
    %c0_5 = arith.constant 0 : index
    %c0_6 = arith.constant 0 : index
    %5 = vector.load %arg4[%c0_5, %c0_6] : memref<896x64xbf16, #tpu.memory_space<vmem>>, vector<896x64xbf16>
    %6 = arith.maximumf %4, %5 : vector<896x64xbf16>
    %c0_7 = arith.constant 0 : index
    %c0_8 = arith.constant 0 : index
    %7 = vector.load %arg5[%c0_7, %c0_8] : memref<896x64xbf16, #tpu.memory_space<vmem>>, vector<896x64xbf16>
    %8 = arith.maximumf %6, %7 : vector<896x64xbf16>
    %c0_9 = arith.constant 0 : index
    %c0_10 = arith.constant 0 : index
    %9 = vector.load %arg6[%c0_9, %c0_10] : memref<896x64xbf16, #tpu.memory_space<vmem>>, vector<896x64xbf16>
    %10 = arith.maximumf %8, %9 : vector<896x64xbf16>
    %c0_11 = arith.constant 0 : index
    %c0_12 = arith.constant 0 : index
    %11 = vector.load %arg7[%c0_11, %c0_12] : memref<896x64xbf16, #tpu.memory_space<vmem>>, vector<896x64xbf16>
    %12 = arith.maximumf %10, %11 : vector<896x64xbf16>
    %c0_13 = arith.constant 0 : index
    %c0_14 = arith.constant 0 : index
    %13 = vector.load %arg8[%c0_13, %c0_14] : memref<896x64xbf16, #tpu.memory_space<vmem>>, vector<896x64xbf16>
    %14 = arith.maximumf %12, %13 : vector<896x64xbf16>
    %c0_15 = arith.constant 0 : index
    %c0_16 = arith.constant 0 : index
    %15 = vector.load %arg9[%c0_15, %c0_16] : memref<896x64xbf16, #tpu.memory_space<vmem>>, vector<896x64xbf16>
    %16 = arith.maximumf %14, %15 : vector<896x64xbf16>
    %17 = arith.extf %16 : vector<896x64xbf16> to vector<896x64xf32>
    %c0_17 = arith.constant 0 : index
    %c0_18 = arith.constant 0 : index
    %18 = vector.load %arg10[%c0_17, %c0_18] : memref<1x64xf32, #tpu.memory_space<vmem>>, vector<1x64xf32>
    %19 = vector.broadcast %18 : vector<1x64xf32> to vector<896x64xf32>
    %20 = arith.mulf %17, %19 : vector<896x64xf32>
    %c0_19 = arith.constant 0 : index
    %c0_20 = arith.constant 0 : index
    %21 = vector.load %arg11[%c0_19, %c0_20] : memref<1x64xf32, #tpu.memory_space<vmem>>, vector<1x64xf32>
    %22 = vector.broadcast %21 : vector<1x64xf32> to vector<896x64xf32>
    %23 = arith.addf %20, %22 : vector<896x64xf32>
    %cst = arith.constant 0.000000e+00 : f32
    %24 = vector.broadcast %cst : f32 to vector<896x64xf32>
    %25 = arith.maximumf %23, %24 : vector<896x64xf32>
    %26 = arith.truncf %25 : vector<896x64xf32> to vector<896x64xbf16>
    %c0_21 = arith.constant 0 : index
    %c0_22 = arith.constant 0 : index
    %27 = vector.load %arg12[%c0_21, %c0_22] : memref<896x64xbf16, #tpu.memory_space<vmem>>, vector<896x64xbf16>
    tpu.vector_store %arg12[%c0_21, %c0_22], %26 {strides = array<i32>} : memref<896x64xbf16, #tpu.memory_space<vmem>>, vector<896x64xbf16>,
    return
  }
  func.func @transform_0(%arg0: i32) -> (i32, i32) {
    %c0_i32 = arith.constant 0 : i32
    %c0_i32_0 = arith.constant 0 : i32
    return %arg0, %c0_i32 : i32, i32
  }
  func.func @transform_1(%arg0: i32) -> (i32, i32) {
    %c0_i32 = arith.constant 0 : i32
    %c0_i32_0 = arith.constant 0 : i32
    return %arg0, %c0_i32 : i32, i32
  }
  func.func @transform_2(%arg0: i32) -> (i32, i32) {
    %c0_i32 = arith.constant 0 : i32
    %c0_i32_0 = arith.constant 0 : i32
    return %arg0, %c0_i32 : i32, i32
  }
  func.func @transform_3(%arg0: i32) -> (i32, i32) {
    %c0_i32 = arith.constant 0 : i32
    %c0_i32_0 = arith.constant 0 : i32
    return %arg0, %c0_i32 : i32, i32
  }
  func.func @transform_4(%arg0: i32) -> (i32, i32) {
    %c0_i32 = arith.constant 0 : i32
    %c0_i32_0 = arith.constant 0 : i32
    return %arg0, %c0_i32 : i32, i32
  }
  func.func @transform_5(%arg0: i32) -> (i32, i32) {
    %c0_i32 = arith.constant 0 : i32
    %c0_i32_0 = arith.constant 0 : i32
    return %arg0, %c0_i32 : i32, i32
  }
  func.func @transform_6(%arg0: i32) -> (i32, i32) {
    %c0_i32 = arith.constant 0 : i32
    %c0_i32_0 = arith.constant 0 : i32
    return %arg0, %c0_i32 : i32, i32
  }
  func.func @transform_7(%arg0: i32) -> (i32, i32) {
    %c0_i32 = arith.constant 0 : i32
    %c0_i32_0 = arith.constant 0 : i32
    return %arg0, %c0_i32 : i32, i32
  }
  func.func @transform_8(%arg0: i32) -> (i32, i32) {
    %c0_i32 = arith.constant 0 : i32
    %c0_i32_0 = arith.constant 0 : i32
    return %arg0, %c0_i32 : i32, i32
  }
  func.func @transform_9(%arg0: i32) -> (i32, i32) {
    %c0_i32 = arith.constant 0 : i32
    %c0_i32_0 = arith.constant 0 : i32
    %c0_i32_1 = arith.constant 0 : i32
    return %c0_i32, %c0_i32_0 : i32, i32
  }
  func.func @transform_10(%arg0: i32) -> (i32, i32) {
    %c0_i32 = arith.constant 0 : i32
    %c0_i32_0 = arith.constant 0 : i32
    %c0_i32_1 = arith.constant 0 : i32
    return %c0_i32, %c0_i32_0 : i32, i32
  }
  func.func @transform_11(%arg0: i32) -> (i32, i32) {
    %c0_i32 = arith.constant 0 : i32
    %c0_i32_0 = arith.constant 0 : i32
    return %arg0, %c0_i32 : i32, i32
  }
}

</mosaic_0001>

<bundles_post_ra>
// kernel: _stem_jit.2
= control target key start
LH: loop header
LB: loop body
LE: loop exit
PB: predicated region body
PF: predicated region fallthrough
CT: control target
= control target key end

     0   :  { %s3298_s15 = smov 0   ;;  %s4520_s0 = inlined_call_operand.vmem [shape: bf16[25088,147], index: 0, kind: input, shape index: {}]   ;;  %s4521_s1 = inlined_call_operand.vmem [shape: bf16[147,64], index: 1, kind: input, shape index: {}]   ;;  %s4522_s2 = inlined_call_operand.vmem [shape: bf16[25088,64], index: 2, kind: output, shape index: {0}]   ;;  %s4523_s3 = inlined_call_operand.vmem [shape: f32[28,1,64], index: 3, kind: output, shape index: {1}]   ;;  %s4524_s4 = inlined_call_operand.vmem [shape: f32[28,1,64], index: 4, kind: output, shape index: {2}]  }
   0x1 LB: > { %s3304_s16 = sadd.s32 4294967295, %s3270_s15   ;;  %p2577_p0 = scmp.ge.s32.totalorder %s3270_s15, 1  ;;  %s3270_s15 = sphi %s3298_s15, %s15_s15  }
   0x2   : > { %p169_p1 = scmp.lt.s32.totalorder %s3270_s15, 29 }
   0x4   : > { %p170_p2 = pnand %p2577_p0, %p169_p1 }
   0x6   : > { %173 = sbr.rel (%p170_p2) target bundleno = 741 (0x2e5), region = 28 }
   0xb   : > { %v3243_v0 = vld [vmem:[%s4521_s1 + $0x38] sm:$0xff]  ;;  %v352_v1 = vld [vmem:[%s4521_s1 + $0x48] sm:$0x3]  ;;  %vm1083_vm0 = vcmask 1040384   ;;  %vm1084_vm1 = vcmask 1041408   ;;  %s202_s21 = smul.u32 112, %s3304_s16 }
   0xc   : > { %v894_v2 = vunpack.c.l.b16 %v352_v1  ;;  %1090 = vmatpush.bf16.msra.mxu0 %v3243_v0  ;;  %v3242_v3 = vld [vmem:[%s4521_s1 + $0x30] sm:$0xff]  ;;  %v3272_v4 = vmov 65535   ;;  %3245 = vmatpush.bf16.msra.mxu2 %v3243_v0  ;;  %v3241_v9 = vld [vmem:[%s4521_s1 + $0x28] sm:$0xff]  ;;  %v3244_v10 = vld [vmem:[%s4521_s1 + $0x40] sm:$0xff]  ;;  %vm914_vm2 = vcmask 154624   ;;  %vm2354_vm3 = vcmask 519168  }
   0xd   : > { %v1085_v5 = vsel %vm1083_vm0, 4294967295, %v3272_v4  ;;  %p203_p3 = scmp.lt.s32.totalorder %s202_s21, 3135  ;;  %v3240_v14 = vld [vmem:[%s4521_s1 + $0x20] sm:$0xff]  ;;  %v3239_v15 = vld [vmem:[%s4521_s1 + $0x18] sm:$0xff]  ;;  %v3238_v16 = vld [vmem:[%s4521_s1 + $0x10] sm:$0xff]  ;;  %vm1668_vm4 = vcmask 523264  }
   0xe   : > { %v904_v6 = vpack.c.b16 %v894_v2, %v894_v2  ;;  %v1086_v7 = vsel %vm1084_vm1, %v1085_v5, 0  ;;  %v3237_v17 = vld [vmem:[%s4521_s1 + $0x8] sm:$0xff]  ;;  %v3236_v21 = vld [vmem:[%s4521_s1] sm:$0xff]  ;;  %p215_p4 = scmp.lt.s32.totalorder %s3304_s16, 27  ;;  %vm1898_vm5 = vcmask 516096  }
   0xf   : > { %s4570_s21 = smov (!%p203_p3, %s202_s21), 3135 }
  0x10   : > { %v1088_v8 = vand.u32 %v1086_v7, %v904_v6  ;;  %1091 = vmatpush.bf16.msra.mxu0 %v3242_v3  ;;  %3246 = vmatpush.bf16.msra.mxu2 %v3242_v3  ;;  %s3123_s28 = sshll.u32 %s4570_s21, 3  ;;  %s2580_s18 = sshll.u32 %s4570_s21, 2 }
  0x11   : > { %s3330_s5 = scalar_lea.vmem %s4520_s0, %s3123_s28  ;;  %s3416_s22 = scalar_lea.vmem %s4522_s2, %s2580_s18 }
  0x12   : > { %1385 = vmatpush.bf16.msra.mxu1 %v1088_v8  ;;  %3253 = vmatpush.bf16.msra.mxu3 %v1088_v8  ;;  %v3124_v11 = vld [vmem:[%s3330_s5 + $0x4] sm:$0xf]  ;;  %v2585_v12 = vld [vmem:[%s3330_s5 + $0x8] sm:$0xf0]  ;;  %v3126_v18 = vld [vmem:[%s3330_s5 + $0x14] sm:$0xf] }
  0x13   : > { %v2588_v13 = vor.u32 %v3124_v11, %v2585_v12  ;;  %v2593_v19 = vld [vmem:[%s3330_s5 + $0x18] sm:$0xf0]  ;;  %v2583_v22 = vld [vmem:[%s3330_s5] sm:$0xf]  ;;  %v3125_v23 = vld [vmem:[%s3330_s5 + $0x4] sm:$0xf0] }
  0x14   : > { %1092 = vmatpush.bf16.msra.mxu0 %v3241_v9  ;;  %3247 = vmatpush.bf16.msra.mxu2 %v3241_v9  ;;  %v2596_v20 = vor.u32 %v3126_v18, %v2593_v19  ;;  %v2584_v24 = vor.u32 %v3125_v23, %v2583_v22  ;;  %v3128_v25 = vld [vmem:[%s3330_s5 + $0x24] sm:$0xf]  ;;  %v2601_v26 = vld [vmem:[%s3330_s5 + $0x28] sm:$0xf0]  ;;  %v2591_v28 = vld [vmem:[%s3330_s5 + $0x10] sm:$0xf] }
  0x15   : > { %v2604_v27 = vor.u32 %v3128_v25, %v2601_v26  ;;  %v3127_v29 = vld [vmem:[%s3330_s5 + $0x14] sm:$0xf0]  ;;  %v3130_v31 = vld [vmem:[%s3330_s5 + $0x34] sm:$0xf]  ;;  %v2609_v32 = vld [vmem:[%s3330_s5 + $0x38] sm:$0xf0] }
  0x16   : > { %1386 = vmatpush.bf16.msra.mxu1 %v3244_v10  ;;  %3254 = vmatpush.bf16.msra.mxu3 %v3244_v10  ;;  %v2592_v30 = vor.u32 %v3127_v29, %v2591_v28  ;;  %v2612_v33 = vor.u32 %v3130_v31, %v2609_v32  ;;  %v2599_v34 = vld [vmem:[%s3330_s5 + $0x20] sm:$0xf]  ;;  %v3129_v35 = vld [vmem:[%s3330_s5 + $0x24] sm:$0xf0]  ;;  %v3132_v37 = vld [vmem:[%s3330_s5 + $0x44] sm:$0xf] }
  0x17   : > { %v2600_v36 = vor.u32 %v3129_v35, %v2599_v34  ;;  %v2617_v38 = vld [vmem:[%s3330_s5 + $0x48] sm:$0xf0]  ;;  %v2607_v40 = vld [vmem:[%s3330_s5 + $0x30] sm:$0xf]  ;;  %v3131_v41 = vld [vmem:[%s3330_s5 + $0x34] sm:$0xf0] }
  0x18   : > { %1093 = vmatpush.bf16.msra.mxu0 %v3240_v14  ;;  %3248 = vmatpush.bf16.msra.mxu2 %v3240_v14  ;;  %v2620_v39 = vor.u32 %v3132_v37, %v2617_v38  ;;  %v2608_v42 = vor.u32 %v3131_v41, %v2607_v40  ;;  %v3134_v43 = vld [vmem:[%s3330_s5 + $0x54] sm:$0xf]  ;;  %v2625_v44 = vld [vmem:[%s3330_s5 + $0x58] sm:$0xf0]  ;;  %v2615_v46 = vld [vmem:[%s3330_s5 + $0x40] sm:$0xf] }
  0x19   : > { %3065 = vmatmul.msk.bf16.vlgmr.msra.gmra.mxu1 %vm914_vm2, %v2588_v13  ;;  %v2628_v45 = vor.u32 %v3134_v43, %v2625_v44  ;;  %v3133_v47 = vld [vmem:[%s3330_s5 + $0x44] sm:$0xf0]  ;;  %v2807_v49 = vld [vmem:[%s3330_s5 + $0x1c0] sm:$0xf]  ;;  %v3136_v52 = vld [vmem:[%s3330_s5 + $0x64] sm:$0xf] }
  0x1a   : > { %v2616_v48 = vor.u32 %v3133_v47, %v2615_v46  ;;  %v3181_v50 = vld [vmem:[%s3330_s5 + $0x1c4] sm:$0xf0]  ;;  %v2633_v53 = vld [vmem:[%s3330_s5 + $0x68] sm:$0xf0]  ;;  %v2623_v55 = vld [vmem:[%s3330_s5 + $0x50] sm:$0xf] }
  0x1b   : > { %v2808_v51 = vor.u32 %v3181_v50, %v2807_v49  ;;  %v2636_v54 = vor.u32 %v3136_v52, %v2633_v53  ;;  %v3135_v56 = vld [vmem:[%s3330_s5 + $0x54] sm:$0xf0]  ;;  %v2815_v58 = vld [vmem:[%s3330_s5 + $0x1d0] sm:$0xf]  ;;  %v3182_v60 = vld [vmem:[%s3330_s5 + $0x1d4] sm:$0xf] }
  0x1c   : > { %1094 = vmatpush.bf16.msra.mxu0 %v3239_v15  ;;  %3249 = vmatpush.bf16.msra.mxu2 %v3239_v15  ;;  %v2624_v57 = vor.u32 %v3135_v56, %v2623_v55  ;;  %v3183_v59 = vld [vmem:[%s3330_s5 + $0x1d4] sm:$0xf0]  ;;  %v2817_v62 = vld [vmem:[%s3330_s5 + $0x1d8] sm:$0xf0]  ;;  %v3138_v0 = vld [vmem:[%s3330_s5 + $0x74] sm:$0xf] }
  0x1d   : > { %v2816_v61 = vor.u32 %v3183_v59, %v2815_v58  ;;  %v2820_v63 = vor.u32 %v3182_v60, %v2817_v62  ;;  %v2641_v1 = vld [vmem:[%s3330_s5 + $0x78] sm:$0xf0]  ;;  %v2631_v3 = vld [vmem:[%s3330_s5 + $0x60] sm:$0xf]  ;;  %v3137_v4 = vld [vmem:[%s3330_s5 + $0x64] sm:$0xf0] }
  0x1e   : > { %v2644_v2 = vor.u32 %v3138_v0, %v2641_v1  ;;  %v2632_v5 = vor.u32 %v3137_v4, %v2631_v3  ;;  %v2823_v6 = vld [vmem:[%s3330_s5 + $0x1e0] sm:$0xf]  ;;  %v3185_v7 = vld [vmem:[%s3330_s5 + $0x1e4] sm:$0xf0]  ;;  %v3184_v8 = vld [vmem:[%s3330_s5 + $0x1e4] sm:$0xf] }
  0x1f   : > { %3094 = vmatmul.msk.bf16.vlgmr.msra.gmra.mxu3 %vm914_vm2, %v2820_v63  ;;  %v2824_v9 = vor.u32 %v3185_v7, %v2823_v6  ;;  %v2825_v10 = vld [vmem:[%s3330_s5 + $0x1e8] sm:$0xf0]  ;;  %v3140_v12 = vld [vmem:[%s3330_s5 + $0x84] sm:$0xf]  ;;  %v2639_v15 = vld [vmem:[%s3330_s5 + $0x70] sm:$0xf] }
  0x20   : > { %1095 = vmatpush.bf16.msra.mxu0 %v3238_v16  ;;  %3250 = vmatpush.bf16.msra.mxu2 %v3238_v16  ;;  %v2828_v11 = vor.u32 %v3184_v8, %v2825_v10  ;;  %v2649_v13 = vld [vmem:[%s3330_s5 + $0x88] sm:$0xf0]  ;;  %v3139_v16 = vld [vmem:[%s3330_s5 + $0x74] sm:$0xf0]  ;;  %v2831_v19 = vld [vmem:[%s3330_s5 + $0x1f0] sm:$0xf] }
  0x21   : > { %v2652_v14 = vor.u32 %v3140_v12, %v2649_v13  ;;  %v2640_v18 = vor.u32 %v3139_v16, %v2639_v15  ;;  %v2833_v23 = vld [vmem:[%s3330_s5 + $0x1f8] sm:$0xf0]  ;;  %v3142_v26 = vld [vmem:[%s3330_s5 + $0x94] sm:$0xf]  ;;  %v2647_v29 = vld [vmem:[%s3330_s5 + $0x80] sm:$0xf] }
  0x22   : > { %v2839_v35 = vld [vmem:[%s3330_s5 + $0x200] sm:$0xf]  ;;  %v3188_v37 = vld [vmem:[%s3330_s5 + $0x204] sm:$0xf]  ;;  %v2841_v40 = vld [vmem:[%s3330_s5 + $0x208] sm:$0xf0] }
  0x23   : > { %v2844_v41 = vor.u32 %v3188_v37, %v2841_v40  ;;  %v3144_v46 = vld [vmem:[%s3330_s5 + $0xa4] sm:$0xf]  ;;  %v2665_v47 = vld [vmem:[%s3330_s5 + $0xa8] sm:$0xf0]  ;;  %v3143_v55 = vld [vmem:[%s3330_s5 + $0x94] sm:$0xf0] }
  0x24   : > { %1096 = vmatpush.bf16.msra.mxu0 %v3237_v17  ;;  %3251 = vmatpush.bf16.msra.mxu2 %v3237_v17  ;;  %v2668_v53 = vor.u32 %v3144_v46, %v2665_v47  ;;  %v2847_v63 = vld [vmem:[%s3330_s5 + $0x210] sm:$0xf]  ;;  %v3191_v0 = vld [vmem:[%s3330_s5 + $0x214] sm:$0xf0]  ;;  %v3190_v1 = vld [vmem:[%s3330_s5 + $0x214] sm:$0xf] }
  0x25   : > { %v2849_v6 = vld [vmem:[%s3330_s5 + $0x218] sm:$0xf0]  ;;  %s4572_s16 = smov (!%p215_p4, %s3304_s16), 27 }
  0x26   : > { %v2852_v8 = vor.u32 %v3190_v1, %v2849_v6  ;;  %v2673_v15 = vld [vmem:[%s3330_s5 + $0xb8] sm:$0xf0]  ;;  %s217_s24 = scalar_lea.vmem %s4523_s3, %s4572_s16  ;;  %s220_s27 = scalar_lea.vmem %s4524_s4, %s4572_s16 }
  0x28   : > { %1097 = vmatpush.bf16.msra.mxu0 %v3236_v21  ;;  %3252 = vmatpush.bf16.msra.mxu2 %v3236_v21  ;;  %v3186_v21 = vld [vmem:[%s3330_s5 + $0x1f4] sm:$0xf] }
  0x29   : > { %3066 = vmatmul.msk.bf16.gmra.mxu1 %vm914_vm2, %v2596_v20  ;;  %v3187_v20 = vld [vmem:[%s3330_s5 + $0x1f4] sm:$0xf0] }
  0x2a   : > { %v2832_v22 = vor.u32 %v3187_v20, %v2831_v19 }
  0x2b   : > { %1098 = vmatmul.bf16.vlgmr.msra.gmra.mxu0 %v2584_v24  ;;  %1238 = vmatmul.bf16.vlgmr.msra.gmra.mxu2 %v2808_v51  ;;  %v2836_v24 = vor.u32 %v3186_v21, %v2833_v23  ;;  %v2663_v21 = vld [vmem:[%s3330_s5 + $0xa0] sm:$0xf] }
  0x2f   : > { %3095 = vmatmul.msk.bf16.gmra.mxu3 %vm914_vm2, %v2828_v11 }
  0x39   : > { %3067 = vmatmul.msk.bf16.gmra.mxu1 %vm914_vm2, %v2604_v27  ;;  %v2657_v27 = vld [vmem:[%s3330_s5 + $0x98] sm:$0xf0] }
  0x3a   : > { %v2660_v28 = vor.u32 %v3142_v26, %v2657_v27 }
  0x3b   : > { %1103 = vmatmul.bf16.gmra.mxu0 %v2592_v30  ;;  %1243 = vmatmul.bf16.gmra.mxu2 %v2816_v61  ;;  %v3141_v30 = vld [vmem:[%s3330_s5 + $0x84] sm:$0xf0] }
  0x3c   : > { %v2648_v32 = vor.u32 %v3141_v30, %v2647_v29  ;;  %v2855_v29 = vld [vmem:[%s3330_s5 + $0x220] sm:$0xf]  ;;  %v3193_v30 = vld [vmem:[%s3330_s5 + $0x224] sm:$0xf0] }
  0x3f   : > { %3096 = vmatmul.msk.bf16.gmra.mxu3 %vm914_vm2, %v2836_v24 }
  0x49   : > { %3068 = vmatmul.msk.bf16.gmra.mxu1 %vm914_vm2, %v2612_v33 }
  0x4b   : > { %1108 = vmatmul.bf16.gmra.mxu0 %v2600_v36  ;;  %1248 = vmatmul.bf16.gmra.mxu2 %v2824_v9  ;;  %v3189_v36 = vld [vmem:[%s3330_s5 + $0x204] sm:$0xf0] }
  0x4f   : > { %3097 = vmatmul.msk.bf16.gmra.mxu3 %vm914_vm2, %v2844_v41 }
  0x59   : > { %3069 = vmatmul.msk.bf16.gmra.mxu1 %vm914_vm2, %v2620_v39  ;;  %v2840_v39 = vor.u32 %v3189_v36, %v2839_v35  ;;  %v2856_v35 = vor.u32 %v3193_v30, %v2855_v29  ;;  %v2857_v36 = vld [vmem:[%s3330_s5 + $0x228] sm:$0xf0] }
  0x5b   : > { %1113 = vmatmul.bf16.gmra.mxu0 %v2608_v42  ;;  %1253 = vmatmul.bf16.gmra.mxu2 %v2832_v22  ;;  %v3145_v22 = vld [vmem:[%s3330_s5 + $0xa4] sm:$0xf0] }
  0x5c   : > { %v2664_v26 = vor.u32 %v3145_v22, %v2663_v21 }
  0x5f   : > { %3098 = vmatmul.msk.bf16.gmra.mxu3 %vm914_vm2, %v2852_v8 }
  0x69   : > { %3070 = vmatmul.msk.bf16.gmra.mxu1 %vm914_vm2, %v2628_v45 }
  0x6b   : > { %1118 = vmatmul.bf16.gmra.mxu0 %v2616_v48  ;;  %1258 = vmatmul.bf16.gmra.mxu2 %v2840_v39 }
  0x79   : > { %3071 = vmatmul.msk.bf16.gmra.mxu1 %vm914_vm2, %v2636_v54  ;;  %v2655_v54 = vld [vmem:[%s3330_s5 + $0x90] sm:$0xf] }
  0x7a   : > { %v2656_v60 = vor.u32 %v3143_v55, %v2655_v54 }
  0x7b   : > { %1123 = vmatmul.bf16.gmra.mxu0 %v2624_v57 }
  0x89   : > { %3072 = vmatmul.msk.bf16.gmra.mxu1 %vm914_vm2, %v2644_v2 }
  0x8b   : > { %1128 = vmatmul.bf16.gmra.mxu0 %v2632_v5  ;;  %v2848_v5 = vor.u32 %v3191_v0, %v2847_v63 }
  0x8d   : > { %1263 = vmatmul.bf16.gmra.mxu2 %v2848_v5 }
  0x96   : > { %v1388_v17 = vpop.f32.mrf.mxu1 }
  0x99   : > { %3073 = vmatmul.msk.bf16.gmra.mxu1 %vm914_vm2, %v2652_v14  ;;  %v3146_v14 = vld [vmem:[%s3330_s5 + $0xb4] sm:$0xf] }
  0x9a   : > { %v2676_v20 = vor.u32 %v3146_v14, %v2673_v15 }
  0x9b   : > { %1133 = vmatmul.bf16.gmra.mxu0 %v2640_v18 }
  0x9d   : > { %1268 = vmatmul.bf16.gmra.mxu2 %v2856_v35 }
  0x9e   : > { %v1390_v25 = vpop.f32.mrf.mxu1 }
  0xa6   : > { %v1393_v31 = vpop.f32.mrf.mxu1 }
  0xa8   : > { %v1099_v33 = vpop.f32.mrf.mxu0 }
  0xa9   : > { %3074 = vmatmul.msk.bf16.gmra.mxu1 %vm914_vm2, %v2660_v28  ;;  %v1389_v34 = vadd.f32 %v1388_v17, %v1099_v33 }
  0xab   : > { %v2242_v38 = vpack.c.bf16 %v1389_v34, %v1389_v34  ;;  %1138 = vmatmul.bf16.gmra.mxu0 %v2648_v32  ;;  %v1900_v44 = vmul.f32 %v1389_v34, %v1389_v34  ;;  %v1669_v48 = vsel %vm1668_vm4, %v1389_v34, 0.0 }
  0xad   : > { %2355 = vst.msk [vmem:[%s3416_s22] sm:$0xf] %vm2354_vm3, %v2242_v38  ;;  %v2012_v56 = vsel %vm1668_vm4, %v1900_v44, 0.0  ;;  %v3148_v44 = vld [vmem:[%s3330_s5 + $0xc4] sm:$0xf] }
  0xae   : > { %v1395_v42 = vpop.f32.mrf.mxu1 }
  0xb0   : > { %v1101_v43 = vpop.f32.mrf.mxu0 }
  0xb1   : > { %v1391_v45 = vadd.f32 %v1390_v25, %v1101_v43 }
  0xb3   : > { %v1670_v49 = vsel %vm1668_vm4, %v1391_v45, 0.0  ;;  %v1901_v50 = vmul.f32 %v1391_v45, %v1391_v45  ;;  %v2243_v51 = vpack.c.bf16 %v1391_v45, %v1391_v45  ;;  %v2681_v45 = vld [vmem:[%s3330_s5 + $0xc8] sm:$0xf0] }
  0xb4   : > { %v1671_v52 = vadd.f32 %v1670_v49, %v1669_v48 }
  0xb5   : > { %v2013_v57 = vsel %vm1668_vm4, %v1901_v50, 0.0  ;;  %2356 = vst.msk [vmem:[%s3416_s22 + $0x4] sm:$0xf] %vm2354_vm3, %v2243_v51  ;;  %v2684_v50 = vor.u32 %v3148_v44, %v2681_v45  ;;  %v2671_v51 = vld [vmem:[%s3330_s5 + $0xb0] sm:$0xf] }
  0xb6   : > { %v1398_v58 = vpop.f32.mrf.mxu1  ;;  %v2014_v59 = vadd.f32 %v2013_v57, %v2012_v56 }
  0xb8   : > { %v1104_v61 = vpop.f32.mrf.mxu0 }
  0xb9   : > { %3075 = vmatmul.msk.bf16.gmra.mxu1 %vm914_vm2, %v2668_v53  ;;  %v1394_v62 = vadd.f32 %v1393_v31, %v1104_v61  ;;  %v3192_v31 = vld [vmem:[%s3330_s5 + $0x224] sm:$0xf]  ;;  %v3194_v61 = vld [vmem:[%s3330_s5 + $0x234] sm:$0xf] }
  0xba   : > { %v2860_v38 = vor.u32 %v3192_v31, %v2857_v36 }
  0xbb   : > { %v1672_v2 = vsel %vm1668_vm4, %v1394_v62, 0.0  ;;  %v1902_v3 = vmul.f32 %v1394_v62, %v1394_v62  ;;  %v2244_v4 = vpack.c.bf16 %v1394_v62, %v1394_v62  ;;  %1143 = vmatmul.bf16.gmra.mxu0 %v2656_v60  ;;  %v3195_v60 = vld [vmem:[%s3330_s5 + $0x234] sm:$0xf0] }
  0xbc   : > { %v1673_v7 = vadd.f32 %v1672_v2, %v1671_v52  ;;  %3099 = vmatmul.msk.bf16.gmra.mxu3 %vm914_vm2, %v2860_v38  ;;  %v3147_v52 = vld [vmem:[%s3330_s5 + $0xb4] sm:$0xf0]  ;;  %v2865_v2 = vld [vmem:[%s3330_s5 + $0x238] sm:$0xf0] }
  0xbd   : > { %v2015_v9 = vsel %vm1668_vm4, %v1902_v3, 0.0  ;;  %2357 = vst.msk [vmem:[%s3416_s22 + $0x8] sm:$0xf] %vm2354_vm3, %v2244_v4  ;;  %v2672_v56 = vor.u32 %v3147_v52, %v2671_v51  ;;  %v2868_v4 = vor.u32 %v3194_v61, %v2865_v2 }
  0xbe   : > { %v1400_v10 = vpop.f32.mrf.mxu1  ;;  %v2016_v11 = vadd.f32 %v2015_v9, %v2014_v59  ;;  %v2863_v59 = vld [vmem:[%s3330_s5 + $0x230] sm:$0xf] }
  0xbf   : > { %v2864_v1 = vor.u32 %v3195_v60, %v2863_v59  ;;  %v3198_v59 = vld [vmem:[%s3330_s5 + $0x254] sm:$0xf] }
  0xc0   : > { %v1106_v12 = vpop.f32.mrf.mxu0 }
  0xc1   : > { %v1396_v13 = vadd.f32 %v1395_v42, %v1106_v12  ;;  %1273 = vmatmul.bf16.gmra.mxu2 %v2864_v1 }
  0xc3   : > { %v1674_v16 = vsel %vm1668_vm4, %v1396_v13, 0.0  ;;  %v1903_v17 = vmul.f32 %v1396_v13, %v1396_v13  ;;  %v2245_v18 = vpack.c.bf16 %v1396_v13, %v1396_v13 }
  0xc4   : > { %v1675_v19 = vadd.f32 %v1674_v16, %v1673_v7 }
  0xc5   : > { %v2017_v23 = vsel %vm1668_vm4, %v1903_v17, 0.0  ;;  %2358 = vst.msk [vmem:[%s3416_s22 + $0xc] sm:$0xf] %vm2354_vm3, %v2245_v18  ;;  %v2679_v17 = vld [vmem:[%s3330_s5 + $0xc0] sm:$0xf] }
  0xc6   : > { %v1403_v24 = vpop.f32.mrf.mxu1  ;;  %v2018_v25 = vadd.f32 %v2017_v23, %v2016_v11  ;;  %v2689_v11 = vld [vmem:[%s3330_s5 + $0xd8] sm:$0xf0]  ;;  %v3149_v18 = vld [vmem:[%s3330_s5 + $0xc4] sm:$0xf0] }
  0xc7   : > { %v2680_v22 = vor.u32 %v3149_v18, %v2679_v17  ;;  %v2695_v17 = vld [vmem:[%s3330_s5 + $0xe0] sm:$0xf]  ;;  %v3153_v18 = vld [vmem:[%s3330_s5 + $0xe4] sm:$0xf0] }
  0xc8   : > { %v1109_v27 = vpop.f32.mrf.mxu0 }
  0xc9   : > { %3076 = vmatmul.msk.bf16.gmra.mxu1 %vm914_vm2, %v2676_v20  ;;  %v1399_v28 = vadd.f32 %v1398_v58, %v1109_v27  ;;  %v3196_v27 = vld [vmem:[%s3330_s5 + $0x244] sm:$0xf] }
  0xcb   : > { %v1676_v32 = vsel %vm1668_vm4, %v1399_v28, 0.0  ;;  %v1904_v33 = vmul.f32 %v1399_v28, %v1399_v28  ;;  %v2246_v34 = vpack.c.bf16 %v1399_v28, %v1399_v28  ;;  %1148 = vmatmul.bf16.gmra.mxu0 %v2664_v26  ;;  %v3197_v26 = vld [vmem:[%s3330_s5 + $0x244] sm:$0xf0] }
  0xcc   : > { %v1677_v37 = vadd.f32 %v1676_v32, %v1675_v19  ;;  %3100 = vmatmul.msk.bf16.gmra.mxu3 %vm914_vm2, %v2868_v4  ;;  %v2873_v32 = vld [vmem:[%s3330_s5 + $0x248] sm:$0xf0] }
  0xcd   : > { %v2019_v39 = vsel %vm1668_vm4, %v1904_v33, 0.0  ;;  %2359 = vst.msk [vmem:[%s3416_s22 + $0x10] sm:$0xf] %vm2354_vm3, %v2246_v34  ;;  %v2876_v34 = vor.u32 %v3196_v27, %v2873_v32 }
  0xce   : > { %v1405_v40 = vpop.f32.mrf.mxu1  ;;  %v2020_v41 = vadd.f32 %v2019_v39, %v2018_v25  ;;  %v2871_v25 = vld [vmem:[%s3330_s5 + $0x240] sm:$0xf]  ;;  %v3499_v39 = vpop.f32.mrf.mxu2 }
  0xcf   : > { %v2872_v31 = vor.u32 %v3197_v26, %v2871_v25 }
  0xd0   : > { %v1111_v42 = vpop.f32.mrf.mxu0 }
  0xd1   : > { %v1401_v43 = vadd.f32 %v1400_v10, %v1111_v42  ;;  %v3150_v10 = vld [vmem:[%s3330_s5 + $0xd4] sm:$0xf]  ;;  %1278 = vmatmul.bf16.gmra.mxu2 %v2872_v31  ;;  %v2697_v42 = vld [vmem:[%s3330_s5 + $0xe8] sm:$0xf0] }
  0xd2   : > { %v2692_v16 = vor.u32 %v3150_v10, %v2689_v11  ;;  %v2705_v10 = vld [vmem:[%s3330_s5 + $0xf8] sm:$0xf0]  ;;  %v1533_v11 = vpop.f32.mrf.mxu3 }
  0xd3   : > { %v1678_v46 = vsel %vm1668_vm4, %v1401_v43, 0.0  ;;  %v1905_v47 = vmul.f32 %v1401_v43, %v1401_v43  ;;  %v2247_v48 = vpack.c.bf16 %v1401_v43, %v1401_v43 }
  0xd4   : > { %v1679_v49 = vadd.f32 %v1678_v46, %v1677_v37 }
  0xd5   : > { %v2021_v53 = vsel %vm1668_vm4, %v1905_v47, 0.0  ;;  %2360 = vst.msk [vmem:[%s3416_s22 + $0x14] sm:$0xf] %vm2354_vm3, %v2247_v48  ;;  %v2687_v48 = vld [vmem:[%s3330_s5 + $0xd0] sm:$0xf] }
  0xd6   : > { %v1408_v54 = vpop.f32.mrf.mxu1  ;;  %v2022_v55 = vadd.f32 %v2021_v53, %v2020_v41  ;;  %v3152_v41 = vld [vmem:[%s3330_s5 + $0xe4] sm:$0xf] }
  0xd7   : > { %v2700_v47 = vor.u32 %v3152_v41, %v2697_v42 }
  0xd8   : > { %v1114_v57 = vpop.f32.mrf.mxu0 }
  0xd9   : > { %3077 = vmatmul.msk.bf16.gmra.mxu1 %vm914_vm2, %v2684_v50  ;;  %v1404_v58 = vadd.f32 %v1403_v24, %v1114_v57  ;;  %v2879_v57 = vld [vmem:[%s3330_s5 + $0x250] sm:$0xf] }
  0xdb   : > { %v1680_v62 = vsel %vm1668_vm4, %v1404_v58, 0.0  ;;  %v1906_v63 = vmul.f32 %v1404_v58, %v1404_v58  ;;  %v2248_v0 = vpack.c.bf16 %v1404_v58, %v1404_v58  ;;  %1153 = vmatmul.bf16.gmra.mxu0 %v2672_v56  ;;  %v3199_v58 = vld [vmem:[%s3330_s5 + $0x254] sm:$0xf0] }
  0xdc   : > { %v1681_v3 = vadd.f32 %v1680_v62, %v1679_v49  ;;  %3101 = vmatmul.msk.bf16.gmra.mxu3 %vm914_vm2, %v2876_v34  ;;  %v3151_v49 = vld [vmem:[%s3330_s5 + $0xd4] sm:$0xf0]  ;;  %v3201_v34 = vld [vmem:[%s3330_s5 + $0x264] sm:$0xf0] }
  0xdd   : > { %v2023_v5 = vsel %vm1668_vm4, %v1906_v63, 0.0  ;;  %2361 = vst.msk [vmem:[%s3416_s22 + $0x18] sm:$0xf] %vm2354_vm3, %v2248_v0  ;;  %v2688_v53 = vor.u32 %v3151_v49, %v2687_v48  ;;  %v2880_v63 = vor.u32 %v3199_v58, %v2879_v57  ;;  %v2881_v0 = vld [vmem:[%s3330_s5 + $0x258] sm:$0xf0] }
  0xde   : > { %v1410_v6 = vpop.f32.mrf.mxu1  ;;  %v2024_v7 = vadd.f32 %v2023_v5, %v2022_v55  ;;  %v3510_v55 = vpop.f32.mrf.mxu2  ;;  %v2884_v2 = vor.u32 %v3198_v59, %v2881_v0  ;;  %v3156_v48 = vld [vmem:[%s3330_s5 + $0x104] sm:$0xf]  ;;  %v2713_v49 = vld [vmem:[%s3330_s5 + $0x108] sm:$0xf0]  ;;  %v2703_v57 = vld [vmem:[%s3330_s5 + $0xf0] sm:$0xf] }
  0xdf   : > { %v3155_v58 = vld [vmem:[%s3330_s5 + $0xf4] sm:$0xf0] }
  0xe0   : > { %v1116_v8 = vpop.f32.mrf.mxu0 }
  0xe1   : > { %v1406_v9 = vadd.f32 %v1405_v40, %v1116_v8  ;;  %1283 = vmatmul.bf16.gmra.mxu2 %v2880_v63  ;;  %v2704_v63 = vor.u32 %v3155_v58, %v2703_v57 }
  0xe3   : > { %v1682_v12 = vsel %vm1668_vm4, %v1406_v9, 0.0  ;;  %v1907_v13 = vmul.f32 %v1406_v9, %v1406_v9  ;;  %v2249_v14 = vpack.c.bf16 %v1406_v9, %v1406_v9  ;;  %v3154_v9 = vld [vmem:[%s3330_s5 + $0xf4] sm:$0xf] }
  0xe4   : > { %v1683_v15 = vadd.f32 %v1682_v12, %v1681_v3 }
  0xe5   : > { %v2025_v19 = vsel %vm1668_vm4, %v1907_v13, 0.0  ;;  %2362 = vst.msk [vmem:[%s3416_s22 + $0x1c] sm:$0xf] %vm2354_vm3, %v2249_v14 }
  0xe6   : > { %v1413_v20 = vpop.f32.mrf.mxu1  ;;  %v2026_v21 = vadd.f32 %v2025_v19, %v2024_v7  ;;  %v1244_v7 = vpop.f32.mrf.mxu2 }
  0xe8   : > { %v1119_v23 = vpop.f32.mrf.mxu0 }
  0xe9   : > { %3078 = vmatmul.msk.bf16.gmra.mxu1 %vm914_vm2, %v2692_v16  ;;  %v1409_v24 = vadd.f32 %v1408_v54, %v1119_v23  ;;  %v2708_v16 = vor.u32 %v3154_v9, %v2705_v10  ;;  %v2696_v23 = vor.u32 %v3153_v18, %v2695_v17  ;;  %v3203_v10 = vld [vmem:[%s3330_s5 + $0x274] sm:$0xf0] }
  0xeb   : > { %v1684_v28 = vsel %vm1668_vm4, %v1409_v24, 0.0  ;;  %v1908_v29 = vmul.f32 %v1409_v24, %v1409_v24  ;;  %v2250_v30 = vpack.c.bf16 %v1409_v24, %v1409_v24  ;;  %1158 = vmatmul.bf16.gmra.mxu0 %v2680_v22  ;;  %v3529_v22 = vadd.f32 %v1533_v11, %v1244_v7  ;;  %v3202_v11 = vld [vmem:[%s3330_s5 + $0x274] sm:$0xf] }
  0xec   : > { %v1685_v33 = vadd.f32 %v1684_v28, %v1683_v15  ;;  %3102 = vmatmul.msk.bf16.gmra.mxu3 %vm914_vm2, %v2884_v2  ;;  %v1535_v28 = vpop.f32.mrf.mxu3 }
  0xed   : > { %v2027_v35 = vsel %vm1668_vm4, %v1908_v29, 0.0  ;;  %2363 = vst.msk [vmem:[%s3416_s22 + $0x20] sm:$0xf] %vm2354_vm3, %v2250_v30  ;;  %v2300_v25 = vpack.c.bf16 %v3529_v22, %v3529_v22  ;;  %v2887_v30 = vld [vmem:[%s3330_s5 + $0x260] sm:$0xf] }
  0xee   : > { %v1415_v36 = vpop.f32.mrf.mxu1  ;;  %v2028_v37 = vadd.f32 %v2027_v35, %v2026_v21  ;;  %v1246_v26 = vpop.f32.mrf.mxu2  ;;  %v3200_v35 = vld [vmem:[%s3330_s5 + $0x264] sm:$0xf]  ;;  %v2888_v42 = vor.u32 %v3201_v34, %v2887_v30  ;;  %v3157_v34 = vld [vmem:[%s3330_s5 + $0x104] sm:$0xf0] }
  0xef   : > { %2413 = vst.msk [vmem:[%s3416_s22 + $0xe8] sm:$0xf] %vm2354_vm3, %v2300_v25  ;;  %v3536_v29 = vadd.f32 %v1535_v28, %v1246_v26  ;;  %v2721_v25 = vld [vmem:[%s3330_s5 + $0x118] sm:$0xf0] }
  0xf0   : > { %v1121_v38 = vpop.f32.mrf.mxu0 }
  0xf1   : > { %v1411_v40 = vadd.f32 %v1410_v6, %v1121_v38  ;;  %v2889_v38 = vld [vmem:[%s3330_s5 + $0x268] sm:$0xf0]  ;;  %1288 = vmatmul.bf16.gmra.mxu2 %v2888_v42 }
  0xf3   : > { %v1686_v43 = vsel %vm1668_vm4, %v1411_v40, 0.0  ;;  %v1909_v44 = vmul.f32 %v1411_v40, %v1411_v40  ;;  %v2251_v45 = vpack.c.bf16 %v1411_v40, %v1411_v40 }
  0xf4   : > { %v1687_v46 = vadd.f32 %v1686_v43, %v1685_v33  ;;  %v2892_v43 = vor.u32 %v3200_v35, %v2889_v38 }
  0xf5   : > { %v2029_v50 = vsel %vm1668_vm4, %v1909_v44, 0.0  ;;  %2364 = vst.msk [vmem:[%s3416_s22 + $0x24] sm:$0xf] %vm2354_vm3, %v2251_v45 }
  0xf6   : > { %v1418_v51 = vpop.f32.mrf.mxu1  ;;  %v2030_v52 = vadd.f32 %v2029_v50, %v2028_v37  ;;  %v2301_v37 = vpack.c.bf16 %v3536_v29, %v3536_v29  ;;  %v1538_v50 = vpop.f32.mrf.mxu3 }
  0xf8   : > { %v1124_v54 = vpop.f32.mrf.mxu0  ;;  %2414 = vst.msk [vmem:[%s3416_s22 + $0xec] sm:$0xf] %vm2354_vm3, %v2301_v37 }
  0xf9   : > { %3079 = vmatmul.msk.bf16.gmra.mxu1 %vm914_vm2, %v2700_v47  ;;  %v1414_v56 = vadd.f32 %v1413_v20, %v1124_v54 }
  0xfb   : > { %v1688_v60 = vsel %vm1668_vm4, %v1414_v56, 0.0  ;;  %v1910_v61 = vmul.f32 %v1414_v56, %v1414_v56  ;;  %v2252_v62 = vpack.c.bf16 %v1414_v56, %v1414_v56  ;;  %1163 = vmatmul.bf16.gmra.mxu0 %v2688_v53  ;;  %v2716_v56 = vor.u32 %v3156_v48, %v2713_v49 }
  0xfc   : > { %v1689_v1 = vadd.f32 %v1688_v60, %v1687_v46  ;;  %3103 = vmatmul.msk.bf16.gmra.mxu3 %vm914_vm2, %v2892_v43  ;;  %v1249_v46 = vpop.f32.mrf.mxu2 }
  0xfd   : > { %v2031_v3 = vsel %vm1668_vm4, %v1910_v61, 0.0  ;;  %2365 = vst.msk [vmem:[%s3416_s22 + $0x28] sm:$0xf] %vm2354_vm3, %v2252_v62  ;;  %v3559_v62 = vadd.f32 %v1538_v50, %v1249_v46 }
  0xfe   : > { %v1420_v4 = vpop.f32.mrf.mxu1  ;;  %v2032_v5 = vadd.f32 %v2031_v3, %v2030_v52 }
 0x100   : > { %v1126_v6 = vpop.f32.mrf.mxu0 }
 0x101   : > { %v1416_v8 = vadd.f32 %v1415_v36, %v1126_v6  ;;  %v2895_v6 = vld [vmem:[%s3330_s5 + $0x270] sm:$0xf] }
 0x102   : > { %v2896_v17 = vor.u32 %v3203_v10, %v2895_v6 }
 0x103   : > { %v1690_v12 = vsel %vm1668_vm4, %v1416_v8, 0.0  ;;  %v1911_v13 = vmul.f32 %v1416_v8, %v1416_v8  ;;  %v2253_v14 = vpack.c.bf16 %v1416_v8, %v1416_v8 }
 0x104   : > { %v1691_v15 = vadd.f32 %v1690_v12, %v1689_v1  ;;  %v2302_v1 = vpack.c.bf16 %v3559_v62, %v3559_v62  ;;  %v1251_v2 = vpop.f32.mrf.mxu2  ;;  %1293 = vmatmul.bf16.gmra.mxu2 %v2896_v17 }
 0x105   : > { %v2033_v19 = vsel %vm1668_vm4, %v1911_v13, 0.0  ;;  %2366 = vst.msk [vmem:[%s3416_s22 + $0x2c] sm:$0xf] %vm2354_vm3, %v2253_v14  ;;  %v2897_v14 = vld [vmem:[%s3330_s5 + $0x278] sm:$0xf0] }
 0x106   : > { %v1423_v20 = vpop.f32.mrf.mxu1  ;;  %v2034_v21 = vadd.f32 %v2033_v19, %v2032_v5  ;;  %2415 = vst.msk [vmem:[%s3416_s22 + $0xf0] sm:$0xf] %vm2354_vm3, %v2302_v1  ;;  %v2900_v18 = vor.u32 %v3202_v11, %v2897_v14  ;;  %v2719_v11 = vld [vmem:[%s3330_s5 + $0x110] sm:$0xf] }
 0x108   : > { %v1129_v24 = vpop.f32.mrf.mxu0 }
 0x109   : > { %3080 = vmatmul.msk.bf16.gmra.mxu1 %vm914_vm2, %v2708_v16  ;;  %v1419_v27 = vadd.f32 %v1418_v51, %v1129_v24  ;;  %v3158_v24 = vld [vmem:[%s3330_s5 + $0x114] sm:$0xf] }
 0x10b   : > { %v1692_v31 = vsel %vm1668_vm4, %v1419_v27, 0.0  ;;  %v1912_v32 = vmul.f32 %v1419_v27, %v1419_v27  ;;  %v2254_v33 = vpack.c.bf16 %v1419_v27, %v1419_v27  ;;  %1168 = vmatmul.bf16.gmra.mxu0 %v2696_v23 }
 0x10c   : > { %v1693_v36 = vadd.f32 %v1692_v31, %v1691_v15  ;;  %3104 = vmatmul.msk.bf16.gmra.mxu3 %vm914_vm2, %v2900_v18 }
 0x10d   : > { %v2035_v40 = vsel %vm1668_vm4, %v1912_v32, 0.0  ;;  %2367 = vst.msk [vmem:[%s3416_s22 + $0x30] sm:$0xf] %vm2354_vm3, %v2254_v33  ;;  %v2724_v32 = vor.u32 %v3158_v24, %v2721_v25  ;;  %v2711_v33 = vld [vmem:[%s3330_s5 + $0x100] sm:$0xf] }
 0x10e   : > { %v1425_v41 = vpop.f32.mrf.mxu1  ;;  %v2036_v44 = vadd.f32 %v2035_v40, %v2034_v21  ;;  %v1254_v21 = vpop.f32.mrf.mxu2  ;;  %v2712_v40 = vor.u32 %v3157_v34, %v2711_v33  ;;  %v2911_v25 = vld [vmem:[%s3330_s5 + $0x290] sm:$0xf]  ;;  %v2913_v34 = vld [vmem:[%s3330_s5 + $0x298] sm:$0xf0] }
 0x110   : > { %v1131_v45 = vpop.f32.mrf.mxu0 }
 0x111   : > { %v1421_v47 = vadd.f32 %v1420_v4, %v1131_v45  ;;  %v1540_v4 = vpop.f32.mrf.mxu3 }
 0x112   : > { %v3566_v5 = vadd.f32 %v1540_v4, %v1251_v2  ;;  %v3160_v2 = vld [vmem:[%s3330_s5 + $0x124] sm:$0xf] }
 0x113   : > { %v1694_v51 = vsel %vm1668_vm4, %v1421_v47, 0.0  ;;  %v1913_v52 = vmul.f32 %v1421_v47, %v1421_v47  ;;  %v2255_v53 = vpack.c.bf16 %v1421_v47, %v1421_v47  ;;  %v2903_v47 = vld [vmem:[%s3330_s5 + $0x280] sm:$0xf] }
 0x114   : > { %v1695_v54 = vadd.f32 %v1694_v51, %v1693_v36  ;;  %v2303_v13 = vpack.c.bf16 %v3566_v5, %v3566_v5  ;;  %v3205_v51 = vld [vmem:[%s3330_s5 + $0x284] sm:$0xf0] }
 0x115   : > { %v2037_v59 = vsel %vm1668_vm4, %v1913_v52, 0.0  ;;  %2368 = vst.msk [vmem:[%s3416_s22 + $0x34] sm:$0xf] %vm2354_vm3, %v2255_v53  ;;  %v3204_v52 = vld [vmem:[%s3330_s5 + $0x284] sm:$0xf] }
 0x116   : > { %v1428_v60 = vpop.f32.mrf.mxu1  ;;  %v2038_v61 = vadd.f32 %v2037_v59, %v2036_v44  ;;  %2416 = vst.msk [vmem:[%s3416_s22 + $0xf4] sm:$0xf] %vm2354_vm3, %v2303_v13  ;;  %v1256_v43 = vpop.f32.mrf.mxu2  ;;  %v2904_v59 = vor.u32 %v3205_v51, %v2903_v47  ;;  %v2737_v47 = vld [vmem:[%s3330_s5 + $0x138] sm:$0xf0] }
 0x118   : > { %v1134_v0 = vpop.f32.mrf.mxu0  ;;  %1298 = vmatmul.bf16.gmra.mxu2 %v2904_v59 }
 0x119   : > { %3081 = vmatmul.msk.bf16.gmra.mxu1 %vm914_vm2, %v2716_v56  ;;  %v1424_v3 = vadd.f32 %v1423_v20, %v1134_v0  ;;  %v1543_v26 = vpop.f32.mrf.mxu3  ;;  %v2905_v56 = vld [vmem:[%s3330_s5 + $0x288] sm:$0xf0] }
 0x11a   : > { %v3589_v38 = vadd.f32 %v1543_v26, %v1254_v21 }
 0x11b   : > { %v1696_v7 = vsel %vm1668_vm4, %v1424_v3, 0.0  ;;  %v1914_v8 = vmul.f32 %v1424_v3, %v1424_v3  ;;  %v2256_v9 = vpack.c.bf16 %v1424_v3, %v1424_v3  ;;  %1173 = vmatmul.bf16.gmra.mxu0 %v2704_v63  ;;  %v2729_v3 = vld [vmem:[%s3330_s5 + $0x128] sm:$0xf0] }
 0x11c   : > { %v1697_v12 = vadd.f32 %v1696_v7, %v1695_v54  ;;  %v2304_v42 = vpack.c.bf16 %v3589_v38, %v3589_v38  ;;  %v2732_v10 = vor.u32 %v3160_v2, %v2729_v3 }
 0x11d   : > { %v2039_v15 = vsel %vm1668_vm4, %v1914_v8, 0.0  ;;  %2369 = vst.msk [vmem:[%s3416_s22 + $0x38] sm:$0xf] %vm2354_vm3, %v2256_v9 }
 0x11e   : > { %v1430_v16 = vpop.f32.mrf.mxu1  ;;  %v2040_v19 = vadd.f32 %v2039_v15, %v2038_v61  ;;  %2417 = vst.msk [vmem:[%s3416_s22 + $0xf8] sm:$0xf] %vm2354_vm3, %v2304_v42  ;;  %v1259_v0 = vpop.f32.mrf.mxu2 }
 0x120   : > { %v1136_v20 = vpop.f32.mrf.mxu0 }
 0x121   : > { %v1426_v23 = vadd.f32 %v1425_v41, %v1136_v20  ;;  %v1545_v45 = vpop.f32.mrf.mxu3 }
 0x122   : > { %v3596_v46 = vadd.f32 %v1545_v45, %v1256_v43  ;;  %v3162_v45 = vld [vmem:[%s3330_s5 + $0x134] sm:$0xf] }
 0x123   : > { %v1698_v27 = vsel %vm1668_vm4, %v1426_v23, 0.0  ;;  %v1915_v28 = vmul.f32 %v1426_v23, %v1426_v23  ;;  %v2257_v30 = vpack.c.bf16 %v1426_v23, %v1426_v23 }
 0x124   : > { %v1699_v31 = vadd.f32 %v1698_v27, %v1697_v12  ;;  %v2305_v54 = vpack.c.bf16 %v3596_v46, %v3596_v46  ;;  %v3159_v12 = vld [vmem:[%s3330_s5 + $0x114] sm:$0xf0] }
 0x125   : > { %v2041_v35 = vsel %vm1668_vm4, %v1915_v28, 0.0  ;;  %2370 = vst.msk [vmem:[%s3416_s22 + $0x3c] sm:$0xf] %vm2354_vm3, %v2257_v30  ;;  %v2720_v17 = vor.u32 %v3159_v12, %v2719_v11  ;;  %v3207_v30 = vld [vmem:[%s3330_s5 + $0x294] sm:$0xf0] }
 0x126   : > { %v1433_v36 = vpop.f32.mrf.mxu1  ;;  %v2042_v37 = vadd.f32 %v2041_v35, %v2040_v19  ;;  %2418 = vst.msk [vmem:[%s3416_s22 + $0xfc] sm:$0xf] %vm2354_vm3, %v2305_v54  ;;  %v1261_v20 = vpop.f32.mrf.mxu2  ;;  %v2727_v54 = vld [vmem:[%s3330_s5 + $0x120] sm:$0xf]  ;;  %v3208_v11 = vld [vmem:[%s3330_s5 + $0x2a4] sm:$0xf] }
 0x128   : > { %v1139_v41 = vpop.f32.mrf.mxu0 }
 0x129   : > { %3082 = vmatmul.msk.bf16.gmra.mxu1 %vm914_vm2, %v2724_v32  ;;  %v1429_v44 = vadd.f32 %v1428_v60, %v1139_v41  ;;  %v2908_v60 = vor.u32 %v3204_v52, %v2905_v56  ;;  %v1548_v4 = vpop.f32.mrf.mxu3  ;;  %v3161_v56 = vld [vmem:[%s3330_s5 + $0x124] sm:$0xf0] }
 0x12b   : > { %v1700_v48 = vsel %vm1668_vm4, %v1429_v44, 0.0  ;;  %v1916_v49 = vmul.f32 %v1429_v44, %v1429_v44  ;;  %v2258_v50 = vpack.c.bf16 %v1429_v44, %v1429_v44  ;;  %1178 = vmatmul.bf16.gmra.mxu0 %v2712_v40  ;;  %3105 = vmatmul.msk.bf16.gmra.mxu3 %vm914_vm2, %v2908_v60 }
 0x12c   : > { %v1701_v53 = vadd.f32 %v1700_v48, %v1699_v31  ;;  %v3206_v31 = vld [vmem:[%s3330_s5 + $0x294] sm:$0xf] }
 0x12d   : > { %v2043_v57 = vsel %vm1668_vm4, %v1916_v49, 0.0  ;;  %2371 = vst.msk [vmem:[%s3416_s22 + $0x40] sm:$0xf] %vm2354_vm3, %v2258_v50  ;;  %v2916_v40 = vor.u32 %v3206_v31, %v2913_v34 }
 0x12e   : > { %v1435_v58 = vpop.f32.mrf.mxu1  ;;  %v2044_v61 = vadd.f32 %v2043_v57, %v2042_v37  ;;  %v2912_v37 = vor.u32 %v3207_v30, %v2911_v25  ;;  %v1264_v43 = vpop.f32.mrf.mxu2 }
 0x130   : > { %v1141_v63 = vpop.f32.mrf.mxu0  ;;  %1303 = vmatmul.bf16.gmra.mxu2 %v2912_v37  ;;  %v3163_v37 = vld [vmem:[%s3330_s5 + $0x134] sm:$0xf0] }
 0x131   : > { %v1431_v1 = vadd.f32 %v1430_v16, %v1141_v63  ;;  %v3619_v16 = vadd.f32 %v1548_v4, %v1259_v0  ;;  %v1550_v23 = vpop.f32.mrf.mxu3 }
 0x132   : > { %v3626_v24 = vadd.f32 %v1550_v23, %v1261_v20 }
 0x133   : > { %v1702_v6 = vsel %vm1668_vm4, %v1431_v1, 0.0  ;;  %v1917_v7 = vmul.f32 %v1431_v1, %v1431_v1  ;;  %v2259_v8 = vpack.c.bf16 %v1431_v1, %v1431_v1  ;;  %v2306_v19 = vpack.c.bf16 %v3619_v16, %v3619_v16 }
 0x134   : > { %v1703_v9 = vadd.f32 %v1702_v6, %v1701_v53  ;;  %v2307_v33 = vpack.c.bf16 %v3626_v24, %v3626_v24  ;;  %v2740_v53 = vor.u32 %v3162_v45, %v2737_v47  ;;  %v2919_v6 = vld [vmem:[%s3330_s5 + $0x2a0] sm:$0xf] }
 0x135   : > { %v2045_v13 = vsel %vm1668_vm4, %v1917_v7, 0.0  ;;  %2372 = vst.msk [vmem:[%s3416_s22 + $0x44] sm:$0xf] %vm2354_vm3, %v2259_v8 }
 0x136   : > { %v1438_v14 = vpop.f32.mrf.mxu1  ;;  %v2046_v15 = vadd.f32 %v2045_v13, %v2044_v61  ;;  %2419 = vst.msk [vmem:[%s3416_s22 + $0x100] sm:$0xf] %vm2354_vm3, %v2306_v19  ;;  %v2728_v61 = vor.u32 %v3161_v56, %v2727_v54  ;;  %v1266_v1 = vpop.f32.mrf.mxu2  ;;  %v3211_v56 = vld [vmem:[%s3330_s5 + $0x2b4] sm:$0xf0] }
 0x137   : > { %2420 = vst.msk [vmem:[%s3416_s22 + $0x104] sm:$0xf] %vm2354_vm3, %v2307_v33 }
 0x138   : > { %v1144_v18 = vpop.f32.mrf.mxu0 }
 0x139   : > { %3083 = vmatmul.msk.bf16.gmra.mxu1 %vm914_vm2, %v2732_v10  ;;  %v1434_v21 = vadd.f32 %v1433_v36, %v1144_v18  ;;  %v1553_v48 = vpop.f32.mrf.mxu3  ;;  %v3209_v10 = vld [vmem:[%s3330_s5 + $0x2a4] sm:$0xf0] }
 0x13a   : > { %v2920_v18 = vor.u32 %v3209_v10, %v2919_v6  ;;  %v2753_v10 = vld [vmem:[%s3330_s5 + $0x158] sm:$0xf0] }
 0x13b   : > { %v1704_v26 = vsel %vm1668_vm4, %v1434_v21, 0.0  ;;  %v1918_v27 = vmul.f32 %v1434_v21, %v1434_v21  ;;  %v2260_v28 = vpack.c.bf16 %v1434_v21, %v1434_v21  ;;  %1183 = vmatmul.bf16.gmra.mxu0 %v2720_v17  ;;  %3106 = vmatmul.msk.bf16.gmra.mxu3 %vm914_vm2, %v2916_v40 }
 0x13c   : > { %v1705_v32 = vadd.f32 %v1704_v26, %v1703_v9  ;;  %v3164_v26 = vld [vmem:[%s3330_s5 + $0x144] sm:$0xf] }
 0x13d   : > { %v2047_v35 = vsel %vm1668_vm4, %v1918_v27, 0.0  ;;  %2373 = vst.msk [vmem:[%s3416_s22 + $0x48] sm:$0xf] %vm2354_vm3, %v2260_v28  ;;  %v2745_v27 = vld [vmem:[%s3330_s5 + $0x148] sm:$0xf0] }
 0x13e   : > { %v1440_v36 = vpop.f32.mrf.mxu1  ;;  %v2048_v41 = vadd.f32 %v2047_v35, %v2046_v15  ;;  %v1269_v23 = vpop.f32.mrf.mxu2  ;;  %v2748_v34 = vor.u32 %v3164_v26, %v2745_v27  ;;  %v2735_v35 = vld [vmem:[%s3330_s5 + $0x130] sm:$0xf] }
 0x140   : > { %v1146_v42 = vpop.f32.mrf.mxu0  ;;  %1308 = vmatmul.bf16.gmra.mxu2 %v2920_v18 }
 0x141   : > { %v1436_v44 = vadd.f32 %v1435_v58, %v1146_v42  ;;  %v3649_v58 = vadd.f32 %v1553_v48, %v1264_v43  ;;  %v1555_v3 = vpop.f32.mrf.mxu3  ;;  %v2736_v43 = vor.u32 %v3163_v37, %v2735_v35 }
 0x142   : > { %v3656_v4 = vadd.f32 %v1555_v3, %v1266_v1 }
 0x143   : > { %v1706_v49 = vsel %vm1668_vm4, %v1436_v44, 0.0  ;;  %v1919_v50 = vmul.f32 %v1436_v44, %v1436_v44  ;;  %v2261_v51 = vpack.c.bf16 %v1436_v44, %v1436_v44  ;;  %v2308_v0 = vpack.c.bf16 %v3649_v58, %v3649_v58 }
 0x144   : > { %v1707_v52 = vadd.f32 %v1706_v49, %v1705_v32  ;;  %v2309_v13 = vpack.c.bf16 %v3656_v4, %v3656_v4 }
 0x145   : > { %v2049_v57 = vsel %vm1668_vm4, %v1919_v50, 0.0  ;;  %2374 = vst.msk [vmem:[%s3416_s22 + $0x4c] sm:$0xf] %vm2354_vm3, %v2261_v51  ;;  %v2927_v51 = vld [vmem:[%s3330_s5 + $0x2b0] sm:$0xf] }
 0x146   : > { %v1443_v59 = vpop.f32.mrf.mxu1  ;;  %v2050_v60 = vadd.f32 %v2049_v57, %v2048_v41  ;;  %2421 = vst.msk [vmem:[%s3416_s22 + $0x108] sm:$0xf] %vm2354_vm3, %v2308_v0  ;;  %v1271_v47 = vpop.f32.mrf.mxu2  ;;  %v3210_v57 = vld [vmem:[%s3330_s5 + $0x2b4] sm:$0xf]  ;;  %v2928_v1 = vor.u32 %v3211_v56, %v2927_v51 }
 0x147   : > { %2422 = vst.msk [vmem:[%s3416_s22 + $0x10c] sm:$0xf] %vm2354_vm3, %v2309_v13 }
 0x148   : > { %v1149_v63 = vpop.f32.mrf.mxu0 }
 0x149   : > { %3084 = vmatmul.msk.bf16.gmra.mxu1 %vm914_vm2, %v2740_v53  ;;  %v1439_v2 = vadd.f32 %v1438_v14, %v1149_v63  ;;  %v2921_v14 = vld [vmem:[%s3330_s5 + $0x2a8] sm:$0xf0]  ;;  %v1558_v28 = vpop.f32.mrf.mxu3 }
 0x14a   : > { %v2924_v19 = vor.u32 %v3208_v11, %v2921_v14 }
 0x14b   : > { %v1708_v7 = vsel %vm1668_vm4, %v1439_v2, 0.0  ;;  %v1920_v8 = vmul.f32 %v1439_v2, %v1439_v2  ;;  %v2262_v9 = vpack.c.bf16 %v1439_v2, %v1439_v2  ;;  %1188 = vmatmul.bf16.gmra.mxu0 %v2728_v61  ;;  %v2929_v61 = vld [vmem:[%s3330_s5 + $0x2b8] sm:$0xf0] }
 0x14c   : > { %v1709_v12 = vadd.f32 %v1708_v7, %v1707_v52  ;;  %3107 = vmatmul.msk.bf16.gmra.mxu3 %vm914_vm2, %v2924_v19  ;;  %v2932_v2 = vor.u32 %v3210_v57, %v2929_v61  ;;  %v2743_v19 = vld [vmem:[%s3330_s5 + $0x140] sm:$0xf]  ;;  %v3168_v57 = vld [vmem:[%s3330_s5 + $0x164] sm:$0xf] }
 0x14d   : > { %v2051_v15 = vsel %vm1668_vm4, %v1920_v8, 0.0  ;;  %2375 = vst.msk [vmem:[%s3416_s22 + $0x50] sm:$0xf] %vm2354_vm3, %v2262_v9  ;;  %v3166_v9 = vld [vmem:[%s3330_s5 + $0x154] sm:$0xf] }
 0x14e   : > { %v1445_v17 = vpop.f32.mrf.mxu1  ;;  %v2052_v20 = vadd.f32 %v2051_v15, %v2050_v60  ;;  %v1274_v7 = vpop.f32.mrf.mxu2  ;;  %v2756_v18 = vor.u32 %v3166_v9, %v2753_v10 }
 0x150   : > { %v1151_v21 = vpop.f32.mrf.mxu0  ;;  %1313 = vmatmul.bf16.gmra.mxu2 %v2928_v1 }
 0x151   : > { %v1441_v25 = vadd.f32 %v1440_v36, %v1151_v21  ;;  %v3679_v36 = vadd.f32 %v1558_v28, %v1269_v23  ;;  %v1560_v49 = vpop.f32.mrf.mxu3 }
 0x152   : > { %v3686_v50 = vadd.f32 %v1560_v49, %v1271_v47 }
 0x153   : > { %v1710_v30 = vsel %vm1668_vm4, %v1441_v25, 0.0  ;;  %v1921_v31 = vmul.f32 %v1441_v25, %v1441_v25  ;;  %v2263_v32 = vpack.c.bf16 %v1441_v25, %v1441_v25  ;;  %v2310_v45 = vpack.c.bf16 %v3679_v36, %v3679_v36 }
 0x154   : > { %v1711_v33 = vadd.f32 %v1710_v30, %v1709_v12 }
 0x155   : > { %v2053_v40 = vsel %vm1668_vm4, %v1921_v31, 0.0  ;;  %2376 = vst.msk [vmem:[%s3416_s22 + $0x54] sm:$0xf] %vm2354_vm3, %v2263_v32 }
 0x156   : > { %v1448_v41 = vpop.f32.mrf.mxu1  ;;  %v2054_v42 = vadd.f32 %v2053_v40, %v2052_v20  ;;  %2423 = vst.msk [vmem:[%s3416_s22 + $0x110] sm:$0xf] %vm2354_vm3, %v2310_v45  ;;  %v3165_v20 = vld [vmem:[%s3330_s5 + $0x144] sm:$0xf0]  ;;  %v1276_v30 = vpop.f32.mrf.mxu2  ;;  %v2937_v45 = vld [vmem:[%s3330_s5 + $0x2c8] sm:$0xf0] }
 0x157   : > { %v2744_v26 = vor.u32 %v3165_v20, %v2743_v19  ;;  %v2943_v20 = vld [vmem:[%s3330_s5 + $0x2d0] sm:$0xf] }
 0x158   : > { %v1154_v44 = vpop.f32.mrf.mxu0 }
 0x159   : > { %3085 = vmatmul.msk.bf16.gmra.mxu1 %vm914_vm2, %v2748_v34  ;;  %v1444_v48 = vadd.f32 %v1443_v59, %v1154_v44  ;;  %v2311_v59 = vpack.c.bf16 %v3686_v50, %v3686_v50  ;;  %v1563_v11 = vpop.f32.mrf.mxu3  ;;  %v2935_v34 = vld [vmem:[%s3330_s5 + $0x2c0] sm:$0xf] }
 0x15b   : > { %v1712_v52 = vsel %vm1668_vm4, %v1444_v48, 0.0  ;;  %v1922_v53 = vmul.f32 %v1444_v48, %v1444_v48  ;;  %v2264_v54 = vpack.c.bf16 %v1444_v48, %v1444_v48  ;;  %1193 = vmatmul.bf16.gmra.mxu0 %v2736_v43  ;;  %2424 = vst.msk [vmem:[%s3416_s22 + $0x114] sm:$0xf] %vm2354_vm3, %v2311_v59  ;;  %v3212_v43 = vld [vmem:[%s3330_s5 + $0x2c4] sm:$0xf] }
 0x15c   : > { %v1713_v60 = vadd.f32 %v1712_v52, %v1711_v33  ;;  %3108 = vmatmul.msk.bf16.gmra.mxu3 %vm914_vm2, %v2932_v2  ;;  %v2940_v51 = vor.u32 %v3212_v43, %v2937_v45  ;;  %v2769_v45 = vld [vmem:[%s3330_s5 + $0x178] sm:$0xf0] }
 0x15d   : > { %v2055_v63 = vsel %vm1668_vm4, %v1922_v53, 0.0  ;;  %2377 = vst.msk [vmem:[%s3416_s22 + $0x58] sm:$0xf] %vm2354_vm3, %v2264_v54 }
 0x15e   : > { %v1450_v0 = vpop.f32.mrf.mxu1  ;;  %v2056_v3 = vadd.f32 %v2055_v63, %v2054_v42  ;;  %v3213_v42 = vld [vmem:[%s3330_s5 + $0x2c4] sm:$0xf0]  ;;  %v1279_v54 = vpop.f32.mrf.mxu2 }
 0x15f   : > { %v2936_v49 = vor.u32 %v3213_v42, %v2935_v34 }
 0x160   : > { %v1156_v6 = vpop.f32.mrf.mxu0 }
 0x161   : > { %v1446_v8 = vadd.f32 %v1445_v17, %v1156_v6  ;;  %v3709_v17 = vadd.f32 %v1563_v11, %v1274_v7  ;;  %v1565_v32 = vpop.f32.mrf.mxu3  ;;  %1318 = vmatmul.bf16.gmra.mxu2 %v2936_v49  ;;  %v2751_v6 = vld [vmem:[%s3330_s5 + $0x150] sm:$0xf]  ;;  %v3167_v7 = vld [vmem:[%s3330_s5 + $0x154] sm:$0xf0] }
 0x162   : > { %v3716_v33 = vadd.f32 %v1565_v32, %v1276_v30  ;;  %v2752_v11 = vor.u32 %v3167_v7, %v2751_v6 }
 0x163   : > { %v1714_v12 = vsel %vm1668_vm4, %v1446_v8, 0.0  ;;  %v1923_v13 = vmul.f32 %v1446_v8, %v1446_v8  ;;  %v2265_v14 = vpack.c.bf16 %v1446_v8, %v1446_v8  ;;  %v2312_v28 = vpack.c.bf16 %v3709_v17, %v3709_v17 }
 0x164   : > { %v1715_v15 = vadd.f32 %v1714_v12, %v1713_v60  ;;  %v2761_v60 = vld [vmem:[%s3330_s5 + $0x168] sm:$0xf0] }
 0x165   : > { %v2057_v21 = vsel %vm1668_vm4, %v1923_v13, 0.0  ;;  %2378 = vst.msk [vmem:[%s3416_s22 + $0x5c] sm:$0xf] %vm2354_vm3, %v2265_v14 }
 0x166   : > { %v1453_v23 = vpop.f32.mrf.mxu1  ;;  %v2058_v25 = vadd.f32 %v2057_v21, %v2056_v3  ;;  %2425 = vst.msk [vmem:[%s3416_s22 + $0x118] sm:$0xf] %vm2354_vm3, %v2312_v28  ;;  %v2764_v3 = vor.u32 %v3168_v57, %v2761_v60  ;;  %v1281_v14 = vpop.f32.mrf.mxu2  ;;  %v3214_v28 = vld [vmem:[%s3330_s5 + $0x2d4] sm:$0xf]  ;;  %v3169_v57 = vld [vmem:[%s3330_s5 + $0x164] sm:$0xf0] }
 0x168   : > { %v1159_v27 = vpop.f32.mrf.mxu0 }
 0x169   : > { %3086 = vmatmul.msk.bf16.gmra.mxu1 %vm914_vm2, %v2756_v18  ;;  %v1449_v31 = vadd.f32 %v1448_v41, %v1159_v27  ;;  %v2313_v41 = vpack.c.bf16 %v3716_v33, %v3716_v33  ;;  %v1568_v59 = vpop.f32.mrf.mxu3  ;;  %v3215_v27 = vld [vmem:[%s3330_s5 + $0x2d4] sm:$0xf0] }
 0x16b   : > { %v1716_v35 = vsel %vm1668_vm4, %v1449_v31, 0.0  ;;  %v1924_v37 = vmul.f32 %v1449_v31, %v1449_v31  ;;  %v2266_v40 = vpack.c.bf16 %v1449_v31, %v1449_v31  ;;  %1198 = vmatmul.bf16.gmra.mxu0 %v2744_v26  ;;  %2426 = vst.msk [vmem:[%s3416_s22 + $0x11c] sm:$0xf] %vm2354_vm3, %v2313_v41  ;;  %v2945_v31 = vld [vmem:[%s3330_s5 + $0x2d8] sm:$0xf0] }
 0x16c   : > { %v1717_v44 = vadd.f32 %v1716_v35, %v1715_v15  ;;  %3109 = vmatmul.msk.bf16.gmra.mxu3 %vm914_vm2, %v2940_v51  ;;  %v2944_v35 = vor.u32 %v3215_v27, %v2943_v20  ;;  %v3170_v41 = vld [vmem:[%s3330_s5 + $0x174] sm:$0xf]  ;;  %v2953_v20 = vld [vmem:[%s3330_s5 + $0x2e8] sm:$0xf0] }
 0x16d   : > { %v2059_v47 = vsel %vm1668_vm4, %v1924_v37, 0.0  ;;  %2379 = vst.msk [vmem:[%s3416_s22 + $0x60] sm:$0xf] %vm2354_vm3, %v2266_v40  ;;  %v2948_v37 = vor.u32 %v3214_v28, %v2945_v31  ;;  %v3172_v31 = vld [vmem:[%s3330_s5 + $0x184] sm:$0xf] }
 0x16e   : > { %v1455_v48 = vpop.f32.mrf.mxu1  ;;  %v2060_v52 = vadd.f32 %v2059_v47, %v2058_v25  ;;  %v1284_v43 = vpop.f32.mrf.mxu2 }
 0x170   : > { %v1161_v53 = vpop.f32.mrf.mxu0 }
 0x171   : > { %v1451_v56 = vadd.f32 %v1450_v0, %v1161_v53  ;;  %v3739_v0 = vadd.f32 %v1568_v59, %v1279_v54  ;;  %v1570_v18 = vpop.f32.mrf.mxu3  ;;  %1323 = vmatmul.bf16.gmra.mxu2 %v2944_v35  ;;  %v2772_v54 = vor.u32 %v3170_v41, %v2769_v45  ;;  %v2767_v45 = vld [vmem:[%s3330_s5 + $0x170] sm:$0xf] }
 0x172   : > { %v3746_v19 = vadd.f32 %v1570_v18, %v1281_v14  ;;  %v3217_v14 = vld [vmem:[%s3330_s5 + $0x2e4] sm:$0xf0] }
 0x173   : > { %v1718_v61 = vsel %vm1668_vm4, %v1451_v56, 0.0  ;;  %v1925_v63 = vmul.f32 %v1451_v56, %v1451_v56  ;;  %v2267_v1 = vpack.c.bf16 %v1451_v56, %v1451_v56  ;;  %v2314_v13 = vpack.c.bf16 %v3739_v0, %v3739_v0  ;;  %v2759_v56 = vld [vmem:[%s3330_s5 + $0x160] sm:$0xf] }
 0x174   : > { %v1719_v2 = vadd.f32 %v1718_v61, %v1717_v44 }
 0x175   : > { %v2061_v8 = vsel %vm1668_vm4, %v1925_v63, 0.0  ;;  %2380 = vst.msk [vmem:[%s3416_s22 + $0x64] sm:$0xf] %vm2354_vm3, %v2267_v1  ;;  %v2760_v63 = vor.u32 %v3169_v57, %v2759_v56 }
 0x176   : > { %v1458_v9 = vpop.f32.mrf.mxu1  ;;  %v2062_v10 = vadd.f32 %v2061_v8, %v2060_v52  ;;  %2427 = vst.msk [vmem:[%s3416_s22 + $0x120] sm:$0xf] %vm2354_vm3, %v2314_v13 }
 0x178   : > { %v1164_v12 = vpop.f32.mrf.mxu0 }
 0x179   : > { %3087 = vmatmul.msk.bf16.gmra.mxu1 %vm914_vm2, %v2764_v3  ;;  %v1454_v15 = vadd.f32 %v1453_v23, %v1164_v12  ;;  %v2315_v23 = vpack.c.bf16 %v3746_v19, %v3746_v19  ;;  %v1573_v47 = vpop.f32.mrf.mxu3  ;;  %v1286_v3 = vpop.f32.mrf.mxu2 }
 0x17b   : > { %v1720_v21 = vsel %vm1668_vm4, %v1454_v15, 0.0  ;;  %v1926_v25 = vmul.f32 %v1454_v15, %v1454_v15  ;;  %v2268_v26 = vpack.c.bf16 %v1454_v15, %v1454_v15  ;;  %1203 = vmatmul.bf16.gmra.mxu0 %v2752_v11  ;;  %2428 = vst.msk [vmem:[%s3416_s22 + $0x124] sm:$0xf] %vm2354_vm3, %v2315_v23  ;;  %v3216_v15 = vld [vmem:[%s3330_s5 + $0x2e4] sm:$0xf] }
 0x17c   : > { %v1721_v30 = vadd.f32 %v1720_v21, %v1719_v2  ;;  %3110 = vmatmul.msk.bf16.gmra.mxu3 %vm914_vm2, %v2948_v37  ;;  %v2956_v27 = vor.u32 %v3216_v15, %v2953_v20 }
 0x17d   : > { %v2063_v32 = vsel %vm1668_vm4, %v1926_v25, 0.0  ;;  %2381 = vst.msk [vmem:[%s3416_s22 + $0x68] sm:$0xf] %vm2354_vm3, %v2268_v26 }
 0x17e   : > { %v1460_v34 = vpop.f32.mrf.mxu1  ;;  %v2064_v40 = vadd.f32 %v2063_v32, %v2062_v10  ;;  %v2951_v10 = vld [vmem:[%s3330_s5 + $0x2e0] sm:$0xf]  ;;  %v2777_v32 = vld [vmem:[%s3330_s5 + $0x188] sm:$0xf0] }
 0x17f   : > { %v2952_v26 = vor.u32 %v3217_v14, %v2951_v10  ;;  %v2780_v41 = vor.u32 %v3172_v31, %v2777_v32  ;;  %v3218_v10 = vld [vmem:[%s3330_s5 + $0x2f4] sm:$0xf] }
 0x180   : > { %v1166_v42 = vpop.f32.mrf.mxu0 }
 0x181   : > { %v1456_v44 = vadd.f32 %v1455_v48, %v1166_v42  ;;  %v3769_v48 = vadd.f32 %v1573_v47, %v1284_v43  ;;  %v1575_v7 = vpop.f32.mrf.mxu3  ;;  %1328 = vmatmul.bf16.gmra.mxu2 %v2952_v26  ;;  %v1289_v35 = vpop.f32.mrf.mxu2  ;;  %v3171_v47 = vld [vmem:[%s3330_s5 + $0x174] sm:$0xf0]  ;;  %v3174_v26 = vld [vmem:[%s3330_s5 + $0x194] sm:$0xf] }
 0x182   : > { %v3776_v8 = vadd.f32 %v1575_v7, %v1286_v3  ;;  %v3219_v7 = vld [vmem:[%s3330_s5 + $0x2f4] sm:$0xf0] }
 0x183   : > { %v1722_v49 = vsel %vm1668_vm4, %v1456_v44, 0.0  ;;  %v1927_v51 = vmul.f32 %v1456_v44, %v1456_v44  ;;  %v2269_v52 = vpack.c.bf16 %v1456_v44, %v1456_v44  ;;  %v2316_v2 = vpack.c.bf16 %v3769_v48, %v3769_v48 }
 0x184   : > { %v1723_v53 = vadd.f32 %v1722_v49, %v1721_v30 }
 0x185   : > { %v2065_v60 = vsel %vm1668_vm4, %v1927_v51, 0.0  ;;  %2382 = vst.msk [vmem:[%s3416_s22 + $0x6c] sm:$0xf] %vm2354_vm3, %v2269_v52 }
 0x186   : > { %v1463_v59 = vpop.f32.mrf.mxu1  ;;  %v2066_v61 = vadd.f32 %v2065_v60, %v2064_v40  ;;  %2429 = vst.msk [vmem:[%s3416_s22 + $0x128] sm:$0xf] %vm2354_vm3, %v2316_v2 }
 0x188   : > { %v1169_v1 = vpop.f32.mrf.mxu0 }
 0x189   : > { %3088 = vmatmul.msk.bf16.gmra.mxu1 %vm914_vm2, %v2772_v54  ;;  %v1459_v6 = vadd.f32 %v1458_v9, %v1169_v1  ;;  %v2317_v9 = vpack.c.bf16 %v3776_v8, %v3776_v8  ;;  %v1578_v37 = vpop.f32.mrf.mxu3  ;;  %v1291_v60 = vpop.f32.mrf.mxu2 }
 0x18a   : > { %v3799_v52 = vadd.f32 %v1578_v37, %v1289_v35 }
 0x18b   : > { %v1724_v11 = vsel %vm1668_vm4, %v1459_v6, 0.0  ;;  %v1928_v12 = vmul.f32 %v1459_v6, %v1459_v6  ;;  %v2270_v13 = vpack.c.bf16 %v1459_v6, %v1459_v6  ;;  %1208 = vmatmul.bf16.gmra.mxu0 %v2760_v63  ;;  %2430 = vst.msk [vmem:[%s3416_s22 + $0x12c] sm:$0xf] %vm2354_vm3, %v2317_v9  ;;  %v2959_v63 = vld [vmem:[%s3330_s5 + $0x2f0] sm:$0xf] }
 0x18c   : > { %v1725_v18 = vadd.f32 %v1724_v11, %v1723_v53  ;;  %3111 = vmatmul.msk.bf16.gmra.mxu3 %vm914_vm2, %v2956_v27  ;;  %v2768_v53 = vor.u32 %v3171_v47, %v2767_v45  ;;  %v2318_v56 = vpack.c.bf16 %v3799_v52, %v3799_v52  ;;  %v2785_v27 = vld [vmem:[%s3330_s5 + $0x198] sm:$0xf0] }
 0x18d   : > { %v2067_v21 = vsel %vm1668_vm4, %v1928_v12, 0.0  ;;  %2383 = vst.msk [vmem:[%s3416_s22 + $0x70] sm:$0xf] %vm2354_vm3, %v2270_v13  ;;  %v2961_v12 = vld [vmem:[%s3330_s5 + $0x2f8] sm:$0xf0]  ;;  %v2788_v37 = vor.u32 %v3174_v26, %v2785_v27 }
 0x18e   : > { %v1465_v25 = vpop.f32.mrf.mxu1  ;;  %v2068_v28 = vadd.f32 %v2067_v21, %v2066_v61  ;;  %2431 = vst.msk [vmem:[%s3416_s22 + $0x130] sm:$0xf] %vm2354_vm3, %v2318_v56  ;;  %v2964_v9 = vor.u32 %v3218_v10, %v2961_v12  ;;  %v2967_v56 = vld [vmem:[%s3330_s5 + $0x300] sm:$0xf] }
 0x190   : > { %v1171_v30 = vpop.f32.mrf.mxu0 }
 0x191   : > { %v1461_v23 = vadd.f32 %v1460_v34, %v1171_v30  ;;  %v1580_v61 = vpop.f32.mrf.mxu3 }
 0x192   : > { %v3808_v6 = vadd.f32 %v1580_v61, %v1291_v60 }
 0x193   : > { %v1726_v40 = vsel %vm1668_vm4, %v1461_v23, 0.0  ;;  %v1929_v42 = vmul.f32 %v1461_v23, %v1461_v23  ;;  %v2271_v43 = vpack.c.bf16 %v1461_v23, %v1461_v23 }
 0x194   : > { %v1727_v44 = vadd.f32 %v1726_v40, %v1725_v18  ;;  %v2319_v15 = vpack.c.bf16 %v3808_v6, %v3808_v6  ;;  %v2775_v40 = vld [vmem:[%s3330_s5 + $0x180] sm:$0xf] }
 0x195   : > { %v2069_v49 = vsel %vm1668_vm4, %v1929_v42, 0.0  ;;  %2384 = vst.msk [vmem:[%s3416_s22 + $0x74] sm:$0xf] %vm2354_vm3, %v2271_v43  ;;  %v3173_v42 = vld [vmem:[%s3330_s5 + $0x184] sm:$0xf0] }
 0x196   : > { %v1468_v51 = vpop.f32.mrf.mxu1  ;;  %v2070_v34 = vadd.f32 %v2069_v49, %v2068_v28  ;;  %2432 = vst.msk [vmem:[%s3416_s22 + $0x134] sm:$0xf] %vm2354_vm3, %v2319_v15  ;;  %v1294_v28 = vpop.f32.mrf.mxu2  ;;  %v2776_v45 = vor.u32 %v3173_v42, %v2775_v40 }
 0x198   : > { %v1174_v54 = vpop.f32.mrf.mxu0 }
 0x199   : > { %3089 = vmatmul.msk.bf16.gmra.mxu1 %vm914_vm2, %v2780_v41  ;;  %v1464_v57 = vadd.f32 %v1463_v59, %v1174_v54  ;;  %v2960_v59 = vor.u32 %v3219_v7, %v2959_v63  ;;  %v1583_v30 = vpop.f32.mrf.mxu3  ;;  %v2969_v7 = vld [vmem:[%s3330_s5 + $0x308] sm:$0xf0] }
 0x19a   : > { %v3829_v41 = vadd.f32 %v1583_v30, %v1294_v28 }
 0x19b   : > { %v1728_v1 = vsel %vm1668_vm4, %v1464_v57, 0.0  ;;  %v1930_v2 = vmul.f32 %v1464_v57, %v1464_v57  ;;  %v2272_v3 = vpack.c.bf16 %v1464_v57, %v1464_v57  ;;  %1213 = vmatmul.bf16.gmra.mxu0 %v2768_v53  ;;  %1333 = vmatmul.bf16.gmra.mxu2 %v2960_v59 }
 0x19c   : > { %v1729_v11 = vadd.f32 %v1728_v1, %v1727_v44  ;;  %3112 = vmatmul.msk.bf16.gmra.mxu3 %vm914_vm2, %v2964_v9  ;;  %v2320_v49 = vpack.c.bf16 %v3829_v41, %v3829_v41  ;;  %v3221_v1 = vld [vmem:[%s3330_s5 + $0x304] sm:$0xf0]  ;;  %v3176_v9 = vld [vmem:[%s3330_s5 + $0x1a4] sm:$0xf] }
 0x19d   : > { %v2071_v13 = vsel %vm1668_vm4, %v1930_v2, 0.0  ;;  %2385 = vst.msk [vmem:[%s3416_s22 + $0x78] sm:$0xf] %vm2354_vm3, %v2272_v3  ;;  %v3220_v2 = vld [vmem:[%s3330_s5 + $0x304] sm:$0xf] }
 0x19e   : > { %v1470_v14 = vpop.f32.mrf.mxu1  ;;  %v2072_v18 = vadd.f32 %v2071_v13, %v2070_v34  ;;  %2433 = vst.msk [vmem:[%s3416_s22 + $0x138] sm:$0xf] %vm2354_vm3, %v2320_v49  ;;  %v1296_v53 = vpop.f32.mrf.mxu2  ;;  %v2972_v13 = vor.u32 %v3220_v2, %v2969_v7 }
 0x1a0   : > { %v1176_v20 = vpop.f32.mrf.mxu0 }
 0x1a1   : > { %v1466_v21 = vadd.f32 %v1465_v25, %v1176_v20  ;;  %v1585_v54 = vpop.f32.mrf.mxu3  ;;  %v2793_v20 = vld [vmem:[%s3330_s5 + $0x1a8] sm:$0xf0] }
 0x1a2   : > { %v3838_v63 = vadd.f32 %v1585_v54, %v1296_v53  ;;  %v2975_v53 = vld [vmem:[%s3330_s5 + $0x310] sm:$0xf] }
 0x1a3   : > { %v1730_v23 = vsel %vm1668_vm4, %v1466_v21, 0.0  ;;  %v1931_v31 = vmul.f32 %v1466_v21, %v1466_v21  ;;  %v2273_v32 = vpack.c.bf16 %v1466_v21, %v1466_v21 }
 0x1a4   : > { %v1731_v35 = vadd.f32 %v1730_v23, %v1729_v11  ;;  %v2321_v59 = vpack.c.bf16 %v3838_v63, %v3838_v63 }
 0x1a5   : > { %v2073_v43 = vsel %vm1668_vm4, %v1931_v31, 0.0  ;;  %2386 = vst.msk [vmem:[%s3416_s22 + $0x7c] sm:$0xf] %vm2354_vm3, %v2273_v32  ;;  %v2796_v31 = vor.u32 %v3176_v9, %v2793_v20  ;;  %v2783_v32 = vld [vmem:[%s3330_s5 + $0x190] sm:$0xf] }
 0x1a6   : > { %v1473_v44 = vpop.f32.mrf.mxu1  ;;  %v2074_v25 = vadd.f32 %v2073_v43, %v2072_v18  ;;  %2434 = vst.msk [vmem:[%s3416_s22 + $0x13c] sm:$0xf] %vm2354_vm3, %v2321_v59  ;;  %v1299_v21 = vpop.f32.mrf.mxu2  ;;  %v2801_v9 = vld [vmem:[%s3330_s5 + $0x1b8] sm:$0xf0] }
 0x1a8   : > { %v1179_v47 = vpop.f32.mrf.mxu0 }
 0x1a9   : > { %3090 = vmatmul.msk.bf16.gmra.mxu1 %vm914_vm2, %v2788_v37  ;;  %v1469_v34 = vadd.f32 %v1468_v51, %v1179_v47  ;;  %v2968_v51 = vor.u32 %v3221_v1, %v2967_v56  ;;  %v3222_v1 = vld [vmem:[%s3330_s5 + $0x314] sm:$0xf] }
 0x1ab   : > { %v1732_v57 = vsel %vm1668_vm4, %v1469_v34, 0.0  ;;  %v1932_v60 = vmul.f32 %v1469_v34, %v1469_v34  ;;  %v2274_v61 = vpack.c.bf16 %v1469_v34, %v1469_v34  ;;  %1218 = vmatmul.bf16.gmra.mxu0 %v2776_v45  ;;  %1338 = vmatmul.bf16.gmra.mxu2 %v2968_v51 }
 0x1ac   : > { %v1733_v3 = vadd.f32 %v1732_v57, %v1731_v35  ;;  %3113 = vmatmul.msk.bf16.gmra.mxu3 %vm914_vm2, %v2972_v13  ;;  %v3175_v35 = vld [vmem:[%s3330_s5 + $0x194] sm:$0xf0] }
 0x1ad   : > { %v2075_v10 = vsel %vm1668_vm4, %v1932_v60, 0.0  ;;  %2387 = vst.msk [vmem:[%s3416_s22 + $0x80] sm:$0xf] %vm2354_vm3, %v2274_v61  ;;  %v2784_v43 = vor.u32 %v3175_v35, %v2783_v32  ;;  %v3223_v61 = vld [vmem:[%s3330_s5 + $0x314] sm:$0xf0] }
 0x1ae   : > { %v1475_v11 = vpop.f32.mrf.mxu1  ;;  %v2076_v12 = vadd.f32 %v2075_v10, %v2074_v25  ;;  %v1588_v26 = vpop.f32.mrf.mxu3  ;;  %v3177_v32 = vld [vmem:[%s3330_s5 + $0x1a4] sm:$0xf0] }
 0x1af   : > { %v3859_v42 = vadd.f32 %v1588_v26, %v1299_v21  ;;  %v1301_v49 = vpop.f32.mrf.mxu2 }
 0x1b0   : > { %v1181_v15 = vpop.f32.mrf.mxu0 }
 0x1b1   : > { %v1471_v18 = vadd.f32 %v1470_v14, %v1181_v15  ;;  %v2322_v45 = vpack.c.bf16 %v3859_v42, %v3859_v42 }
 0x1b3   : > { %v1734_v27 = vsel %vm1668_vm4, %v1471_v18, 0.0  ;;  %v1933_v28 = vmul.f32 %v1471_v18, %v1471_v18  ;;  %v2275_v30 = vpack.c.bf16 %v1471_v18, %v1471_v18  ;;  %2435 = vst.msk [vmem:[%s3416_s22 + $0x140] sm:$0xf] %vm2354_vm3, %v2322_v45  ;;  %v3178_v18 = vld [vmem:[%s3330_s5 + $0x1b4] sm:$0xf] }
 0x1b4   : > { %v1735_v23 = vadd.f32 %v1734_v27, %v1733_v3  ;;  %v2977_v3 = vld [vmem:[%s3330_s5 + $0x318] sm:$0xf0] }
 0x1b5   : > { %v2077_v37 = vsel %vm1668_vm4, %v1933_v28, 0.0  ;;  %2388 = vst.msk [vmem:[%s3416_s22 + $0x84] sm:$0xf] %vm2354_vm3, %v2275_v30 }
 0x1b6   : > { %v1478_v40 = vpop.f32.mrf.mxu1  ;;  %v2078_v14 = vadd.f32 %v2077_v37, %v2076_v12  ;;  %v1590_v34 = vpop.f32.mrf.mxu3  ;;  %v2980_v12 = vor.u32 %v3222_v1, %v2977_v3  ;;  %v3225_v1 = vld [vmem:[%s3330_s5 + $0x324] sm:$0xf0]  ;;  %v2985_v3 = vld [vmem:[%s3330_s5 + $0x328] sm:$0xf0] }
 0x1b7   : > { %v3868_v60 = vadd.f32 %v1590_v34, %v1301_v49  ;;  %v1304_v20 = vpop.f32.mrf.mxu2 }
 0x1b8   : > { %v1184_v25 = vpop.f32.mrf.mxu0 }
 0x1b9   : > { %3091 = vmatmul.msk.bf16.gmra.mxu1 %vm914_vm2, %v2796_v31  ;;  %v1474_v47 = vadd.f32 %v1473_v44, %v1184_v25  ;;  %v2976_v44 = vor.u32 %v3223_v61, %v2975_v53  ;;  %v2323_v10 = vpack.c.bf16 %v3868_v60, %v3868_v60  ;;  %v2791_v31 = vld [vmem:[%s3330_s5 + $0x1a0] sm:$0xf] }
 0x1ba   : > { %v2983_v53 = vld [vmem:[%s3330_s5 + $0x320] sm:$0xf] }
 0x1bb   : > { %v1736_v54 = vsel %vm1668_vm4, %v1474_v47, 0.0  ;;  %v1934_v56 = vmul.f32 %v1474_v47, %v1474_v47  ;;  %v2276_v57 = vpack.c.bf16 %v1474_v47, %v1474_v47  ;;  %1223 = vmatmul.bf16.gmra.mxu0 %v2784_v43  ;;  %2436 = vst.msk [vmem:[%s3416_s22 + $0x144] sm:$0xf] %vm2354_vm3, %v2323_v10  ;;  %1343 = vmatmul.bf16.gmra.mxu2 %v2976_v44 }
 0x1bc   : > { %v1737_v2 = vadd.f32 %v1736_v54, %v1735_v23  ;;  %3114 = vmatmul.msk.bf16.gmra.mxu3 %vm914_vm2, %v2980_v12  ;;  %v2804_v23 = vor.u32 %v3178_v18, %v2801_v9  ;;  %v2792_v43 = vor.u32 %v3177_v32, %v2791_v31  ;;  %v3180_v9 = vld [vmem:[%s3330_s5 + $0x1c4] sm:$0xf]  ;;  %v2799_v32 = vld [vmem:[%s3330_s5 + $0x1b0] sm:$0xf] }
 0x1bd   : > { %v2079_v51 = vsel %vm1668_vm4, %v1934_v56, 0.0  ;;  %2389 = vst.msk [vmem:[%s3416_s22 + $0x88] sm:$0xf] %vm2354_vm3, %v2276_v57 }
 0x1be   : > { %v1480_v7 = vpop.f32.mrf.mxu1  ;;  %v2080_v59 = vadd.f32 %v2079_v51, %v2078_v14  ;;  %v1593_v21 = vpop.f32.mrf.mxu3 }
 0x1bf   : > { %v3889_v14 = vadd.f32 %v1593_v21, %v1304_v20  ;;  %v1306_v49 = vpop.f32.mrf.mxu2  ;;  %v2809_v20 = vld [vmem:[%s3330_s5 + $0x1c8] sm:$0xf0] }
 0x1c0   : > { %v1186_v13 = vpop.f32.mrf.mxu0  ;;  %v2812_v31 = vor.u32 %v3180_v9, %v2809_v20 }
 0x1c1   : > { %v1476_v15 = vadd.f32 %v1475_v11, %v1186_v13  ;;  %v2324_v45 = vpack.c.bf16 %v3889_v14, %v3889_v14 }
 0x1c3   : > { %v1738_v26 = vsel %vm1668_vm4, %v1476_v15, 0.0  ;;  %v1935_v27 = vmul.f32 %v1476_v15, %v1476_v15  ;;  %v2277_v28 = vpack.c.bf16 %v1476_v15, %v1476_v15  ;;  %2437 = vst.msk [vmem:[%s3416_s22 + $0x148] sm:$0xf] %vm2354_vm3, %v2324_v45 }
 0x1c4   : > { %v1739_v30 = vadd.f32 %v1738_v26, %v1737_v2  ;;  %v3224_v2 = vld [vmem:[%s3330_s5 + $0x324] sm:$0xf] }
 0x1c5   : > { %v2081_v35 = vsel %vm1668_vm4, %v1935_v27, 0.0  ;;  %2390 = vst.msk [vmem:[%s3416_s22 + $0x8c] sm:$0xf] %vm2354_vm3, %v2277_v28  ;;  %v2988_v13 = vor.u32 %v3224_v2, %v2985_v3  ;;  %v3226_v3 = vld [vmem:[%s3330_s5 + $0x334] sm:$0xf] }
 0x1c6   : > { %v1483_v37 = vpop.f32.mrf.mxu1  ;;  %v2082_v11 = vadd.f32 %v2081_v35, %v2080_v59  ;;  %v1595_v34 = vpop.f32.mrf.mxu3  ;;  %v3179_v35 = vld [vmem:[%s3330_s5 + $0x1b4] sm:$0xf0] }
 0x1c7   : > { %v3898_v61 = vadd.f32 %v1595_v34, %v1306_v49  ;;  %v1309_v21 = vpop.f32.mrf.mxu2  ;;  %v2800_v45 = vor.u32 %v3179_v35, %v2799_v32 }
 0x1c8   : > { %v1189_v25 = vpop.f32.mrf.mxu0 }
 0x1c9   : > { %3092 = vmatmul.msk.bf16.gmra.mxu1 %vm914_vm2, %v2804_v23  ;;  %v1479_v47 = vadd.f32 %v1478_v40, %v1189_v25  ;;  %v2984_v40 = vor.u32 %v3225_v1, %v2983_v53  ;;  %v2325_v59 = vpack.c.bf16 %v3898_v61, %v3898_v61 }
 0x1cb   : > { %v1740_v54 = vsel %vm1668_vm4, %v1479_v47, 0.0  ;;  %v1936_v56 = vmul.f32 %v1479_v47, %v1479_v47  ;;  %v2278_v57 = vpack.c.bf16 %v1479_v47, %v1479_v47  ;;  %1228 = vmatmul.bf16.gmra.mxu0 %v2792_v43  ;;  %2438 = vst.msk [vmem:[%s3416_s22 + $0x14c] sm:$0xf] %vm2354_vm3, %v2325_v59  ;;  %1348 = vmatmul.bf16.gmra.mxu2 %v2984_v40  ;;  %v3227_v40 = vld [vmem:[%s3330_s5 + $0x334] sm:$0xf0] }
 0x1cc   : > { %v1741_v44 = vadd.f32 %v1740_v54, %v1739_v30  ;;  %3115 = vmatmul.msk.bf16.gmra.mxu3 %vm914_vm2, %v2988_v13 }
 0x1cd   : > { %v2083_v51 = vsel %vm1668_vm4, %v1936_v56, 0.0  ;;  %2391 = vst.msk [vmem:[%s3416_s22 + $0x90] sm:$0xf] %vm2354_vm3, %v2278_v57  ;;  %v2991_v56 = vld [vmem:[%s3330_s5 + $0x330] sm:$0xf] }
 0x1ce   : > { %v1485_v10 = vpop.f32.mrf.mxu1  ;;  %v2084_v12 = vadd.f32 %v2083_v51, %v2082_v11  ;;  %v2992_v59 = vor.u32 %v3227_v40, %v2991_v56  ;;  %v3228_v40 = vld [vmem:[%s3330_s5 + $0x344] sm:$0xf] }
 0x1cf   : > { %v1598_v26 = vpop.f32.mrf.mxu3  ;;  %v1311_v53 = vpop.f32.mrf.mxu2 }
 0x1d0   : > { %v1191_v15 = vpop.f32.mrf.mxu0  ;;  %v3919_v25 = vadd.f32 %v1598_v26, %v1309_v21 }
 0x1d1   : > { %v1481_v18 = vadd.f32 %v1480_v7, %v1191_v15 }
 0x1d2   : > { %v2326_v49 = vpack.c.bf16 %v3919_v25, %v3919_v25 }
 0x1d3   : > { %v1742_v27 = vsel %vm1668_vm4, %v1481_v18, 0.0  ;;  %v1937_v28 = vmul.f32 %v1481_v18, %v1481_v18  ;;  %v2279_v30 = vpack.c.bf16 %v1481_v18, %v1481_v18 }
 0x1d4   : > { %v1743_v23 = vadd.f32 %v1742_v27, %v1741_v44  ;;  %2439 = vst.msk [vmem:[%s3416_s22 + $0x150] sm:$0xf] %vm2354_vm3, %v2326_v49 }
 0x1d5   : > { %v2085_v11 = vsel %vm1668_vm4, %v1937_v28, 0.0  ;;  %2392 = vst.msk [vmem:[%s3416_s22 + $0x94] sm:$0xf] %vm2354_vm3, %v2279_v30 }
 0x1d6   : > { %v1488_v43 = vpop.f32.mrf.mxu1  ;;  %v2086_v7 = vadd.f32 %v2085_v11, %v2084_v12  ;;  %v2993_v12 = vld [vmem:[%s3330_s5 + $0x338] sm:$0xf0] }
 0x1d7   : > { %v1600_v54 = vpop.f32.mrf.mxu3  ;;  %v2996_v9 = vor.u32 %v3226_v3, %v2993_v12  ;;  %v1314_v26 = vpop.f32.mrf.mxu2 }
 0x1d8   : > { %v1194_v47 = vpop.f32.mrf.mxu0  ;;  %v3928_v44 = vadd.f32 %v1600_v54, %v1311_v53  ;;  %v2999_v53 = vld [vmem:[%s3330_s5 + $0x340] sm:$0xf] }
 0x1d9   : > { %3093 = vmatmul.msk.bf16.gmra.mxu1 %vm914_vm2, %v2812_v31  ;;  %v1484_v34 = vadd.f32 %v1483_v37, %v1194_v47 }
 0x1da   : > { %v2327_v15 = vpack.c.bf16 %v3928_v44, %v3928_v44 }
 0x1db   : > { %v1744_v57 = vsel %vm1668_vm4, %v1484_v34, 0.0  ;;  %v1938_v1 = vmul.f32 %v1484_v34, %v1484_v34  ;;  %v2280_v2 = vpack.c.bf16 %v1484_v34, %v1484_v34  ;;  %1233 = vmatmul.bf16.gmra.mxu0 %v2800_v45  ;;  %1353 = vmatmul.bf16.gmra.mxu2 %v2992_v59  ;;  %v3001_v59 = vld [vmem:[%s3330_s5 + $0x348] sm:$0xf0] }
 0x1dc   : > { %v1745_v51 = vadd.f32 %v1744_v57, %v1743_v23  ;;  %2440 = vst.msk [vmem:[%s3416_s22 + $0x154] sm:$0xf] %vm2354_vm3, %v2327_v15  ;;  %3116 = vmatmul.msk.bf16.gmra.mxu3 %vm914_vm2, %v2996_v9 }
 0x1dd   : > { %v2087_v37 = vsel %vm1668_vm4, %v1938_v1, 0.0  ;;  %2393 = vst.msk [vmem:[%s3416_s22 + $0x98] sm:$0xf] %vm2354_vm3, %v2280_v2  ;;  %v3229_v2 = vld [vmem:[%s3330_s5 + $0x344] sm:$0xf0] }
 0x1de   : > { %v1490_v13 = vpop.f32.mrf.mxu1  ;;  %v2088_v18 = vadd.f32 %v2087_v37, %v2086_v7 }
 0x1df   : > { %v1603_v27 = vpop.f32.mrf.mxu3  ;;  %v1316_v49 = vpop.f32.mrf.mxu2 }
 0x1e0   : > { %v1196_v20 = vpop.f32.mrf.mxu0  ;;  %v3945_v7 = vadd.f32 %v1603_v27, %v1314_v26 }
 0x1e1   : > { %v1486_v21 = vadd.f32 %v1485_v10, %v1196_v20 }
 0x1e2   : > { %v2328_v45 = vpack.c.bf16 %v3945_v7, %v3945_v7 }
 0x1e3   : > { %v1746_v28 = vsel %vm1668_vm4, %v1486_v21, 0.0  ;;  %v1939_v30 = vmul.f32 %v1486_v21, %v1486_v21  ;;  %v2281_v23 = vpack.c.bf16 %v1486_v21, %v1486_v21 }
 0x1e4   : > { %v1747_v31 = vadd.f32 %v1746_v28, %v1745_v51  ;;  %2441 = vst.msk [vmem:[%s3416_s22 + $0x158] sm:$0xf] %vm2354_vm3, %v2328_v45  ;;  %v3000_v51 = vor.u32 %v3229_v2, %v2999_v53  ;;  %v3007_v53 = vld [vmem:[%s3330_s5 + $0x350] sm:$0xf] }
 0x1e5   : > { %v2089_v32 = vsel %vm1668_vm4, %v1939_v30, 0.0  ;;  %2394 = vst.msk [vmem:[%s3416_s22 + $0x9c] sm:$0xf] %vm2354_vm3, %v2281_v23 }
 0x1e6   : > { %v1493_v35 = vpop.f32.mrf.mxu1  ;;  %v2090_v11 = vadd.f32 %v2089_v32, %v2088_v18  ;;  %v3004_v18 = vor.u32 %v3228_v40, %v3001_v59  ;;  %v3231_v40 = vld [vmem:[%s3330_s5 + $0x354] sm:$0xf0] }
 0x1e7   : > { %v1605_v34 = vpop.f32.mrf.mxu3  ;;  %v1319_v21 = vpop.f32.mrf.mxu2  ;;  %v3008_v59 = vor.u32 %v3231_v40, %v3007_v53 }
 0x1e8   : > { %v1199_v10 = vpop.f32.mrf.mxu0  ;;  %v3953_v1 = vadd.f32 %v1605_v34, %v1316_v49 }
 0x1e9   : > { %v1489_v47 = vadd.f32 %v1488_v43, %v1199_v10 }
 0x1ea   : > { %v2329_v37 = vpack.c.bf16 %v3953_v1, %v3953_v1 }
 0x1eb   : > { %v1748_v54 = vsel %vm1668_vm4, %v1489_v47, 0.0  ;;  %v1940_v56 = vmul.f32 %v1489_v47, %v1489_v47  ;;  %v2282_v57 = vpack.c.bf16 %v1489_v47, %v1489_v47  ;;  %1358 = vmatmul.bf16.gmra.mxu2 %v3000_v51 }
 0x1ec   : > { %v1749_v3 = vadd.f32 %v1748_v54, %v1747_v31  ;;  %2442 = vst.msk [vmem:[%s3416_s22 + $0x15c] sm:$0xf] %vm2354_vm3, %v2329_v37  ;;  %3117 = vmatmul.msk.bf16.gmra.mxu3 %vm914_vm2, %v3004_v18 }
 0x1ed   : > { %v2091_v12 = vsel %vm1668_vm4, %v1940_v56, 0.0  ;;  %2395 = vst.msk [vmem:[%s3416_s22 + $0xa0] sm:$0xf] %vm2354_vm3, %v2282_v57 }
 0x1ee   : > { %v1495_v43 = vpop.f32.mrf.mxu1  ;;  %v2092_v15 = vadd.f32 %v2091_v12, %v2090_v11  ;;  %v3009_v12 = vld [vmem:[%s3330_s5 + $0x358] sm:$0xf0] }
 0x1ef   : > { %v1608_v26 = vpop.f32.mrf.mxu3  ;;  %v1321_v49 = vpop.f32.mrf.mxu2 }
 0x1f0   : > { %v1201_v9 = vpop.f32.mrf.mxu0  ;;  %v3970_v10 = vadd.f32 %v1608_v26, %v1319_v21 }
 0x1f1   : > { %v1491_v20 = vadd.f32 %v1490_v13, %v1201_v9 }
 0x1f2   : > { %v2330_v45 = vpack.c.bf16 %v3970_v10, %v3970_v10 }
 0x1f3   : > { %v1750_v27 = vsel %vm1668_vm4, %v1491_v20, 0.0  ;;  %v1941_v28 = vmul.f32 %v1491_v20, %v1491_v20  ;;  %v2283_v30 = vpack.c.bf16 %v1491_v20, %v1491_v20 }
 0x1f4   : > { %v1751_v23 = vadd.f32 %v1750_v27, %v1749_v3  ;;  %2443 = vst.msk [vmem:[%s3416_s22 + $0x160] sm:$0xf] %vm2354_vm3, %v2330_v45  ;;  %v3230_v3 = vld [vmem:[%s3330_s5 + $0x354] sm:$0xf] }
 0x1f5   : > { %v2093_v31 = vsel %vm1668_vm4, %v1941_v28, 0.0  ;;  %2396 = vst.msk [vmem:[%s3416_s22 + $0xa4] sm:$0xf] %vm2354_vm3, %v2283_v30  ;;  %v3012_v9 = vor.u32 %v3230_v3, %v3009_v12  ;;  %v3232_v12 = vld [vmem:[%s3330_s5 + $0x364] sm:$0xf] }
 0x1f6   : > { %v1498_v32 = vpop.f32.mrf.mxu1  ;;  %v2094_v11 = vadd.f32 %v2093_v31, %v2092_v15 }
 0x1f7   : > { %v1610_v34 = vpop.f32.mrf.mxu3  ;;  %v1324_v26 = vpop.f32.mrf.mxu2 }
 0x1f8   : > { %v1204_v13 = vpop.f32.mrf.mxu0  ;;  %v3978_v2 = vadd.f32 %v1610_v34, %v1321_v49 }
 0x1f9   : > { %v1494_v47 = vadd.f32 %v1493_v35, %v1204_v13 }
 0x1fa   : > { %4547 = vst [vmem:[#allocation2_spill] sm:$0xff] %v3978_v2  ;;  %v2331_v15 = vpack.c.bf16 %v3978_v2, %v3978_v2 }
 0x1fb   : > { %v1752_v54 = vsel %vm1668_vm4, %v1494_v47, 0.0  ;;  %v1942_v56 = vmul.f32 %v1494_v47, %v1494_v47  ;;  %v2284_v57 = vpack.c.bf16 %v1494_v47, %v1494_v47  ;;  %1363 = vmatmul.bf16.gmra.mxu2 %v3008_v59  ;;  %v3233_v59 = vld [vmem:[%s3330_s5 + $0x364] sm:$0xf0] }
 0x1fc   : > { %v1753_v51 = vadd.f32 %v1752_v54, %v1751_v23  ;;  %2444 = vst.msk [vmem:[%s3416_s22 + $0x164] sm:$0xf] %vm2354_vm3, %v2331_v15  ;;  %3118 = vmatmul.msk.bf16.gmra.mxu3 %vm914_vm2, %v3012_v9 }
 0x1fd   : > { %v2095_v37 = vsel %vm1668_vm4, %v1942_v56, 0.0  ;;  %2397 = vst.msk [vmem:[%s3416_s22 + $0xa8] sm:$0xf] %vm2354_vm3, %v2284_v57  ;;  %v3015_v56 = vld [vmem:[%s3330_s5 + $0x360] sm:$0xf] }
 0x1fe   : > { %v1500_v35 = vpop.f32.mrf.mxu1  ;;  %v2096_v18 = vadd.f32 %v2095_v37, %v2094_v11  ;;  %v3016_v15 = vor.u32 %v3233_v59, %v3015_v56 }
 0x1ff   : > { %v1613_v27 = vpop.f32.mrf.mxu3  ;;  %v1326_v53 = vpop.f32.mrf.mxu2 }
 0x200   : > { %v1206_v20 = vpop.f32.mrf.mxu0  ;;  %v3995_v47 = vadd.f32 %v1613_v27, %v1324_v26 }
 0x201   : > { %v1496_v21 = vadd.f32 %v1495_v43, %v1206_v20 }
 0x202   : > { %4548 = vst [vmem:[#allocation3_spill] sm:$0xff] %v3995_v47  ;;  %v2332_v49 = vpack.c.bf16 %v3995_v47, %v3995_v47 }
 0x203   : > { %v1754_v28 = vsel %vm1668_vm4, %v1496_v21, 0.0  ;;  %v1943_v30 = vmul.f32 %v1496_v21, %v1496_v21  ;;  %v2285_v23 = vpack.c.bf16 %v1496_v21, %v1496_v21 }
 0x204   : > { %v1755_v31 = vadd.f32 %v1754_v28, %v1753_v51  ;;  %2445 = vst.msk [vmem:[%s3416_s22 + $0x168] sm:$0xf] %vm2354_vm3, %v2332_v49 }
 0x205   : > { %v2097_v13 = vsel %vm1668_vm4, %v1943_v30, 0.0  ;;  %2398 = vst.msk [vmem:[%s3416_s22 + $0xac] sm:$0xf] %vm2354_vm3, %v2285_v23 }
 0x206   : > { %v1503_v11 = vpop.f32.mrf.mxu1  ;;  %v2098_v45 = vadd.f32 %v2097_v13, %v2096_v18  ;;  %v3017_v18 = vld [vmem:[%s3330_s5 + $0x368] sm:$0xf0] }
 0x207   : > { %v1615_v54 = vpop.f32.mrf.mxu3  ;;  %v3020_v26 = vor.u32 %v3232_v12, %v3017_v18  ;;  %v1329_v30 = vpop.f32.mrf.mxu2  ;;  %v3025_v12 = vld [vmem:[%s3330_s5 + $0x378] sm:$0xf0] }
 0x208   : > { %v1209_v43 = vpop.f32.mrf.mxu0  ;;  %v4003_v51 = vadd.f32 %v1615_v54, %v1326_v53  ;;  %v3023_v54 = vld [vmem:[%s3330_s5 + $0x370] sm:$0xf] }
 0x209   : > { %v1499_v34 = vadd.f32 %v1498_v32, %v1209_v43 }
 0x20a   : > { %4549 = vst [vmem:[#allocation4_spill] sm:$0xff] %v4003_v51  ;;  %v2333_v20 = vpack.c.bf16 %v4003_v51, %v4003_v51 }
 0x20b   : > { %v1756_v57 = vsel %vm1668_vm4, %v1499_v34, 0.0  ;;  %v1944_v40 = vmul.f32 %v1499_v34, %v1499_v34  ;;  %v2286_v3 = vpack.c.bf16 %v1499_v34, %v1499_v34  ;;  %1368 = vmatmul.bf16.gmra.mxu2 %v3016_v15 }
 0x20c   : > { %v4007_v37 = vadd.f32 %v1756_v57, %v1755_v31  ;;  %2446 = vst.msk [vmem:[%s3416_s22 + $0x16c] sm:$0xf] %vm2354_vm3, %v2333_v20  ;;  %3119 = vmatmul.msk.bf16.gmra.mxu3 %vm914_vm2, %v3020_v26 }
 0x20d   : > { %v2099_v32 = vsel %vm1668_vm4, %v1944_v40, 0.0  ;;  %2399 = vst.msk [vmem:[%s3416_s22 + $0xb0] sm:$0xf] %vm2354_vm3, %v2286_v3  ;;  %v3235_v40 = vld [vmem:[%s3330_s5 + $0x374] sm:$0xf0] }
 0x20e   : > { %v1505_v9 = vpop.f32.mrf.mxu1  ;;  %v4015_v21 = vadd.f32 %v2099_v32, %v2098_v45  ;;  %v3234_v3 = vld [vmem:[%s3330_s5 + $0x374] sm:$0xf]  ;;  %v3024_v59 = vor.u32 %v3235_v40, %v3023_v54 }
 0x20f   : > { %v1618_v23 = vpop.f32.mrf.mxu3  ;;  %v1331_v34 = vpop.f32.mrf.mxu2  ;;  %v3028_v18 = vor.u32 %v3234_v3, %v3025_v12 }
 0x210   : > { %v1211_v27 = vpop.f32.mrf.mxu0  ;;  %v4026_v45 = vadd.f32 %v1618_v23, %v1329_v30 }
 0x211   : > { %v4020_v28 = vadd.f32 %v1500_v35, %v1211_v27 }
 0x212   : > { %4550 = vst [vmem:[#allocation5_spill] sm:$0xff] %v4026_v45  ;;  %v2334_v49 = vpack.c.bf16 %v4026_v45, %v4026_v45 }
 0x213   : > { %v2287_v31 = vpack.c.bf16 %v4020_v28, %v4020_v28 }
 0x214   : > { %2447 = vst.msk [vmem:[%s3416_s22 + $0x170] sm:$0xf] %vm2354_vm3, %v2334_v49 }
 0x215   : > { %2400 = vst.msk [vmem:[%s3416_s22 + $0xb4] sm:$0xf] %vm2354_vm3, %v2287_v31 }
 0x216   : > { %v1508_v13 = vpop.f32.mrf.mxu1 }
 0x217   : > { %v1620_v53 = vpop.f32.mrf.mxu3 }
 0x218   : > { %v1214_v43 = vpop.f32.mrf.mxu0  ;;  %v4037_v57 = vadd.f32 %v1620_v53, %v1331_v34 }
 0x219   : > { %v4030_v35 = vadd.f32 %v1503_v11, %v1214_v43 }
 0x21a   : > { %4551 = vst [vmem:[#allocation6_spill] sm:$0xff] %v4037_v57  ;;  %v2335_v11 = vpack.c.bf16 %v4037_v57, %v4037_v57 }
 0x21b   : > { %v2288_v56 = vpack.c.bf16 %v4030_v35, %v4030_v35  ;;  %1373 = vmatmul.bf16.gmra.mxu2 %v3024_v59 }
 0x21c   : > { %2448 = vst.msk [vmem:[%s3416_s22 + $0x174] sm:$0xf] %vm2354_vm3, %v2335_v11  ;;  %3120 = vmatmul.msk.bf16.gmra.mxu3 %vm914_vm2, %v3028_v18 }
 0x21d   : > { %2401 = vst.msk [vmem:[%s3416_s22 + $0xb8] sm:$0xf] %vm2354_vm3, %v2288_v56 }
 0x21e   : > { %v1510_v15 = vpop.f32.mrf.mxu1  ;;  %v1334_v26 = vpop.f32.mrf.mxu2 }
 0x21f   : > { %v1623_v30 = vpop.f32.mrf.mxu3 }
 0x220   : > { %v1216_v32 = vpop.f32.mrf.mxu0  ;;  %v4055_v31 = vadd.f32 %v1623_v30, %v1334_v26 }
 0x221   : > { %v4049_v20 = vadd.f32 %v1505_v9, %v1216_v32 }
 0x222   : > { %4552 = vst [vmem:[#allocation7_spill] sm:$0xff] %v4055_v31  ;;  %v2336_v49 = vpack.c.bf16 %v4055_v31, %v4055_v31 }
 0x223   : > { %v2289_v27 = vpack.c.bf16 %v4049_v20, %v4049_v20 }
 0x224   : > { %2449 = vst.msk [vmem:[%s3416_s22 + $0x178] sm:$0xf] %vm2354_vm3, %v2336_v49 }
 0x225   : > { %2402 = vst.msk [vmem:[%s3416_s22 + $0xbc] sm:$0xf] %vm2354_vm3, %v2289_v27 }
 0x226   : > { %v1513_v23 = vpop.f32.mrf.mxu1  ;;  %v1336_v9 = vpop.f32.mrf.mxu2 }
 0x227   : > { %v1625_v54 = vpop.f32.mrf.mxu3 }
 0x228   : > { %v1219_v43 = vpop.f32.mrf.mxu0  ;;  %v4065_v56 = vadd.f32 %v1625_v54, %v1336_v9 }
 0x229   : > { %v4059_v34 = vadd.f32 %v1508_v13, %v1219_v43 }
 0x22a   : > { %4553 = vst [vmem:[#allocation8_spill] sm:$0xff] %v4065_v56  ;;  %v2337_v3 = vpack.c.bf16 %v4065_v56, %v4065_v56 }
 0x22b   : > { %v2290_v53 = vpack.c.bf16 %v4059_v34, %v4059_v34 }
 0x22c   : > { %2450 = vst.msk [vmem:[%s3416_s22 + $0x17c] sm:$0xf] %vm2354_vm3, %v2337_v3 }
 0x22d   : > { %2403 = vst.msk [vmem:[%s3416_s22 + $0xc0] sm:$0xf] %vm2354_vm3, %v2290_v53 }
 0x22e   : > { %v1515_v40 = vpop.f32.mrf.mxu1  ;;  %v1339_v12 = vpop.f32.mrf.mxu2 }
 0x22f   : > { %v1628_v18 = vpop.f32.mrf.mxu3 }
 0x230   : > { %v1221_v59 = vpop.f32.mrf.mxu0  ;;  %v4079_v26 = vadd.f32 %v1628_v18, %v1339_v12 }
 0x231   : > { %v4073_v13 = vadd.f32 %v1510_v15, %v1221_v59 }
 0x232   : > { %4554 = vst [vmem:[#allocation9_spill] sm:$0xff] %v4079_v26  ;;  %v2338_v30 = vpack.c.bf16 %v4079_v26, %v4079_v26 }
 0x233   : > { %v2291_v11 = vpack.c.bf16 %v4073_v13, %v4073_v13 }
 0x234   : > { %2451 = vst.msk [vmem:[%s3416_s22 + $0x180] sm:$0xf] %vm2354_vm3, %v2338_v30 }
 0x235   : > { %2404 = vst.msk [vmem:[%s3416_s22 + $0xc4] sm:$0xf] %vm2354_vm3, %v2291_v11 }
 0x236   : > { %v1518_v32 = vpop.f32.mrf.mxu1  ;;  %v1341_v15 = vpop.f32.mrf.mxu2 }
 0x237   : > { %v1630_v9 = vpop.f32.mrf.mxu3 }
 0x238   : > { %v1224_v27 = vpop.f32.mrf.mxu0  ;;  %v4085_v53 = vadd.f32 %v1630_v9, %v1341_v15 }
 0x239   : > { %v1514_v43 = vadd.f32 %v1513_v23, %v1224_v27 }
 0x23a   : > { %4555 = vst [vmem:[#allocation10_spill] sm:$0xff] %v4085_v53  ;;  %v2339_v3 = vpack.c.bf16 %v4085_v53, %v4085_v53  ;;  %v1945_v53 = vmul.f32 %v4020_v28, %v4020_v28 }
 0x23b   : > { %v2292_v49 = vpack.c.bf16 %v1514_v43, %v1514_v43  ;;  %v1950_v47 = vmul.f32 %v1514_v43, %v1514_v43 }
 0x23c   : > { %2452 = vst.msk [vmem:[%s3416_s22 + $0x184] sm:$0xf] %vm2354_vm3, %v2339_v3 }
 0x23d   : > { %2405 = vst.msk [vmem:[%s3416_s22 + $0xc8] sm:$0xf] %vm2354_vm3, %v2292_v49 }
 0x23e   : > { %v1520_v54 = vpop.f32.mrf.mxu1  ;;  %v1344_v11 = vpop.f32.mrf.mxu2 }
 0x23f   : > { %v1633_v18 = vpop.f32.mrf.mxu3 }
 0x240   : > { %v1226_v59 = vpop.f32.mrf.mxu0  ;;  %v4095_v9 = vadd.f32 %v1633_v18, %v1344_v11  ;;  %v1760_v18 = vsel %vm1668_vm4, %v4030_v35, 0.0 }
 0x241   : > { %v1516_v12 = vadd.f32 %v1515_v40, %v1226_v59  ;;  %v1758_v59 = vsel %vm1668_vm4, %v4020_v28, 0.0 }
 0x242   : > { %4556 = vst [vmem:[#allocation11_spill] sm:$0xff] %v4095_v9  ;;  %v2340_v40 = vpack.c.bf16 %v4095_v9, %v4095_v9  ;;  %v1762_v9 = vsel %vm1668_vm4, %v4049_v20, 0.0 }
 0x243   : > { %v2293_v23 = vpack.c.bf16 %v1516_v12, %v1516_v12 }
 0x244   : > { %2453 = vst.msk [vmem:[%s3416_s22 + $0x188] sm:$0xf] %vm2354_vm3, %v2340_v40 }
 0x245   : > { %2406 = vst.msk [vmem:[%s3416_s22 + $0xcc] sm:$0xf] %vm2354_vm3, %v2293_v23  ;;  %v2101_v23 = vsel %vm1668_vm4, %v1945_v53, 0.0  ;;  %v1948_v53 = vmul.f32 %v4059_v34, %v4059_v34 }
 0x246   : > { %v1523_v27 = vpop.f32.mrf.mxu1  ;;  %v1346_v49 = vpop.f32.mrf.mxu2 }
 0x247   : > { %v1635_v56 = vpop.f32.mrf.mxu3 }
 0x248   : > { %v1229_v30 = vpop.f32.mrf.mxu0  ;;  %v4101_v3 = vadd.f32 %v1635_v56, %v1346_v49  ;;  %v1947_v56 = vmul.f32 %v4049_v20, %v4049_v20 }
 0x249   : > { %v1519_v15 = vadd.f32 %v1518_v32, %v1229_v30  ;;  %v1946_v32 = vmul.f32 %v4030_v35, %v4030_v35  ;;  %v1759_v30 = vadd.f32 %v1758_v59, %v4007_v37  ;;  %v2102_v35 = vadd.f32 %v2101_v23, %v4015_v21 }
 0x24a   : > { %4557 = vst [vmem:[#allocation12_spill] sm:$0xff] %v4101_v3  ;;  %v2341_v28 = vpack.c.bf16 %v4101_v3, %v4101_v3  ;;  %v2105_v3 = vsel %vm1668_vm4, %v1947_v56, 0.0  ;;  %v1764_v37 = vsel %vm1668_vm4, %v4059_v34, 0.0  ;;  %v1949_v59 = vmul.f32 %v4073_v13, %v4073_v13 }
 0x24b   : > { %v2294_v26 = vpack.c.bf16 %v1519_v15, %v1519_v15  ;;  %v1761_v31 = vadd.f32 %v1760_v18, %v1759_v30  ;;  %v1766_v21 = vsel %vm1668_vm4, %v4073_v13, 0.0  ;;  %v1768_v30 = vsel %vm1668_vm4, %v1514_v43, 0.0 }
 0x24c   : > { %2454 = vst.msk [vmem:[%s3416_s22 + $0x18c] sm:$0xf] %vm2354_vm3, %v2341_v28  ;;  %v2109_v28 = vsel %vm1668_vm4, %v1949_v59, 0.0  ;;  %v1770_v13 = vsel %vm1668_vm4, %v1516_v12, 0.0 }
 0x24d   : > { %2407 = vst.msk [vmem:[%s3416_s22 + $0xd0] sm:$0xf] %vm2354_vm3, %v2294_v26  ;;  %v2103_v26 = vsel %vm1668_vm4, %v1946_v32, 0.0  ;;  %v1763_v51 = vadd.f32 %v1762_v9, %v1761_v31 }
 0x24e   : > { %v4109_v11 = vpop.f32.mrf.mxu1  ;;  %v1349_v57 = vpop.f32.mrf.mxu2  ;;  %v2104_v45 = vadd.f32 %v2103_v26, %v2102_v35  ;;  %v2111_v26 = vsel %vm1668_vm4, %v1950_v47, 0.0 }
 0x24f   : > { %v1638_v32 = vpop.f32.mrf.mxu3  ;;  %v1765_v56 = vadd.f32 %v1764_v37, %v1763_v51  ;;  %v1772_v37 = vsel %vm1668_vm4, %v1519_v15, 0.0 }
 0x250   : > { %v1231_v49 = vpop.f32.mrf.mxu0  ;;  %v2106_v18 = vadd.f32 %v2105_v3, %v2104_v45  ;;  %v4144_v45 = vadd.f32 %v1638_v32, %v1349_v57 }
 0x251   : > { %v1521_v40 = vadd.f32 %v1520_v54, %v1231_v49  ;;  %v2107_v54 = vsel %vm1668_vm4, %v1948_v53, 0.0  ;;  %v1951_v49 = vmul.f32 %v1516_v12, %v1516_v12  ;;  %v1767_v9 = vadd.f32 %v1766_v21, %v1765_v56 }
 0x252   : > { %v2108_v31 = vadd.f32 %v2107_v54, %v2106_v18  ;;  %v2342_v57 = vpack.c.bf16 %v4144_v45, %v4144_v45 }
 0x253   : > { %v2295_v20 = vpack.c.bf16 %v1521_v40, %v1521_v40  ;;  %v2113_v43 = vsel %vm1668_vm4, %v1951_v49, 0.0  ;;  %v1953_v47 = vmul.f32 %v1521_v40, %v1521_v40 }
 0x254   : > { %v2110_v51 = vadd.f32 %v2109_v28, %v2108_v31  ;;  %2455 = vst.msk [vmem:[%s3416_s22 + $0x190] sm:$0xf] %vm2354_vm3, %v2342_v57 }
 0x255   : > { %2408 = vst.msk [vmem:[%s3416_s22 + $0xd4] sm:$0xf] %vm2354_vm3, %v2295_v20  ;;  %v1952_v20 = vmul.f32 %v1519_v15, %v1519_v15  ;;  %v2117_v49 = vsel %vm1668_vm4, %v1953_v47, 0.0 }
 0x256   : > { %v1528_v23 = vpop.f32.mrf.mxu1  ;;  %v1351_v3 = vpop.f32.mrf.mxu2  ;;  %v2112_v21 = vadd.f32 %v2111_v26, %v2110_v51 }
 0x257   : > { %v1529_v34 = vadd.f32 %v1528_v23, %v3499_v39  ;;  %v1769_v39 = vadd.f32 %v1768_v30, %v1767_v9  ;;  %v1640_v54 = vpop.f32.mrf.mxu3  ;;  %v2115_v32 = vsel %vm1668_vm4, %v1952_v20, 0.0  ;;  %v1774_v23 = vsel %vm1668_vm4, %v1521_v40, 0.0 }
 0x258   : > { %v1234_v35 = vpop.f32.mrf.mxu0  ;;  %v2114_v56 = vadd.f32 %v2113_v43, %v2112_v21 }
 0x259   : > { %v2298_v53 = vpack.c.bf16 %v1529_v34, %v1529_v34  ;;  %v1524_v2 = vadd.f32 %v1523_v27, %v1234_v35  ;;  %v1771_v12 = vadd.f32 %v1770_v13, %v1769_v39  ;;  %v4152_v27 = vadd.f32 %v1640_v54, %v1351_v3 }
 0x25a   : > { %v2116_v40 = vadd.f32 %v2115_v32, %v2114_v56  ;;  %v1780_v21 = vsel %vm1668_vm4, %v1529_v34, 0.0 }
 0x25b   : > { %2411 = vst.msk [vmem:[%s3416_s22 + $0xe0] sm:$0xf] %vm2354_vm3, %v2298_v53  ;;  %v2296_v59 = vpack.c.bf16 %v1524_v2, %v1524_v2  ;;  %v1954_v18 = vmul.f32 %v1524_v2, %v1524_v2  ;;  %v1773_v28 = vadd.f32 %v1772_v37, %v1771_v12  ;;  %v1776_v31 = vsel %vm1668_vm4, %v1524_v2, 0.0 }
 0x25c   : > { %v2343_v9 = vpack.c.bf16 %v4152_v27, %v4152_v27  ;;  %v1956_v2 = vmul.f32 %v1529_v34, %v1529_v34  ;;  %v1959_v34 = vmul.f32 %v3536_v29, %v3536_v29 }
 0x25d   : > { %2409 = vst.msk [vmem:[%s3416_s22 + $0xd8] sm:$0xf] %vm2354_vm3, %v2296_v59  ;;  %v1775_v26 = vadd.f32 %v1774_v23, %v1773_v28  ;;  %v2119_v13 = vsel %vm1668_vm4, %v1954_v18, 0.0  ;;  %v1958_v23 = vmul.f32 %v3529_v22, %v3529_v22 }
 0x25e   : > { %v1530_v15 = vpop.f32.mrf.mxu1  ;;  %2456 = vst.msk [vmem:[%s3416_s22 + $0x194] sm:$0xf] %vm2354_vm3, %v2343_v9  ;;  %v1354_v39 = vpop.f32.mrf.mxu2  ;;  %v2123_v18 = vsel %vm1668_vm4, %v1956_v2, 0.0 }
 0x25f   : > { %v1531_v30 = vadd.f32 %v1530_v15, %v3510_v55  ;;  %v2118_v55 = vadd.f32 %v2117_v49, %v2116_v40  ;;  %v1777_v51 = vadd.f32 %v1776_v31, %v1775_v26  ;;  %v1643_v47 = vpop.f32.mrf.mxu3  ;;  %v1784_v49 = vsel %vm1668_vm4, %v3529_v22, 0.0 }
 0x260   : > { %v1236_v35 = vpop.f32.mrf.mxu0  ;;  %v4185_v9 = vadd.f32 %v1643_v47, %v1354_v39  ;;  %v2129_v39 = vsel %vm1668_vm4, %v1959_v34, 0.0 }
 0x261   : > { %v2299_v53 = vpack.c.bf16 %v1531_v30, %v1531_v30  ;;  %v1526_v20 = vadd.f32 %v4109_v11, %v1236_v35  ;;  %v2120_v59 = vadd.f32 %v2119_v13, %v2118_v55  ;;  %v1957_v12 = vmul.f32 %v1531_v30, %v1531_v30 }
 0x262   : > { %v1782_v15 = vsel %vm1668_vm4, %v1531_v30, 0.0  ;;  %v2127_v35 = vsel %vm1668_vm4, %v1958_v23, 0.0  ;;  %v1786_v30 = vsel %vm1668_vm4, %v3536_v29, 0.0  ;;  %v1960_v13 = vmul.f32 %v3559_v62, %v3559_v62 }
 0x263   : > { %2412 = vst.msk [vmem:[%s3416_s22 + $0xe4] sm:$0xf] %vm2354_vm3, %v2299_v53  ;;  %v1778_v3 = vsel %vm1668_vm4, %v1526_v20, 0.0  ;;  %v1955_v43 = vmul.f32 %v1526_v20, %v1526_v20  ;;  %v2297_v37 = vpack.c.bf16 %v1526_v20, %v1526_v20  ;;  %v2125_v31 = vsel %vm1668_vm4, %v1957_v12, 0.0 }
 0x264   : > { %v1779_v54 = vadd.f32 %v1778_v3, %v1777_v51  ;;  %v2344_v22 = vpack.c.bf16 %v4185_v9, %v4185_v9  ;;  %v1788_v3 = vsel %vm1668_vm4, %v3559_v62, 0.0  ;;  %v1961_v29 = vmul.f32 %v3566_v5, %v3566_v5 }
 0x265   : > { %v2121_v11 = vsel %vm1668_vm4, %v1955_v43, 0.0  ;;  %2410 = vst.msk [vmem:[%s3416_s22 + $0xdc] sm:$0xf] %vm2354_vm3, %v2297_v37  ;;  %v2131_v47 = vsel %vm1668_vm4, %v1960_v13, 0.0  ;;  %v1966_v13 = vmul.f32 %v3649_v58, %v3649_v58 }
 0x266   : > { %v1781_v57 = vadd.f32 %v1780_v21, %v1779_v54  ;;  %v2122_v32 = vadd.f32 %v2121_v11, %v2120_v59  ;;  %v1356_v53 = vpop.f32.mrf.mxu2  ;;  %2457 = vst.msk [vmem:[%s3416_s22 + $0x198] sm:$0xf] %vm2354_vm3, %v2344_v22  ;;  %v1790_v59 = vsel %vm1668_vm4, %v3566_v5, 0.0  ;;  %v1962_v54 = vmul.f32 %v3589_v38, %v3589_v38 }
 0x267   : > { %v1645_v20 = vpop.f32.mrf.mxu3  ;;  %v2133_v11 = vsel %vm1668_vm4, %v1961_v29, 0.0 }
 0x268   : > { %v1783_v56 = vadd.f32 %v1782_v15, %v1781_v57  ;;  %v2124_v28 = vadd.f32 %v2123_v18, %v2122_v32  ;;  %v4194_v2 = vadd.f32 %v1645_v20, %v1356_v53  ;;  %v1792_v57 = vsel %vm1668_vm4, %v3589_v38, 0.0 }
 0x269   : > { %v1963_v32 = vmul.f32 %v3596_v46, %v3596_v46  ;;  %v2135_v15 = vsel %vm1668_vm4, %v1962_v54, 0.0 }
 0x26a   : > { %v1785_v40 = vadd.f32 %v1784_v49, %v1783_v56  ;;  %v2126_v26 = vadd.f32 %v2125_v31, %v2124_v28  ;;  %v2345_v21 = vpack.c.bf16 %v4194_v2, %v4194_v2  ;;  %v1794_v56 = vsel %vm1668_vm4, %v3596_v46, 0.0 }
 0x26b   : > { %v1964_v28 = vmul.f32 %v3619_v16, %v3619_v16  ;;  %v2137_v38 = vsel %vm1668_vm4, %v1963_v32, 0.0  ;;  %v1798_v46 = vsel %vm1668_vm4, %v3626_v24, 0.0 }
 0x26c   : > { %v1787_v55 = vadd.f32 %v1786_v30, %v1785_v40  ;;  %v2128_v51 = vadd.f32 %v2127_v35, %v2126_v26  ;;  %2458 = vst.msk [vmem:[%s3416_s22 + $0x19c] sm:$0xf] %vm2354_vm3, %v2345_v21  ;;  %v1796_v40 = vsel %vm1668_vm4, %v3619_v16, 0.0  ;;  %v1965_v26 = vmul.f32 %v3626_v24, %v3626_v24 }
 0x26d   : > { %v2139_v30 = vsel %vm1668_vm4, %v1964_v28, 0.0  ;;  %v1800_v16 = vsel %vm1668_vm4, %v3649_v58, 0.0  ;;  %v2143_v24 = vsel %vm1668_vm4, %v1966_v13, 0.0  ;;  %v1812_v13 = vsel %vm1668_vm4, %v3739_v0, 0.0 }
 0x26e   : > { %v1789_v43 = vadd.f32 %v1788_v3, %v1787_v55  ;;  %v2130_v37 = vadd.f32 %v2129_v39, %v2128_v51  ;;  %v1359_v18 = vpop.f32.mrf.mxu2  ;;  %v2141_v55 = vsel %vm1668_vm4, %v1965_v26, 0.0  ;;  %v1967_v51 = vmul.f32 %v3656_v4, %v3656_v4 }
 0x26f   : > { %v1648_v49 = vpop.f32.mrf.mxu3  ;;  %v1810_v26 = vsel %vm1668_vm4, %v3716_v33, 0.0 }
 0x270   : > { %v1791_v12 = vadd.f32 %v1790_v59, %v1789_v43  ;;  %v2132_v62 = vadd.f32 %v2131_v47, %v2130_v37  ;;  %v4237_v39 = vadd.f32 %v1648_v49, %v1359_v18  ;;  %v1802_v37 = vsel %vm1668_vm4, %v3656_v4, 0.0 }
 0x271   : > { %v1968_v47 = vmul.f32 %v3679_v36, %v3679_v36  ;;  %v1969_v4 = vmul.f32 %v3686_v50, %v3686_v50  ;;  %v1970_v18 = vmul.f32 %v3709_v17, %v3709_v17  ;;  %v1808_v49 = vsel %vm1668_vm4, %v3709_v17, 0.0 }
 0x272   : > { %v1793_v23 = vadd.f32 %v1792_v57, %v1791_v12  ;;  %v2134_v5 = vadd.f32 %v2133_v11, %v2132_v62  ;;  %v2346_v58 = vpack.c.bf16 %v4237_v39, %v4237_v39  ;;  %v2145_v62 = vsel %vm1668_vm4, %v1967_v51, 0.0 }
 0x273   : > { %v1804_v11 = vsel %vm1668_vm4, %v3679_v36, 0.0  ;;  %v2149_v28 = vsel %vm1668_vm4, %v1969_v4, 0.0  ;;  %v1974_v51 = vmul.f32 %v3769_v48, %v3769_v48 }
 0x274   : > { %v1795_v34 = vadd.f32 %v1794_v56, %v1793_v23  ;;  %v2136_v31 = vadd.f32 %v2135_v15, %v2134_v5  ;;  %2459 = vst.msk [vmem:[%s3416_s22 + $0x1a0] sm:$0xf] %vm2354_vm3, %v2346_v58  ;;  %v2147_v23 = vsel %vm1668_vm4, %v1968_v47, 0.0  ;;  %v1806_v5 = vsel %vm1668_vm4, %v3686_v50, 0.0 }
 0x276   : > { %v1797_v53 = vadd.f32 %v1796_v40, %v1795_v34  ;;  %v2138_v35 = vadd.f32 %v2137_v38, %v2136_v31  ;;  %v1361_v43 = vpop.f32.mrf.mxu2  ;;  %v1971_v34 = vmul.f32 %v3716_v33, %v3716_v33  ;;  %v2151_v40 = vsel %vm1668_vm4, %v1970_v18, 0.0 }
 0x277   : > { %v1650_v59 = vpop.f32.mrf.mxu3  ;;  %v1814_v33 = vsel %vm1668_vm4, %v3746_v19, 0.0 }
 0x278   : > { %v1799_v22 = vadd.f32 %v1798_v46, %v1797_v53  ;;  %v2140_v20 = vadd.f32 %v2139_v30, %v2138_v35  ;;  %v4246_v12 = vadd.f32 %v1650_v59, %v1361_v43  ;;  %v1972_v53 = vmul.f32 %v3739_v0, %v3739_v0 }
 0x279   : > { %v2153_v17 = vsel %vm1668_vm4, %v1971_v34, 0.0  ;;  %v1816_v0 = vsel %vm1668_vm4, %v3769_v48, 0.0 }
 0x27a   : > { %v1801_v3 = vadd.f32 %v1800_v16, %v1799_v22  ;;  %v2142_v29 = vadd.f32 %v2141_v55, %v2140_v20  ;;  %v2347_v15 = vpack.c.bf16 %v4246_v12, %v4246_v12  ;;  %v1973_v22 = vmul.f32 %v3746_v19, %v3746_v19 }
 0x27b   : > { %v2155_v16 = vsel %vm1668_vm4, %v1972_v53, 0.0  ;;  %v2159_v19 = vsel %vm1668_vm4, %v1974_v51, 0.0  ;;  %v1826_v53 = vsel %vm1668_vm4, %v3838_v63, 0.0 }
 0x27c   : > { %v1803_v54 = vadd.f32 %v1802_v37, %v1801_v3  ;;  %v2144_v21 = vadd.f32 %v2143_v24, %v2142_v29  ;;  %2460 = vst.msk [vmem:[%s3416_s22 + $0x1a4] sm:$0xf] %vm2354_vm3, %v2347_v15  ;;  %v2157_v43 = vsel %vm1668_vm4, %v1973_v22, 0.0  ;;  %v1975_v24 = vmul.f32 %v3776_v8, %v3776_v8 }
 0x27d   : > { %v1981_v22 = vmul.f32 %v3868_v60, %v3868_v60 }
 0x27e   : > { %v1805_v57 = vadd.f32 %v1804_v11, %v1803_v54  ;;  %v2146_v32 = vadd.f32 %v2145_v62, %v2144_v21  ;;  %v1364_v38 = vpop.f32.mrf.mxu2  ;;  %v1818_v54 = vsel %vm1668_vm4, %v3776_v8, 0.0  ;;  %v1976_v21 = vmul.f32 %v3799_v52, %v3799_v52 }
 0x27f   : > { %v1653_v35 = vpop.f32.mrf.mxu3  ;;  %v1977_v8 = vmul.f32 %v3808_v6, %v3808_v6 }
 0x280   : > { %v1807_v56 = vadd.f32 %v1806_v5, %v1805_v57  ;;  %v2148_v36 = vadd.f32 %v2147_v23, %v2146_v32  ;;  %v4289_v37 = vadd.f32 %v1653_v35, %v1364_v38  ;;  %v2161_v32 = vsel %vm1668_vm4, %v1975_v24, 0.0 }
 0x281   : > { %v1820_v23 = vsel %vm1668_vm4, %v3799_v52, 0.0  ;;  %v2163_v15 = vsel %vm1668_vm4, %v1976_v21, 0.0  ;;  %v2165_v34 = vsel %vm1668_vm4, %v1977_v8, 0.0  ;;  %v1980_v35 = vmul.f32 %v3859_v42, %v3859_v42 }
 0x282   : > { %v1809_v31 = vadd.f32 %v1808_v49, %v1807_v56  ;;  %v2150_v50 = vadd.f32 %v2149_v28, %v2148_v36  ;;  %v2348_v48 = vpack.c.bf16 %v4289_v37, %v4289_v37  ;;  %v1822_v56 = vsel %vm1668_vm4, %v3808_v6, 0.0 }
 0x283   : > { %v1978_v36 = vmul.f32 %v3829_v41, %v3829_v41 }
 0x284   : > { %v1811_v30 = vadd.f32 %v1810_v26, %v1809_v31  ;;  %v2152_v46 = vadd.f32 %v2151_v40, %v2150_v50  ;;  %2461 = vst.msk [vmem:[%s3416_s22 + $0x1a8] sm:$0xf] %vm2354_vm3, %v2348_v48  ;;  %v1824_v31 = vsel %vm1668_vm4, %v3829_v41, 0.0  ;;  %v1979_v50 = vmul.f32 %v3838_v63, %v3838_v63 }
 0x285   : > { %v2167_v26 = vsel %vm1668_vm4, %v1978_v36, 0.0  ;;  %v1830_v63 = vsel %vm1668_vm4, %v3868_v60, 0.0 }
 0x286   : > { %v1813_v20 = vadd.f32 %v1812_v13, %v1811_v30  ;;  %v2154_v55 = vadd.f32 %v2153_v17, %v2152_v46  ;;  %v1366_v59 = vpop.f32.mrf.mxu2  ;;  %v2169_v41 = vsel %vm1668_vm4, %v1979_v50, 0.0  ;;  %v1828_v13 = vsel %vm1668_vm4, %v3859_v42, 0.0 }
 0x287   : > { %v1655_v62 = vpop.f32.mrf.mxu3  ;;  %v1832_v42 = vsel %vm1668_vm4, %v3889_v14, 0.0  ;;  %v1842_v50 = vsel %vm1668_vm4, %v3953_v1, 0.0 }
 0x288   : > { %v1815_v3 = vadd.f32 %v1814_v33, %v1813_v20  ;;  %v2156_v29 = vadd.f32 %v2155_v16, %v2154_v55  ;;  %v4298_v57 = vadd.f32 %v1655_v62, %v1366_v59  ;;  %v2171_v16 = vsel %vm1668_vm4, %v1980_v35, 0.0  ;;  %v4558_v35 = vld [vmem:[#allocation2_spill] sm:$0xff] }
 0x289   : > { %v1982_v33 = vmul.f32 %v3889_v14, %v3889_v14  ;;  %v1834_v59 = vsel %vm1668_vm4, %v3898_v61, 0.0 }
 0x28a   : > { %v1817_v47 = vadd.f32 %v1816_v0, %v1815_v3  ;;  %v2158_v58 = vadd.f32 %v2157_v43, %v2156_v29  ;;  %v2349_v28 = vpack.c.bf16 %v4298_v57, %v4298_v57  ;;  %v2173_v29 = vsel %vm1668_vm4, %v1981_v22, 0.0 }
 0x28b   : > { %v1983_v43 = vmul.f32 %v3898_v61, %v3898_v61  ;;  %v2175_v60 = vsel %vm1668_vm4, %v1982_v33, 0.0  ;;  %v1985_v61 = vmul.f32 %v3928_v44, %v3928_v44 }
 0x28c   : > { %v1819_v11 = vadd.f32 %v1818_v54, %v1817_v47  ;;  %v2160_v4 = vadd.f32 %v2159_v19, %v2158_v58  ;;  %2462 = vst.msk [vmem:[%s3416_s22 + $0x1ac] sm:$0xf] %vm2354_vm3, %v2349_v28  ;;  %v1984_v19 = vmul.f32 %v3919_v25, %v3919_v25  ;;  %v1840_v28 = vsel %vm1668_vm4, %v3945_v7, 0.0 }
 0x28d   : > { %v2181_v36 = vsel %vm1668_vm4, %v1985_v61, 0.0 }
 0x28e   : > { %v1821_v5 = vadd.f32 %v1820_v23, %v1819_v11  ;;  %v2162_v18 = vadd.f32 %v2161_v32, %v2160_v4  ;;  %v1369_v40 = vpop.f32.mrf.mxu2  ;;  %v2177_v11 = vsel %vm1668_vm4, %v1983_v43, 0.0  ;;  %v1836_v4 = vsel %vm1668_vm4, %v3919_v25, 0.0 }
 0x28f   : > { %v1658_v30 = vpop.f32.mrf.mxu3  ;;  %v2179_v8 = vsel %vm1668_vm4, %v1984_v19, 0.0 }
 0x290   : > { %v2164_v49 = vadd.f32 %v2163_v15, %v2162_v18  ;;  %v1823_v52 = vadd.f32 %v1822_v56, %v1821_v5  ;;  %v4341_v0 = vadd.f32 %v1658_v30, %v1369_v40  ;;  %v1838_v5 = vsel %vm1668_vm4, %v3928_v44, 0.0 }
 0x291   : > { %v1986_v18 = vmul.f32 %v3945_v7, %v3945_v7  ;;  %v1989_v30 = vmul.f32 %v4558_v35, %v4558_v35 }
 0x292   : > { %v1825_v38 = vadd.f32 %v1824_v31, %v1823_v52  ;;  %v2166_v6 = vadd.f32 %v2165_v34, %v2164_v49  ;;  %v2350_v14 = vpack.c.bf16 %v4341_v0, %v4341_v0  ;;  %v1987_v49 = vmul.f32 %v3953_v1, %v3953_v1 }
 0x293   : > { %v2183_v31 = vsel %vm1668_vm4, %v1986_v18, 0.0  ;;  %v1846_v1 = vsel %vm1668_vm4, %v4558_v35, 0.0  ;;  %v4566_v35 = vld [vmem:[#allocation10_spill] sm:$0xff] }
 0x294   : > { %v1827_v46 = vadd.f32 %v1826_v53, %v1825_v38  ;;  %v2168_v17 = vadd.f32 %v2167_v26, %v2166_v6  ;;  %2463 = vst.msk [vmem:[%s3416_s22 + $0x1b0] sm:$0xf] %vm2354_vm3, %v2350_v14  ;;  %v1988_v38 = vmul.f32 %v3970_v10, %v3970_v10  ;;  %v2185_v7 = vsel %vm1668_vm4, %v1987_v49, 0.0  ;;  %v4564_v49 = vld [vmem:[#allocation8_spill] sm:$0xff] }
 0x295   : > { %v1844_v53 = vsel %vm1668_vm4, %v3970_v10, 0.0 }
 0x296   : > { %v1829_v20 = vadd.f32 %v1828_v13, %v1827_v46  ;;  %v2170_v55 = vadd.f32 %v2169_v41, %v2168_v17  ;;  %v1371_v58 = vpop.f32.mrf.mxu2  ;;  %v2187_v41 = vsel %vm1668_vm4, %v1988_v38, 0.0  ;;  %v4559_v13 = vld [vmem:[#allocation3_spill] sm:$0xff]  ;;  %v4565_v38 = vld [vmem:[#allocation9_spill] sm:$0xff] }
 0x297   : > { %v1660_v54 = vpop.f32.mrf.mxu3  ;;  %v1990_v22 = vmul.f32 %v4559_v13, %v4559_v13  ;;  %v1848_v10 = vsel %vm1668_vm4, %v4559_v13, 0.0  ;;  %v4567_v13 = vld [vmem:[#allocation11_spill] sm:$0xff] }
 0x298   : > { %v1831_v51 = vadd.f32 %v1830_v63, %v1829_v20  ;;  %v2172_v3 = vadd.f32 %v2171_v16, %v2170_v55  ;;  %v4350_v62 = vadd.f32 %v1660_v54, %v1371_v58  ;;  %v2189_v16 = vsel %vm1668_vm4, %v1989_v30, 0.0  ;;  %v4560_v63 = vld [vmem:[#allocation4_spill] sm:$0xff] }
 0x299   : > { %v1991_v33 = vmul.f32 %v4560_v63, %v4560_v63  ;;  %v2191_v43 = vsel %vm1668_vm4, %v1990_v22, 0.0  ;;  %v1997_v30 = vmul.f32 %v4566_v35, %v4566_v35  ;;  %v1998_v22 = vmul.f32 %v4567_v13, %v4567_v13 }
 0x29a   : > { %v1833_v24 = vadd.f32 %v1832_v42, %v1831_v51  ;;  %v2174_v47 = vadd.f32 %v2173_v29, %v2172_v3  ;;  %v2351_v15 = vpack.c.bf16 %v4350_v62, %v4350_v62 }
 0x29c   : > { %v1835_v21 = vadd.f32 %v1834_v59, %v1833_v24  ;;  %v2176_v48 = vadd.f32 %v2175_v60, %v2174_v47  ;;  %2464 = vst.msk [vmem:[%s3416_s22 + $0x1b4] sm:$0xf] %vm2354_vm3, %v2351_v15  ;;  %v1850_v24 = vsel %vm1668_vm4, %v4560_v63, 0.0  ;;  %v4561_v47 = vld [vmem:[#allocation5_spill] sm:$0xff]  ;;  %v4568_v63 = vld [vmem:[#allocation12_spill] sm:$0xff] }
 0x29d   : > { %v1992_v58 = vmul.f32 %v4561_v47, %v4561_v47 }
 0x29e   : > { %v1837_v32 = vadd.f32 %v1836_v4, %v1835_v21  ;;  %v2178_v23 = vadd.f32 %v2177_v11, %v2176_v48  ;;  %v1374_v34 = vpop.f32.mrf.mxu2  ;;  %v2193_v21 = vsel %vm1668_vm4, %v1991_v33, 0.0  ;;  %v1852_v48 = vsel %vm1668_vm4, %v4561_v47, 0.0  ;;  %v4562_v11 = vld [vmem:[#allocation6_spill] sm:$0xff] }
 0x29f   : > { %v1663_v6 = vpop.f32.mrf.mxu3  ;;  %v1993_v4 = vmul.f32 %v4562_v11, %v4562_v11  ;;  %v1999_v33 = vmul.f32 %v4568_v63, %v4568_v63 }
 0x2a0   : > { %v1839_v56 = vadd.f32 %v1838_v5, %v1837_v32  ;;  %v2180_v25 = vadd.f32 %v2179_v8, %v2178_v23  ;;  %v4393_v51 = vadd.f32 %v1663_v6, %v1374_v34  ;;  %v2195_v23 = vsel %vm1668_vm4, %v1992_v58, 0.0  ;;  %v4563_v5 = vld [vmem:[#allocation7_spill] sm:$0xff] }
 0x2a1   : > { %v1854_v8 = vsel %vm1668_vm4, %v4562_v11, 0.0  ;;  %v1994_v18 = vmul.f32 %v4563_v5, %v4563_v5  ;;  %v1996_v6 = vmul.f32 %v4565_v38, %v4565_v38  ;;  %v1870_v11 = vsel %vm1668_vm4, %v4152_v27, 0.0 }
 0x2a2   : > { %v1841_v52 = vadd.f32 %v1840_v28, %v1839_v56  ;;  %v2182_v44 = vadd.f32 %v2181_v36, %v2180_v25  ;;  %v2352_v60 = vpack.c.bf16 %v4393_v51, %v4393_v51  ;;  %v2197_v36 = vsel %vm1668_vm4, %v1993_v4, 0.0 }
 0x2a3   : > { %v1856_v28 = vsel %vm1668_vm4, %v4563_v5, 0.0  ;;  %v2002_v4 = vmul.f32 %v4185_v9, %v4185_v9 }
 0x2a4   : > { %v1843_v40 = vadd.f32 %v1842_v50, %v1841_v52  ;;  %v2184_v26 = vadd.f32 %v2183_v31, %v2182_v44  ;;  %2465 = vst.msk [vmem:[%s3416_s22 + $0x1b8] sm:$0xf] %vm2354_vm3, %v2352_v60  ;;  %v1995_v52 = vmul.f32 %v4564_v49, %v4564_v49  ;;  %v2199_v31 = vsel %vm1668_vm4, %v1994_v18, 0.0 }
 0x2a5   : > { %v1858_v50 = vsel %vm1668_vm4, %v4564_v49, 0.0  ;;  %v2209_v60 = vsel %vm1668_vm4, %v1999_v33, 0.0  ;;  %v2005_v49 = vmul.f32 %v4246_v12, %v4246_v12 }
 0x2a6   : > { %v1845_v46 = vadd.f32 %v1844_v53, %v1843_v40  ;;  %v2186_v17 = vadd.f32 %v2185_v7, %v2184_v26  ;;  %v1376_v42 = vpop.f32.mrf.mxu2  ;;  %v2201_v7 = vsel %vm1668_vm4, %v1995_v52, 0.0  ;;  %v1860_v53 = vsel %vm1668_vm4, %v4565_v38, 0.0 }
 0x2a7   : > { %v1665_v59 = vpop.f32.mrf.mxu3 }
 0x2a8   : > { %v1847_v20 = vadd.f32 %v1846_v1, %v1845_v46  ;;  %v2188_v55 = vadd.f32 %v2187_v41, %v2186_v17  ;;  %v4402_v54 = vadd.f32 %v1665_v59, %v1376_v42  ;;  %v2203_v41 = vsel %vm1668_vm4, %v1996_v6, 0.0 }
 0x2a9   : > { %v1862_v1 = vsel %vm1668_vm4, %v4566_v35, 0.0  ;;  %v2207_v42 = vsel %vm1668_vm4, %v1998_v22, 0.0  ;;  %v1868_v59 = vsel %vm1668_vm4, %v4144_v45, 0.0  ;;  %v2221_v6 = vsel %vm1668_vm4, %v2005_v49, 0.0 }
 0x2aa   : > { %v1849_v3 = vadd.f32 %v1848_v10, %v1847_v20  ;;  %v2190_v29 = vadd.f32 %v2189_v16, %v2188_v55  ;;  %v2353_v15 = vpack.c.bf16 %v4402_v54, %v4402_v54  ;;  %v2205_v16 = vsel %vm1668_vm4, %v1997_v30, 0.0 }
 0x2ab   : > { %v1864_v10 = vsel %vm1668_vm4, %v4567_v13, 0.0  ;;  %v2008_v35 = vmul.f32 %v4341_v0, %v4341_v0 }
 0x2ac   : > { %v1851_v19 = vadd.f32 %v1850_v24, %v1849_v3  ;;  %v2192_v14 = vadd.f32 %v2191_v43, %v2190_v29  ;;  %2466 = vst.msk [vmem:[%s3416_s22 + $0x1bc] sm:$0xf] %vm2354_vm3, %v2353_v15  ;;  %v1866_v43 = vsel %vm1668_vm4, %v4568_v63, 0.0  ;;  %v2000_v24 = vmul.f32 %v4144_v45, %v4144_v45 }
 0x2ad   : > { %v1872_v45 = vsel %vm1668_vm4, %v4185_v9, 0.0  ;;  %v2215_v15 = vsel %vm1668_vm4, %v2002_v4, 0.0  ;;  %v1876_v9 = vsel %vm1668_vm4, %v4237_v39, 0.0  ;;  %v2227_v22 = vsel %vm1668_vm4, %v2008_v35, 0.0 }
 0x2ae   : > { %v1853_v61 = vadd.f32 %v1852_v48, %v1851_v19  ;;  %v2194_v32 = vadd.f32 %v2193_v21, %v2192_v14  ;;  %v2001_v19 = vmul.f32 %v4152_v27, %v4152_v27  ;;  %v2211_v48 = vsel %vm1668_vm4, %v2000_v24, 0.0 }
 0x2af   : > { %v1874_v27 = vsel %vm1668_vm4, %v4194_v2, 0.0  ;;  %v2011_v63 = vmul.f32 %v4402_v54, %v4402_v54 }
 0x2b0   : > { %v1855_v56 = vadd.f32 %v1854_v8, %v1853_v61  ;;  %v2196_v25 = vadd.f32 %v2195_v23, %v2194_v32  ;;  %v2213_v23 = vsel %vm1668_vm4, %v2001_v19, 0.0  ;;  %v2003_v8 = vmul.f32 %v4194_v2, %v4194_v2 }
 0x2b1   : > { %v1878_v2 = vsel %vm1668_vm4, %v4246_v12, 0.0  ;;  %v1882_v12 = vsel %vm1668_vm4, %v4298_v57, 0.0  ;;  %v2233_v24 = vsel %vm1668_vm4, %v2011_v63, 0.0 }
 0x2b2   : > { %v1857_v44 = vadd.f32 %v1856_v28, %v1855_v56  ;;  %v2198_v34 = vadd.f32 %v2197_v36, %v2196_v25  ;;  %v2004_v56 = vmul.f32 %v4237_v39, %v4237_v39  ;;  %v2217_v28 = vsel %vm1668_vm4, %v2003_v8, 0.0 }
 0x2b3   : > { %v1880_v39 = vsel %vm1668_vm4, %v4289_v37, 0.0 }
 0x2b4   : > { %v1859_v40 = vadd.f32 %v1858_v50, %v1857_v44  ;;  %v2200_v26 = vadd.f32 %v2199_v31, %v2198_v34  ;;  %v2219_v34 = vsel %vm1668_vm4, %v2004_v56, 0.0  ;;  %v2006_v31 = vmul.f32 %v4289_v37, %v4289_v37 }
 0x2b5   : > { %v1884_v37 = vsel %vm1668_vm4, %v4341_v0, 0.0  ;;  %v1888_v0 = vsel %vm1668_vm4, %v4393_v51, 0.0 }
 0x2b6   : > { %v1861_v46 = vadd.f32 %v1860_v53, %v1859_v40  ;;  %v2202_v17 = vadd.f32 %v2201_v7, %v2200_v26  ;;  %v2007_v40 = vmul.f32 %v4298_v57, %v4298_v57  ;;  %v2223_v53 = vsel %vm1668_vm4, %v2006_v31, 0.0 }
 0x2b7   : > { %v1886_v57 = vsel %vm1668_vm4, %v4350_v62, 0.0 }
 0x2b8   : > { %v1863_v20 = vadd.f32 %v1862_v1, %v1861_v46  ;;  %v2204_v55 = vadd.f32 %v2203_v41, %v2202_v17  ;;  %v2225_v17 = vsel %vm1668_vm4, %v2007_v40, 0.0  ;;  %v2009_v41 = vmul.f32 %v4350_v62, %v4350_v62 }
 0x2b9   : > { %v1890_v62 = vsel %vm1668_vm4, %v4402_v54, 0.0 }
 0x2ba   : > { %v1865_v3 = vadd.f32 %v1864_v10, %v1863_v20  ;;  %v2206_v29 = vadd.f32 %v2205_v16, %v2204_v55  ;;  %v2010_v20 = vmul.f32 %v4393_v51, %v4393_v51  ;;  %v2229_v10 = vsel %vm1668_vm4, %v2009_v41, 0.0 }
 0x2bc   : > { %v2208_v47 = vadd.f32 %v2207_v42, %v2206_v29  ;;  %v1867_v58 = vadd.f32 %v1866_v43, %v1865_v3  ;;  %v2231_v29 = vsel %vm1668_vm4, %v2010_v20, 0.0 }
 0x2be   : > { %v2210_v14 = vadd.f32 %v2209_v60, %v2208_v47  ;;  %v1869_v21 = vadd.f32 %v1868_v59, %v1867_v58 }
 0x2c0   : > { %v2212_v61 = vadd.f32 %v2211_v48, %v2210_v14  ;;  %v1871_v32 = vadd.f32 %v1870_v11, %v1869_v21 }
 0x2c2   : > { %v2214_v5 = vadd.f32 %v2213_v23, %v2212_v61  ;;  %v1873_v18 = vadd.f32 %v1872_v45, %v1871_v32 }
 0x2c4   : > { %v2216_v25 = vadd.f32 %v2215_v15, %v2214_v5  ;;  %v1875_v36 = vadd.f32 %v1874_v27, %v1873_v18 }
 0x2c6   : > { %v2218_v52 = vadd.f32 %v2217_v28, %v2216_v25  ;;  %v1877_v44 = vadd.f32 %v1876_v9, %v1875_v36 }
 0x2c8   : > { %v2220_v50 = vadd.f32 %v2219_v34, %v2218_v52  ;;  %v1879_v38 = vadd.f32 %v1878_v2, %v1877_v44 }
 0x2ca   : > { %v2222_v26 = vadd.f32 %v2221_v6, %v2220_v50  ;;  %v1881_v7 = vadd.f32 %v1880_v39, %v1879_v38 }
 0x2cc   : > { %v2224_v30 = vadd.f32 %v2223_v53, %v2222_v26  ;;  %v1883_v46 = vadd.f32 %v1882_v12, %v1881_v7 }
 0x2ce   : > { %v2226_v1 = vadd.f32 %v2225_v17, %v2224_v30  ;;  %v1885_v13 = vadd.f32 %v1884_v37, %v1883_v46 }
 0x2d0   : > { %v2228_v55 = vadd.f32 %v2227_v22, %v2226_v1  ;;  %v1887_v16 = vadd.f32 %v1886_v57, %v1885_v13 }
 0x2d2   : > { %v2230_v33 = vadd.f32 %v2229_v10, %v2228_v55  ;;  %v1889_v3 = vadd.f32 %v1888_v0, %v1887_v16 }
 0x2d4   : > { %v2232_v42 = vadd.f32 %v2231_v29, %v2230_v33  ;;  %v1891_v43 = vadd.f32 %v1890_v62, %v1889_v3 }
 0x2d6   : > { %v1892_v47 = vrot.slane %v1891_v43, 4  ;;  %v2234_v58 = vadd.f32 %v2233_v24, %v2232_v42 }
 0x2d8   : > { %v1893_v60 = vadd.f32 %v1892_v47, %v1891_v43  ;;  %v2235_v51 = vrot.slane %v2234_v58, 4 }
 0x2da   : > { %v1894_v59 = vrot.slane %v1893_v60, 2  ;;  %v2236_v19 = vadd.f32 %v2235_v51, %v2234_v58 }
 0x2dc   : > { %v1895_v14 = vadd.f32 %v1894_v59, %v1893_v60  ;;  %v2237_v21 = vrot.slane %v2236_v19, 2 }
 0x2de   : > { %v1896_v48 = vrot.slane %v1895_v14, 1  ;;  %v2238_v11 = vadd.f32 %v2237_v21, %v2236_v19 }
 0x2e0   : > { %v1897_v54 = vadd.f32 %v1896_v48, %v1895_v14  ;;  %v2239_v4 = vrot.slane %v2238_v11, 1 }
 0x2e2   : > { %1899 = vst.msk [vmem:[%s217_s24] sm:$0x1] %vm1898_vm5, %v1897_v54  ;;  %v2240_v61 = vadd.f32 %v2239_v4, %v2238_v11 }
 0x2e4   : > { %2241 = vst.msk [vmem:[%s220_s27] sm:$0x1] %vm1898_vm5, %v2240_v61 }
 0x2e5 PF: > { %s15_s15 = sadd.s32 1, %s3270_s15  }
 0x2e6   : > { %p12_p5 = scmp.ge.s32.totalorder %s15_s15, 30  }
 0x2e8   :  { %14 = sbr.rel (!%p12_p5) target bundleno = 1 (0x1), region = 82 }

// kernel: _stem_jit.3
= control target key start
LH: loop header
LB: loop body
LE: loop exit
PB: predicated region body
PF: predicated region fallthrough
CT: control target
= control target key end

     0   :  { %s10931_s0 = inlined_call_operand.vmem [shape: bf16[6272,64], index: 0, kind: input, shape index: {}]   ;;  %s10932_s1 = inlined_call_operand.vmem [shape: bf16[6272,64], index: 1, kind: input, shape index: {}]   ;;  %s10933_s2 = inlined_call_operand.vmem [shape: bf16[6272,64], index: 2, kind: input, shape index: {}]   ;;  %s10934_s3 = inlined_call_operand.vmem [shape: bf16[6272,64], index: 3, kind: input, shape index: {}]   ;;  %s10935_s4 = inlined_call_operand.vmem [shape: bf16[6272,64], index: 4, kind: input, shape index: {}]   ;;  %s10936_s5 = inlined_call_operand.vmem [shape: bf16[6272,64], index: 5, kind: input, shape index: {}]   ;;  %s10937_s6 = inlined_call_operand.vmem [shape: bf16[6272,64], index: 6, kind: input, shape index: {}]   ;;  %s10938_s7 = inlined_call_operand.vmem [shape: bf16[6272,64], index: 7, kind: input, shape index: {}]   ;;  %s10939_s8 = inlined_call_operand.vmem [shape: bf16[6272,64], index: 8, kind: input, shape index: {}]   ;;  %s10940_s9 = inlined_call_operand.vmem [shape: f32[1,64], index: 9, kind: input, shape index: {}]   ;;  %s10941_s10 = inlined_call_operand.vmem [shape: f32[1,64], index: 10, kind: input, shape index: {}]   ;;  %s10942_s11 = inlined_call_operand.hbm [shape: bf16[6272,64], index: 11, kind: output, shape index: {}]  }
   0x1   :  { %10946 = sst [smem:[#allocation8_spill]] %s10931_s0 }
   0x2   :  { %10947 = sst [smem:[#allocation9_spill]] %s10932_s1 }
   0x3   :  { %16 = vsyncpa [#allocation3], 0 }
   0x4   :  { %18 = vsyncpa [#allocation3 + $0x1], 0  ;;  %s8719_s17 = smov 0   ;;  %s8721_s18 = smov 0  }
   0x5   :  { %s8723_s19 = smov 0   ;;  %s8725_s20 = smov 0  }
   0x6 LB: > { %10948 = sst [smem:[#allocation5_spill]] %s8651_s19  ;;  %s8740_s21 = sadd.s32 4294967295, %s8655_s20   ;;  %s8655_s20 = sphi %s8725_s20, %s10955_s20   ;;  %s8651_s19 = sphi %s8723_s19, %s10957_s19   ;;  %s8647_s18 = sphi %s8721_s18, %s10959_s18   ;;  %s8643_s17 = sphi %s8719_s17, %s10958_s17  }
   0x7   : > { %s6011_s22 = sadd.s32 4294967294, %s8655_s20   ;;  %s8744_s23 = sadd.s32 1, %s8655_s20  }
   0x8   : > { %10949 = sst [smem:[#allocation6_spill]] %s8744_s23  ;;  %s307_s24 = sadd.s32 1, %s8651_s19 }
   0x9   : > { %s304_s25 = ssub.s32 %s8655_s20, %s8744_s23  ;;  %p317_p0 = scmp.ne.s32.totalorder %s8651_s19, %s8647_s18 }
   0xa   : > { %p305_p1 = scmp.eq.s32.totalorder %s304_s25, 0  ;;  %p318_p2 = scmp.eq.s32.totalorder %s8740_s21, 6 }
   0xb   : > { %p323_p3 = scmp.ne.s32.totalorder %s8647_s18, %s8643_s17  ;;  %p324_p4 = scmp.eq.s32.totalorder %s6011_s22, 6 }
   0xc   : > { %s8755_s26 = scalar_select %p305_p1, %s8651_s19, %s307_s24  }
   0xd   : > { %p8757_p5 = por %p318_p2, %p317_p0  ;;  %p8761_p6 = por %p324_p4, %p323_p3 }
   0xe   : > { %10950 = sst [smem:[#allocation7_spill]] %s8755_s26  ;;  %p6014_p7 = scmp.ge.s32.totalorder %s8655_s20, 1 }
   0xf   : > { %p429_p8 = scmp.lt.s32.totalorder %s8655_s20, 8 }
  0x11   : > { %p430_p9 = pnand %p6014_p7, %p429_p8 }
  0x12   : > { %s509_s29 = smul.u32 (!%p430_p9), 112, %s8740_s21  ;;  %s10953_s0 = sld [smem:[#allocation8_spill]] (!%p430_p9) }
  0x13   : > { %433 = sbr.rel (%p430_p9) target bundleno = 692 (0x2b4), region = 64  ;;  %s10954_s1 = sld [smem:[#allocation9_spill]] (!%p430_p9) }
  0x14   : > { %p510_p10 = scmp.lt.s32.totalorder (!%p430_p9), %s509_s29, 783  ;;  %s8613_s23 = scalar_lea.hbm (!%p430_p9), %s10942_s11, 3136 }
  0x18   : > { %s10961_s29 = smov (!%p510_p10, %s509_s29), 783  ;;  %vm5724_vm0 = vcmask 519168  }
  0x19   : > { %s6015_s30 = sshll.u32 %s10961_s29, 2 }
  0x1a   : > { %s8771_s14 = scalar_lea.vmem %s10953_s0, %s6015_s30  ;;  %s8776_s22 = scalar_lea.vmem %s10954_s1, %s6015_s30 }
  0x1b   : > { %s8781_s26 = scalar_lea.vmem %s10933_s2, %s6015_s30  ;;  %s8786_s29 = scalar_lea.vmem %s10934_s3, %s6015_s30  ;;  %v6029_v0 = vld [vmem:[%s8771_s14] sm:$0xff]   ;;  %v8044_v13 = vld [vmem:[%s8771_s14 + $0x8] sm:$0xff]   ;;  %v8045_v61 = vld [vmem:[%s8771_s14 + $0x10] sm:$0xff]  }
  0x1c   : > { %v6253_v1 = vld [vmem:[%s8776_s22] sm:$0xff]   ;;  %s8793_s15 = scalar_lea.vmem %s10935_s4, %s6015_s30  ;;  %s8798_s25 = scalar_lea.vmem %s10936_s5, %s6015_s30  ;;  %v6030_v2 = vunpack.c.l.bf16 %v6029_v0  ;;  %v6031_v6 = vunpack.c.h.bf16 %v6029_v0  ;;  %v8099_v20 = vld [vmem:[%s8776_s22 + $0x8] sm:$0xff]   ;;  %v6034_v36 = vunpack.c.l.bf16 %v8044_v13  ;;  %v6035_v54 = vunpack.c.h.bf16 %v8044_v13  ;;  %v8100_v62 = vld [vmem:[%s8776_s22 + $0x10] sm:$0xff]  }
  0x1d   : > { %v6254_v3 = vunpack.c.l.bf16 %v6253_v1  ;;  %v6477_v4 = vld [vmem:[%s8781_s26] sm:$0xff]   ;;  %v6255_v7 = vunpack.c.h.bf16 %v6253_v1  ;;  %s8805_s12 = scalar_lea.vmem %s10937_s6, %s6015_s30  ;;  %s8810_s16 = scalar_lea.vmem %s10938_s7, %s6015_s30  ;;  %v8154_v26 = vld [vmem:[%s8781_s26 + $0x8] sm:$0xff]   ;;  %v6258_v37 = vunpack.c.l.bf16 %v8099_v20  ;;  %v6259_v55 = vunpack.c.h.bf16 %v8099_v20  ;;  %v8865_v13 = vld [vmem:[%s8793_s15 + $0x10] sm:$0xff]  }
  0x1e   : > { %v6701_v5 = vld [vmem:[%s8786_s29] sm:$0xff]   ;;  %v6478_v8 = vunpack.c.l.bf16 %v6477_v4  ;;  %v6479_v12 = vunpack.c.h.bf16 %v6477_v4  ;;  %s8818_s19 = scalar_lea.vmem %s10939_s8, %s6015_s30  ;;  %v8209_v31 = vld [vmem:[%s8786_s29 + $0x8] sm:$0xff]   ;;  %v6482_v43 = vunpack.c.l.bf16 %v8154_v26  ;;  %v6483_v56 = vunpack.c.h.bf16 %v8154_v26  ;;  %s506_s30 = sand.u32 1, %s8647_s18  }
  0x1f   : > { %v6702_v9 = vunpack.c.l.bf16 %v6701_v5  ;;  %v6925_v10 = vld [vmem:[%s8793_s15] sm:$0xff]   ;;  %v1012_v14 = vmax.f32 %v6030_v2, %v6254_v3  ;;  %v1013_v18 = vmax.f32 %v6031_v6, %v6255_v7  ;;  %v6703_v19 = vunpack.c.h.bf16 %v6701_v5  ;;  %v8833_v32 = vld [vmem:[%s8793_s15 + $0x8] sm:$0xff]   ;;  %v8155_v3 = vld [vmem:[%s8781_s26 + $0x10] sm:$0xff]   ;;  %s8903_s24 = smul.u32 448, %s506_s30 }
  0x20   : > { %v7149_v11 = vld [vmem:[%s8798_s25] sm:$0xff]   ;;  %v6926_v15 = vunpack.c.l.bf16 %v6925_v10  ;;  %v6927_v25 = vunpack.c.h.bf16 %v6925_v10  ;;  %v8836_v33 = vld [vmem:[%s8798_s25 + $0x8] sm:$0xff]   ;;  %v1014_v44 = vmax.f32 %v6034_v36, %v6258_v37  ;;  %v6706_v45 = vunpack.c.l.bf16 %v8209_v31 }
  0x21   : > { %v7373_v16 = vld [vmem:[%s8805_s12] sm:$0xff]   ;;  %v7150_v21 = vunpack.c.l.bf16 %v7149_v11  ;;  %v1572_v27 = vmax.f32 %v1012_v14, %v6478_v8  ;;  %v1573_v29 = vmax.f32 %v1013_v18, %v6479_v12  ;;  %v7151_v30 = vunpack.c.h.bf16 %v7149_v11  ;;  %v8840_v38 = vld [vmem:[%s8805_s12 + $0x8] sm:$0xff]   ;;  %v8862_v8 = vld [vmem:[%s8786_s29 + $0x10] sm:$0xff]   ;;  %s8934_s0 = scalar_lea.vmem [#allocation2], %s8903_s24 }
  0x22   : > { %v8822_v17 = vld [vmem:[%s8810_s16] sm:$0xff]   ;;  %v7374_v22 = vunpack.c.l.bf16 %v7373_v16  ;;  %v7375_v34 = vunpack.c.h.bf16 %v7373_v16  ;;  %v8843_v39 = vld [vmem:[%s8810_s16 + $0x8] sm:$0xff]   ;;  %v6930_v46 = vunpack.c.l.bf16 %v8833_v32  ;;  %v7154_v47 = vunpack.c.l.bf16 %v8836_v33  ;;  %v8868_v14 = vld [vmem:[%s8798_s25 + $0x10] sm:$0xff]  }
  0x23   : > { %v7598_v23 = vunpack.c.l.bf16 %v8822_v17  ;;  %v8827_v24 = vld [vmem:[%s8818_s19] sm:$0xff]   ;;  %v7599_v35 = vunpack.c.h.bf16 %v8822_v17  ;;  %v2132_v40 = vmax.f32 %v1572_v27, %v6702_v9  ;;  %v2133_v41 = vmax.f32 %v1573_v29, %v6703_v19  ;;  %v8849_v48 = vld [vmem:[%s8818_s19 + $0x8] sm:$0xff]   ;;  %v8872_v19 = vld [vmem:[%s8805_s12 + $0x10] sm:$0xff]  }
  0x24   : > { %v7822_v28 = vunpack.c.l.bf16 %v8827_v24  ;;  %v7823_v42 = vunpack.c.h.bf16 %v8827_v24  ;;  %v7378_v51 = vunpack.c.l.bf16 %v8840_v38  ;;  %v7602_v52 = vunpack.c.l.bf16 %v8843_v39 }
  0x25   : > { %v2692_v49 = vmax.f32 %v2132_v40, %v6926_v15  ;;  %v2693_v50 = vmax.f32 %v2133_v41, %v6927_v25  ;;  %v1574_v53 = vmax.f32 %v1014_v44, %v6482_v43  ;;  %v7826_v59 = vunpack.c.l.bf16 %v8849_v48  ;;  %v8876_v25 = vld [vmem:[%s8810_s16 + $0x10] sm:$0xff]   ;;  %v8894_v44 = vld [vmem:[%s10941_s10] ss:$0 sm:$0xff] }
  0x26   : > { %v6707_v60 = vunpack.c.h.bf16 %v8209_v31  ;;  %v1015_v0 = vmax.f32 %v6035_v54, %v6259_v55  ;;  %v6931_v1 = vunpack.c.h.bf16 %v8833_v32  ;;  %v7155_v2 = vunpack.c.h.bf16 %v8836_v33  ;;  %v8888_v41 = vld [vmem:[%s8818_s19 + $0x10] sm:$0xff]  }
  0x27   : > { %v3252_v57 = vmax.f32 %v2692_v49, %v7150_v21  ;;  %v3253_v58 = vmax.f32 %v2693_v50, %v7151_v30  ;;  %v2134_v63 = vmax.f32 %v1574_v53, %v6706_v45  ;;  %v7379_v6 = vunpack.c.h.bf16 %v8840_v38 }
  0x28   : > { %v7603_v7 = vunpack.c.h.bf16 %v8843_v39  ;;  %v1575_v10 = vmax.f32 %v1015_v0, %v6483_v56  ;;  %v6038_v11 = vunpack.c.l.bf16 %v8045_v61  ;;  %v6262_v12 = vunpack.c.l.bf16 %v8100_v62 }
  0x29   : > { %v3812_v4 = vmax.f32 %v3252_v57, %v7374_v22  ;;  %v3813_v5 = vmax.f32 %v3253_v58, %v7375_v34  ;;  %v2694_v9 = vmax.f32 %v2134_v63, %v6930_v46  ;;  %v7827_v17 = vunpack.c.h.bf16 %v8849_v48 }
  0x2a   : > { %v6486_v18 = vunpack.c.l.bf16 %v8155_v3  ;;  %v2135_v21 = vmax.f32 %v1575_v10, %v6707_v60  ;;  %v1016_v22 = vmax.f32 %v6038_v11, %v6262_v12  ;;  %v6710_v24 = vunpack.c.l.bf16 %v8862_v8  ;;  %v8906_v60 = vld [vmem:[%s8771_s14 + $0x18] sm:$0xff]  }
  0x2b   : > { %v4372_v15 = vmax.f32 %v3812_v4, %v7598_v23  ;;  %v4373_v16 = vmax.f32 %v3813_v5, %v7599_v35  ;;  %v3254_v20 = vmax.f32 %v2694_v9, %v7154_v47  ;;  %v6934_v29 = vunpack.c.l.bf16 %v8865_v13  ;;  %v8884_v35 = vld [vmem:[%s10940_s9] ss:$0 sm:$0xff]  ;;  %v8101_v5 = vld [vmem:[%s8776_s22 + $0x18] sm:$0xff]  }
  0x2c   : > { %v7158_v23 = vunpack.c.l.bf16 %v8868_v14  ;;  %v2695_v31 = vmax.f32 %v2135_v21, %v6931_v1  ;;  %v1576_v32 = vmax.f32 %v1016_v22, %v6486_v18  ;;  %v7382_v33 = vunpack.c.l.bf16 %v8872_v19 }
  0x2d   : > { %v4932_v26 = vmax.f32 %v4372_v15, %v7822_v28  ;;  %v4933_v27 = vmax.f32 %v4373_v16, %v7823_v42  ;;  %v3814_v30 = vmax.f32 %v3254_v20, %v7378_v51  ;;  %v7606_v28 = vunpack.c.l.bf16 %v8876_v25  ;;  %v8920_v15 = vld [vmem:[%s8786_s29 + $0x18] sm:$0xff]  }
  0x2e   : > { %v6039_v37 = vunpack.c.h.bf16 %v8045_v61  ;;  %v3255_v39 = vmax.f32 %v2695_v31, %v7155_v2  ;;  %v2136_v40 = vmax.f32 %v1576_v32, %v6710_v24  ;;  %v6263_v42 = vunpack.c.h.bf16 %v8100_v62 }
  0x2f   : > { %v5044_v34 = vpack.c.bf16 %v4932_v26, %v4932_v26  ;;  %v5045_v36 = vpack.c.bf16 %v4933_v27, %v4933_v27  ;;  %v4374_v38 = vmax.f32 %v3814_v30, %v7602_v52  ;;  %v6487_v46 = vunpack.c.h.bf16 %v8155_v3  ;;  %v8928_v26 = vld [vmem:[%s8798_s25 + $0x18] sm:$0xff]  }
  0x30   : > { %v6711_v47 = vunpack.c.h.bf16 %v8862_v8  ;;  %v3815_v49 = vmax.f32 %v3255_v39, %v7379_v6  ;;  %v2696_v50 = vmax.f32 %v2136_v40, %v6934_v29  ;;  %v1017_v51 = vmax.f32 %v6039_v37, %v6263_v42  ;;  %v8914_v6 = vld [vmem:[%s8781_s26 + $0x18] sm:$0xff]  }
  0x31   : > { %v5156_v43 = vunpack.c.l.bf16 %v5044_v34  ;;  %v5157_v45 = vunpack.c.l.bf16 %v5045_v36  ;;  %v4934_v48 = vmax.f32 %v4374_v38, %v7826_v59  ;;  %v7830_v54 = vunpack.c.l.bf16 %v8888_v41  ;;  %v8931_v27 = vld [vmem:[%s8805_s12 + $0x18] sm:$0xff]  }
  0x32   : > { %v6935_v55 = vunpack.c.h.bf16 %v8865_v13  ;;  %v4375_v57 = vmax.f32 %v3815_v49, %v7603_v7  ;;  %v3256_v58 = vmax.f32 %v2696_v50, %v7158_v23  ;;  %v1577_v59 = vmax.f32 %v1017_v51, %v6487_v46  ;;  %v8947_v39 = vld [vmem:[%s8810_s16 + $0x18] sm:$0xff]  }
  0x33   : > { %v5272_v52 = vmul.f32 %v8884_v35, %v5156_v43  ;;  %v5273_v53 = vmul.f32 %v8884_v35, %v5157_v45  ;;  %v5046_v56 = vpack.c.bf16 %v4934_v48, %v4934_v48  ;;  %v7159_v63 = vunpack.c.h.bf16 %v8868_v14  ;;  %v8951_v45 = vld [vmem:[%s8818_s19 + $0x18] sm:$0xff]  }
  0x34   : > { %v7383_v0 = vunpack.c.h.bf16 %v8872_v19  ;;  %v4935_v2 = vmax.f32 %v4375_v57, %v7827_v17  ;;  %v3816_v3 = vmax.f32 %v3256_v58, %v7382_v33  ;;  %v2137_v4 = vmax.f32 %v1577_v59, %v6711_v47  ;;  %v8047_v58 = vld [vmem:[%s8771_s14 + $0x20] sm:$0xff]  }
  0x35   : > { %v5388_v61 = vadd.f32 %v8894_v44, %v5272_v52  ;;  %v5389_v62 = vadd.f32 %v8894_v44, %v5273_v53  ;;  %v5158_v1 = vunpack.c.l.bf16 %v5046_v56  ;;  %v7607_v9 = vunpack.c.h.bf16 %v8876_v25  ;;  %v8925_v25 = vld [vmem:[%s8793_s15 + $0x18] sm:$0xff]   ;;  %v8102_v59 = vld [vmem:[%s8776_s22 + $0x20] sm:$0xff]  }
  0x36   : > { %v6042_v10 = vunpack.c.l.bf16 %v8906_v60  ;;  %v5047_v12 = vpack.c.bf16 %v4935_v2, %v4935_v2  ;;  %v4376_v13 = vmax.f32 %v3816_v3, %v7606_v28  ;;  %v2697_v14 = vmax.f32 %v2137_v4, %v6935_v55 }
  0x37   : > { %v5500_v7 = vmax.f32 %v5388_v61, 0.0  ;;  %v5501_v8 = vmax.f32 %v5389_v62, 0.0  ;;  %v5274_v11 = vmul.f32 %v8884_v35, %v5158_v1  ;;  %v6266_v18 = vunpack.c.l.bf16 %v8101_v5 }
  0x38   : > { %v6490_v19 = vunpack.c.l.bf16 %v8914_v6  ;;  %v5159_v21 = vunpack.c.l.bf16 %v5047_v12  ;;  %v4936_v22 = vmax.f32 %v4376_v13, %v7830_v54  ;;  %v3257_v24 = vmax.f32 %v2697_v14, %v7159_v63 }
  0x39   : > { %v5612_v16 = vpack.c.bf16 %v5500_v7, %v5500_v7  ;;  %v5613_v17 = vpack.c.bf16 %v5501_v8, %v5501_v8  ;;  %v5390_v20 = vadd.f32 %v8894_v44, %v5274_v11  ;;  %v7831_v29 = vunpack.c.h.bf16 %v8888_v41 }
  0x3a   : > { %v1018_v23 = vmax.f32 %v6042_v10, %v6266_v18  ;;  %v6714_v30 = vunpack.c.l.bf16 %v8920_v15  ;;  %v5275_v32 = vmul.f32 %v8884_v35, %v5159_v21  ;;  %v5048_v33 = vpack.c.bf16 %v4936_v22, %v4936_v22  ;;  %v8972_v10 = vld [vmem:[%s8793_s15 + $0x20] sm:$0xff]  }
  0x3b   : > { %5725 = vst.msk [vmem:[%s8934_s0] sm:$0xf] %vm5724_vm0, %v5612_v16  ;;  %v5502_v31 = vmax.f32 %v5390_v20, 0.0  ;;  %v3817_v34 = vmax.f32 %v3257_v24, %v7383_v0  ;;  %v6938_v28 = vunpack.c.l.bf16 %v8925_v25  ;;  %v7162_v37 = vunpack.c.l.bf16 %v8928_v26  ;;  %v8157_v0 = vld [vmem:[%s8781_s26 + $0x20] sm:$0xff]  }
  0x3c   : > { %5726 = vst.msk [vmem:[%s8934_s0 + $0x4] sm:$0xf] %vm5724_vm0, %v5613_v17  ;;  %v1578_v36 = vmax.f32 %v1018_v23, %v6490_v19  ;;  %v7386_v38 = vunpack.c.l.bf16 %v8931_v27  ;;  %v5391_v41 = vadd.f32 %v8894_v44, %v5275_v32  ;;  %v5160_v42 = vunpack.c.l.bf16 %v5048_v33  ;;  %v8979_v16 = vld [vmem:[%s8805_s12 + $0x20] sm:$0xff]  }
  0x3d   : > { %v5614_v40 = vpack.c.bf16 %v5502_v31, %v5502_v31  ;;  %v4377_v43 = vmax.f32 %v3817_v34, %v7607_v9  ;;  %v6043_v47 = vunpack.c.h.bf16 %v8906_v60  ;;  %v6267_v48 = vunpack.c.h.bf16 %v8101_v5  ;;  %v8212_v5 = vld [vmem:[%s8786_s29 + $0x20] sm:$0xff]  }
  0x3e   : > { %v2138_v46 = vmax.f32 %v1578_v36, %v6714_v30  ;;  %v6491_v49 = vunpack.c.h.bf16 %v8914_v6  ;;  %v5503_v50 = vmax.f32 %v5391_v41, 0.0  ;;  %v5276_v51 = vmul.f32 %v8884_v35, %v5160_v42  ;;  %v8993_v33 = vld [vmem:[%s8818_s19 + $0x20] sm:$0xff]  }
  0x3f   : > { %5727 = vst.msk [vmem:[%s8934_s0 + $0x8] sm:$0xf] %vm5724_vm0, %v5614_v40  ;;  %v4937_v52 = vmax.f32 %v4377_v43, %v7831_v29  ;;  %v7610_v53 = vunpack.c.l.bf16 %v8947_v39  ;;  %v7834_v55 = vunpack.c.l.bf16 %v8951_v45  ;;  %v1019_v56 = vmax.f32 %v6043_v47, %v6267_v48 }
  0x40   : > { %v2698_v54 = vmax.f32 %v2138_v46, %v6938_v28  ;;  %v6715_v57 = vunpack.c.h.bf16 %v8920_v15  ;;  %v5615_v60 = vpack.c.bf16 %v5503_v50, %v5503_v50  ;;  %v5392_v61 = vadd.f32 %v8894_v44, %v5276_v51  ;;  %v8976_v15 = vld [vmem:[%s8798_s25 + $0x20] sm:$0xff]   ;;  %v8103_v46 = vld [vmem:[%s8776_s22 + $0x28] sm:$0xff]  }
  0x41   : > { %v5049_v62 = vpack.c.bf16 %v4937_v52, %v4937_v52  ;;  %v6939_v63 = vunpack.c.h.bf16 %v8925_v25  ;;  %v1579_v2 = vmax.f32 %v1019_v56, %v6491_v49  ;;  %v7163_v3 = vunpack.c.h.bf16 %v8928_v26  ;;  %v8985_v26 = vld [vmem:[%s8810_s16 + $0x20] sm:$0xff]   ;;  %v8158_v51 = vld [vmem:[%s8781_s26 + $0x28] sm:$0xff]  }
  0x42   : > { %v3258_v1 = vmax.f32 %v2698_v54, %v7162_v37  ;;  %v7387_v4 = vunpack.c.h.bf16 %v8931_v27  ;;  %5728 = vst.msk [vmem:[%s8934_s0 + $0xc] sm:$0xf] %vm5724_vm0, %v5615_v60  ;;  %v5504_v6 = vmax.f32 %v5392_v61, 0.0  ;;  %v6046_v8 = vunpack.c.l.bf16 %v8047_v58  ;;  %v8213_v56 = vld [vmem:[%s8786_s29 + $0x28] sm:$0xff]  }
  0x43   : > { %v5161_v7 = vunpack.c.l.bf16 %v5049_v62  ;;  %v6270_v9 = vunpack.c.l.bf16 %v8102_v59  ;;  %v2139_v12 = vmax.f32 %v1579_v2, %v6715_v57  ;;  %v7611_v13 = vunpack.c.h.bf16 %v8947_v39  ;;  %v9009_v2 = vld [vmem:[%s8798_s25 + $0x28] sm:$0xff]  }
  0x44   : > { %v3818_v11 = vmax.f32 %v3258_v1, %v7386_v38  ;;  %v6494_v14 = vunpack.c.l.bf16 %v8157_v0  ;;  %v5616_v17 = vpack.c.bf16 %v5504_v6, %v5504_v6  ;;  %v6718_v20 = vunpack.c.l.bf16 %v8212_v5  ;;  %v8268_v1 = vld [vmem:[%s8793_s15 + $0x28] sm:$0xff]  }
  0x45   : > { %v5277_v18 = vmul.f32 %v8884_v35, %v5161_v7  ;;  %v1020_v19 = vmax.f32 %v6046_v8, %v6270_v9  ;;  %v2699_v22 = vmax.f32 %v2139_v12, %v6939_v63  ;;  %v7835_v24 = vunpack.c.h.bf16 %v8951_v45  ;;  %v8048_v45 = vld [vmem:[%s8771_s14 + $0x28] sm:$0xff]  }
  0x46   : > { %v4378_v21 = vmax.f32 %v3818_v11, %v7610_v53  ;;  %v6942_v25 = vunpack.c.l.bf16 %v8972_v10  ;;  %5729 = vst.msk [vmem:[%s8934_s0 + $0x10] sm:$0xf] %vm5724_vm0, %v5616_v17  ;;  %v7166_v23 = vunpack.c.l.bf16 %v8976_v15  ;;  %v7390_v30 = vunpack.c.l.bf16 %v8979_v16  ;;  %v9013_v7 = vld [vmem:[%s8805_s12 + $0x28] sm:$0xff]  }
  0x47   : > { %v5393_v27 = vadd.f32 %v8894_v44, %v5277_v18  ;;  %v1580_v29 = vmax.f32 %v1020_v19, %v6494_v14  ;;  %v3259_v32 = vmax.f32 %v2699_v22, %v7163_v3  ;;  %v6047_v34 = vunpack.c.h.bf16 %v8047_v58  ;;  %v9020_v22 = vld [vmem:[%s8810_s16 + $0x28] sm:$0xff]  }
  0x48   : > { %v4938_v31 = vmax.f32 %v4378_v21, %v7834_v55  ;;  %v6271_v36 = vunpack.c.h.bf16 %v8102_v59  ;;  %v7614_v38 = vunpack.c.l.bf16 %v8985_v26  ;;  %v6495_v39 = vunpack.c.h.bf16 %v8157_v0 }
  0x49   : > { %v5505_v28 = vmax.f32 %v5393_v27, 0.0  ;;  %v2140_v37 = vmax.f32 %v1580_v29, %v6718_v20  ;;  %v3819_v41 = vmax.f32 %v3259_v32, %v7387_v4  ;;  %v6719_v43 = vunpack.c.h.bf16 %v8212_v5  ;;  %v9024_v32 = vld [vmem:[%s8818_s19 + $0x28] sm:$0xff]  }
  0x4a   : > { %v5050_v40 = vpack.c.bf16 %v4938_v31, %v4938_v31  ;;  %v1021_v42 = vmax.f32 %v6047_v34, %v6271_v36  ;;  %v7838_v49 = vunpack.c.l.bf16 %v8993_v33  ;;  %v6943_v50 = vunpack.c.h.bf16 %v8972_v10 }
  0x4b   : > { %v5617_v47 = vpack.c.bf16 %v5505_v28, %v5505_v28  ;;  %v2700_v48 = vmax.f32 %v2140_v37, %v6942_v25  ;;  %v4379_v53 = vmax.f32 %v3819_v41, %v7611_v13  ;;  %v7167_v55 = vunpack.c.h.bf16 %v8976_v15 }
  0x4c   : > { %v5162_v52 = vunpack.c.l.bf16 %v5050_v40  ;;  %v1581_v54 = vmax.f32 %v1021_v42, %v6495_v39  ;;  %v7391_v58 = vunpack.c.h.bf16 %v8979_v16  ;;  %v6050_v59 = vunpack.c.l.bf16 %v8048_v45 }
  0x4d   : > { %5730 = vst.msk [vmem:[%s8934_s0 + $0x14] sm:$0xf] %vm5724_vm0, %v5617_v47  ;;  %v3260_v57 = vmax.f32 %v2700_v48, %v7166_v23  ;;  %v6274_v60 = vunpack.c.l.bf16 %v8103_v46  ;;  %v4939_v62 = vmax.f32 %v4379_v53, %v7835_v24  ;;  %v6498_v0 = vunpack.c.l.bf16 %v8158_v51 }
  0x4e   : > { %v5278_v61 = vmul.f32 %v8884_v35, %v5162_v52  ;;  %v2141_v63 = vmax.f32 %v1581_v54, %v6719_v43  ;;  %v7615_v4 = vunpack.c.h.bf16 %v8985_v26  ;;  %v6722_v6 = vunpack.c.l.bf16 %v8213_v56  ;;  %v8104_v43 = vld [vmem:[%s8776_s22 + $0x30] sm:$0xff]  }
  0x4f   : > { %v3820_v3 = vmax.f32 %v3260_v57, %v7390_v30  ;;  %v1022_v5 = vmax.f32 %v6050_v59, %v6274_v60  ;;  %v5051_v9 = vpack.c.bf16 %v4939_v62, %v4939_v62  ;;  %v7839_v11 = vunpack.c.h.bf16 %v8993_v33  ;;  %v9039_v54 = vld [vmem:[%s8786_s29 + $0x30] sm:$0xff]  }
  0x50   : > { %v5394_v8 = vadd.f32 %v8894_v44, %v5278_v61  ;;  %v2701_v10 = vmax.f32 %v2141_v63, %v6943_v50  ;;  %v6946_v14 = vunpack.c.l.bf16 %v8268_v1  ;;  %v7170_v15 = vunpack.c.l.bf16 %v9009_v2  ;;  %v9045_v63 = vld [vmem:[%s8793_s15 + $0x30] sm:$0xff]  }
  0x51   : > { %v4380_v12 = vmax.f32 %v3820_v3, %v7614_v38  ;;  %v1582_v13 = vmax.f32 %v1022_v5, %v6498_v0  ;;  %v5163_v17 = vunpack.c.l.bf16 %v5051_v9  ;;  %v7394_v19 = vunpack.c.l.bf16 %v9013_v7  ;;  %v8049_v38 = vld [vmem:[%s8771_s14 + $0x30] sm:$0xff]  }
  0x52   : > { %v5506_v16 = vmax.f32 %v5394_v8, 0.0  ;;  %v3261_v18 = vmax.f32 %v2701_v10, %v7167_v55  ;;  %v6051_v24 = vunpack.c.h.bf16 %v8048_v45  ;;  %v6275_v25 = vunpack.c.h.bf16 %v8103_v46  ;;  %v9033_v45 = vld [vmem:[%s8781_s26 + $0x30] sm:$0xff]  }
  0x53   : > { %v4940_v20 = vmax.f32 %v4380_v12, %v7838_v49  ;;  %v2142_v21 = vmax.f32 %v1582_v13, %v6722_v6  ;;  %v5279_v27 = vmul.f32 %v8884_v35, %v5163_v17  ;;  %v6499_v23 = vunpack.c.h.bf16 %v8158_v51  ;;  %v9048_v0 = vld [vmem:[%s8798_s25 + $0x30] sm:$0xff]  }
  0x54   : > { %v5618_v26 = vpack.c.bf16 %v5506_v16, %v5506_v16  ;;  %v3821_v29 = vmax.f32 %v3261_v18, %v7391_v58  ;;  %v1023_v33 = vmax.f32 %v6051_v24, %v6275_v25  ;;  %v6723_v34 = vunpack.c.h.bf16 %v8213_v56  ;;  %v9059_v13 = vld [vmem:[%s8805_s12 + $0x30] sm:$0xff]  }
  0x55   : > { %v5052_v30 = vpack.c.bf16 %v4940_v20, %v4940_v20  ;;  %v2702_v31 = vmax.f32 %v2142_v21, %v6946_v14  ;;  %v5395_v36 = vadd.f32 %v8894_v44, %v5279_v27  ;;  %v7618_v37 = vunpack.c.l.bf16 %v9020_v22  ;;  %v9062_v14 = vld [vmem:[%s8810_s16 + $0x30] sm:$0xff]  }
  0x56   : > { %5731 = vst.msk [vmem:[%s8934_s0 + $0x18] sm:$0xf] %vm5724_vm0, %v5618_v26  ;;  %v4381_v28 = vmax.f32 %v3821_v29, %v7615_v4  ;;  %v1583_v41 = vmax.f32 %v1023_v33, %v6499_v23  ;;  %v6947_v42 = vunpack.c.h.bf16 %v8268_v1  ;;  %v7842_v48 = vunpack.c.l.bf16 %v9024_v32  ;;  %v9066_v21 = vld [vmem:[%s8818_s19 + $0x30] sm:$0xff]   ;;  %v8050_v33 = vld [vmem:[%s8771_s14 + $0x38] sm:$0xff]  }
  0x57   : > { %v5164_v39 = vunpack.c.l.bf16 %v5052_v30  ;;  %v3262_v40 = vmax.f32 %v2702_v31, %v7170_v15  ;;  %v5507_v46 = vmax.f32 %v5395_v36, 0.0  ;;  %v7171_v49 = vunpack.c.h.bf16 %v9009_v2 }
  0x58   : > { %v4941_v47 = vmax.f32 %v4381_v28, %v7839_v11  ;;  %v2143_v52 = vmax.f32 %v1583_v41, %v6723_v34  ;;  %v6054_v53 = vunpack.c.l.bf16 %v8049_v38  ;;  %v6278_v57 = vunpack.c.l.bf16 %v8104_v43  ;;  %v8105_v34 = vld [vmem:[%s8776_s22 + $0x38] sm:$0xff]  }
  0x59   : > { %v5280_v50 = vmul.f32 %v8884_v35, %v5164_v39  ;;  %v3822_v51 = vmax.f32 %v3262_v40, %v7394_v19  ;;  %v5619_v55 = vpack.c.bf16 %v5507_v46, %v5507_v46  ;;  %v6502_v58 = vunpack.c.l.bf16 %v9033_v45  ;;  %v8160_v39 = vld [vmem:[%s8781_s26 + $0x38] sm:$0xff]  }
  0x5a   : > { %v5053_v56 = vpack.c.bf16 %v4941_v47, %v4941_v47  ;;  %v2703_v61 = vmax.f32 %v2143_v52, %v6947_v42  ;;  %v7395_v62 = vunpack.c.h.bf16 %v9013_v7  ;;  %v7619_v2 = vunpack.c.h.bf16 %v9020_v22 }
  0x5b   : > { %v5396_v59 = vadd.f32 %v8894_v44, %v5280_v50  ;;  %v4382_v60 = vmax.f32 %v3822_v51, %v7618_v37  ;;  %5732 = vst.msk [vmem:[%s8934_s0 + $0x1c] sm:$0xf] %vm5724_vm0, %v5619_v55  ;;  %v1024_v3 = vmax.f32 %v6054_v53, %v6278_v57  ;;  %v6726_v4 = vunpack.c.l.bf16 %v9039_v54 }
  0x5c   : > { %v5165_v1 = vunpack.c.l.bf16 %v5053_v56  ;;  %v3263_v8 = vmax.f32 %v2703_v61, %v7171_v49  ;;  %v7843_v7 = vunpack.c.h.bf16 %v9024_v32  ;;  %v6950_v11 = vunpack.c.l.bf16 %v9045_v63 }
  0x5d   : > { %v5508_v5 = vmax.f32 %v5396_v59, 0.0  ;;  %v4942_v6 = vmax.f32 %v4382_v60, %v7842_v48  ;;  %v1584_v10 = vmax.f32 %v1024_v3, %v6502_v58  ;;  %v7174_v12 = vunpack.c.l.bf16 %v9048_v0  ;;  %v9093_v59 = vld [vmem:[%s8798_s25 + $0x38] sm:$0xff]  }
  0x5e   : > { %v5281_v9 = vmul.f32 %v8884_v35, %v5165_v1  ;;  %v3823_v17 = vmax.f32 %v3263_v8, %v7395_v62  ;;  %v6055_v18 = vunpack.c.h.bf16 %v8049_v38  ;;  %v6279_v22 = vunpack.c.h.bf16 %v8104_v43 }
  0x5f   : > { %v5620_v15 = vpack.c.bf16 %v5508_v5, %v5508_v5  ;;  %v5054_v16 = vpack.c.bf16 %v4942_v6, %v4942_v6  ;;  %v2144_v20 = vmax.f32 %v1584_v10, %v6726_v4  ;;  %v6503_v24 = vunpack.c.h.bf16 %v9033_v45  ;;  %v9082_v45 = vld [vmem:[%s8786_s29 + $0x38] sm:$0xff]  }
  0x60   : > { %v5397_v19 = vadd.f32 %v8894_v44, %v5281_v9  ;;  %v4383_v26 = vmax.f32 %v3823_v17, %v7619_v2  ;;  %v7398_v27 = vunpack.c.l.bf16 %v9059_v13  ;;  %v7622_v29 = vunpack.c.l.bf16 %v9062_v14  ;;  %v9100_v4 = vld [vmem:[%s8805_s12 + $0x38] sm:$0xff]  }
  0x61   : > { %5733 = vst.msk [vmem:[%s8934_s0 + $0x20] sm:$0xf] %vm5724_vm0, %v5620_v15  ;;  %v5166_v25 = vunpack.c.l.bf16 %v5054_v16  ;;  %v2704_v30 = vmax.f32 %v2144_v20, %v6950_v11  ;;  %v1025_v31 = vmax.f32 %v6055_v18, %v6279_v22  ;;  %v6727_v32 = vunpack.c.h.bf16 %v9039_v54  ;;  %v9089_v54 = vld [vmem:[%s8793_s15 + $0x38] sm:$0xff]  }
  0x62   : > { %v5509_v23 = vmax.f32 %v5397_v19, 0.0  ;;  %v4943_v28 = vmax.f32 %v4383_v26, %v7843_v7  ;;  %v7846_v37 = vunpack.c.l.bf16 %v9066_v21  ;;  %v6951_v38 = vunpack.c.h.bf16 %v9045_v63  ;;  %v9103_v5 = vld [vmem:[%s8810_s16 + $0x38] sm:$0xff]  }
  0x63   : > { %v5282_v36 = vmul.f32 %v8884_v35, %v5166_v25  ;;  %v3264_v41 = vmax.f32 %v2704_v30, %v7174_v12  ;;  %v1585_v42 = vmax.f32 %v1025_v31, %v6503_v24  ;;  %v7175_v43 = vunpack.c.h.bf16 %v9048_v0  ;;  %v9110_v12 = vld [vmem:[%s8818_s19 + $0x38] sm:$0xff]   ;;  %v8051_v24 = vld [vmem:[%s8771_s14 + $0x40] sm:$0xff]  }
  0x64   : > { %v5621_v40 = vpack.c.bf16 %v5509_v23, %v5509_v23  ;;  %v5055_v47 = vpack.c.bf16 %v4943_v28, %v4943_v28  ;;  %v6058_v48 = vunpack.c.l.bf16 %v8050_v33  ;;  %v6282_v49 = vunpack.c.l.bf16 %v8105_v34  ;;  %v8106_v25 = vld [vmem:[%s8776_s22 + $0x40] sm:$0xff]  }
  0x65   : > { %v5398_v46 = vadd.f32 %v8894_v44, %v5282_v36  ;;  %v3824_v50 = vmax.f32 %v3264_v41, %v7398_v27  ;;  %v2145_v51 = vmax.f32 %v1585_v42, %v6727_v32  ;;  %v7399_v52 = vunpack.c.h.bf16 %v9059_v13  ;;  %v8161_v30 = vld [vmem:[%s8781_s26 + $0x40] sm:$0xff]  }
  0x66   : > { %5734 = vst.msk [vmem:[%s8934_s0 + $0x24] sm:$0xf] %vm5724_vm0, %v5621_v40  ;;  %v6506_v53 = vunpack.c.l.bf16 %v8160_v39  ;;  %v5167_v56 = vunpack.c.l.bf16 %v5055_v47  ;;  %v1026_v57 = vmax.f32 %v6058_v48, %v6282_v49  ;;  %v6730_v58 = vunpack.c.l.bf16 %v9082_v45  ;;  %v9122_v36 = vld [vmem:[%s8786_s29 + $0x40] sm:$0xff]  }
  0x67   : > { %v5510_v55 = vmax.f32 %v5398_v46, 0.0  ;;  %v4384_v60 = vmax.f32 %v3824_v50, %v7622_v29  ;;  %v2705_v61 = vmax.f32 %v2145_v51, %v6951_v38  ;;  %v7623_v62 = vunpack.c.h.bf16 %v9062_v14  ;;  %v9132_v50 = vld [vmem:[%s8798_s25 + $0x40] sm:$0xff]  }
  0x68   : > { %v7847_v63 = vunpack.c.h.bf16 %v9066_v21  ;;  %v5283_v1 = vmul.f32 %v8884_v35, %v5167_v56  ;;  %v1586_v2 = vmax.f32 %v1026_v57, %v6506_v53  ;;  %v6954_v3 = vunpack.c.l.bf16 %v9089_v54 }
  0x69   : > { %v5622_v0 = vpack.c.bf16 %v5510_v55, %v5510_v55  ;;  %v4944_v6 = vmax.f32 %v4384_v60, %v7846_v37  ;;  %v3265_v8 = vmax.f32 %v2705_v61, %v7175_v43  ;;  %v7178_v7 = vunpack.c.l.bf16 %v9093_v59 }
  0x6a   : > { %v6059_v9 = vunpack.c.h.bf16 %v8050_v33  ;;  %v5399_v10 = vadd.f32 %v8894_v44, %v5283_v1  ;;  %v2146_v11 = vmax.f32 %v1586_v2, %v6730_v58  ;;  %v6283_v13 = vunpack.c.h.bf16 %v8105_v34 }
  0x6b   : > { %5735 = vst.msk [vmem:[%s8934_s0 + $0x28] sm:$0xf] %vm5724_vm0, %v5622_v0  ;;  %v6507_v14 = vunpack.c.h.bf16 %v8160_v39  ;;  %v5056_v15 = vpack.c.bf16 %v4944_v6, %v4944_v6  ;;  %v3825_v16 = vmax.f32 %v3265_v8, %v7399_v52  ;;  %v7402_v17 = vunpack.c.l.bf16 %v9100_v4 }
  0x6c   : > { %v7626_v18 = vunpack.c.l.bf16 %v9103_v5  ;;  %v5511_v19 = vmax.f32 %v5399_v10, 0.0  ;;  %v2706_v20 = vmax.f32 %v2146_v11, %v6954_v3  ;;  %v1027_v21 = vmax.f32 %v6059_v9, %v6283_v13  ;;  %v9142_v3 = vld [vmem:[%s8810_s16 + $0x40] sm:$0xff]  }
  0x6d   : > { %v6731_v22 = vunpack.c.h.bf16 %v9082_v45  ;;  %v5168_v26 = vunpack.c.l.bf16 %v5056_v15  ;;  %v4385_v27 = vmax.f32 %v3825_v16, %v7623_v62  ;;  %v7850_v29 = vunpack.c.l.bf16 %v9110_v12  ;;  %v8271_v45 = vld [vmem:[%s8793_s15 + $0x40] sm:$0xff]  }
  0x6e   : > { %v6955_v23 = vunpack.c.h.bf16 %v9089_v54  ;;  %v5623_v31 = vpack.c.bf16 %v5511_v19, %v5511_v19  ;;  %v3266_v32 = vmax.f32 %v2706_v20, %v7178_v7  ;;  %v1587_v33 = vmax.f32 %v1027_v21, %v6507_v14  ;;  %v8052_v14 = vld [vmem:[%s8771_s14 + $0x48] sm:$0xff]  }
  0x6f   : > { %v7179_v34 = vunpack.c.h.bf16 %v9093_v59  ;;  %v5284_v28 = vmul.f32 %v8884_v35, %v5168_v26  ;;  %v4945_v37 = vmax.f32 %v4385_v27, %v7847_v63  ;;  %v6062_v38 = vunpack.c.l.bf16 %v8051_v24  ;;  %v9137_v59 = vld [vmem:[%s8805_s12 + $0x40] sm:$0xff]   ;;  %v8107_v19 = vld [vmem:[%s8776_s22 + $0x48] sm:$0xff]  }
  0x70   : > { %v6286_v39 = vunpack.c.l.bf16 %v8106_v25  ;;  %5736 = vst.msk [vmem:[%s8934_s0 + $0x2c] sm:$0xf] %vm5724_vm0, %v5623_v31  ;;  %v3826_v40 = vmax.f32 %v3266_v32, %v7402_v17  ;;  %v2147_v41 = vmax.f32 %v1587_v33, %v6731_v22  ;;  %v7403_v42 = vunpack.c.h.bf16 %v9100_v4  ;;  %v9145_v4 = vld [vmem:[%s8818_s19 + $0x40] sm:$0xff]  }
  0x71   : > { %v6510_v43 = vunpack.c.l.bf16 %v8161_v30  ;;  %v5400_v46 = vadd.f32 %v8894_v44, %v5284_v28  ;;  %v5057_v47 = vpack.c.bf16 %v4945_v37, %v4945_v37  ;;  %v6734_v49 = vunpack.c.l.bf16 %v9122_v36 }
  0x72   : > { %v1028_v48 = vmax.f32 %v6062_v38, %v6286_v39  ;;  %v4386_v51 = vmax.f32 %v3826_v40, %v7626_v18  ;;  %v2707_v52 = vmax.f32 %v2147_v41, %v6955_v23  ;;  %v7627_v53 = vunpack.c.h.bf16 %v9103_v5  ;;  %v9165_v39 = vld [vmem:[%s8793_s15 + $0x48] sm:$0xff]  }
  0x73   : > { %v7851_v54 = vunpack.c.h.bf16 %v9110_v12  ;;  %v5512_v55 = vmax.f32 %v5400_v46, 0.0  ;;  %v5169_v56 = vunpack.c.l.bf16 %v5057_v47  ;;  %v6958_v58 = vunpack.c.l.bf16 %v8271_v45 }
  0x74   : > { %v1588_v57 = vmax.f32 %v1028_v48, %v6510_v43  ;;  %v4946_v60 = vmax.f32 %v4386_v51, %v7850_v29  ;;  %v3267_v61 = vmax.f32 %v2707_v52, %v7179_v34  ;;  %v7182_v62 = vunpack.c.l.bf16 %v9132_v50 }
  0x75   : > { %v6063_v63 = vunpack.c.h.bf16 %v8051_v24  ;;  %v5624_v0 = vpack.c.bf16 %v5512_v55, %v5512_v55  ;;  %v5285_v1 = vmul.f32 %v8884_v35, %v5169_v56  ;;  %v6287_v5 = vunpack.c.h.bf16 %v8106_v25  ;;  %v8162_v25 = vld [vmem:[%s8781_s26 + $0x48] sm:$0xff]  }
  0x76   : > { %v2148_v2 = vmax.f32 %v1588_v57, %v6734_v49  ;;  %v5058_v6 = vpack.c.bf16 %v4946_v60, %v4946_v60  ;;  %v3827_v8 = vmax.f32 %v3267_v61, %v7403_v42  ;;  %v7406_v7 = vunpack.c.l.bf16 %v9137_v59 }
  0x77   : > { %v6511_v9 = vunpack.c.h.bf16 %v8161_v30  ;;  %5737 = vst.msk [vmem:[%s8934_s0 + $0x30] sm:$0xf] %vm5724_vm0, %v5624_v0  ;;  %v5401_v10 = vadd.f32 %v8894_v44, %v5285_v1  ;;  %v1029_v12 = vmax.f32 %v6063_v63, %v6287_v5  ;;  %v6735_v13 = vunpack.c.h.bf16 %v9122_v36  ;;  %v9160_v30 = vld [vmem:[%s8786_s29 + $0x48] sm:$0xff]  }
  0x78   : > { %v2708_v11 = vmax.f32 %v2148_v2, %v6958_v58  ;;  %v5170_v15 = vunpack.c.l.bf16 %v5058_v6  ;;  %v4387_v16 = vmax.f32 %v3827_v8, %v7627_v53  ;;  %v7630_v17 = vunpack.c.l.bf16 %v9142_v3  ;;  %v9185_v63 = vld [vmem:[%s8818_s19 + $0x48] sm:$0xff]  }
  0x79   : > { %v7854_v18 = vunpack.c.l.bf16 %v9145_v4  ;;  %v5513_v20 = vmax.f32 %v5401_v10, 0.0  ;;  %v1589_v22 = vmax.f32 %v1029_v12, %v6511_v9  ;;  %v6959_v24 = vunpack.c.h.bf16 %v8271_v45  ;;  %v9171_v45 = vld [vmem:[%s8798_s25 + $0x48] sm:$0xff]   ;;  %v8053_v9 = vld [vmem:[%s8771_s14 + $0x50] sm:$0xff]  }
  0x7a   : > { %v3268_v21 = vmax.f32 %v2708_v11, %v7182_v62  ;;  %v5286_v26 = vmul.f32 %v8884_v35, %v5170_v15  ;;  %v4947_v27 = vmax.f32 %v4387_v16, %v7851_v54  ;;  %v7183_v29 = vunpack.c.h.bf16 %v9132_v50  ;;  %v9177_v54 = vld [vmem:[%s8805_s12 + $0x48] sm:$0xff]   ;;  %v8108_v10 = vld [vmem:[%s8776_s22 + $0x50] sm:$0xff]  }
  0x7b   : > { %v6066_v23 = vunpack.c.l.bf16 %v8052_v14  ;;  %v5625_v31 = vpack.c.bf16 %v5513_v20, %v5513_v20  ;;  %v2149_v33 = vmax.f32 %v1589_v22, %v6735_v13  ;;  %v6290_v34 = vunpack.c.l.bf16 %v8107_v19  ;;  %v9182_v62 = vld [vmem:[%s8810_s16 + $0x48] sm:$0xff]   ;;  %v8218_v20 = vld [vmem:[%s8786_s29 + $0x50] sm:$0xff]  }
  0x7c   : > { %v3828_v32 = vmax.f32 %v3268_v21, %v7406_v7  ;;  %v5402_v36 = vadd.f32 %v8894_v44, %v5286_v26  ;;  %v5059_v28 = vpack.c.bf16 %v4947_v27, %v4947_v27  ;;  %v7407_v37 = vunpack.c.h.bf16 %v9137_v59 }
  0x7d   : > { %v6514_v38 = vunpack.c.l.bf16 %v8162_v25  ;;  %5738 = vst.msk [vmem:[%s8934_s0 + $0x34] sm:$0xf] %vm5724_vm0, %v5625_v31  ;;  %v2709_v41 = vmax.f32 %v2149_v33, %v6959_v24  ;;  %v1030_v42 = vmax.f32 %v6066_v23, %v6290_v34  ;;  %v6738_v43 = vunpack.c.l.bf16 %v9160_v30 }
  0x7e   : > { %v4388_v40 = vmax.f32 %v3828_v32, %v7630_v17  ;;  %v5514_v46 = vmax.f32 %v5402_v36, 0.0  ;;  %v5171_v47 = vunpack.c.l.bf16 %v5059_v28  ;;  %v7631_v48 = vunpack.c.h.bf16 %v9142_v3 }
  0x7f   : > { %v7855_v49 = vunpack.c.h.bf16 %v9145_v4  ;;  %v3269_v51 = vmax.f32 %v2709_v41, %v7183_v29  ;;  %v1590_v52 = vmax.f32 %v1030_v42, %v6514_v38  ;;  %v6962_v53 = vunpack.c.l.bf16 %v9165_v39 }
  0x80   : > { %v4948_v50 = vmax.f32 %v4388_v40, %v7854_v18  ;;  %v5626_v55 = vpack.c.bf16 %v5514_v46, %v5514_v46  ;;  %v5287_v56 = vmul.f32 %v8884_v35, %v5171_v47  ;;  %v7186_v57 = vunpack.c.l.bf16 %v9171_v45 }
  0x81   : > { %v6067_v58 = vunpack.c.h.bf16 %v8052_v14  ;;  %v3829_v60 = vmax.f32 %v3269_v51, %v7407_v37  ;;  %v2150_v61 = vmax.f32 %v1590_v52, %v6738_v43  ;;  %v6291_v0 = vunpack.c.h.bf16 %v8107_v19  ;;  %v8163_v19 = vld [vmem:[%s8781_s26 + $0x50] sm:$0xff]  }
  0x82   : > { %v5060_v59 = vpack.c.bf16 %v4948_v50, %v4948_v50  ;;  %5739 = vst.msk [vmem:[%s8934_s0 + $0x38] sm:$0xf] %vm5724_vm0, %v5626_v55  ;;  %v5403_v1 = vadd.f32 %v8894_v44, %v5287_v56  ;;  %v7410_v2 = vunpack.c.l.bf16 %v9177_v54  ;;  %v6515_v3 = vunpack.c.h.bf16 %v8162_v25  ;;  %v9217_v52 = vld [vmem:[%s8810_s16 + $0x50] sm:$0xff]  }
  0x83   : > { %v6739_v4 = vunpack.c.h.bf16 %v9160_v30  ;;  %v4389_v6 = vmax.f32 %v3829_v60, %v7631_v48  ;;  %v2710_v8 = vmax.f32 %v2150_v61, %v6962_v53  ;;  %v1031_v7 = vmax.f32 %v6067_v58, %v6291_v0  ;;  %v9203_v30 = vld [vmem:[%s8793_s15 + $0x50] sm:$0xff]  }
  0x84   : > { %v5172_v5 = vunpack.c.l.bf16 %v5060_v59  ;;  %v5515_v11 = vmax.f32 %v5403_v1, 0.0  ;;  %v7634_v12 = vunpack.c.l.bf16 %v9182_v62  ;;  %v7858_v13 = vunpack.c.l.bf16 %v9185_v63  ;;  %v9223_v58 = vld [vmem:[%s8818_s19 + $0x50] sm:$0xff]  }
  0x85   : > { %v6963_v14 = vunpack.c.h.bf16 %v9165_v39  ;;  %v4949_v16 = vmax.f32 %v4389_v6, %v7855_v49  ;;  %v3270_v17 = vmax.f32 %v2710_v8, %v7186_v57  ;;  %v1591_v18 = vmax.f32 %v1031_v7, %v6515_v3  ;;  %v8328_v39 = vld [vmem:[%s8798_s25 + $0x50] sm:$0xff]  }
  0x86   : > { %v5288_v15 = vmul.f32 %v8884_v35, %v5172_v5  ;;  %v5627_v21 = vpack.c.bf16 %v5515_v11, %v5515_v11  ;;  %v7187_v22 = vunpack.c.h.bf16 %v9171_v45  ;;  %v6070_v24 = vunpack.c.l.bf16 %v8053_v9  ;;  %v9214_v49 = vld [vmem:[%s8805_s12 + $0x50] sm:$0xff]   ;;  %v8109_v5 = vld [vmem:[%s8776_s22 + $0x58] sm:$0xff]  }
  0x87   : > { %v6294_v25 = vunpack.c.l.bf16 %v8108_v10  ;;  %v5061_v27 = vpack.c.bf16 %v4949_v16, %v4949_v16  ;;  %v3830_v29 = vmax.f32 %v3270_v17, %v7410_v2  ;;  %v2151_v23 = vmax.f32 %v1591_v18, %v6739_v4  ;;  %v8054_v4 = vld [vmem:[%s8771_s14 + $0x58] sm:$0xff]  }
  0x88   : > { %v5404_v26 = vadd.f32 %v8894_v44, %v5288_v15  ;;  %5740 = vst.msk [vmem:[%s8934_s0 + $0x3c] sm:$0xf] %vm5724_vm0, %v5627_v21  ;;  %v7411_v31 = vunpack.c.h.bf16 %v9177_v54  ;;  %v6518_v33 = vunpack.c.l.bf16 %v8163_v19  ;;  %v6742_v34 = vunpack.c.l.bf16 %v8218_v20  ;;  %v9234_v15 = vld [vmem:[%s8786_s29 + $0x58] sm:$0xff]  }
  0x89   : > { %v1032_v32 = vmax.f32 %v6070_v24, %v6294_v25  ;;  %v5173_v28 = vunpack.c.l.bf16 %v5061_v27  ;;  %v4390_v37 = vmax.f32 %v3830_v29, %v7634_v12  ;;  %v2711_v38 = vmax.f32 %v2151_v23, %v6963_v14  ;;  %v9241_v25 = vld [vmem:[%s8793_s15 + $0x58] sm:$0xff]  }
  0x8a   : > { %v5516_v36 = vmax.f32 %v5404_v26, 0.0  ;;  %v7635_v40 = vunpack.c.h.bf16 %v9182_v62  ;;  %v7859_v41 = vunpack.c.h.bf16 %v9185_v63  ;;  %v6966_v43 = vunpack.c.l.bf16 %v9203_v30  ;;  %v9245_v23 = vld [vmem:[%s8798_s25 + $0x58] sm:$0xff]  }
  0x8b   : > { %v1592_v42 = vmax.f32 %v1032_v32, %v6518_v33  ;;  %v5289_v46 = vmul.f32 %v8884_v35, %v5173_v28  ;;  %v4950_v47 = vmax.f32 %v4390_v37, %v7858_v13  ;;  %v3271_v48 = vmax.f32 %v2711_v38, %v7187_v22  ;;  %v9251_v37 = vld [vmem:[%s8805_s12 + $0x58] sm:$0xff]  }
  0x8c   : > { %v5628_v45 = vpack.c.bf16 %v5516_v36, %v5516_v36  ;;  %v7190_v51 = vunpack.c.l.bf16 %v8328_v39  ;;  %v6071_v53 = vunpack.c.h.bf16 %v8053_v9  ;;  %v6295_v54 = vunpack.c.h.bf16 %v8108_v10  ;;  %v8164_v10 = vld [vmem:[%s8781_s26 + $0x58] sm:$0xff]  }
  0x8d   : > { %v2152_v50 = vmax.f32 %v1592_v42, %v6742_v34  ;;  %v5405_v55 = vadd.f32 %v8894_v44, %v5289_v46  ;;  %v5062_v56 = vpack.c.bf16 %v4950_v47, %v4950_v47  ;;  %v3831_v57 = vmax.f32 %v3271_v48, %v7411_v31  ;;  %v9261_v47 = vld [vmem:[%s8810_s16 + $0x58] sm:$0xff]  }
  0x8e   : > { %5741 = vst.msk [vmem:[%s8934_s0 + $0x40] sm:$0xf] %vm5724_vm0, %v5628_v45  ;;  %v6519_v59 = vunpack.c.h.bf16 %v8163_v19  ;;  %v7414_v61 = vunpack.c.l.bf16 %v9214_v49  ;;  %v1033_v62 = vmax.f32 %v6071_v53, %v6295_v54  ;;  %v6743_v63 = vunpack.c.h.bf16 %v8218_v20  ;;  %v9264_v48 = vld [vmem:[%s8818_s19 + $0x58] sm:$0xff]  }
  0x8f   : > { %v2712_v60 = vmax.f32 %v2152_v50, %v6966_v43  ;;  %v5517_v0 = vmax.f32 %v5405_v55, 0.0  ;;  %v5174_v1 = vunpack.c.l.bf16 %v5062_v56  ;;  %v4391_v2 = vmax.f32 %v3831_v57, %v7635_v40  ;;  %v9271_v50 = vld [vmem:[%s10941_s10] ss:$0 sm:$0xff] }
  0x90   : > { %v7638_v3 = vunpack.c.l.bf16 %v9217_v52  ;;  %v7862_v8 = vunpack.c.l.bf16 %v9223_v58  ;;  %v1593_v7 = vmax.f32 %v1033_v62, %v6519_v59  ;;  %v6967_v9 = vunpack.c.h.bf16 %v9203_v30  ;;  %v8055_v59 = vld [vmem:[%s8771_s14 + $0x60] sm:$0xff]  }
  0x91   : > { %v3272_v6 = vmax.f32 %v2712_v60, %v7190_v51  ;;  %v5629_v11 = vpack.c.bf16 %v5517_v0, %v5517_v0  ;;  %v5290_v12 = vmul.f32 %v8884_v35, %v5174_v1  ;;  %v4951_v13 = vmax.f32 %v4391_v2, %v7859_v41  ;;  %v8110_v60 = vld [vmem:[%s8776_s22 + $0x60] sm:$0xff]  }
  0x92   : > { %v7191_v14 = vunpack.c.h.bf16 %v8328_v39  ;;  %v2153_v17 = vmax.f32 %v1593_v7, %v6743_v63  ;;  %v6074_v18 = vunpack.c.l.bf16 %v8054_v4  ;;  %v6298_v19 = vunpack.c.l.bf16 %v8109_v5  ;;  %v9256_v39 = vld [vmem:[%s10940_s9] ss:$0 sm:$0xff] }
  0x93   : > { %v3832_v16 = vmax.f32 %v3272_v6, %v7414_v61  ;;  %5742 = vst.msk [vmem:[%s8934_s0 + $0x44] sm:$0xf] %vm5724_vm0, %v5629_v11  ;;  %v5406_v20 = vadd.f32 %v8894_v44, %v5290_v12  ;;  %v5063_v21 = vpack.c.bf16 %v4951_v13, %v4951_v13  ;;  %v7415_v22 = vunpack.c.h.bf16 %v9214_v49  ;;  %v8220_v6 = vld [vmem:[%s8786_s29 + $0x60] sm:$0xff]  }
  0x94   : > { %v6522_v24 = vunpack.c.l.bf16 %v8164_v10  ;;  %v2713_v26 = vmax.f32 %v2153_v17, %v6967_v9  ;;  %v1034_v27 = vmax.f32 %v6074_v18, %v6298_v19  ;;  %v6746_v29 = vunpack.c.l.bf16 %v9234_v15 }
  0x95   : > { %v4392_v35 = vmax.f32 %v3832_v16, %v7638_v3  ;;  %v5518_v30 = vmax.f32 %v5406_v20, 0.0  ;;  %v5175_v31 = vunpack.c.l.bf16 %v5063_v21  ;;  %v7639_v32 = vunpack.c.h.bf16 %v9217_v52 }
  0x96   : > { %v7863_v44 = vunpack.c.h.bf16 %v9223_v58  ;;  %v3273_v34 = vmax.f32 %v2713_v26, %v7191_v14  ;;  %v1594_v36 = vmax.f32 %v1034_v27, %v6522_v24  ;;  %v6970_v28 = vunpack.c.l.bf16 %v9241_v25 }
  0x97   : > { %v4952_v33 = vmax.f32 %v4392_v35, %v7862_v8  ;;  %v5630_v38 = vpack.c.bf16 %v5518_v30, %v5518_v30  ;;  %v5291_v40 = vmul.f32 %v9256_v39, %v5175_v31  ;;  %v7194_v41 = vunpack.c.l.bf16 %v9245_v23 }
  0x98   : > { %v6075_v42 = vunpack.c.h.bf16 %v8054_v4  ;;  %v3833_v45 = vmax.f32 %v3273_v34, %v7415_v22  ;;  %v2154_v46 = vmax.f32 %v1594_v36, %v6746_v29  ;;  %v6299_v49 = vunpack.c.h.bf16 %v8109_v5  ;;  %v8165_v5 = vld [vmem:[%s8781_s26 + $0x60] sm:$0xff]  }
  0x99   : > { %v5064_v43 = vpack.c.bf16 %v4952_v33, %v4952_v33  ;;  %5743 = vst.msk [vmem:[%s8934_s0 + $0x48] sm:$0xf] %vm5724_vm0, %v5630_v38  ;;  %v5407_v51 = vadd.f32 %v9271_v50, %v5291_v40  ;;  %v7418_v52 = vunpack.c.l.bf16 %v9251_v37  ;;  %v6523_v53 = vunpack.c.h.bf16 %v8164_v10  ;;  %v9299_v36 = vld [vmem:[%s8810_s16 + $0x60] sm:$0xff]  }
  0x9a   : > { %v6747_v54 = vunpack.c.h.bf16 %v9234_v15  ;;  %v4393_v56 = vmax.f32 %v3833_v45, %v7639_v32  ;;  %v2714_v57 = vmax.f32 %v2154_v46, %v6970_v28  ;;  %v1035_v58 = vmax.f32 %v6075_v42, %v6299_v49  ;;  %v9287_v15 = vld [vmem:[%s8793_s15 + $0x60] sm:$0xff]  }
  0x9b   : > { %v5176_v55 = vunpack.c.l.bf16 %v5064_v43  ;;  %v5519_v61 = vmax.f32 %v5407_v51, 0.0  ;;  %v7642_v62 = vunpack.c.l.bf16 %v9261_v47  ;;  %v7866_v63 = vunpack.c.l.bf16 %v9264_v48  ;;  %v9305_v42 = vld [vmem:[%s8818_s19 + $0x60] sm:$0xff]  }
  0x9c   : > { %v6971_v0 = vunpack.c.h.bf16 %v9241_v25  ;;  %v4953_v2 = vmax.f32 %v4393_v56, %v7863_v44  ;;  %v3274_v3 = vmax.f32 %v2714_v57, %v7194_v41  ;;  %v1595_v4 = vmax.f32 %v1035_v58, %v6523_v53  ;;  %v8330_v25 = vld [vmem:[%s8798_s25 + $0x60] sm:$0xff]  }
  0x9d   : > { %v5292_v1 = vmul.f32 %v9256_v39, %v5176_v55  ;;  %v5631_v8 = vpack.c.bf16 %v5519_v61, %v5519_v61  ;;  %v7195_v7 = vunpack.c.h.bf16 %v9245_v23  ;;  %v6078_v9 = vunpack.c.l.bf16 %v8055_v59  ;;  %v8385_v44 = vld [vmem:[%s8805_s12 + $0x60] sm:$0xff]   ;;  %v8111_v55 = vld [vmem:[%s8776_s22 + $0x68] sm:$0xff]  }
  0x9e   : > { %v6302_v10 = vunpack.c.l.bf16 %v8110_v60  ;;  %v5065_v12 = vpack.c.bf16 %v4953_v2, %v4953_v2  ;;  %v3834_v13 = vmax.f32 %v3274_v3, %v7418_v52  ;;  %v2155_v14 = vmax.f32 %v1595_v4, %v6747_v54  ;;  %v8056_v54 = vld [vmem:[%s8771_s14 + $0x68] sm:$0xff]  }
  0x9f   : > { %v5408_v11 = vadd.f32 %v9271_v50, %v5292_v1  ;;  %5744 = vst.msk [vmem:[%s8934_s0 + $0x4c] sm:$0xf] %vm5724_vm0, %v5631_v8  ;;  %v7419_v16 = vunpack.c.h.bf16 %v9251_v37  ;;  %v6526_v18 = vunpack.c.l.bf16 %v8165_v5  ;;  %v6750_v19 = vunpack.c.l.bf16 %v8220_v6  ;;  %v9315_v1 = vld [vmem:[%s8786_s29 + $0x68] sm:$0xff]  }
  0xa0   : > { %v1036_v17 = vmax.f32 %v6078_v9, %v6302_v10  ;;  %v5177_v21 = vunpack.c.l.bf16 %v5065_v12  ;;  %v4394_v22 = vmax.f32 %v3834_v13, %v7642_v62  ;;  %v2715_v24 = vmax.f32 %v2155_v14, %v6971_v0  ;;  %v9321_v10 = vld [vmem:[%s8793_s15 + $0x68] sm:$0xff]  }
  0xa1   : > { %v5520_v20 = vmax.f32 %v5408_v11, 0.0  ;;  %v7643_v35 = vunpack.c.h.bf16 %v9261_v47  ;;  %v7867_v26 = vunpack.c.h.bf16 %v9264_v48  ;;  %v6974_v29 = vunpack.c.l.bf16 %v9287_v15 }
  0xa2   : > { %v1596_v27 = vmax.f32 %v1036_v17, %v6526_v18  ;;  %v5293_v30 = vmul.f32 %v9256_v39, %v5177_v21  ;;  %v4954_v31 = vmax.f32 %v4394_v22, %v7866_v63  ;;  %v3275_v32 = vmax.f32 %v2715_v24, %v7195_v7 }
  0xa3   : > { %v5632_v23 = vpack.c.bf16 %v5520_v20, %v5520_v20  ;;  %v7198_v34 = vunpack.c.l.bf16 %v8330_v25  ;;  %v6079_v28 = vunpack.c.h.bf16 %v8055_v59  ;;  %v6303_v37 = vunpack.c.h.bf16 %v8110_v60  ;;  %v8166_v60 = vld [vmem:[%s8781_s26 + $0x68] sm:$0xff]  }
  0xa4   : > { %v2156_v33 = vmax.f32 %v1596_v27, %v6750_v19  ;;  %v5409_v38 = vadd.f32 %v9271_v50, %v5293_v30  ;;  %v5066_v40 = vpack.c.bf16 %v4954_v31, %v4954_v31  ;;  %v3835_v41 = vmax.f32 %v3275_v32, %v7419_v16  ;;  %v9336_v32 = vld [vmem:[%s8810_s16 + $0x68] sm:$0xff]  }
  0xa5   : > { %5745 = vst.msk [vmem:[%s8934_s0 + $0x50] sm:$0xf] %vm5724_vm0, %v5632_v23  ;;  %v6527_v43 = vunpack.c.h.bf16 %v8165_v5  ;;  %v7422_v46 = vunpack.c.l.bf16 %v8385_v44  ;;  %v1037_v47 = vmax.f32 %v6079_v28, %v6303_v37  ;;  %v6751_v48 = vunpack.c.h.bf16 %v8220_v6 }
  0xa6   : > { %v2716_v45 = vmax.f32 %v2156_v33, %v6974_v29  ;;  %v5521_v49 = vmax.f32 %v5409_v38, 0.0  ;;  %v5178_v51 = vunpack.c.l.bf16 %v5066_v40  ;;  %v4395_v52 = vmax.f32 %v3835_v41, %v7643_v35 }
  0xa7   : > { %v7646_v53 = vunpack.c.l.bf16 %v9299_v36  ;;  %v7870_v57 = vunpack.c.l.bf16 %v9305_v42  ;;  %v1597_v58 = vmax.f32 %v1037_v47, %v6527_v43  ;;  %v6975_v59 = vunpack.c.h.bf16 %v9287_v15  ;;  %v9325_v15 = vld [vmem:[%s8798_s25 + $0x68] sm:$0xff]   ;;  %v8057_v43 = vld [vmem:[%s8771_s14 + $0x70] sm:$0xff]  }
  0xa8   : > { %v3276_v56 = vmax.f32 %v2716_v45, %v7198_v34  ;;  %v5633_v61 = vpack.c.bf16 %v5521_v49, %v5521_v49  ;;  %v5294_v62 = vmul.f32 %v9256_v39, %v5178_v51  ;;  %v4955_v63 = vmax.f32 %v4395_v52, %v7867_v26  ;;  %v8112_v45 = vld [vmem:[%s8776_s22 + $0x70] sm:$0xff]  }
  0xa9   : > { %v7199_v0 = vunpack.c.h.bf16 %v8330_v25  ;;  %v2157_v3 = vmax.f32 %v1597_v58, %v6751_v48  ;;  %v6082_v4 = vunpack.c.l.bf16 %v8056_v54  ;;  %v6306_v5 = vunpack.c.l.bf16 %v8111_v55  ;;  %v9331_v25 = vld [vmem:[%s8805_s12 + $0x68] sm:$0xff]  }
  0xaa   : > { %v3836_v2 = vmax.f32 %v3276_v56, %v7422_v46  ;;  %5746 = vst.msk [vmem:[%s8934_s0 + $0x54] sm:$0xf] %vm5724_vm0, %v5633_v61  ;;  %v5410_v6 = vadd.f32 %v9271_v50, %v5294_v62  ;;  %v5067_v8 = vpack.c.bf16 %v4955_v63, %v4955_v63  ;;  %v7423_v7 = vunpack.c.h.bf16 %v8385_v44  ;;  %v9339_v44 = vld [vmem:[%s8818_s19 + $0x68] sm:$0xff]   ;;  %v8222_v56 = vld [vmem:[%s8786_s29 + $0x70] sm:$0xff]  }
  0xab   : > { %v6530_v9 = vunpack.c.l.bf16 %v8166_v60  ;;  %v2717_v12 = vmax.f32 %v2157_v3, %v6975_v59  ;;  %v1038_v13 = vmax.f32 %v6082_v4, %v6306_v5  ;;  %v6754_v14 = vunpack.c.l.bf16 %v9315_v1 }
  0xac   : > { %v4396_v11 = vmax.f32 %v3836_v2, %v7646_v53  ;;  %v5522_v16 = vmax.f32 %v5410_v6, 0.0  ;;  %v5179_v17 = vunpack.c.l.bf16 %v5067_v8  ;;  %v7647_v18 = vunpack.c.h.bf16 %v9299_v36 }
  0xad   : > { %v7871_v19 = vunpack.c.h.bf16 %v9305_v42  ;;  %v3277_v21 = vmax.f32 %v2717_v12, %v7199_v0  ;;  %v1598_v22 = vmax.f32 %v1038_v13, %v6530_v9  ;;  %v6978_v24 = vunpack.c.l.bf16 %v9321_v10 }
  0xae   : > { %v4956_v20 = vmax.f32 %v4396_v11, %v7870_v57  ;;  %v5634_v35 = vpack.c.bf16 %v5522_v16, %v5522_v16  ;;  %v5295_v26 = vmul.f32 %v9256_v39, %v5179_v17  ;;  %v7202_v27 = vunpack.c.l.bf16 %v9325_v15 }
  0xaf   : > { %v6083_v29 = vunpack.c.h.bf16 %v8056_v54  ;;  %v3837_v30 = vmax.f32 %v3277_v21, %v7423_v7  ;;  %v2158_v31 = vmax.f32 %v1598_v22, %v6754_v14  ;;  %v6307_v33 = vunpack.c.h.bf16 %v8111_v55  ;;  %v8167_v55 = vld [vmem:[%s8781_s26 + $0x70] sm:$0xff]  }
  0xb0   : > { %v5068_v23 = vpack.c.bf16 %v4956_v20, %v4956_v20  ;;  %5747 = vst.msk [vmem:[%s8934_s0 + $0x58] sm:$0xf] %vm5724_vm0, %v5634_v35  ;;  %v5411_v34 = vadd.f32 %v9271_v50, %v5295_v26  ;;  %v7426_v36 = vunpack.c.l.bf16 %v9331_v25  ;;  %v6531_v28 = vunpack.c.h.bf16 %v8166_v60  ;;  %v9369_v22 = vld [vmem:[%s8810_s16 + $0x70] sm:$0xff]  }
  0xb1   : > { %v6755_v37 = vunpack.c.h.bf16 %v9315_v1  ;;  %v4397_v40 = vmax.f32 %v3837_v30, %v7647_v18  ;;  %v2718_v41 = vmax.f32 %v2158_v31, %v6978_v24  ;;  %v1039_v42 = vmax.f32 %v6083_v29, %v6307_v33  ;;  %v9357_v1 = vld [vmem:[%s8793_s15 + $0x70] sm:$0xff]  }
  0xb2   : > { %v5180_v38 = vunpack.c.l.bf16 %v5068_v23  ;;  %v5523_v46 = vmax.f32 %v5411_v34, 0.0  ;;  %v7650_v47 = vunpack.c.l.bf16 %v9336_v32  ;;  %v7874_v48 = vunpack.c.l.bf16 %v9339_v44  ;;  %v9375_v29 = vld [vmem:[%s8818_s19 + $0x70] sm:$0xff]  }
  0xb3   : > { %v6979_v49 = vunpack.c.h.bf16 %v9321_v10  ;;  %v4957_v52 = vmax.f32 %v4397_v40, %v7871_v19  ;;  %v3278_v53 = vmax.f32 %v2718_v41, %v7202_v27  ;;  %v1599_v54 = vmax.f32 %v1039_v42, %v6531_v28  ;;  %v8332_v10 = vld [vmem:[%s8798_s25 + $0x70] sm:$0xff]  }
  0xb4   : > { %v5296_v51 = vmul.f32 %v9256_v39, %v5180_v38  ;;  %v5635_v57 = vpack.c.bf16 %v5523_v46, %v5523_v46  ;;  %v7203_v58 = vunpack.c.h.bf16 %v9325_v15  ;;  %v6086_v59 = vunpack.c.l.bf16 %v8057_v43  ;;  %v8387_v19 = vld [vmem:[%s8805_s12 + $0x70] sm:$0xff]   ;;  %v8113_v38 = vld [vmem:[%s8776_s22 + $0x78] sm:$0xff]  }
  0xb5   : > { %v6310_v60 = vunpack.c.l.bf16 %v8112_v45  ;;  %v5069_v62 = vpack.c.bf16 %v4957_v52, %v4957_v52  ;;  %v3838_v63 = vmax.f32 %v3278_v53, %v7426_v36  ;;  %v2159_v0 = vmax.f32 %v1599_v54, %v6755_v37  ;;  %v8058_v37 = vld [vmem:[%s8771_s14 + $0x78] sm:$0xff]  }
  0xb6   : > { %v5412_v61 = vadd.f32 %v9271_v50, %v5296_v51  ;;  %5748 = vst.msk [vmem:[%s8934_s0 + $0x5c] sm:$0xf] %vm5724_vm0, %v5635_v57  ;;  %v7427_v2 = vunpack.c.h.bf16 %v9331_v25  ;;  %v6534_v4 = vunpack.c.l.bf16 %v8167_v55  ;;  %v6758_v5 = vunpack.c.l.bf16 %v8222_v56  ;;  %v9385_v51 = vld [vmem:[%s8786_s29 + $0x78] sm:$0xff]  }
  0xb7   : > { %v1040_v3 = vmax.f32 %v6086_v59, %v6310_v60  ;;  %v5181_v8 = vunpack.c.l.bf16 %v5069_v62  ;;  %v4398_v7 = vmax.f32 %v3838_v63, %v7650_v47  ;;  %v2719_v9 = vmax.f32 %v2159_v0, %v6979_v49  ;;  %v9391_v60 = vld [vmem:[%s8793_s15 + $0x78] sm:$0xff]  }
  0xb8   : > { %v5524_v6 = vmax.f32 %v5412_v61, 0.0  ;;  %v7651_v11 = vunpack.c.h.bf16 %v9336_v32  ;;  %v7875_v12 = vunpack.c.h.bf16 %v9339_v44  ;;  %v6982_v14 = vunpack.c.l.bf16 %v9357_v1 }
  0xb9   : > { %v1600_v13 = vmax.f32 %v1040_v3, %v6534_v4  ;;  %v5297_v16 = vmul.f32 %v9256_v39, %v5181_v8  ;;  %v4958_v17 = vmax.f32 %v4398_v7, %v7874_v48  ;;  %v3279_v18 = vmax.f32 %v2719_v9, %v7203_v58 }
  0xba   : > { %v5636_v15 = vpack.c.bf16 %v5524_v6, %v5524_v6  ;;  %v7206_v21 = vunpack.c.l.bf16 %v8332_v10  ;;  %v6087_v24 = vunpack.c.h.bf16 %v8057_v43  ;;  %v6311_v25 = vunpack.c.h.bf16 %v8112_v45  ;;  %v8168_v45 = vld [vmem:[%s8781_s26 + $0x78] sm:$0xff]  }
  0xbb   : > { %v2160_v20 = vmax.f32 %v1600_v13, %v6758_v5  ;;  %v5413_v35 = vadd.f32 %v9271_v50, %v5297_v16  ;;  %v5070_v26 = vpack.c.bf16 %v4958_v17, %v4958_v17  ;;  %v3839_v27 = vmax.f32 %v3279_v18, %v7427_v2  ;;  %v9406_v18 = vld [vmem:[%s8810_s16 + $0x78] sm:$0xff]  }
  0xbc   : > { %5749 = vst.msk [vmem:[%s8934_s0 + $0x60] sm:$0xf] %vm5724_vm0, %v5636_v15  ;;  %v6535_v23 = vunpack.c.h.bf16 %v8167_v55  ;;  %v7430_v31 = vunpack.c.l.bf16 %v8387_v19  ;;  %v1041_v32 = vmax.f32 %v6087_v24, %v6311_v25  ;;  %v6759_v44 = vunpack.c.h.bf16 %v8222_v56 }
  0xbd   : > { %v2720_v30 = vmax.f32 %v2160_v20, %v6982_v14  ;;  %v5525_v33 = vmax.f32 %v5413_v35, 0.0  ;;  %v5182_v34 = vunpack.c.l.bf16 %v5070_v26  ;;  %v4399_v36 = vmax.f32 %v3839_v27, %v7651_v11 }
  0xbe   : > { %v7654_v28 = vunpack.c.l.bf16 %v9369_v22  ;;  %v7878_v41 = vunpack.c.l.bf16 %v9375_v29  ;;  %v1601_v42 = vmax.f32 %v1041_v32, %v6535_v23  ;;  %v6983_v43 = vunpack.c.h.bf16 %v9357_v1  ;;  %v9395_v1 = vld [vmem:[%s8798_s25 + $0x78] sm:$0xff]   ;;  %v8059_v23 = vld [vmem:[%s8771_s14 + $0x80] sm:$0xff]  }
  0xbf   : > { %v3280_v40 = vmax.f32 %v2720_v30, %v7206_v21  ;;  %v5637_v46 = vpack.c.bf16 %v5525_v33, %v5525_v33  ;;  %v5298_v47 = vmul.f32 %v9256_v39, %v5182_v34  ;;  %v4959_v48 = vmax.f32 %v4399_v36, %v7875_v12  ;;  %v8114_v30 = vld [vmem:[%s8776_s22 + $0x80] sm:$0xff]  }
  0xc0   : > { %v7207_v49 = vunpack.c.h.bf16 %v8332_v10  ;;  %v2161_v53 = vmax.f32 %v1601_v42, %v6759_v44  ;;  %v6090_v54 = vunpack.c.l.bf16 %v8058_v37  ;;  %v6314_v55 = vunpack.c.l.bf16 %v8113_v38  ;;  %v9401_v10 = vld [vmem:[%s8805_s12 + $0x78] sm:$0xff]  }
  0xc1   : > { %v3840_v52 = vmax.f32 %v3280_v40, %v7430_v31  ;;  %5750 = vst.msk [vmem:[%s8934_s0 + $0x64] sm:$0xf] %vm5724_vm0, %v5637_v46  ;;  %v5414_v56 = vadd.f32 %v9271_v50, %v5298_v47  ;;  %v5071_v57 = vpack.c.bf16 %v4959_v48, %v4959_v48  ;;  %v7431_v58 = vunpack.c.h.bf16 %v8387_v19  ;;  %v9409_v19 = vld [vmem:[%s8818_s19 + $0x78] sm:$0xff]   ;;  %v8224_v40 = vld [vmem:[%s8786_s29 + $0x80] sm:$0xff]  }
  0xc2   : > { %v6538_v59 = vunpack.c.l.bf16 %v8168_v45  ;;  %v2721_v62 = vmax.f32 %v2161_v53, %v6983_v43  ;;  %v1042_v63 = vmax.f32 %v6090_v54, %v6314_v55  ;;  %v6762_v0 = vunpack.c.l.bf16 %v9385_v51 }
  0xc3   : > { %v4400_v61 = vmax.f32 %v3840_v52, %v7654_v28  ;;  %v5526_v2 = vmax.f32 %v5414_v56, 0.0  ;;  %v5183_v3 = vunpack.c.l.bf16 %v5071_v57  ;;  %v7655_v4 = vunpack.c.h.bf16 %v9369_v22 }
  0xc4   : > { %v7879_v5 = vunpack.c.h.bf16 %v9375_v29  ;;  %v3281_v8 = vmax.f32 %v2721_v62, %v7207_v49  ;;  %v1602_v7 = vmax.f32 %v1042_v63, %v6538_v59  ;;  %v6986_v9 = vunpack.c.l.bf16 %v9391_v60 }
  0xc5   : > { %v4960_v6 = vmax.f32 %v4400_v61, %v7878_v41  ;;  %v5638_v11 = vpack.c.bf16 %v5526_v2, %v5526_v2  ;;  %v5299_v12 = vmul.f32 %v9256_v39, %v5183_v3  ;;  %v7210_v13 = vunpack.c.l.bf16 %v9395_v1 }
  0xc6   : > { %v6091_v14 = vunpack.c.h.bf16 %v8058_v37  ;;  %v3841_v16 = vmax.f32 %v3281_v8, %v7431_v58  ;;  %v2162_v17 = vmax.f32 %v1602_v7, %v6762_v0  ;;  %v6315_v20 = vunpack.c.h.bf16 %v8113_v38  ;;  %v8169_v38 = vld [vmem:[%s8781_s26 + $0x80] sm:$0xff]  }
  0xc7   : > { %v5072_v15 = vpack.c.bf16 %v4960_v6, %v4960_v6  ;;  %5751 = vst.msk [vmem:[%s8934_s0 + $0x68] sm:$0xf] %vm5724_vm0, %v5638_v11  ;;  %v5415_v21 = vadd.f32 %v9271_v50, %v5299_v12  ;;  %v7434_v22 = vunpack.c.l.bf16 %v9401_v10  ;;  %v6539_v24 = vunpack.c.h.bf16 %v8168_v45  ;;  %v9439_v7 = vld [vmem:[%s8810_s16 + $0x80] sm:$0xff]  }
  0xc8   : > { %v6763_v25 = vunpack.c.h.bf16 %v9385_v51  ;;  %v4401_v26 = vmax.f32 %v3841_v16, %v7655_v4  ;;  %v2722_v27 = vmax.f32 %v2162_v17, %v6986_v9  ;;  %v1043_v29 = vmax.f32 %v6091_v14, %v6315_v20  ;;  %v9427_v51 = vld [vmem:[%s8793_s15 + $0x80] sm:$0xff]  }
  0xc9   : > { %v5184_v35 = vunpack.c.l.bf16 %v5072_v15  ;;  %v5527_v31 = vmax.f32 %v5415_v21, 0.0  ;;  %v7658_v32 = vunpack.c.l.bf16 %v9406_v18  ;;  %v7882_v44 = vunpack.c.l.bf16 %v9409_v19  ;;  %v9445_v14 = vld [vmem:[%s8818_s19 + $0x80] sm:$0xff]  }
  0xca   : > { %v6987_v33 = vunpack.c.h.bf16 %v9391_v60  ;;  %v4961_v36 = vmax.f32 %v4401_v26, %v7879_v5  ;;  %v3282_v28 = vmax.f32 %v2722_v27, %v7210_v13  ;;  %v1603_v37 = vmax.f32 %v1043_v29, %v6539_v24  ;;  %v8334_v60 = vld [vmem:[%s8798_s25 + $0x80] sm:$0xff]  }
  0xcb   : > { %v5300_v34 = vmul.f32 %v9256_v39, %v5184_v35  ;;  %v5639_v41 = vpack.c.bf16 %v5527_v31, %v5527_v31  ;;  %v7211_v42 = vunpack.c.h.bf16 %v9395_v1  ;;  %v6094_v43 = vunpack.c.l.bf16 %v8059_v23  ;;  %v8389_v5 = vld [vmem:[%s8805_s12 + $0x80] sm:$0xff]   ;;  %v8115_v35 = vld [vmem:[%s8776_s22 + $0x88] sm:$0xff]  }
  0xcc   : > { %v6318_v45 = vunpack.c.l.bf16 %v8114_v30  ;;  %v5073_v47 = vpack.c.bf16 %v4961_v36, %v4961_v36  ;;  %v3842_v48 = vmax.f32 %v3282_v28, %v7434_v22  ;;  %v2163_v49 = vmax.f32 %v1603_v37, %v6763_v25  ;;  %v8060_v25 = vld [vmem:[%s8771_s14 + $0x88] sm:$0xff]  }
  0xcd   : > { %v5416_v46 = vadd.f32 %v9271_v50, %v5300_v34  ;;  %5752 = vst.msk [vmem:[%s8934_s0 + $0x6c] sm:$0xf] %vm5724_vm0, %v5639_v41  ;;  %v7435_v52 = vunpack.c.h.bf16 %v9401_v10  ;;  %v6542_v54 = vunpack.c.l.bf16 %v8169_v38  ;;  %v6766_v55 = vunpack.c.l.bf16 %v8224_v40  ;;  %v9455_v34 = vld [vmem:[%s8786_s29 + $0x88] sm:$0xff]  }
  0xce   : > { %v1044_v53 = vmax.f32 %v6094_v43, %v6318_v45  ;;  %v5185_v57 = vunpack.c.l.bf16 %v5073_v47  ;;  %v4402_v58 = vmax.f32 %v3842_v48, %v7658_v32  ;;  %v2723_v59 = vmax.f32 %v2163_v49, %v6987_v33  ;;  %v9461_v45 = vld [vmem:[%s8793_s15 + $0x88] sm:$0xff]  }
  0xcf   : > { %v5528_v56 = vmax.f32 %v5416_v46, 0.0  ;;  %v7659_v61 = vunpack.c.h.bf16 %v9406_v18  ;;  %v7883_v62 = vunpack.c.h.bf16 %v9409_v19  ;;  %v6990_v0 = vunpack.c.l.bf16 %v9427_v51 }
  0xd0   : > { %v1604_v63 = vmax.f32 %v1044_v53, %v6542_v54  ;;  %v5301_v2 = vmul.f32 %v9256_v39, %v5185_v57  ;;  %v4962_v3 = vmax.f32 %v4402_v58, %v7882_v44  ;;  %v3283_v4 = vmax.f32 %v2723_v59, %v7211_v42 }
  0xd1   : > { %v5640_v1 = vpack.c.bf16 %v5528_v56, %v5528_v56  ;;  %v7214_v8 = vunpack.c.l.bf16 %v8334_v60  ;;  %v6095_v9 = vunpack.c.h.bf16 %v8059_v23  ;;  %v6319_v10 = vunpack.c.h.bf16 %v8114_v30  ;;  %v8170_v30 = vld [vmem:[%s8781_s26 + $0x88] sm:$0xff]  }
  0xd2   : > { %v2164_v6 = vmax.f32 %v1604_v63, %v6766_v55  ;;  %v5417_v11 = vadd.f32 %v9271_v50, %v5301_v2  ;;  %v5074_v12 = vpack.c.bf16 %v4962_v3, %v4962_v3  ;;  %v3843_v13 = vmax.f32 %v3283_v4, %v7435_v52  ;;  %v9476_v4 = vld [vmem:[%s8810_s16 + $0x88] sm:$0xff]  }
  0xd3   : > { %5753 = vst.msk [vmem:[%s8934_s0 + $0x70] sm:$0xf] %vm5724_vm0, %v5640_v1  ;;  %v6543_v15 = vunpack.c.h.bf16 %v8169_v38  ;;  %v7438_v17 = vunpack.c.l.bf16 %v8389_v5  ;;  %v1045_v18 = vmax.f32 %v6095_v9, %v6319_v10  ;;  %v6767_v19 = vunpack.c.h.bf16 %v8224_v40 }
  0xd4   : > { %v2724_v16 = vmax.f32 %v2164_v6, %v6990_v0  ;;  %v5529_v20 = vmax.f32 %v5417_v11, 0.0  ;;  %v5186_v21 = vunpack.c.l.bf16 %v5074_v12  ;;  %v4403_v22 = vmax.f32 %v3843_v13, %v7659_v61 }
  0xd5   : > { %v7662_v24 = vunpack.c.l.bf16 %v9439_v7  ;;  %v7886_v27 = vunpack.c.l.bf16 %v9445_v14  ;;  %v1605_v29 = vmax.f32 %v1045_v18, %v6543_v15  ;;  %v6991_v23 = vunpack.c.h.bf16 %v9427_v51  ;;  %v9465_v51 = vld [vmem:[%s8798_s25 + $0x88] sm:$0xff]   ;;  %v8061_v15 = vld [vmem:[%s8771_s14 + $0x90] sm:$0xff]  }
  0xd6   : > { %v3284_v26 = vmax.f32 %v2724_v16, %v7214_v8  ;;  %v5641_v31 = vpack.c.bf16 %v5529_v20, %v5529_v20  ;;  %v5302_v32 = vmul.f32 %v9256_v39, %v5186_v21  ;;  %v4963_v44 = vmax.f32 %v4403_v22, %v7883_v62  ;;  %v8116_v16 = vld [vmem:[%s8776_s22 + $0x90] sm:$0xff]  }
  0xd7   : > { %v7215_v33 = vunpack.c.h.bf16 %v8334_v60  ;;  %v2165_v28 = vmax.f32 %v1605_v29, %v6767_v19  ;;  %v6098_v37 = vunpack.c.l.bf16 %v8060_v25  ;;  %v6322_v38 = vunpack.c.l.bf16 %v8115_v35  ;;  %v9471_v60 = vld [vmem:[%s8805_s12 + $0x88] sm:$0xff]  }
  0xd8   : > { %v3844_v36 = vmax.f32 %v3284_v26, %v7438_v17  ;;  %5754 = vst.msk [vmem:[%s8934_s0 + $0x74] sm:$0xf] %vm5724_vm0, %v5641_v31  ;;  %v5418_v40 = vadd.f32 %v9271_v50, %v5302_v32  ;;  %v5075_v41 = vpack.c.bf16 %v4963_v44, %v4963_v44  ;;  %v7439_v42 = vunpack.c.h.bf16 %v8389_v5  ;;  %v9479_v5 = vld [vmem:[%s8818_s19 + $0x88] sm:$0xff]   ;;  %v8226_v26 = vld [vmem:[%s8786_s29 + $0x90] sm:$0xff]  }
  0xd9   : > { %v6546_v43 = vunpack.c.l.bf16 %v8170_v30  ;;  %v2725_v47 = vmax.f32 %v2165_v28, %v6991_v23  ;;  %v1046_v48 = vmax.f32 %v6098_v37, %v6322_v38  ;;  %v6770_v49 = vunpack.c.l.bf16 %v9455_v34 }
  0xda   : > { %v4404_v46 = vmax.f32 %v3844_v36, %v7662_v24  ;;  %v5530_v52 = vmax.f32 %v5418_v40, 0.0  ;;  %v5187_v53 = vunpack.c.l.bf16 %v5075_v41  ;;  %v7663_v54 = vunpack.c.h.bf16 %v9439_v7 }
  0xdb   : > { %v7887_v55 = vunpack.c.h.bf16 %v9445_v14  ;;  %v3285_v57 = vmax.f32 %v2725_v47, %v7215_v33  ;;  %v1606_v58 = vmax.f32 %v1046_v48, %v6546_v43  ;;  %v6994_v59 = vunpack.c.l.bf16 %v9461_v45 }
  0xdc   : > { %v4964_v56 = vmax.f32 %v4404_v46, %v7886_v27  ;;  %v5642_v61 = vpack.c.bf16 %v5530_v52, %v5530_v52  ;;  %v5303_v62 = vmul.f32 %v9256_v39, %v5187_v53  ;;  %v7218_v63 = vunpack.c.l.bf16 %v9465_v51 }
  0xdd   : > { %v6099_v0 = vunpack.c.h.bf16 %v8060_v25  ;;  %v3845_v2 = vmax.f32 %v3285_v57, %v7439_v42  ;;  %v2166_v3 = vmax.f32 %v1606_v58, %v6770_v49  ;;  %v6323_v6 = vunpack.c.h.bf16 %v8115_v35  ;;  %v8171_v35 = vld [vmem:[%s8781_s26 + $0x90] sm:$0xff]  }
  0xde   : > { %v5076_v1 = vpack.c.bf16 %v4964_v56, %v4964_v56  ;;  %5755 = vst.msk [vmem:[%s8934_s0 + $0x78] sm:$0xf] %vm5724_vm0, %v5642_v61  ;;  %v5419_v8 = vadd.f32 %v9271_v50, %v5303_v62  ;;  %v7442_v7 = vunpack.c.l.bf16 %v9471_v60  ;;  %v6547_v9 = vunpack.c.h.bf16 %v8170_v30  ;;  %v9509_v58 = vld [vmem:[%s8810_s16 + $0x90] sm:$0xff]  }
  0xdf   : > { %v6771_v10 = vunpack.c.h.bf16 %v9455_v34  ;;  %v4405_v12 = vmax.f32 %v3845_v2, %v7663_v54  ;;  %v2726_v13 = vmax.f32 %v2166_v3, %v6994_v59  ;;  %v1047_v14 = vmax.f32 %v6099_v0, %v6323_v6  ;;  %v9497_v34 = vld [vmem:[%s8793_s15 + $0x90] sm:$0xff]  }
  0xe0   : > { %v5188_v11 = vunpack.c.l.bf16 %v5076_v1  ;;  %v5531_v17 = vmax.f32 %v5419_v8, 0.0  ;;  %v7666_v18 = vunpack.c.l.bf16 %v9476_v4  ;;  %v7890_v19 = vunpack.c.l.bf16 %v9479_v5  ;;  %v9515_v0 = vld [vmem:[%s8818_s19 + $0x90] sm:$0xff]  }
  0xe1   : > { %v6995_v20 = vunpack.c.h.bf16 %v9461_v45  ;;  %v4965_v22 = vmax.f32 %v4405_v12, %v7887_v55  ;;  %v3286_v24 = vmax.f32 %v2726_v13, %v7218_v63  ;;  %v1607_v25 = vmax.f32 %v1047_v14, %v6547_v9  ;;  %v8336_v45 = vld [vmem:[%s8798_s25 + $0x90] sm:$0xff]  }
  0xe2   : > { %v5304_v21 = vmul.f32 %v9256_v39, %v5188_v11  ;;  %v5643_v27 = vpack.c.bf16 %v5531_v17, %v5531_v17  ;;  %v7219_v29 = vunpack.c.h.bf16 %v9465_v51  ;;  %v6102_v23 = vunpack.c.l.bf16 %v8061_v15  ;;  %v8391_v55 = vld [vmem:[%s8805_s12 + $0x90] sm:$0xff]   ;;  %v8117_v11 = vld [vmem:[%s8776_s22 + $0x98] sm:$0xff]  }
  0xe3   : > { %v6326_v30 = vunpack.c.l.bf16 %v8116_v16  ;;  %v5077_v32 = vpack.c.bf16 %v4965_v22, %v4965_v22  ;;  %v3846_v44 = vmax.f32 %v3286_v24, %v7442_v7  ;;  %v2167_v33 = vmax.f32 %v1607_v25, %v6771_v10  ;;  %v8062_v10 = vld [vmem:[%s8771_s14 + $0x98] sm:$0xff]  }
  0xe4   : > { %v5420_v31 = vadd.f32 %v9271_v50, %v5304_v21  ;;  %5756 = vst.msk [vmem:[%s8934_s0 + $0x7c] sm:$0xf] %vm5724_vm0, %v5643_v27  ;;  %v7443_v36 = vunpack.c.h.bf16 %v9471_v60  ;;  %v6550_v37 = vunpack.c.l.bf16 %v8171_v35  ;;  %v6774_v38 = vunpack.c.l.bf16 %v8226_v26  ;;  %v9525_v21 = vld [vmem:[%s8786_s29 + $0x98] sm:$0xff]  }
  0xe5   : > { %v1048_v28 = vmax.f32 %v6102_v23, %v6326_v30  ;;  %v5189_v41 = vunpack.c.l.bf16 %v5077_v32  ;;  %v4406_v42 = vmax.f32 %v3846_v44, %v7666_v18  ;;  %v2727_v43 = vmax.f32 %v2167_v33, %v6995_v20  ;;  %v9531_v30 = vld [vmem:[%s8793_s15 + $0x98] sm:$0xff]  }
  0xe6   : > { %v5532_v40 = vmax.f32 %v5420_v31, 0.0  ;;  %v7667_v46 = vunpack.c.h.bf16 %v9476_v4  ;;  %v7891_v47 = vunpack.c.h.bf16 %v9479_v5  ;;  %v6998_v49 = vunpack.c.l.bf16 %v9497_v34 }
  0xe7   : > { %v1608_v48 = vmax.f32 %v1048_v28, %v6550_v37  ;;  %v5305_v52 = vmul.f32 %v9256_v39, %v5189_v41  ;;  %v4966_v53 = vmax.f32 %v4406_v42, %v7890_v19  ;;  %v3287_v54 = vmax.f32 %v2727_v43, %v7219_v29 }
  0xe8   : > { %v5644_v51 = vpack.c.bf16 %v5532_v40, %v5532_v40  ;;  %v7222_v57 = vunpack.c.l.bf16 %v8336_v45  ;;  %v6103_v59 = vunpack.c.h.bf16 %v8061_v15  ;;  %v6327_v60 = vunpack.c.h.bf16 %v8116_v16  ;;  %v8172_v16 = vld [vmem:[%s8781_s26 + $0x98] sm:$0xff]  }
  0xe9   : > { %v2168_v56 = vmax.f32 %v1608_v48, %v6774_v38  ;;  %v5421_v61 = vadd.f32 %v9271_v50, %v5305_v52  ;;  %v5078_v62 = vpack.c.bf16 %v4966_v53, %v4966_v53  ;;  %v3847_v63 = vmax.f32 %v3287_v54, %v7443_v36  ;;  %v9546_v54 = vld [vmem:[%s8810_s16 + $0x98] sm:$0xff]  }
  0xea   : > { %5757 = vst.msk [vmem:[%s8934_s0 + $0x80] sm:$0xf] %vm5724_vm0, %v5644_v51  ;;  %v6551_v1 = vunpack.c.h.bf16 %v8171_v35  ;;  %v7446_v3 = vunpack.c.l.bf16 %v8391_v55  ;;  %v1049_v4 = vmax.f32 %v6103_v59, %v6327_v60  ;;  %v6775_v5 = vunpack.c.h.bf16 %v8226_v26 }
  0xeb   : > { %v2728_v2 = vmax.f32 %v2168_v56, %v6998_v49  ;;  %v5533_v6 = vmax.f32 %v5421_v61, 0.0  ;;  %v5190_v8 = vunpack.c.l.bf16 %v5078_v62  ;;  %v4407_v7 = vmax.f32 %v3847_v63, %v7667_v46 }
  0xec   : > { %v7670_v9 = vunpack.c.l.bf16 %v9509_v58  ;;  %v7894_v13 = vunpack.c.l.bf16 %v9515_v0  ;;  %v1609_v14 = vmax.f32 %v1049_v4, %v6551_v1  ;;  %v6999_v15 = vunpack.c.h.bf16 %v9497_v34  ;;  %v9535_v34 = vld [vmem:[%s8798_s25 + $0x98] sm:$0xff]   ;;  %v8063_v1 = vld [vmem:[%s8771_s14 + $0xa0] sm:$0xff]  }
  0xed   : > { %v3288_v12 = vmax.f32 %v2728_v2, %v7222_v57  ;;  %v5645_v17 = vpack.c.bf16 %v5533_v6, %v5533_v6  ;;  %v5306_v18 = vmul.f32 %v9256_v39, %v5190_v8  ;;  %v4967_v19 = vmax.f32 %v4407_v7, %v7891_v47  ;;  %v8118_v2 = vld [vmem:[%s8776_s22 + $0xa0] sm:$0xff]  }
  0xee   : > { %v7223_v20 = vunpack.c.h.bf16 %v8336_v45  ;;  %v2169_v24 = vmax.f32 %v1609_v14, %v6775_v5  ;;  %v6106_v25 = vunpack.c.l.bf16 %v8062_v10  ;;  %v6330_v35 = vunpack.c.l.bf16 %v8117_v11  ;;  %v9541_v45 = vld [vmem:[%s8805_s12 + $0x98] sm:$0xff]  }
  0xef   : > { %v3848_v22 = vmax.f32 %v3288_v12, %v7446_v3  ;;  %5758 = vst.msk [vmem:[%s8934_s0 + $0x84] sm:$0xf] %vm5724_vm0, %v5645_v17  ;;  %v5422_v26 = vadd.f32 %v9271_v50, %v5306_v18  ;;  %v5079_v27 = vpack.c.bf16 %v4967_v19, %v4967_v19  ;;  %v7447_v29 = vunpack.c.h.bf16 %v8391_v55  ;;  %v9549_v55 = vld [vmem:[%s8818_s19 + $0x98] sm:$0xff]   ;;  %v9564_v12 = vld [vmem:[%s8786_s29 + $0xa0] sm:$0xff]  }
  0xf0   : > { %v6554_v23 = vunpack.c.l.bf16 %v8172_v16  ;;  %v2729_v32 = vmax.f32 %v2169_v24, %v6999_v15  ;;  %v1050_v44 = vmax.f32 %v6106_v25, %v6330_v35  ;;  %v6778_v33 = vunpack.c.l.bf16 %v9525_v21 }
  0xf1   : > { %v4408_v31 = vmax.f32 %v3848_v22, %v7670_v9  ;;  %v5534_v36 = vmax.f32 %v5422_v26, 0.0  ;;  %v5191_v28 = vunpack.c.l.bf16 %v5079_v27  ;;  %v7671_v37 = vunpack.c.h.bf16 %v9509_v58 }
  0xf2   : > { %v7895_v38 = vunpack.c.h.bf16 %v9515_v0  ;;  %v3289_v41 = vmax.f32 %v2729_v32, %v7223_v20  ;;  %v1610_v42 = vmax.f32 %v1050_v44, %v6554_v23  ;;  %v7002_v43 = vunpack.c.l.bf16 %v9531_v30 }
  0xf3   : > { %v4968_v40 = vmax.f32 %v4408_v31, %v7894_v13  ;;  %v5646_v46 = vpack.c.bf16 %v5534_v36, %v5534_v36  ;;  %v5307_v47 = vmul.f32 %v9256_v39, %v5191_v28  ;;  %v7226_v48 = vunpack.c.l.bf16 %v9535_v34 }
  0xf4   : > { %v6107_v49 = vunpack.c.h.bf16 %v8062_v10  ;;  %v3849_v52 = vmax.f32 %v3289_v41, %v7447_v29  ;;  %v2170_v53 = vmax.f32 %v1610_v42, %v6778_v33  ;;  %v6331_v56 = vunpack.c.h.bf16 %v8117_v11  ;;  %v8173_v11 = vld [vmem:[%s8781_s26 + $0xa0] sm:$0xff]  }
  0xf5   : > { %v5080_v51 = vpack.c.bf16 %v4968_v40, %v4968_v40  ;;  %5759 = vst.msk [vmem:[%s8934_s0 + $0x88] sm:$0xf] %vm5724_vm0, %v5646_v46  ;;  %v5423_v57 = vadd.f32 %v9271_v50, %v5307_v47  ;;  %v7450_v58 = vunpack.c.l.bf16 %v9541_v45  ;;  %v6555_v59 = vunpack.c.h.bf16 %v8172_v16  ;;  %v9587_v42 = vld [vmem:[%s8810_s16 + $0xa0] sm:$0xff]  }
  0xf6   : > { %v6779_v60 = vunpack.c.h.bf16 %v9525_v21  ;;  %v4409_v62 = vmax.f32 %v3849_v52, %v7671_v37  ;;  %v2730_v63 = vmax.f32 %v2170_v53, %v7002_v43  ;;  %v1051_v0 = vmax.f32 %v6107_v49, %v6331_v56  ;;  %v9569_v21 = vld [vmem:[%s8793_s15 + $0xa0] sm:$0xff]  }
  0xf7   : > { %v5192_v61 = vunpack.c.l.bf16 %v5080_v51  ;;  %v5535_v3 = vmax.f32 %v5423_v57, 0.0  ;;  %v7674_v4 = vunpack.c.l.bf16 %v9546_v54  ;;  %v7898_v5 = vunpack.c.l.bf16 %v9549_v55 }
  0xf8   : > { %v7003_v6 = vunpack.c.h.bf16 %v9531_v30  ;;  %v4969_v7 = vmax.f32 %v4409_v62, %v7895_v38  ;;  %v3290_v9 = vmax.f32 %v2730_v63, %v7226_v48  ;;  %v1611_v10 = vmax.f32 %v1051_v0, %v6555_v59  ;;  %v9576_v30 = vld [vmem:[%s8798_s25 + $0xa0] sm:$0xff]   ;;  %v8064_v59 = vld [vmem:[%s8771_s14 + $0xa8] sm:$0xff]  }
  0xf9   : > { %v5308_v8 = vmul.f32 %v9256_v39, %v5192_v61  ;;  %v5647_v13 = vpack.c.bf16 %v5535_v3, %v5535_v3  ;;  %v7227_v14 = vunpack.c.h.bf16 %v9535_v34  ;;  %v6110_v15 = vunpack.c.l.bf16 %v8063_v1  ;;  %v9583_v38 = vld [vmem:[%s8805_s12 + $0xa0] sm:$0xff]   ;;  %v8174_v0 = vld [vmem:[%s8781_s26 + $0xa8] sm:$0xff]  }
  0xfa   : > { %v6334_v16 = vunpack.c.l.bf16 %v8118_v2  ;;  %v5081_v18 = vpack.c.bf16 %v4969_v7, %v4969_v7  ;;  %v3850_v19 = vmax.f32 %v3290_v9, %v7450_v58  ;;  %v2171_v20 = vmax.f32 %v1611_v10, %v6779_v60 }
  0xfb   : > { %v5424_v17 = vadd.f32 %v9271_v50, %v5308_v8  ;;  %5760 = vst.msk [vmem:[%s8934_s0 + $0x8c] sm:$0xf] %vm5724_vm0, %v5647_v13  ;;  %v7451_v22 = vunpack.c.h.bf16 %v9541_v45  ;;  %v6558_v25 = vunpack.c.l.bf16 %v8173_v11  ;;  %v6782_v35 = vunpack.c.l.bf16 %v9564_v12 }
  0xfc   : > { %v1052_v24 = vmax.f32 %v6110_v15, %v6334_v16  ;;  %v5193_v27 = vunpack.c.l.bf16 %v5081_v18  ;;  %v4410_v29 = vmax.f32 %v3850_v19, %v7674_v4  ;;  %v2731_v23 = vmax.f32 %v2171_v20, %v7003_v6  ;;  %v9611_v6 = vld [vmem:[%s8786_s29 + $0xa8] sm:$0xff]  }
  0xfd   : > { %v5536_v26 = vmax.f32 %v5424_v17, 0.0  ;;  %v7675_v31 = vunpack.c.h.bf16 %v9546_v54  ;;  %v7899_v32 = vunpack.c.h.bf16 %v9549_v55  ;;  %v7006_v33 = vunpack.c.l.bf16 %v9569_v21  ;;  %v9623_v16 = vld [vmem:[%s8793_s15 + $0xa8] sm:$0xff]  }
  0xfe   : > { %v1612_v44 = vmax.f32 %v1052_v24, %v6558_v25  ;;  %v5309_v36 = vmul.f32 %v9256_v39, %v5193_v27  ;;  %v4970_v28 = vmax.f32 %v4410_v29, %v7898_v5  ;;  %v3291_v37 = vmax.f32 %v2731_v23, %v7227_v14  ;;  %v9593_v39 = vld [vmem:[%s8818_s19 + $0xa0] sm:$0xff]  }
  0xff   : > { %v5648_v34 = vpack.c.bf16 %v5536_v26, %v5536_v26  ;;  %v7230_v41 = vunpack.c.l.bf16 %v9576_v30  ;;  %v6111_v43 = vunpack.c.h.bf16 %v8063_v1  ;;  %v6335_v45 = vunpack.c.h.bf16 %v8118_v2  ;;  %v9606_v2 = vld [vmem:[%s10940_s9] ss:$0 sm:$0xff] }
 0x100   : > { %v2172_v40 = vmax.f32 %v1612_v44, %v6782_v35  ;;  %v5425_v46 = vadd.f32 %v9271_v50, %v5309_v36  ;;  %v5082_v47 = vpack.c.bf16 %v4970_v28, %v4970_v28  ;;  %v3851_v48 = vmax.f32 %v3291_v37, %v7451_v22  ;;  %v8119_v50 = vld [vmem:[%s8776_s22 + $0xa8] sm:$0xff]  }
 0x101   : > { %5761 = vst.msk [vmem:[%s8934_s0 + $0x90] sm:$0xf] %vm5724_vm0, %v5648_v34  ;;  %v6559_v49 = vunpack.c.h.bf16 %v8173_v11  ;;  %v7454_v52 = vunpack.c.l.bf16 %v9583_v38  ;;  %v1053_v53 = vmax.f32 %v6111_v43, %v6335_v45  ;;  %v6783_v54 = vunpack.c.h.bf16 %v9564_v12  ;;  %v9618_v11 = vld [vmem:[%s10941_s10] ss:$0 sm:$0xff]  ;;  %v9638_v37 = vld [vmem:[%s8810_s16 + $0xa8] sm:$0xff]  }
 0x102   : > { %v2732_v51 = vmax.f32 %v2172_v40, %v7006_v33  ;;  %v5537_v55 = vmax.f32 %v5425_v46, 0.0  ;;  %v5194_v56 = vunpack.c.l.bf16 %v5082_v47  ;;  %v4411_v57 = vmax.f32 %v3851_v48, %v7675_v31 }
 0x103   : > { %v7678_v58 = vunpack.c.l.bf16 %v9587_v42  ;;  %v7902_v61 = vunpack.c.l.bf16 %v9593_v39  ;;  %v1613_v62 = vmax.f32 %v1053_v53, %v6559_v49  ;;  %v7007_v63 = vunpack.c.h.bf16 %v9569_v21  ;;  %v9627_v21 = vld [vmem:[%s8798_s25 + $0xa8] sm:$0xff]   ;;  %v8065_v49 = vld [vmem:[%s8771_s14 + $0xb0] sm:$0xff]  }
 0x104   : > { %v3292_v60 = vmax.f32 %v2732_v51, %v7230_v41  ;;  %v5649_v1 = vpack.c.bf16 %v5537_v55, %v5537_v55  ;;  %v5310_v3 = vmul.f32 %v9606_v2, %v5194_v56  ;;  %v4971_v4 = vmax.f32 %v4411_v57, %v7899_v32  ;;  %v8120_v51 = vld [vmem:[%s8776_s22 + $0xb0] sm:$0xff]  }
 0x105   : > { %v7231_v5 = vunpack.c.h.bf16 %v9576_v30  ;;  %v2173_v7 = vmax.f32 %v1613_v62, %v6783_v54  ;;  %v6114_v9 = vunpack.c.l.bf16 %v8064_v59  ;;  %v6338_v10 = vunpack.c.l.bf16 %v8119_v50  ;;  %v9633_v30 = vld [vmem:[%s8805_s12 + $0xa8] sm:$0xff]  }
 0x106   : > { %v3852_v8 = vmax.f32 %v3292_v60, %v7454_v52  ;;  %5762 = vst.msk [vmem:[%s8934_s0 + $0x94] sm:$0xf] %vm5724_vm0, %v5649_v1  ;;  %v5426_v12 = vadd.f32 %v9618_v11, %v5310_v3  ;;  %v5083_v13 = vpack.c.bf16 %v4971_v4, %v4971_v4  ;;  %v7455_v14 = vunpack.c.h.bf16 %v9583_v38  ;;  %v9641_v38 = vld [vmem:[%s8818_s19 + $0xa8] sm:$0xff]   ;;  %v8230_v60 = vld [vmem:[%s8786_s29 + $0xb0] sm:$0xff]  }
 0x107   : > { %v6562_v15 = vunpack.c.l.bf16 %v8174_v0  ;;  %v2733_v18 = vmax.f32 %v2173_v7, %v7007_v63  ;;  %v1054_v19 = vmax.f32 %v6114_v9, %v6338_v10  ;;  %v6786_v20 = vunpack.c.l.bf16 %v9611_v6 }
 0x108   : > { %v4412_v17 = vmax.f32 %v3852_v8, %v7678_v58  ;;  %v5538_v22 = vmax.f32 %v5426_v12, 0.0  ;;  %v5195_v24 = vunpack.c.l.bf16 %v5083_v13  ;;  %v7679_v25 = vunpack.c.h.bf16 %v9587_v42 }
 0x109   : > { %v7903_v35 = vunpack.c.h.bf16 %v9593_v39  ;;  %v3293_v27 = vmax.f32 %v2733_v18, %v7231_v5  ;;  %v1614_v29 = vmax.f32 %v1054_v19, %v6562_v15  ;;  %v7010_v23 = vunpack.c.l.bf16 %v9623_v16 }
 0x10a   : > { %v4972_v26 = vmax.f32 %v4412_v17, %v7902_v61  ;;  %v5650_v31 = vpack.c.bf16 %v5538_v22, %v5538_v22  ;;  %v5311_v32 = vmul.f32 %v9606_v2, %v5195_v24  ;;  %v7234_v44 = vunpack.c.l.bf16 %v9627_v21 }
 0x10b   : > { %v6115_v33 = vunpack.c.h.bf16 %v8064_v59  ;;  %v3853_v36 = vmax.f32 %v3293_v27, %v7455_v14  ;;  %v2174_v28 = vmax.f32 %v1614_v29, %v6786_v20  ;;  %v6339_v40 = vunpack.c.h.bf16 %v8119_v50  ;;  %v8175_v50 = vld [vmem:[%s8781_s26 + $0xb0] sm:$0xff]  }
 0x10c   : > { %v5084_v34 = vpack.c.bf16 %v4972_v26, %v4972_v26  ;;  %5763 = vst.msk [vmem:[%s8934_s0 + $0x98] sm:$0xf] %vm5724_vm0, %v5650_v31  ;;  %v5427_v41 = vadd.f32 %v9618_v11, %v5311_v32  ;;  %v7458_v42 = vunpack.c.l.bf16 %v9633_v30  ;;  %v6563_v43 = vunpack.c.h.bf16 %v8174_v0  ;;  %v9671_v29 = vld [vmem:[%s8810_s16 + $0xb0] sm:$0xff]  }
 0x10d   : > { %v6787_v45 = vunpack.c.h.bf16 %v9611_v6  ;;  %v4413_v47 = vmax.f32 %v3853_v36, %v7679_v25  ;;  %v2734_v48 = vmax.f32 %v2174_v28, %v7010_v23  ;;  %v1055_v39 = vmax.f32 %v6115_v33, %v6339_v40  ;;  %v9659_v6 = vld [vmem:[%s8793_s15 + $0xb0] sm:$0xff]  }
 0x10e   : > { %v5196_v46 = vunpack.c.l.bf16 %v5084_v34  ;;  %v5539_v52 = vmax.f32 %v5427_v41, 0.0  ;;  %v7682_v53 = vunpack.c.l.bf16 %v9638_v37  ;;  %v7906_v54 = vunpack.c.l.bf16 %v9641_v38  ;;  %v9677_v33 = vld [vmem:[%s8818_s19 + $0xb0] sm:$0xff]  }
 0x10f   : > { %v7011_v55 = vunpack.c.h.bf16 %v9623_v16  ;;  %v4973_v57 = vmax.f32 %v4413_v47, %v7903_v35  ;;  %v3294_v58 = vmax.f32 %v2734_v48, %v7234_v44  ;;  %v1615_v59 = vmax.f32 %v1055_v39, %v6563_v43  ;;  %v8340_v16 = vld [vmem:[%s8798_s25 + $0xb0] sm:$0xff]  }
 0x110   : > { %v5312_v56 = vmul.f32 %v9606_v2, %v5196_v46  ;;  %v5651_v61 = vpack.c.bf16 %v5539_v52, %v5539_v52  ;;  %v7235_v62 = vunpack.c.h.bf16 %v9627_v21  ;;  %v6118_v63 = vunpack.c.l.bf16 %v8065_v49  ;;  %v8395_v35 = vld [vmem:[%s8805_s12 + $0xb0] sm:$0xff]   ;;  %v8121_v46 = vld [vmem:[%s8776_s22 + $0xb8] sm:$0xff]  }
 0x111   : > { %v6342_v0 = vunpack.c.l.bf16 %v8120_v51  ;;  %v5085_v3 = vpack.c.bf16 %v4973_v57, %v4973_v57  ;;  %v3854_v4 = vmax.f32 %v3294_v58, %v7458_v42  ;;  %v2175_v5 = vmax.f32 %v1615_v59, %v6787_v45  ;;  %v8066_v45 = vld [vmem:[%s8771_s14 + $0xb8] sm:$0xff]  }
 0x112   : > { %v5428_v1 = vadd.f32 %v9618_v11, %v5312_v56  ;;  %5764 = vst.msk [vmem:[%s8934_s0 + $0x9c] sm:$0xf] %vm5724_vm0, %v5651_v61  ;;  %v7459_v8 = vunpack.c.h.bf16 %v9633_v30  ;;  %v6566_v9 = vunpack.c.l.bf16 %v8175_v50  ;;  %v6790_v10 = vunpack.c.l.bf16 %v8230_v60  ;;  %v9687_v56 = vld [vmem:[%s8786_s29 + $0xb8] sm:$0xff]  }
 0x113   : > { %v1056_v7 = vmax.f32 %v6118_v63, %v6342_v0  ;;  %v5197_v13 = vunpack.c.l.bf16 %v5085_v3  ;;  %v4414_v14 = vmax.f32 %v3854_v4, %v7682_v53  ;;  %v2735_v15 = vmax.f32 %v2175_v5, %v7011_v55  ;;  %v9693_v0 = vld [vmem:[%s8793_s15 + $0xb8] sm:$0xff]  }
 0x114   : > { %v5540_v12 = vmax.f32 %v5428_v1, 0.0  ;;  %v7683_v17 = vunpack.c.h.bf16 %v9638_v37  ;;  %v7907_v18 = vunpack.c.h.bf16 %v9641_v38  ;;  %v7014_v20 = vunpack.c.l.bf16 %v9659_v6 }
 0x115   : > { %v1616_v19 = vmax.f32 %v1056_v7, %v6566_v9  ;;  %v5313_v22 = vmul.f32 %v9606_v2, %v5197_v13  ;;  %v4974_v24 = vmax.f32 %v4414_v14, %v7906_v54  ;;  %v3295_v25 = vmax.f32 %v2735_v15, %v7235_v62 }
 0x116   : > { %v5652_v21 = vpack.c.bf16 %v5540_v12, %v5540_v12  ;;  %v7238_v27 = vunpack.c.l.bf16 %v8340_v16  ;;  %v6119_v23 = vunpack.c.h.bf16 %v8065_v49  ;;  %v6343_v30 = vunpack.c.h.bf16 %v8120_v51  ;;  %v8176_v51 = vld [vmem:[%s8781_s26 + $0xb8] sm:$0xff]  }
 0x117   : > { %v2176_v26 = vmax.f32 %v1616_v19, %v6790_v10  ;;  %v5429_v31 = vadd.f32 %v9618_v11, %v5313_v22  ;;  %v5086_v32 = vpack.c.bf16 %v4974_v24, %v4974_v24  ;;  %v3855_v44 = vmax.f32 %v3295_v25, %v7459_v8  ;;  %v9708_v25 = vld [vmem:[%s8810_s16 + $0xb8] sm:$0xff]  }
 0x118   : > { %5765 = vst.msk [vmem:[%s8934_s0 + $0xa0] sm:$0xf] %vm5724_vm0, %v5652_v21  ;;  %v6567_v34 = vunpack.c.h.bf16 %v8175_v50  ;;  %v7462_v28 = vunpack.c.l.bf16 %v8395_v35  ;;  %v1057_v37 = vmax.f32 %v6119_v23, %v6343_v30  ;;  %v6791_v38 = vunpack.c.h.bf16 %v8230_v60 }
 0x119   : > { %v2736_v36 = vmax.f32 %v2176_v26, %v7014_v20  ;;  %v5541_v40 = vmax.f32 %v5429_v31, 0.0  ;;  %v5198_v41 = vunpack.c.l.bf16 %v5086_v32  ;;  %v4415_v42 = vmax.f32 %v3855_v44, %v7683_v17 }
 0x11a   : > { %v7686_v43 = vunpack.c.l.bf16 %v9671_v29  ;;  %v7910_v48 = vunpack.c.l.bf16 %v9677_v33  ;;  %v1617_v39 = vmax.f32 %v1057_v37, %v6567_v34  ;;  %v7015_v49 = vunpack.c.h.bf16 %v9659_v6  ;;  %v9697_v6 = vld [vmem:[%s8798_s25 + $0xb8] sm:$0xff]   ;;  %v8067_v34 = vld [vmem:[%s8771_s14 + $0xc0] sm:$0xff]  }
 0x11b   : > { %v3296_v47 = vmax.f32 %v2736_v36, %v7238_v27  ;;  %v5653_v52 = vpack.c.bf16 %v5541_v40, %v5541_v40  ;;  %v5314_v53 = vmul.f32 %v9606_v2, %v5198_v41  ;;  %v4975_v54 = vmax.f32 %v4415_v42, %v7907_v18  ;;  %v8122_v36 = vld [vmem:[%s8776_s22 + $0xc0] sm:$0xff]  }
 0x11c   : > { %v7239_v55 = vunpack.c.h.bf16 %v8340_v16  ;;  %v2177_v58 = vmax.f32 %v1617_v39, %v6791_v38  ;;  %v6122_v59 = vunpack.c.l.bf16 %v8066_v45  ;;  %v6346_v50 = vunpack.c.l.bf16 %v8121_v46  ;;  %v9703_v16 = vld [vmem:[%s8805_s12 + $0xb8] sm:$0xff]  }
 0x11d   : > { %v3856_v57 = vmax.f32 %v3296_v47, %v7462_v28  ;;  %5766 = vst.msk [vmem:[%s8934_s0 + $0xa4] sm:$0xf] %vm5724_vm0, %v5653_v52  ;;  %v5430_v60 = vadd.f32 %v9618_v11, %v5314_v53  ;;  %v5087_v61 = vpack.c.bf16 %v4975_v54, %v4975_v54  ;;  %v7463_v62 = vunpack.c.h.bf16 %v8395_v35  ;;  %v9711_v35 = vld [vmem:[%s8818_s19 + $0xb8] sm:$0xff]   ;;  %v8232_v47 = vld [vmem:[%s8786_s29 + $0xc0] sm:$0xff]  }
 0x11e   : > { %v6570_v63 = vunpack.c.l.bf16 %v8176_v51  ;;  %v2737_v3 = vmax.f32 %v2177_v58, %v7015_v49  ;;  %v1058_v4 = vmax.f32 %v6122_v59, %v6346_v50  ;;  %v6794_v5 = vunpack.c.l.bf16 %v9687_v56 }
 0x11f   : > { %v4416_v1 = vmax.f32 %v3856_v57, %v7686_v43  ;;  %v5542_v8 = vmax.f32 %v5430_v60, 0.0  ;;  %v5199_v7 = vunpack.c.l.bf16 %v5087_v61  ;;  %v7687_v9 = vunpack.c.h.bf16 %v9671_v29 }
 0x120   : > { %v7911_v10 = vunpack.c.h.bf16 %v9677_v33  ;;  %v3297_v13 = vmax.f32 %v2737_v3, %v7239_v55  ;;  %v1618_v14 = vmax.f32 %v1058_v4, %v6570_v63  ;;  %v7018_v15 = vunpack.c.l.bf16 %v9693_v0 }
 0x121   : > { %v4976_v12 = vmax.f32 %v4416_v1, %v7910_v48  ;;  %v5654_v17 = vpack.c.bf16 %v5542_v8, %v5542_v8  ;;  %v5315_v18 = vmul.f32 %v9606_v2, %v5199_v7  ;;  %v7242_v19 = vunpack.c.l.bf16 %v9697_v6 }
 0x122   : > { %v6123_v20 = vunpack.c.h.bf16 %v8066_v45  ;;  %v3857_v22 = vmax.f32 %v3297_v13, %v7463_v62  ;;  %v2178_v24 = vmax.f32 %v1618_v14, %v6794_v5  ;;  %v6347_v26 = vunpack.c.h.bf16 %v8121_v46  ;;  %v8177_v46 = vld [vmem:[%s8781_s26 + $0xc0] sm:$0xff]  }
 0x123   : > { %v5088_v21 = vpack.c.bf16 %v4976_v12, %v4976_v12  ;;  %5767 = vst.msk [vmem:[%s8934_s0 + $0xa8] sm:$0xf] %vm5724_vm0, %v5654_v17  ;;  %v5431_v27 = vadd.f32 %v9618_v11, %v5315_v18  ;;  %v7466_v29 = vunpack.c.l.bf16 %v9703_v16  ;;  %v6571_v23 = vunpack.c.h.bf16 %v8176_v51  ;;  %v9741_v14 = vld [vmem:[%s8810_s16 + $0xc0] sm:$0xff]  }
 0x124   : > { %v6795_v30 = vunpack.c.h.bf16 %v9687_v56  ;;  %v4417_v32 = vmax.f32 %v3857_v22, %v7687_v9  ;;  %v2738_v44 = vmax.f32 %v2178_v24, %v7018_v15  ;;  %v1059_v33 = vmax.f32 %v6123_v20, %v6347_v26  ;;  %v9729_v56 = vld [vmem:[%s8793_s15 + $0xc0] sm:$0xff]  }
 0x125   : > { %v5200_v31 = vunpack.c.l.bf16 %v5088_v21  ;;  %v5543_v28 = vmax.f32 %v5431_v27, 0.0  ;;  %v7690_v37 = vunpack.c.l.bf16 %v9708_v25  ;;  %v7914_v38 = vunpack.c.l.bf16 %v9711_v35  ;;  %v9747_v20 = vld [vmem:[%s8818_s19 + $0xc0] sm:$0xff]  }
 0x126   : > { %v7019_v40 = vunpack.c.h.bf16 %v9693_v0  ;;  %v4977_v42 = vmax.f32 %v4417_v32, %v7911_v10  ;;  %v3298_v43 = vmax.f32 %v2738_v44, %v7242_v19  ;;  %v1619_v45 = vmax.f32 %v1059_v33, %v6571_v23  ;;  %v8342_v0 = vld [vmem:[%s8798_s25 + $0xc0] sm:$0xff]  }
 0x127   : > { %v5316_v41 = vmul.f32 %v9606_v2, %v5200_v31  ;;  %v5655_v48 = vpack.c.bf16 %v5543_v28, %v5543_v28  ;;  %v7243_v39 = vunpack.c.h.bf16 %v9697_v6  ;;  %v6126_v49 = vunpack.c.l.bf16 %v8067_v34  ;;  %v8397_v10 = vld [vmem:[%s8805_s12 + $0xc0] sm:$0xff]   ;;  %v8123_v31 = vld [vmem:[%s8776_s22 + $0xc8] sm:$0xff]  }
 0x128   : > { %v6350_v51 = vunpack.c.l.bf16 %v8122_v36  ;;  %v5089_v53 = vpack.c.bf16 %v4977_v42, %v4977_v42  ;;  %v3858_v54 = vmax.f32 %v3298_v43, %v7466_v29  ;;  %v2179_v55 = vmax.f32 %v1619_v45, %v6795_v30  ;;  %v8068_v30 = vld [vmem:[%s8771_s14 + $0xc8] sm:$0xff]  }
 0x129   : > { %v5432_v52 = vadd.f32 %v9618_v11, %v5316_v41  ;;  %5768 = vst.msk [vmem:[%s8934_s0 + $0xac] sm:$0xf] %vm5724_vm0, %v5655_v48  ;;  %v7467_v57 = vunpack.c.h.bf16 %v9703_v16  ;;  %v6574_v59 = vunpack.c.l.bf16 %v8177_v46  ;;  %v6798_v50 = vunpack.c.l.bf16 %v8232_v47  ;;  %v9757_v41 = vld [vmem:[%s8786_s29 + $0xc8] sm:$0xff]  }
 0x12a   : > { %v1060_v58 = vmax.f32 %v6126_v49, %v6350_v51  ;;  %v5201_v61 = vunpack.c.l.bf16 %v5089_v53  ;;  %v4418_v62 = vmax.f32 %v3858_v54, %v7690_v37  ;;  %v2739_v63 = vmax.f32 %v2179_v55, %v7019_v40  ;;  %v9763_v51 = vld [vmem:[%s8793_s15 + $0xc8] sm:$0xff]  }
 0x12b   : > { %v5544_v60 = vmax.f32 %v5432_v52, 0.0  ;;  %v7691_v1 = vunpack.c.h.bf16 %v9708_v25  ;;  %v7915_v3 = vunpack.c.h.bf16 %v9711_v35  ;;  %v7022_v5 = vunpack.c.l.bf16 %v9729_v56 }
 0x12c   : > { %v1620_v4 = vmax.f32 %v1060_v58, %v6574_v59  ;;  %v5317_v8 = vmul.f32 %v9606_v2, %v5201_v61  ;;  %v4978_v7 = vmax.f32 %v4418_v62, %v7914_v38  ;;  %v3299_v9 = vmax.f32 %v2739_v63, %v7243_v39 }
 0x12d   : > { %v5656_v6 = vpack.c.bf16 %v5544_v60, %v5544_v60  ;;  %v7246_v13 = vunpack.c.l.bf16 %v8342_v0  ;;  %v6127_v15 = vunpack.c.h.bf16 %v8067_v34  ;;  %v6351_v16 = vunpack.c.h.bf16 %v8122_v36  ;;  %v8178_v36 = vld [vmem:[%s8781_s26 + $0xc8] sm:$0xff]  }
 0x12e   : > { %v2180_v12 = vmax.f32 %v1620_v4, %v6798_v50  ;;  %v5433_v17 = vadd.f32 %v9618_v11, %v5317_v8  ;;  %v5090_v18 = vpack.c.bf16 %v4978_v7, %v4978_v7  ;;  %v3859_v19 = vmax.f32 %v3299_v9, %v7467_v57  ;;  %v9778_v9 = vld [vmem:[%s8810_s16 + $0xc8] sm:$0xff]  }
 0x12f   : > { %5769 = vst.msk [vmem:[%s8934_s0 + $0xb0] sm:$0xf] %vm5724_vm0, %v5656_v6  ;;  %v6575_v21 = vunpack.c.h.bf16 %v8177_v46  ;;  %v7470_v24 = vunpack.c.l.bf16 %v8397_v10  ;;  %v1061_v25 = vmax.f32 %v6127_v15, %v6351_v16  ;;  %v6799_v35 = vunpack.c.h.bf16 %v8232_v47 }
 0x130   : > { %v2740_v22 = vmax.f32 %v2180_v12, %v7022_v5  ;;  %v5545_v26 = vmax.f32 %v5433_v17, 0.0  ;;  %v5202_v27 = vunpack.c.l.bf16 %v5090_v18  ;;  %v4419_v29 = vmax.f32 %v3859_v19, %v7691_v1 }
 0x131   : > { %v7694_v23 = vunpack.c.l.bf16 %v9741_v14  ;;  %v7918_v44 = vunpack.c.l.bf16 %v9747_v20  ;;  %v1621_v33 = vmax.f32 %v1061_v25, %v6575_v21  ;;  %v7023_v34 = vunpack.c.h.bf16 %v9729_v56  ;;  %v9767_v56 = vld [vmem:[%s8798_s25 + $0xc8] sm:$0xff]   ;;  %v8069_v21 = vld [vmem:[%s8771_s14 + $0xd0] sm:$0xff]  }
 0x132   : > { %v3300_v32 = vmax.f32 %v2740_v22, %v7246_v13  ;;  %v5657_v28 = vpack.c.bf16 %v5545_v26, %v5545_v26  ;;  %v5318_v37 = vmul.f32 %v9606_v2, %v5202_v27  ;;  %v4979_v38 = vmax.f32 %v4419_v29, %v7915_v3  ;;  %v8124_v22 = vld [vmem:[%s8776_s22 + $0xd0] sm:$0xff]  }
 0x133   : > { %v7247_v40 = vunpack.c.h.bf16 %v8342_v0  ;;  %v2181_v43 = vmax.f32 %v1621_v33, %v6799_v35  ;;  %v6130_v45 = vunpack.c.l.bf16 %v8068_v30  ;;  %v6354_v46 = vunpack.c.l.bf16 %v8123_v31  ;;  %v9773_v0 = vld [vmem:[%s8805_s12 + $0xc8] sm:$0xff]  }
 0x134   : > { %v3860_v42 = vmax.f32 %v3300_v32, %v7470_v24  ;;  %5770 = vst.msk [vmem:[%s8934_s0 + $0xb4] sm:$0xf] %vm5724_vm0, %v5657_v28  ;;  %v5434_v47 = vadd.f32 %v9618_v11, %v5318_v37  ;;  %v5091_v48 = vpack.c.bf16 %v4979_v38, %v4979_v38  ;;  %v7471_v39 = vunpack.c.h.bf16 %v8397_v10  ;;  %v9781_v10 = vld [vmem:[%s8818_s19 + $0xc8] sm:$0xff]   ;;  %v8234_v32 = vld [vmem:[%s8786_s29 + $0xd0] sm:$0xff]  }
 0x135   : > { %v6578_v49 = vunpack.c.l.bf16 %v8178_v36  ;;  %v2741_v53 = vmax.f32 %v2181_v43, %v7023_v34  ;;  %v1062_v54 = vmax.f32 %v6130_v45, %v6354_v46  ;;  %v6802_v55 = vunpack.c.l.bf16 %v9757_v41 }
 0x136   : > { %v4420_v52 = vmax.f32 %v3860_v42, %v7694_v23  ;;  %v5546_v57 = vmax.f32 %v5434_v47, 0.0  ;;  %v5203_v58 = vunpack.c.l.bf16 %v5091_v48  ;;  %v7695_v59 = vunpack.c.h.bf16 %v9741_v14 }
 0x137   : > { %v7919_v50 = vunpack.c.h.bf16 %v9747_v20  ;;  %v3301_v61 = vmax.f32 %v2741_v53, %v7247_v40  ;;  %v1622_v62 = vmax.f32 %v1062_v54, %v6578_v49  ;;  %v7026_v63 = vunpack.c.l.bf16 %v9763_v51 }
 0x138   : > { %v4980_v60 = vmax.f32 %v4420_v52, %v7918_v44  ;;  %v5658_v1 = vpack.c.bf16 %v5546_v57, %v5546_v57  ;;  %v5319_v3 = vmul.f32 %v9606_v2, %v5203_v58  ;;  %v7250_v4 = vunpack.c.l.bf16 %v9767_v56 }
 0x139   : > { %v6131_v5 = vunpack.c.h.bf16 %v8068_v30  ;;  %v3861_v8 = vmax.f32 %v3301_v61, %v7471_v39  ;;  %v2182_v7 = vmax.f32 %v1622_v62, %v6802_v55  ;;  %v6355_v12 = vunpack.c.h.bf16 %v8123_v31  ;;  %v8179_v31 = vld [vmem:[%s8781_s26 + $0xd0] sm:$0xff]  }
 0x13a   : > { %v5092_v6 = vpack.c.bf16 %v4980_v60, %v4980_v60  ;;  %5771 = vst.msk [vmem:[%s8934_s0 + $0xb8] sm:$0xf] %vm5724_vm0, %v5658_v1  ;;  %v5435_v13 = vadd.f32 %v9618_v11, %v5319_v3  ;;  %v7474_v14 = vunpack.c.l.bf16 %v9773_v0  ;;  %v6579_v15 = vunpack.c.h.bf16 %v8178_v36  ;;  %v9811_v62 = vld [vmem:[%s8810_s16 + $0xd0] sm:$0xff]  }
 0x13b   : > { %v6803_v16 = vunpack.c.h.bf16 %v9757_v41  ;;  %v4421_v18 = vmax.f32 %v3861_v8, %v7695_v59  ;;  %v2742_v19 = vmax.f32 %v2182_v7, %v7026_v63  ;;  %v1063_v20 = vmax.f32 %v6131_v5, %v6355_v12  ;;  %v9799_v41 = vld [vmem:[%s8793_s15 + $0xd0] sm:$0xff]  }
 0x13c   : > { %v5204_v17 = vunpack.c.l.bf16 %v5092_v6  ;;  %v5547_v24 = vmax.f32 %v5435_v13, 0.0  ;;  %v7698_v25 = vunpack.c.l.bf16 %v9778_v9  ;;  %v7922_v35 = vunpack.c.l.bf16 %v9781_v10  ;;  %v9817_v5 = vld [vmem:[%s8818_s19 + $0xd0] sm:$0xff]  }
 0x13d   : > { %v7027_v26 = vunpack.c.h.bf16 %v9763_v51  ;;  %v4981_v29 = vmax.f32 %v4421_v18, %v7919_v50  ;;  %v3302_v23 = vmax.f32 %v2742_v19, %v7250_v4  ;;  %v1623_v30 = vmax.f32 %v1063_v20, %v6579_v15  ;;  %v8344_v51 = vld [vmem:[%s8798_s25 + $0xd0] sm:$0xff]  }
 0x13e   : > { %v5320_v27 = vmul.f32 %v9606_v2, %v5204_v17  ;;  %v5659_v44 = vpack.c.bf16 %v5547_v24, %v5547_v24  ;;  %v7251_v33 = vunpack.c.h.bf16 %v9767_v56  ;;  %v6134_v34 = vunpack.c.l.bf16 %v8069_v21  ;;  %v8399_v50 = vld [vmem:[%s8805_s12 + $0xd0] sm:$0xff]   ;;  %v8125_v17 = vld [vmem:[%s8776_s22 + $0xd8] sm:$0xff]  }
 0x13f   : > { %v6358_v36 = vunpack.c.l.bf16 %v8124_v22  ;;  %v5093_v37 = vpack.c.bf16 %v4981_v29, %v4981_v29  ;;  %v3862_v38 = vmax.f32 %v3302_v23, %v7474_v14  ;;  %v2183_v40 = vmax.f32 %v1623_v30, %v6803_v16  ;;  %v8070_v16 = vld [vmem:[%s8771_s14 + $0xd8] sm:$0xff]  }
 0x140   : > { %v5436_v28 = vadd.f32 %v9618_v11, %v5320_v27  ;;  %5772 = vst.msk [vmem:[%s8934_s0 + $0xbc] sm:$0xf] %vm5724_vm0, %v5659_v44  ;;  %v7475_v42 = vunpack.c.h.bf16 %v9773_v0  ;;  %v6582_v45 = vunpack.c.l.bf16 %v8179_v31  ;;  %v6806_v46 = vunpack.c.l.bf16 %v8234_v32  ;;  %v9827_v27 = vld [vmem:[%s8786_s29 + $0xd8] sm:$0xff]  }
 0x141   : > { %v1064_v43 = vmax.f32 %v6134_v34, %v6358_v36  ;;  %v5205_v48 = vunpack.c.l.bf16 %v5093_v37  ;;  %v4422_v39 = vmax.f32 %v3862_v38, %v7698_v25  ;;  %v2743_v49 = vmax.f32 %v2183_v40, %v7027_v26  ;;  %v9833_v36 = vld [vmem:[%s8793_s15 + $0xd8] sm:$0xff]  }
 0x142   : > { %v5548_v47 = vmax.f32 %v5436_v28, 0.0  ;;  %v7699_v52 = vunpack.c.h.bf16 %v9778_v9  ;;  %v7923_v53 = vunpack.c.h.bf16 %v9781_v10  ;;  %v7030_v55 = vunpack.c.l.bf16 %v9799_v41 }
 0x143   : > { %v1624_v54 = vmax.f32 %v1064_v43, %v6582_v45  ;;  %v5321_v57 = vmul.f32 %v9606_v2, %v5205_v48  ;;  %v4982_v58 = vmax.f32 %v4422_v39, %v7922_v35  ;;  %v3303_v59 = vmax.f32 %v2743_v49, %v7251_v33 }
 0x144   : > { %v5660_v56 = vpack.c.bf16 %v5548_v47, %v5548_v47  ;;  %v7254_v61 = vunpack.c.l.bf16 %v8344_v51  ;;  %v6135_v63 = vunpack.c.h.bf16 %v8069_v21  ;;  %v6359_v0 = vunpack.c.h.bf16 %v8124_v22  ;;  %v8180_v22 = vld [vmem:[%s8781_s26 + $0xd8] sm:$0xff]  }
 0x145   : > { %v2184_v60 = vmax.f32 %v1624_v54, %v6806_v46  ;;  %v5437_v1 = vadd.f32 %v9618_v11, %v5321_v57  ;;  %v5094_v3 = vpack.c.bf16 %v4982_v58, %v4982_v58  ;;  %v3863_v4 = vmax.f32 %v3303_v59, %v7475_v42  ;;  %v9848_v59 = vld [vmem:[%s8810_s16 + $0xd8] sm:$0xff]  }
 0x146   : > { %5773 = vst.msk [vmem:[%s8934_s0 + $0xc0] sm:$0xf] %vm5724_vm0, %v5660_v56  ;;  %v6583_v6 = vunpack.c.h.bf16 %v8179_v31  ;;  %v7478_v7 = vunpack.c.l.bf16 %v8399_v50  ;;  %v1065_v9 = vmax.f32 %v6135_v63, %v6359_v0  ;;  %v6807_v10 = vunpack.c.h.bf16 %v8234_v32 }
 0x147   : > { %v2744_v8 = vmax.f32 %v2184_v60, %v7030_v55  ;;  %v5549_v12 = vmax.f32 %v5437_v1, 0.0  ;;  %v5206_v13 = vunpack.c.l.bf16 %v5094_v3  ;;  %v4423_v14 = vmax.f32 %v3863_v4, %v7699_v52 }
 0x148   : > { %v7702_v15 = vunpack.c.l.bf16 %v9811_v62  ;;  %v7926_v19 = vunpack.c.l.bf16 %v9817_v5  ;;  %v1625_v20 = vmax.f32 %v1065_v9, %v6583_v6  ;;  %v7031_v21 = vunpack.c.h.bf16 %v9799_v41  ;;  %v9837_v41 = vld [vmem:[%s8798_s25 + $0xd8] sm:$0xff]   ;;  %v8071_v6 = vld [vmem:[%s8771_s14 + $0xe0] sm:$0xff]  }
 0x149   : > { %v3304_v18 = vmax.f32 %v2744_v8, %v7254_v61  ;;  %v5661_v24 = vpack.c.bf16 %v5549_v12, %v5549_v12  ;;  %v5322_v25 = vmul.f32 %v9606_v2, %v5206_v13  ;;  %v4983_v35 = vmax.f32 %v4423_v14, %v7923_v53  ;;  %v8126_v8 = vld [vmem:[%s8776_s22 + $0xe0] sm:$0xff]  }
 0x14a   : > { %v7255_v26 = vunpack.c.h.bf16 %v8344_v51  ;;  %v2185_v23 = vmax.f32 %v1625_v20, %v6807_v10  ;;  %v6138_v30 = vunpack.c.l.bf16 %v8070_v16  ;;  %v6362_v31 = vunpack.c.l.bf16 %v8125_v17  ;;  %v9843_v51 = vld [vmem:[%s8805_s12 + $0xd8] sm:$0xff]  }
 0x14b   : > { %v3864_v29 = vmax.f32 %v3304_v18, %v7478_v7  ;;  %5774 = vst.msk [vmem:[%s8934_s0 + $0xc4] sm:$0xf] %vm5724_vm0, %v5661_v24  ;;  %v5438_v32 = vadd.f32 %v9618_v11, %v5322_v25  ;;  %v5095_v44 = vpack.c.bf16 %v4983_v35, %v4983_v35  ;;  %v7479_v33 = vunpack.c.h.bf16 %v8399_v50  ;;  %v9851_v50 = vld [vmem:[%s8818_s19 + $0xd8] sm:$0xff]   ;;  %v8236_v18 = vld [vmem:[%s8786_s29 + $0xe0] sm:$0xff]  }
 0x14c   : > { %v6586_v34 = vunpack.c.l.bf16 %v8180_v22  ;;  %v2745_v37 = vmax.f32 %v2185_v23, %v7031_v21  ;;  %v1066_v38 = vmax.f32 %v6138_v30, %v6362_v31  ;;  %v6810_v40 = vunpack.c.l.bf16 %v9827_v27 }
 0x14d   : > { %v4424_v28 = vmax.f32 %v3864_v29, %v7702_v15  ;;  %v5550_v42 = vmax.f32 %v5438_v32, 0.0  ;;  %v5207_v43 = vunpack.c.l.bf16 %v5095_v44  ;;  %v7703_v45 = vunpack.c.h.bf16 %v9811_v62 }
 0x14e   : > { %v7927_v46 = vunpack.c.h.bf16 %v9817_v5  ;;  %v3305_v48 = vmax.f32 %v2745_v37, %v7255_v26  ;;  %v1626_v39 = vmax.f32 %v1066_v38, %v6586_v34  ;;  %v7034_v49 = vunpack.c.l.bf16 %v9833_v36 }
 0x14f   : > { %v4984_v47 = vmax.f32 %v4424_v28, %v7926_v19  ;;  %v5662_v52 = vpack.c.bf16 %v5550_v42, %v5550_v42  ;;  %v5323_v53 = vmul.f32 %v9606_v2, %v5207_v43  ;;  %v7258_v54 = vunpack.c.l.bf16 %v9837_v41 }
 0x150   : > { %v6139_v55 = vunpack.c.h.bf16 %v8070_v16  ;;  %v3865_v57 = vmax.f32 %v3305_v48, %v7479_v33  ;;  %v2186_v58 = vmax.f32 %v1626_v39, %v6810_v40  ;;  %v6363_v60 = vunpack.c.h.bf16 %v8125_v17  ;;  %v8181_v17 = vld [vmem:[%s8781_s26 + $0xe0] sm:$0xff]  }
 0x151   : > { %v5096_v56 = vpack.c.bf16 %v4984_v47, %v4984_v47  ;;  %5775 = vst.msk [vmem:[%s8934_s0 + $0xc8] sm:$0xf] %vm5724_vm0, %v5662_v52  ;;  %v5439_v61 = vadd.f32 %v9618_v11, %v5323_v53  ;;  %v7482_v62 = vunpack.c.l.bf16 %v9843_v51  ;;  %v6587_v63 = vunpack.c.h.bf16 %v8180_v22  ;;  %v9881_v39 = vld [vmem:[%s8810_s16 + $0xe0] sm:$0xff]  }
 0x152   : > { %v6811_v0 = vunpack.c.h.bf16 %v9827_v27  ;;  %v4425_v3 = vmax.f32 %v3865_v57, %v7703_v45  ;;  %v2746_v4 = vmax.f32 %v2186_v58, %v7034_v49  ;;  %v1067_v5 = vmax.f32 %v6139_v55, %v6363_v60  ;;  %v9869_v27 = vld [vmem:[%s8793_s15 + $0xe0] sm:$0xff]  }
 0x153   : > { %v5208_v1 = vunpack.c.l.bf16 %v5096_v56  ;;  %v5551_v7 = vmax.f32 %v5439_v61, 0.0  ;;  %v7706_v9 = vunpack.c.l.bf16 %v9848_v59  ;;  %v7930_v10 = vunpack.c.l.bf16 %v9851_v50  ;;  %v9887_v55 = vld [vmem:[%s8818_s19 + $0xe0] sm:$0xff]  }
 0x154   : > { %v7035_v12 = vunpack.c.h.bf16 %v9833_v36  ;;  %v4985_v14 = vmax.f32 %v4425_v3, %v7927_v46  ;;  %v3306_v15 = vmax.f32 %v2746_v4, %v7258_v54  ;;  %v1627_v16 = vmax.f32 %v1067_v5, %v6587_v63  ;;  %v8346_v36 = vld [vmem:[%s8798_s25 + $0xe0] sm:$0xff]  }
 0x155   : > { %v5324_v13 = vmul.f32 %v9606_v2, %v5208_v1  ;;  %v5663_v19 = vpack.c.bf16 %v5551_v7, %v5551_v7  ;;  %v7259_v20 = vunpack.c.h.bf16 %v9837_v41  ;;  %v6142_v21 = vunpack.c.l.bf16 %v8071_v6  ;;  %v8401_v46 = vld [vmem:[%s8805_s12 + $0xe0] sm:$0xff]   ;;  %v8127_v1 = vld [vmem:[%s8776_s22 + $0xe8] sm:$0xff]  }
 0x156   : > { %v6366_v22 = vunpack.c.l.bf16 %v8126_v8  ;;  %v5097_v25 = vpack.c.bf16 %v4985_v14, %v4985_v14  ;;  %v3866_v35 = vmax.f32 %v3306_v15, %v7482_v62  ;;  %v2187_v26 = vmax.f32 %v1627_v16, %v6811_v0  ;;  %v8072_v0 = vld [vmem:[%s8771_s14 + $0xe8] sm:$0xff]  }
 0x157   : > { %v5440_v24 = vadd.f32 %v9618_v11, %v5324_v13  ;;  %5776 = vst.msk [vmem:[%s8934_s0 + $0xcc] sm:$0xf] %vm5724_vm0, %v5663_v19  ;;  %v7483_v29 = vunpack.c.h.bf16 %v9843_v51  ;;  %v6590_v30 = vunpack.c.l.bf16 %v8181_v17  ;;  %v6814_v31 = vunpack.c.l.bf16 %v8236_v18  ;;  %v9897_v13 = vld [vmem:[%s8786_s29 + $0xe8] sm:$0xff]  }
 0x158   : > { %v1068_v23 = vmax.f32 %v6142_v21, %v6366_v22  ;;  %v5209_v44 = vunpack.c.l.bf16 %v5097_v25  ;;  %v4426_v33 = vmax.f32 %v3866_v35, %v7706_v9  ;;  %v2747_v34 = vmax.f32 %v2187_v26, %v7035_v12  ;;  %v9903_v22 = vld [vmem:[%s8793_s15 + $0xe8] sm:$0xff]  }
 0x159   : > { %v5552_v32 = vmax.f32 %v5440_v24, 0.0  ;;  %v7707_v28 = vunpack.c.h.bf16 %v9848_v59  ;;  %v7931_v37 = vunpack.c.h.bf16 %v9851_v50  ;;  %v7038_v40 = vunpack.c.l.bf16 %v9869_v27 }
 0x15a   : > { %v1628_v38 = vmax.f32 %v1068_v23, %v6590_v30  ;;  %v5325_v42 = vmul.f32 %v9606_v2, %v5209_v44  ;;  %v4986_v43 = vmax.f32 %v4426_v33, %v7930_v10  ;;  %v3307_v45 = vmax.f32 %v2747_v34, %v7259_v20 }
 0x15b   : > { %v5664_v41 = vpack.c.bf16 %v5552_v32, %v5552_v32  ;;  %v7262_v48 = vunpack.c.l.bf16 %v8346_v36  ;;  %v6143_v49 = vunpack.c.h.bf16 %v8071_v6  ;;  %v6367_v51 = vunpack.c.h.bf16 %v8126_v8  ;;  %v8182_v8 = vld [vmem:[%s8781_s26 + $0xe8] sm:$0xff]  }
 0x15c   : > { %v2188_v47 = vmax.f32 %v1628_v38, %v6814_v31  ;;  %v5441_v52 = vadd.f32 %v9618_v11, %v5325_v42  ;;  %v5098_v53 = vpack.c.bf16 %v4986_v43, %v4986_v43  ;;  %v3867_v54 = vmax.f32 %v3307_v45, %v7483_v29  ;;  %v9918_v45 = vld [vmem:[%s8810_s16 + $0xe8] sm:$0xff]  }
 0x15d   : > { %5777 = vst.msk [vmem:[%s8934_s0 + $0xd0] sm:$0xf] %vm5724_vm0, %v5664_v41  ;;  %v6591_v56 = vunpack.c.h.bf16 %v8181_v17  ;;  %v7486_v58 = vunpack.c.l.bf16 %v8401_v46  ;;  %v1069_v59 = vmax.f32 %v6143_v49, %v6367_v51  ;;  %v6815_v50 = vunpack.c.h.bf16 %v8236_v18 }
 0x15e   : > { %v2748_v57 = vmax.f32 %v2188_v47, %v7038_v40  ;;  %v5553_v60 = vmax.f32 %v5441_v52, 0.0  ;;  %v5210_v61 = vunpack.c.l.bf16 %v5098_v53  ;;  %v4427_v62 = vmax.f32 %v3867_v54, %v7707_v28 }
 0x15f   : > { %v7710_v63 = vunpack.c.l.bf16 %v9881_v39  ;;  %v7934_v4 = vunpack.c.l.bf16 %v9887_v55  ;;  %v1629_v5 = vmax.f32 %v1069_v59, %v6591_v56  ;;  %v7039_v6 = vunpack.c.h.bf16 %v9869_v27  ;;  %v9907_v27 = vld [vmem:[%s8798_s25 + $0xe8] sm:$0xff]   ;;  %v8073_v56 = vld [vmem:[%s8771_s14 + $0xf0] sm:$0xff]  }
 0x160   : > { %v3308_v3 = vmax.f32 %v2748_v57, %v7262_v48  ;;  %v5665_v7 = vpack.c.bf16 %v5553_v60, %v5553_v60  ;;  %v5326_v9 = vmul.f32 %v9606_v2, %v5210_v61  ;;  %v4987_v10 = vmax.f32 %v4427_v62, %v7931_v37  ;;  %v8128_v57 = vld [vmem:[%s8776_s22 + $0xf0] sm:$0xff]  }
 0x161   : > { %v7263_v12 = vunpack.c.h.bf16 %v8346_v36  ;;  %v2189_v15 = vmax.f32 %v1629_v5, %v6815_v50  ;;  %v6146_v16 = vunpack.c.l.bf16 %v8072_v0  ;;  %v6370_v17 = vunpack.c.l.bf16 %v8127_v1  ;;  %v9913_v36 = vld [vmem:[%s8805_s12 + $0xe8] sm:$0xff]  }
 0x162   : > { %v3868_v14 = vmax.f32 %v3308_v3, %v7486_v58  ;;  %5778 = vst.msk [vmem:[%s8934_s0 + $0xd4] sm:$0xf] %vm5724_vm0, %v5665_v7  ;;  %v5442_v18 = vadd.f32 %v9618_v11, %v5326_v9  ;;  %v5099_v19 = vpack.c.bf16 %v4987_v10, %v4987_v10  ;;  %v7487_v20 = vunpack.c.h.bf16 %v8401_v46  ;;  %v9921_v46 = vld [vmem:[%s8818_s19 + $0xe8] sm:$0xff]   ;;  %v9936_v3 = vld [vmem:[%s8786_s29 + $0xf0] sm:$0xff]  }
 0x163   : > { %v6594_v21 = vunpack.c.l.bf16 %v8182_v8  ;;  %v2749_v25 = vmax.f32 %v2189_v15, %v7039_v6  ;;  %v1070_v35 = vmax.f32 %v6146_v16, %v6370_v17  ;;  %v6818_v26 = vunpack.c.l.bf16 %v9897_v13 }
 0x164   : > { %v4428_v24 = vmax.f32 %v3868_v14, %v7710_v63  ;;  %v5554_v29 = vmax.f32 %v5442_v18, 0.0  ;;  %v5211_v23 = vunpack.c.l.bf16 %v5099_v19  ;;  %v7711_v30 = vunpack.c.h.bf16 %v9881_v39 }
 0x165   : > { %v7935_v31 = vunpack.c.h.bf16 %v9887_v55  ;;  %v3309_v44 = vmax.f32 %v2749_v25, %v7263_v12  ;;  %v1630_v33 = vmax.f32 %v1070_v35, %v6594_v21  ;;  %v7042_v34 = vunpack.c.l.bf16 %v9903_v22 }
 0x166   : > { %v4988_v32 = vmax.f32 %v4428_v24, %v7934_v4  ;;  %v5666_v28 = vpack.c.bf16 %v5554_v29, %v5554_v29  ;;  %v5327_v37 = vmul.f32 %v9606_v2, %v5211_v23  ;;  %v7266_v38 = vunpack.c.l.bf16 %v9907_v27 }
 0x167   : > { %v6147_v40 = vunpack.c.h.bf16 %v8072_v0  ;;  %v3869_v42 = vmax.f32 %v3309_v44, %v7487_v20  ;;  %v2190_v43 = vmax.f32 %v1630_v33, %v6818_v26  ;;  %v6371_v47 = vunpack.c.h.bf16 %v8127_v1  ;;  %v8183_v1 = vld [vmem:[%s8781_s26 + $0xf0] sm:$0xff]   ;;  %v9956_v26 = vld [vmem:[%s10940_s9] ss:$0 sm:$0xff] }
 0x168   : > { %v5100_v41 = vpack.c.bf16 %v4988_v32, %v4988_v32  ;;  %5779 = vst.msk [vmem:[%s8934_s0 + $0xd8] sm:$0xf] %vm5724_vm0, %v5666_v28  ;;  %v5443_v48 = vadd.f32 %v9618_v11, %v5327_v37  ;;  %v7490_v39 = vunpack.c.l.bf16 %v9913_v36  ;;  %v6595_v49 = vunpack.c.h.bf16 %v8182_v8  ;;  %v9964_v44 = vld [vmem:[%s8810_s16 + $0xf0] sm:$0xff]  }
 0x169   : > { %v6819_v51 = vunpack.c.h.bf16 %v9897_v13  ;;  %v4429_v53 = vmax.f32 %v3869_v42, %v7711_v30  ;;  %v2750_v54 = vmax.f32 %v2190_v43, %v7042_v34  ;;  %v1071_v55 = vmax.f32 %v6147_v40, %v6371_v47  ;;  %v9941_v13 = vld [vmem:[%s8793_s15 + $0xf0] sm:$0xff]  }
 0x16a   : > { %v5212_v52 = vunpack.c.l.bf16 %v5100_v41  ;;  %v5555_v58 = vmax.f32 %v5443_v48, 0.0  ;;  %v7714_v59 = vunpack.c.l.bf16 %v9918_v45  ;;  %v7938_v50 = vunpack.c.l.bf16 %v9921_v46  ;;  %v9960_v30 = vld [vmem:[%s8805_s12 + $0xf0] sm:$0xff]  }
 0x16b   : > { %v7043_v60 = vunpack.c.h.bf16 %v9903_v22  ;;  %v4989_v62 = vmax.f32 %v4429_v53, %v7935_v31  ;;  %v3310_v63 = vmax.f32 %v2750_v54, %v7266_v38  ;;  %v1631_v0 = vmax.f32 %v1071_v55, %v6595_v49  ;;  %v9975_v40 = vld [vmem:[%s8818_s19 + $0xf0] sm:$0xff]  }
 0x16c   : > { %v5328_v61 = vmul.f32 %v9606_v2, %v5212_v52  ;;  %v5667_v4 = vpack.c.bf16 %v5555_v58, %v5555_v58  ;;  %v7267_v5 = vunpack.c.h.bf16 %v9907_v27  ;;  %v6150_v6 = vunpack.c.l.bf16 %v8073_v56  ;;  %v8129_v52 = vld [vmem:[%s8776_s22 + $0xf8] sm:$0xff]  }
 0x16d   : > { %v6374_v8 = vunpack.c.l.bf16 %v8128_v57  ;;  %v5101_v9 = vpack.c.bf16 %v4989_v62, %v4989_v62  ;;  %v3870_v10 = vmax.f32 %v3310_v63, %v7490_v39  ;;  %v2191_v12 = vmax.f32 %v1631_v0, %v6819_v51  ;;  %v8074_v51 = vld [vmem:[%s8771_s14 + $0xf8] sm:$0xff]  }
 0x16e   : > { %v5444_v7 = vadd.f32 %v9618_v11, %v5328_v61  ;;  %5780 = vst.msk [vmem:[%s8934_s0 + $0xdc] sm:$0xf] %vm5724_vm0, %v5667_v4  ;;  %v7491_v2 = vunpack.c.h.bf16 %v9913_v36  ;;  %v6598_v15 = vunpack.c.l.bf16 %v8183_v1  ;;  %v6822_v16 = vunpack.c.l.bf16 %v9936_v3  ;;  %v9948_v11 = vld [vmem:[%s8798_s25 + $0xf0] sm:$0xff]   ;;  %v9971_v36 = vld [vmem:[%s10941_s10] ss:$0 sm:$0xff]  ;;  %v9988_v61 = vld [vmem:[%s8786_s29 + $0xf8] sm:$0xff]  }
 0x16f   : > { %v1072_v14 = vmax.f32 %v6150_v6, %v6374_v8  ;;  %v5213_v18 = vunpack.c.l.bf16 %v5101_v9  ;;  %v4430_v19 = vmax.f32 %v3870_v10, %v7714_v59  ;;  %v2751_v20 = vmax.f32 %v2191_v12, %v7043_v60  ;;  %v9995_v8 = vld [vmem:[%s8793_s15 + $0xf8] sm:$0xff]  }
 0x170   : > { %v5556_v17 = vmax.f32 %v5444_v7, 0.0  ;;  %v7715_v21 = vunpack.c.h.bf16 %v9918_v45  ;;  %v7939_v22 = vunpack.c.h.bf16 %v9921_v46  ;;  %v7046_v25 = vunpack.c.l.bf16 %v9941_v13 }
 0x171   : > { %v1632_v24 = vmax.f32 %v1072_v14, %v6598_v15  ;;  %v5329_v27 = vmul.f32 %v9956_v26, %v5213_v18  ;;  %v4990_v29 = vmax.f32 %v4430_v19, %v7938_v50  ;;  %v3311_v23 = vmax.f32 %v2751_v20, %v7267_v5 }
 0x172   : > { %v5668_v35 = vpack.c.bf16 %v5556_v17, %v5556_v17  ;;  %v7270_v32 = vunpack.c.l.bf16 %v9948_v11  ;;  %v6151_v33 = vunpack.c.h.bf16 %v8073_v56  ;;  %v6375_v34 = vunpack.c.h.bf16 %v8128_v57  ;;  %v8184_v57 = vld [vmem:[%s8781_s26 + $0xf8] sm:$0xff]  }
 0x173   : > { %v2192_v31 = vmax.f32 %v1632_v24, %v6822_v16  ;;  %v5445_v28 = vadd.f32 %v9971_v36, %v5329_v27  ;;  %v5102_v37 = vpack.c.bf16 %v4990_v29, %v4990_v29  ;;  %v3871_v38 = vmax.f32 %v3311_v23, %v7491_v2  ;;  %v10010_v23 = vld [vmem:[%s8810_s16 + $0xf8] sm:$0xff]  }
 0x174   : > { %5781 = vst.msk [vmem:[%s8934_s0 + $0xe0] sm:$0xf] %vm5724_vm0, %v5668_v35  ;;  %v6599_v41 = vunpack.c.h.bf16 %v8183_v1  ;;  %v7494_v43 = vunpack.c.l.bf16 %v9960_v30  ;;  %v1073_v45 = vmax.f32 %v6151_v33, %v6375_v34  ;;  %v6823_v46 = vunpack.c.h.bf16 %v9936_v3 }
 0x175   : > { %v2752_v42 = vmax.f32 %v2192_v31, %v7046_v25  ;;  %v5557_v47 = vmax.f32 %v5445_v28, 0.0  ;;  %v5214_v48 = vunpack.c.l.bf16 %v5102_v37  ;;  %v4431_v39 = vmax.f32 %v3871_v38, %v7715_v21 }
 0x176   : > { %v7718_v49 = vunpack.c.l.bf16 %v9964_v44  ;;  %v7942_v54 = vunpack.c.l.bf16 %v9975_v40  ;;  %v1633_v55 = vmax.f32 %v1073_v45, %v6599_v41  ;;  %v7047_v56 = vunpack.c.h.bf16 %v9941_v13  ;;  %v9999_v13 = vld [vmem:[%s8798_s25 + $0xf8] sm:$0xff]   ;;  %v8075_v41 = vld [vmem:[%s8771_s14 + $0x100] sm:$0xff]  }
 0x177   : > { %v3312_v53 = vmax.f32 %v2752_v42, %v7270_v32  ;;  %v5669_v58 = vpack.c.bf16 %v5557_v47, %v5557_v47  ;;  %v5330_v59 = vmul.f32 %v9956_v26, %v5214_v48  ;;  %v4991_v50 = vmax.f32 %v4431_v39, %v7939_v22  ;;  %v8130_v42 = vld [vmem:[%s8776_s22 + $0x100] sm:$0xff]  }
 0x178   : > { %v7271_v60 = vunpack.c.h.bf16 %v9948_v11  ;;  %v2193_v63 = vmax.f32 %v1633_v55, %v6823_v46  ;;  %v6154_v0 = vunpack.c.l.bf16 %v8074_v51  ;;  %v6378_v1 = vunpack.c.l.bf16 %v8129_v52  ;;  %v10005_v11 = vld [vmem:[%s8805_s12 + $0xf8] sm:$0xff]  }
 0x179   : > { %v3872_v62 = vmax.f32 %v3312_v53, %v7494_v43  ;;  %5782 = vst.msk [vmem:[%s8934_s0 + $0xe4] sm:$0xf] %vm5724_vm0, %v5669_v58  ;;  %v5446_v3 = vadd.f32 %v9971_v36, %v5330_v59  ;;  %v5103_v4 = vpack.c.bf16 %v4991_v50, %v4991_v50  ;;  %v7495_v5 = vunpack.c.h.bf16 %v9960_v30  ;;  %v10013_v30 = vld [vmem:[%s8818_s19 + $0xf8] sm:$0xff]   ;;  %v8240_v53 = vld [vmem:[%s8786_s29 + $0x100] sm:$0xff]  }
 0x17a   : > { %v6602_v6 = vunpack.c.l.bf16 %v8184_v57  ;;  %v2753_v9 = vmax.f32 %v2193_v63, %v7047_v56  ;;  %v1074_v10 = vmax.f32 %v6154_v0, %v6378_v1  ;;  %v6826_v12 = vunpack.c.l.bf16 %v9988_v61 }
 0x17b   : > { %v4432_v7 = vmax.f32 %v3872_v62, %v7718_v49  ;;  %v5558_v2 = vmax.f32 %v5446_v3, 0.0  ;;  %v5215_v14 = vunpack.c.l.bf16 %v5103_v4  ;;  %v7719_v15 = vunpack.c.h.bf16 %v9964_v44 }
 0x17c   : > { %v7943_v16 = vunpack.c.h.bf16 %v9975_v40  ;;  %v3313_v18 = vmax.f32 %v2753_v9, %v7271_v60  ;;  %v1634_v19 = vmax.f32 %v1074_v10, %v6602_v6  ;;  %v7050_v20 = vunpack.c.l.bf16 %v9995_v8 }
 0x17d   : > { %v4992_v17 = vmax.f32 %v4432_v7, %v7942_v54  ;;  %v5670_v21 = vpack.c.bf16 %v5558_v2, %v5558_v2  ;;  %v5331_v22 = vmul.f32 %v9956_v26, %v5215_v14  ;;  %v7274_v24 = vunpack.c.l.bf16 %v9999_v13 }
 0x17e   : > { %v6155_v25 = vunpack.c.h.bf16 %v8074_v51  ;;  %v3873_v27 = vmax.f32 %v3313_v18, %v7495_v5  ;;  %v2194_v29 = vmax.f32 %v1634_v19, %v6826_v12  ;;  %v6379_v31 = vunpack.c.h.bf16 %v8129_v52  ;;  %v8185_v52 = vld [vmem:[%s8781_s26 + $0x100] sm:$0xff]  }
 0x17f   : > { %v5104_v35 = vpack.c.bf16 %v4992_v17, %v4992_v17  ;;  %5783 = vst.msk [vmem:[%s8934_s0 + $0xe8] sm:$0xf] %vm5724_vm0, %v5670_v21  ;;  %v5447_v32 = vadd.f32 %v9971_v36, %v5331_v22  ;;  %v7498_v44 = vunpack.c.l.bf16 %v10005_v11  ;;  %v6603_v33 = vunpack.c.h.bf16 %v8184_v57  ;;  %v10043_v19 = vld [vmem:[%s8810_s16 + $0x100] sm:$0xff]  }
 0x180   : > { %v6827_v34 = vunpack.c.h.bf16 %v9988_v61  ;;  %v4433_v37 = vmax.f32 %v3873_v27, %v7719_v15  ;;  %v2754_v38 = vmax.f32 %v2194_v29, %v7050_v20  ;;  %v1075_v40 = vmax.f32 %v6155_v25, %v6379_v31  ;;  %v10031_v61 = vld [vmem:[%s8793_s15 + $0x100] sm:$0xff]  }
 0x181   : > { %v5216_v28 = vunpack.c.l.bf16 %v5104_v35  ;;  %v5559_v43 = vmax.f32 %v5447_v32, 0.0  ;;  %v7722_v45 = vunpack.c.l.bf16 %v10010_v23  ;;  %v7946_v46 = vunpack.c.l.bf16 %v10013_v30  ;;  %v10049_v25 = vld [vmem:[%s8818_s19 + $0x100] sm:$0xff]  }
 0x182   : > { %v7051_v47 = vunpack.c.h.bf16 %v9995_v8  ;;  %v4993_v39 = vmax.f32 %v4433_v37, %v7943_v16  ;;  %v3314_v49 = vmax.f32 %v2754_v38, %v7274_v24  ;;  %v1635_v51 = vmax.f32 %v1075_v40, %v6603_v33  ;;  %v8350_v8 = vld [vmem:[%s8798_s25 + $0x100] sm:$0xff]  }
 0x183   : > { %v5332_v48 = vmul.f32 %v9956_v26, %v5216_v28  ;;  %v5671_v54 = vpack.c.bf16 %v5559_v43, %v5559_v43  ;;  %v7275_v55 = vunpack.c.h.bf16 %v9999_v13  ;;  %v6158_v56 = vunpack.c.l.bf16 %v8075_v41  ;;  %v8405_v16 = vld [vmem:[%s8805_s12 + $0x100] sm:$0xff]   ;;  %v8131_v28 = vld [vmem:[%s8776_s22 + $0x108] sm:$0xff]  }
 0x184   : > { %v6382_v57 = vunpack.c.l.bf16 %v8130_v42  ;;  %v5105_v59 = vpack.c.bf16 %v4993_v39, %v4993_v39  ;;  %v3874_v50 = vmax.f32 %v3314_v49, %v7498_v44  ;;  %v2195_v60 = vmax.f32 %v1635_v51, %v6827_v34  ;;  %v8076_v34 = vld [vmem:[%s8771_s14 + $0x108] sm:$0xff]  }
 0x185   : > { %v5448_v58 = vadd.f32 %v9971_v36, %v5332_v48  ;;  %5784 = vst.msk [vmem:[%s8934_s0 + $0xec] sm:$0xf] %vm5724_vm0, %v5671_v54  ;;  %v7499_v62 = vunpack.c.h.bf16 %v10005_v11  ;;  %v6606_v0 = vunpack.c.l.bf16 %v8185_v52  ;;  %v6830_v1 = vunpack.c.l.bf16 %v8240_v53  ;;  %v10059_v48 = vld [vmem:[%s8786_s29 + $0x108] sm:$0xff]  }
 0x186   : > { %v1076_v63 = vmax.f32 %v6158_v56, %v6382_v57  ;;  %v5217_v4 = vunpack.c.l.bf16 %v5105_v59  ;;  %v4434_v5 = vmax.f32 %v3874_v50, %v7722_v45  ;;  %v2755_v6 = vmax.f32 %v2195_v60, %v7051_v47  ;;  %v10065_v57 = vld [vmem:[%s8793_s15 + $0x108] sm:$0xff]  }
 0x187   : > { %v5560_v3 = vmax.f32 %v5448_v58, 0.0  ;;  %v7723_v7 = vunpack.c.h.bf16 %v10010_v23  ;;  %v7947_v9 = vunpack.c.h.bf16 %v10013_v30  ;;  %v7054_v12 = vunpack.c.l.bf16 %v10031_v61 }
 0x188   : > { %v1636_v10 = vmax.f32 %v1076_v63, %v6606_v0  ;;  %v5333_v2 = vmul.f32 %v9956_v26, %v5217_v4  ;;  %v4994_v14 = vmax.f32 %v4434_v5, %v7946_v46  ;;  %v3315_v15 = vmax.f32 %v2755_v6, %v7275_v55 }
 0x189   : > { %v5672_v13 = vpack.c.bf16 %v5560_v3, %v5560_v3  ;;  %v7278_v18 = vunpack.c.l.bf16 %v8350_v8  ;;  %v6159_v20 = vunpack.c.h.bf16 %v8075_v41  ;;  %v6383_v11 = vunpack.c.h.bf16 %v8130_v42  ;;  %v8186_v42 = vld [vmem:[%s8781_s26 + $0x108] sm:$0xff]  }
 0x18a   : > { %v2196_v17 = vmax.f32 %v1636_v10, %v6830_v1  ;;  %v5449_v21 = vadd.f32 %v9971_v36, %v5333_v2  ;;  %v5106_v22 = vpack.c.bf16 %v4994_v14, %v4994_v14  ;;  %v3875_v24 = vmax.f32 %v3315_v15, %v7499_v62  ;;  %v10080_v15 = vld [vmem:[%s8810_s16 + $0x108] sm:$0xff]  }
 0x18b   : > { %5785 = vst.msk [vmem:[%s8934_s0 + $0xf0] sm:$0xf] %vm5724_vm0, %v5672_v13  ;;  %v6607_v35 = vunpack.c.h.bf16 %v8185_v52  ;;  %v7502_v29 = vunpack.c.l.bf16 %v8405_v16  ;;  %v1077_v23 = vmax.f32 %v6159_v20, %v6383_v11  ;;  %v6831_v30 = vunpack.c.h.bf16 %v8240_v53 }
 0x18c   : > { %v2756_v27 = vmax.f32 %v2196_v17, %v7054_v12  ;;  %v5561_v31 = vmax.f32 %v5449_v21, 0.0  ;;  %v5218_v32 = vunpack.c.l.bf16 %v5106_v22  ;;  %v4435_v44 = vmax.f32 %v3875_v24, %v7723_v7 }
 0x18d   : > { %v7726_v33 = vunpack.c.l.bf16 %v10043_v19  ;;  %v7950_v38 = vunpack.c.l.bf16 %v10049_v25  ;;  %v1637_v40 = vmax.f32 %v1077_v23, %v6607_v35  ;;  %v7055_v41 = vunpack.c.h.bf16 %v10031_v61  ;;  %v10069_v61 = vld [vmem:[%s8798_s25 + $0x108] sm:$0xff]   ;;  %v8077_v35 = vld [vmem:[%s8771_s14 + $0x110] sm:$0xff]  }
 0x18e   : > { %v3316_v37 = vmax.f32 %v2756_v27, %v7278_v18  ;;  %v5673_v43 = vpack.c.bf16 %v5561_v31, %v5561_v31  ;;  %v5334_v45 = vmul.f32 %v9956_v26, %v5218_v32  ;;  %v4995_v46 = vmax.f32 %v4435_v44, %v7947_v9  ;;  %v8132_v27 = vld [vmem:[%s8776_s22 + $0x110] sm:$0xff]  }
 0x18f   : > { %v7279_v47 = vunpack.c.h.bf16 %v8350_v8  ;;  %v2197_v49 = vmax.f32 %v1637_v40, %v6831_v30  ;;  %v6162_v51 = vunpack.c.l.bf16 %v8076_v34  ;;  %v6386_v52 = vunpack.c.l.bf16 %v8131_v28  ;;  %v10075_v8 = vld [vmem:[%s8805_s12 + $0x108] sm:$0xff]  }
 0x190   : > { %v3876_v39 = vmax.f32 %v3316_v37, %v7502_v29  ;;  %5786 = vst.msk [vmem:[%s8934_s0 + $0xf4] sm:$0xf] %vm5724_vm0, %v5673_v43  ;;  %v5450_v53 = vadd.f32 %v9971_v36, %v5334_v45  ;;  %v5107_v54 = vpack.c.bf16 %v4995_v46, %v4995_v46  ;;  %v7503_v55 = vunpack.c.h.bf16 %v8405_v16  ;;  %v10083_v16 = vld [vmem:[%s8818_s19 + $0x108] sm:$0xff]   ;;  %v8242_v37 = vld [vmem:[%s8786_s29 + $0x110] sm:$0xff]  }
 0x191   : > { %v6610_v56 = vunpack.c.l.bf16 %v8186_v42  ;;  %v2757_v59 = vmax.f32 %v2197_v49, %v7055_v41  ;;  %v1078_v50 = vmax.f32 %v6162_v51, %v6386_v52  ;;  %v6834_v60 = vunpack.c.l.bf16 %v10059_v48 }
 0x192   : > { %v4436_v58 = vmax.f32 %v3876_v39, %v7726_v33  ;;  %v5562_v62 = vmax.f32 %v5450_v53, 0.0  ;;  %v5219_v63 = vunpack.c.l.bf16 %v5107_v54  ;;  %v7727_v0 = vunpack.c.h.bf16 %v10043_v19 }
 0x193   : > { %v7951_v1 = vunpack.c.h.bf16 %v10049_v25  ;;  %v3317_v4 = vmax.f32 %v2757_v59, %v7279_v47  ;;  %v1638_v5 = vmax.f32 %v1078_v50, %v6610_v56  ;;  %v7058_v6 = vunpack.c.l.bf16 %v10065_v57 }
 0x194   : > { %v4996_v3 = vmax.f32 %v4436_v58, %v7950_v38  ;;  %v5674_v7 = vpack.c.bf16 %v5562_v62, %v5562_v62  ;;  %v5335_v9 = vmul.f32 %v9956_v26, %v5219_v63  ;;  %v7282_v10 = vunpack.c.l.bf16 %v10069_v61 }
 0x195   : > { %v6163_v12 = vunpack.c.h.bf16 %v8076_v34  ;;  %v3877_v2 = vmax.f32 %v3317_v4, %v7503_v55  ;;  %v2198_v14 = vmax.f32 %v1638_v5, %v6834_v60  ;;  %v6387_v17 = vunpack.c.h.bf16 %v8131_v28  ;;  %v8187_v28 = vld [vmem:[%s8781_s26 + $0x110] sm:$0xff]  }
 0x196   : > { %v5108_v13 = vpack.c.bf16 %v4996_v3, %v4996_v3  ;;  %5787 = vst.msk [vmem:[%s8934_s0 + $0xf8] sm:$0xf] %vm5724_vm0, %v5674_v7  ;;  %v5451_v18 = vadd.f32 %v9971_v36, %v5335_v9  ;;  %v7506_v19 = vunpack.c.l.bf16 %v10075_v8  ;;  %v6611_v20 = vunpack.c.h.bf16 %v8186_v42  ;;  %v10113_v5 = vld [vmem:[%s8810_s16 + $0x110] sm:$0xff]  }
 0x197   : > { %v6835_v11 = vunpack.c.h.bf16 %v10059_v48  ;;  %v4437_v22 = vmax.f32 %v3877_v2, %v7727_v0  ;;  %v2758_v24 = vmax.f32 %v2198_v14, %v7058_v6  ;;  %v1079_v25 = vmax.f32 %v6163_v12, %v6387_v17  ;;  %v10101_v48 = vld [vmem:[%s8793_s15 + $0x110] sm:$0xff]  }
 0x198   : > { %v5220_v21 = vunpack.c.l.bf16 %v5108_v13  ;;  %v5563_v29 = vmax.f32 %v5451_v18, 0.0  ;;  %v7730_v23 = vunpack.c.l.bf16 %v10080_v15  ;;  %v7954_v30 = vunpack.c.l.bf16 %v10083_v16  ;;  %v10119_v12 = vld [vmem:[%s8818_s19 + $0x110] sm:$0xff]  }
 0x199   : > { %v7059_v31 = vunpack.c.h.bf16 %v10065_v57  ;;  %v4997_v44 = vmax.f32 %v4437_v22, %v7951_v1  ;;  %v3318_v33 = vmax.f32 %v2758_v24, %v7282_v10  ;;  %v1639_v34 = vmax.f32 %v1079_v25, %v6611_v20  ;;  %v8352_v57 = vld [vmem:[%s8798_s25 + $0x110] sm:$0xff]  }
 0x19a   : > { %v5336_v32 = vmul.f32 %v9956_v26, %v5220_v21  ;;  %v5675_v38 = vpack.c.bf16 %v5563_v29, %v5563_v29  ;;  %v7283_v40 = vunpack.c.h.bf16 %v10069_v61  ;;  %v6166_v41 = vunpack.c.l.bf16 %v8077_v35  ;;  %v8407_v1 = vld [vmem:[%s8805_s12 + $0x110] sm:$0xff]   ;;  %v8133_v21 = vld [vmem:[%s8776_s22 + $0x118] sm:$0xff]  }
 0x19b   : > { %v6390_v42 = vunpack.c.l.bf16 %v8132_v27  ;;  %v5109_v45 = vpack.c.bf16 %v4997_v44, %v4997_v44  ;;  %v3878_v46 = vmax.f32 %v3318_v33, %v7506_v19  ;;  %v2199_v47 = vmax.f32 %v1639_v34, %v6835_v11  ;;  %v8078_v11 = vld [vmem:[%s8771_s14 + $0x118] sm:$0xff]  }
 0x19c   : > { %v5452_v43 = vadd.f32 %v9971_v36, %v5336_v32  ;;  %5788 = vst.msk [vmem:[%s8934_s0 + $0xfc] sm:$0xf] %vm5724_vm0, %v5675_v38  ;;  %v7507_v39 = vunpack.c.h.bf16 %v10075_v8  ;;  %v6614_v51 = vunpack.c.l.bf16 %v8187_v28  ;;  %v6838_v52 = vunpack.c.l.bf16 %v8242_v37  ;;  %v10129_v32 = vld [vmem:[%s8786_s29 + $0x118] sm:$0xff]  }
 0x19d   : > { %v1080_v49 = vmax.f32 %v6166_v41, %v6390_v42  ;;  %v5221_v54 = vunpack.c.l.bf16 %v5109_v45  ;;  %v4438_v55 = vmax.f32 %v3878_v46, %v7730_v23  ;;  %v2759_v56 = vmax.f32 %v2199_v47, %v7059_v31  ;;  %v10135_v42 = vld [vmem:[%s8793_s15 + $0x118] sm:$0xff]  }
 0x19e   : > { %v5564_v53 = vmax.f32 %v5452_v43, 0.0  ;;  %v7731_v58 = vunpack.c.h.bf16 %v10080_v15  ;;  %v7955_v59 = vunpack.c.h.bf16 %v10083_v16  ;;  %v7062_v60 = vunpack.c.l.bf16 %v10101_v48 }
 0x19f   : > { %v1640_v50 = vmax.f32 %v1080_v49, %v6614_v51  ;;  %v5337_v62 = vmul.f32 %v9956_v26, %v5221_v54  ;;  %v4998_v63 = vmax.f32 %v4438_v55, %v7954_v30  ;;  %v3319_v0 = vmax.f32 %v2759_v56, %v7283_v40 }
 0x1a0   : > { %v5676_v61 = vpack.c.bf16 %v5564_v53, %v5564_v53  ;;  %v7286_v4 = vunpack.c.l.bf16 %v8352_v57  ;;  %v6167_v6 = vunpack.c.h.bf16 %v8077_v35  ;;  %v6391_v8 = vunpack.c.h.bf16 %v8132_v27  ;;  %v8188_v27 = vld [vmem:[%s8781_s26 + $0x118] sm:$0xff]  }
 0x1a1   : > { %v2200_v3 = vmax.f32 %v1640_v50, %v6838_v52  ;;  %v5453_v7 = vadd.f32 %v9971_v36, %v5337_v62  ;;  %v5110_v9 = vpack.c.bf16 %v4998_v63, %v4998_v63  ;;  %v3879_v10 = vmax.f32 %v3319_v0, %v7507_v39  ;;  %v10150_v0 = vld [vmem:[%s8810_s16 + $0x118] sm:$0xff]  }
 0x1a2   : > { %5789 = vst.msk [vmem:[%s8934_s0 + $0x100] sm:$0xf] %vm5724_vm0, %v5676_v61  ;;  %v6615_v13 = vunpack.c.h.bf16 %v8187_v28  ;;  %v7510_v14 = vunpack.c.l.bf16 %v8407_v1  ;;  %v1081_v15 = vmax.f32 %v6167_v6, %v6391_v8  ;;  %v6839_v16 = vunpack.c.h.bf16 %v8242_v37 }
 0x1a3   : > { %v2760_v2 = vmax.f32 %v2200_v3, %v7062_v60  ;;  %v5565_v17 = vmax.f32 %v5453_v7, 0.0  ;;  %v5222_v18 = vunpack.c.l.bf16 %v5110_v9  ;;  %v4439_v19 = vmax.f32 %v3879_v10, %v7731_v58 }
 0x1a4   : > { %v7734_v20 = vunpack.c.l.bf16 %v10113_v5  ;;  %v7958_v24 = vunpack.c.l.bf16 %v10119_v12  ;;  %v1641_v25 = vmax.f32 %v1081_v15, %v6615_v13  ;;  %v7063_v35 = vunpack.c.h.bf16 %v10101_v48  ;;  %v10139_v48 = vld [vmem:[%s8798_s25 + $0x118] sm:$0xff]   ;;  %v8079_v13 = vld [vmem:[%s8771_s14 + $0x120] sm:$0xff]  }
 0x1a5   : > { %v3320_v22 = vmax.f32 %v2760_v2, %v7286_v4  ;;  %v5677_v29 = vpack.c.bf16 %v5565_v17, %v5565_v17  ;;  %v5338_v23 = vmul.f32 %v9956_v26, %v5222_v18  ;;  %v4999_v30 = vmax.f32 %v4439_v19, %v7955_v59  ;;  %v8134_v2 = vld [vmem:[%s8776_s22 + $0x120] sm:$0xff]  }
 0x1a6   : > { %v7287_v31 = vunpack.c.h.bf16 %v8352_v57  ;;  %v2201_v33 = vmax.f32 %v1641_v25, %v6839_v16  ;;  %v6170_v34 = vunpack.c.l.bf16 %v8078_v11  ;;  %v6394_v28 = vunpack.c.l.bf16 %v8133_v21  ;;  %v10145_v57 = vld [vmem:[%s8805_s12 + $0x118] sm:$0xff]  }
 0x1a7   : > { %v3880_v44 = vmax.f32 %v3320_v22, %v7510_v14  ;;  %5790 = vst.msk [vmem:[%s8934_s0 + $0x104] sm:$0xf] %vm5724_vm0, %v5677_v29  ;;  %v5454_v37 = vadd.f32 %v9971_v36, %v5338_v23  ;;  %v5111_v38 = vpack.c.bf16 %v4999_v30, %v4999_v30  ;;  %v7511_v40 = vunpack.c.h.bf16 %v8407_v1  ;;  %v10153_v1 = vld [vmem:[%s8818_s19 + $0x118] sm:$0xff]   ;;  %v8244_v22 = vld [vmem:[%s8786_s29 + $0x120] sm:$0xff]  }
 0x1a8   : > { %v6618_v41 = vunpack.c.l.bf16 %v8188_v27  ;;  %v2761_v45 = vmax.f32 %v2201_v33, %v7063_v35  ;;  %v1082_v46 = vmax.f32 %v6170_v34, %v6394_v28  ;;  %v6842_v47 = vunpack.c.l.bf16 %v10129_v32 }
 0x1a9   : > { %v4440_v43 = vmax.f32 %v3880_v44, %v7734_v20  ;;  %v5566_v39 = vmax.f32 %v5454_v37, 0.0  ;;  %v5223_v49 = vunpack.c.l.bf16 %v5111_v38  ;;  %v7735_v51 = vunpack.c.h.bf16 %v10113_v5 }
 0x1aa   : > { %v7959_v52 = vunpack.c.h.bf16 %v10119_v12  ;;  %v3321_v54 = vmax.f32 %v2761_v45, %v7287_v31  ;;  %v1642_v55 = vmax.f32 %v1082_v46, %v6618_v41  ;;  %v7066_v56 = vunpack.c.l.bf16 %v10135_v42 }
 0x1ab   : > { %v5000_v53 = vmax.f32 %v4440_v43, %v7958_v24  ;;  %v5678_v58 = vpack.c.bf16 %v5566_v39, %v5566_v39  ;;  %v5339_v59 = vmul.f32 %v9956_v26, %v5223_v49  ;;  %v7290_v50 = vunpack.c.l.bf16 %v10139_v48 }
 0x1ac   : > { %v6171_v60 = vunpack.c.h.bf16 %v8078_v11  ;;  %v3881_v62 = vmax.f32 %v3321_v54, %v7511_v40  ;;  %v2202_v63 = vmax.f32 %v1642_v55, %v6842_v47  ;;  %v6395_v3 = vunpack.c.h.bf16 %v8133_v21  ;;  %v8189_v21 = vld [vmem:[%s8781_s26 + $0x120] sm:$0xff]  }
 0x1ad   : > { %v5112_v61 = vpack.c.bf16 %v5000_v53, %v5000_v53  ;;  %5791 = vst.msk [vmem:[%s8934_s0 + $0x108] sm:$0xf] %vm5724_vm0, %v5678_v58  ;;  %v5455_v4 = vadd.f32 %v9971_v36, %v5339_v59  ;;  %v7514_v5 = vunpack.c.l.bf16 %v10145_v57  ;;  %v6619_v6 = vunpack.c.h.bf16 %v8188_v27  ;;  %v10183_v55 = vld [vmem:[%s8810_s16 + $0x120] sm:$0xff]  }
 0x1ae   : > { %v6843_v8 = vunpack.c.h.bf16 %v10129_v32  ;;  %v4441_v9 = vmax.f32 %v3881_v62, %v7735_v51  ;;  %v2762_v10 = vmax.f32 %v2202_v63, %v7066_v56  ;;  %v1083_v12 = vmax.f32 %v6171_v60, %v6395_v3  ;;  %v10171_v32 = vld [vmem:[%s8793_s15 + $0x120] sm:$0xff]  }
 0x1af   : > { %v5224_v7 = vunpack.c.l.bf16 %v5112_v61  ;;  %v5567_v14 = vmax.f32 %v5455_v4, 0.0  ;;  %v7738_v15 = vunpack.c.l.bf16 %v10150_v0  ;;  %v7962_v16 = vunpack.c.l.bf16 %v10153_v1  ;;  %v10189_v60 = vld [vmem:[%s8818_s19 + $0x120] sm:$0xff]  }
 0x1b0   : > { %v7067_v17 = vunpack.c.h.bf16 %v10135_v42  ;;  %v5001_v19 = vmax.f32 %v4441_v9, %v7959_v52  ;;  %v3322_v20 = vmax.f32 %v2762_v10, %v7290_v50  ;;  %v1643_v11 = vmax.f32 %v1083_v12, %v6619_v6  ;;  %v8354_v42 = vld [vmem:[%s8798_s25 + $0x120] sm:$0xff]  }
 0x1b1   : > { %v5340_v18 = vmul.f32 %v9956_v26, %v5224_v7  ;;  %v5679_v24 = vpack.c.bf16 %v5567_v14, %v5567_v14  ;;  %v7291_v25 = vunpack.c.h.bf16 %v10139_v48  ;;  %v6174_v35 = vunpack.c.l.bf16 %v8079_v13  ;;  %v8409_v52 = vld [vmem:[%s8805_s12 + $0x120] sm:$0xff]   ;;  %v8135_v7 = vld [vmem:[%s8776_s22 + $0x128] sm:$0xff]  }
 0x1b2   : > { %v6398_v27 = vunpack.c.l.bf16 %v8134_v2  ;;  %v5113_v23 = vpack.c.bf16 %v5001_v19, %v5001_v19  ;;  %v3882_v30 = vmax.f32 %v3322_v20, %v7514_v5  ;;  %v2203_v31 = vmax.f32 %v1643_v11, %v6843_v8  ;;  %v8080_v8 = vld [vmem:[%s8771_s14 + $0x128] sm:$0xff]  }
 0x1b3   : > { %v5456_v29 = vadd.f32 %v9971_v36, %v5340_v18  ;;  %5792 = vst.msk [vmem:[%s8934_s0 + $0x10c] sm:$0xf] %vm5724_vm0, %v5679_v24  ;;  %v7515_v44 = vunpack.c.h.bf16 %v10145_v57  ;;  %v6622_v34 = vunpack.c.l.bf16 %v8189_v21  ;;  %v6846_v28 = vunpack.c.l.bf16 %v8244_v22  ;;  %v10199_v18 = vld [vmem:[%s8786_s29 + $0x128] sm:$0xff]  }
 0x1b4   : > { %v1084_v33 = vmax.f32 %v6174_v35, %v6398_v27  ;;  %v5225_v38 = vunpack.c.l.bf16 %v5113_v23  ;;  %v4442_v40 = vmax.f32 %v3882_v30, %v7738_v15  ;;  %v2763_v41 = vmax.f32 %v2203_v31, %v7067_v17  ;;  %v10205_v27 = vld [vmem:[%s8793_s15 + $0x128] sm:$0xff]  }
 0x1b5   : > { %v5568_v37 = vmax.f32 %v5456_v29, 0.0  ;;  %v7739_v43 = vunpack.c.h.bf16 %v10150_v0  ;;  %v7963_v45 = vunpack.c.h.bf16 %v10153_v1  ;;  %v7070_v47 = vunpack.c.l.bf16 %v10171_v32 }
 0x1b6   : > { %v1644_v46 = vmax.f32 %v1084_v33, %v6622_v34  ;;  %v5341_v39 = vmul.f32 %v9956_v26, %v5225_v38  ;;  %v5002_v49 = vmax.f32 %v4442_v40, %v7962_v16  ;;  %v3323_v51 = vmax.f32 %v2763_v41, %v7291_v25 }
 0x1b7   : > { %v5680_v48 = vpack.c.bf16 %v5568_v37, %v5568_v37  ;;  %v7294_v54 = vunpack.c.l.bf16 %v8354_v42  ;;  %v6175_v56 = vunpack.c.h.bf16 %v8079_v13  ;;  %v6399_v57 = vunpack.c.h.bf16 %v8134_v2  ;;  %v8190_v2 = vld [vmem:[%s8781_s26 + $0x128] sm:$0xff]  }
 0x1b8   : > { %v2204_v53 = vmax.f32 %v1644_v46, %v6846_v28  ;;  %v5457_v58 = vadd.f32 %v9971_v36, %v5341_v39  ;;  %v5114_v59 = vpack.c.bf16 %v5002_v49, %v5002_v49  ;;  %v3883_v50 = vmax.f32 %v3323_v51, %v7515_v44  ;;  %v10220_v51 = vld [vmem:[%s8810_s16 + $0x128] sm:$0xff]  }
 0x1b9   : > { %5793 = vst.msk [vmem:[%s8934_s0 + $0x110] sm:$0xf] %vm5724_vm0, %v5680_v48  ;;  %v6623_v61 = vunpack.c.h.bf16 %v8189_v21  ;;  %v7518_v63 = vunpack.c.l.bf16 %v8409_v52  ;;  %v1085_v0 = vmax.f32 %v6175_v56, %v6399_v57  ;;  %v6847_v1 = vunpack.c.h.bf16 %v8244_v22 }
 0x1ba   : > { %v2764_v62 = vmax.f32 %v2204_v53, %v7070_v47  ;;  %v5569_v3 = vmax.f32 %v5457_v58, 0.0  ;;  %v5226_v4 = vunpack.c.l.bf16 %v5114_v59  ;;  %v4443_v5 = vmax.f32 %v3883_v50, %v7739_v43 }
 0x1bb   : > { %v7742_v6 = vunpack.c.l.bf16 %v10183_v55  ;;  %v7966_v10 = vunpack.c.l.bf16 %v10189_v60  ;;  %v1645_v12 = vmax.f32 %v1085_v0, %v6623_v61  ;;  %v7071_v13 = vunpack.c.h.bf16 %v10171_v32  ;;  %v10209_v32 = vld [vmem:[%s8798_s25 + $0x128] sm:$0xff]   ;;  %v8081_v61 = vld [vmem:[%s8771_s14 + $0x130] sm:$0xff]  }
 0x1bc   : > { %v3324_v9 = vmax.f32 %v2764_v62, %v7294_v54  ;;  %v5681_v14 = vpack.c.bf16 %v5569_v3, %v5569_v3  ;;  %v5342_v15 = vmul.f32 %v9956_v26, %v5226_v4  ;;  %v5003_v16 = vmax.f32 %v4443_v5, %v7963_v45  ;;  %v8136_v62 = vld [vmem:[%s8776_s22 + $0x130] sm:$0xff]  }
 0x1bd   : > { %v7295_v17 = vunpack.c.h.bf16 %v8354_v42  ;;  %v2205_v20 = vmax.f32 %v1645_v12, %v6847_v1  ;;  %v6178_v11 = vunpack.c.l.bf16 %v8080_v8  ;;  %v6402_v21 = vunpack.c.l.bf16 %v8135_v7  ;;  %v10215_v42 = vld [vmem:[%s8805_s12 + $0x128] sm:$0xff]  }
 0x1be   : > { %v3884_v19 = vmax.f32 %v3324_v9, %v7518_v63  ;;  %5794 = vst.msk [vmem:[%s8934_s0 + $0x114] sm:$0xf] %vm5724_vm0, %v5681_v14  ;;  %v5458_v22 = vadd.f32 %v9971_v36, %v5342_v15  ;;  %v5115_v24 = vpack.c.bf16 %v5003_v16, %v5003_v16  ;;  %v7519_v25 = vunpack.c.h.bf16 %v8409_v52  ;;  %v10223_v52 = vld [vmem:[%s8818_s19 + $0x128] sm:$0xff]   ;;  %v8246_v9 = vld [vmem:[%s8786_s29 + $0x130] sm:$0xff]  }
 0x1bf   : > { %v6626_v35 = vunpack.c.l.bf16 %v8190_v2  ;;  %v2765_v23 = vmax.f32 %v2205_v20, %v7071_v13  ;;  %v1086_v30 = vmax.f32 %v6178_v11, %v6402_v21  ;;  %v6850_v31 = vunpack.c.l.bf16 %v10199_v18 }
 0x1c0   : > { %v4444_v29 = vmax.f32 %v3884_v19, %v7742_v6  ;;  %v5570_v44 = vmax.f32 %v5458_v22, 0.0  ;;  %v5227_v33 = vunpack.c.l.bf16 %v5115_v24  ;;  %v7743_v34 = vunpack.c.h.bf16 %v10183_v55 }
 0x1c1   : > { %v7967_v28 = vunpack.c.h.bf16 %v10189_v60  ;;  %v3325_v38 = vmax.f32 %v2765_v23, %v7295_v17  ;;  %v1646_v40 = vmax.f32 %v1086_v30, %v6626_v35  ;;  %v7074_v41 = vunpack.c.l.bf16 %v10205_v27 }
 0x1c2   : > { %v5004_v37 = vmax.f32 %v4444_v29, %v7966_v10  ;;  %v5682_v43 = vpack.c.bf16 %v5570_v44, %v5570_v44  ;;  %v5343_v45 = vmul.f32 %v9956_v26, %v5227_v33  ;;  %v7298_v46 = vunpack.c.l.bf16 %v10209_v32 }
 0x1c3   : > { %v6179_v47 = vunpack.c.h.bf16 %v8080_v8  ;;  %v3885_v39 = vmax.f32 %v3325_v38, %v7519_v25  ;;  %v2206_v49 = vmax.f32 %v1646_v40, %v6850_v31  ;;  %v6403_v53 = vunpack.c.h.bf16 %v8135_v7  ;;  %v8191_v7 = vld [vmem:[%s8781_s26 + $0x130] sm:$0xff]  }
 0x1c4   : > { %v5116_v48 = vpack.c.bf16 %v5004_v37, %v5004_v37  ;;  %5795 = vst.msk [vmem:[%s8934_s0 + $0x118] sm:$0xf] %vm5724_vm0, %v5682_v43  ;;  %v5459_v54 = vadd.f32 %v9971_v36, %v5343_v45  ;;  %v7522_v55 = vunpack.c.l.bf16 %v10215_v42  ;;  %v6627_v56 = vunpack.c.h.bf16 %v8190_v2  ;;  %v10255_v40 = vld [vmem:[%s8810_s16 + $0x130] sm:$0xff]  }
 0x1c5   : > { %v6851_v57 = vunpack.c.h.bf16 %v10199_v18  ;;  %v4445_v59 = vmax.f32 %v3885_v39, %v7743_v34  ;;  %v2766_v50 = vmax.f32 %v2206_v49, %v7074_v41  ;;  %v1087_v60 = vmax.f32 %v6179_v47, %v6403_v53  ;;  %v10241_v18 = vld [vmem:[%s8793_s15 + $0x130] sm:$0xff]  }
 0x1c6   : > { %v5228_v58 = vunpack.c.l.bf16 %v5116_v48  ;;  %v5571_v63 = vmax.f32 %v5459_v54, 0.0  ;;  %v7746_v0 = vunpack.c.l.bf16 %v10220_v51  ;;  %v7970_v1 = vunpack.c.l.bf16 %v10223_v52  ;;  %v10261_v47 = vld [vmem:[%s8818_s19 + $0x130] sm:$0xff]  }
 0x1c7   : > { %v7075_v3 = vunpack.c.h.bf16 %v10205_v27  ;;  %v5005_v5 = vmax.f32 %v4445_v59, %v7967_v28  ;;  %v3326_v6 = vmax.f32 %v2766_v50, %v7298_v46  ;;  %v1647_v8 = vmax.f32 %v1087_v60, %v6627_v56  ;;  %v8356_v27 = vld [vmem:[%s8798_s25 + $0x130] sm:$0xff]  }
 0x1c8   : > { %v5344_v4 = vmul.f32 %v9956_v26, %v5228_v58  ;;  %v5683_v10 = vpack.c.bf16 %v5571_v63, %v5571_v63  ;;  %v7299_v12 = vunpack.c.h.bf16 %v10209_v32  ;;  %v6182_v13 = vunpack.c.l.bf16 %v8081_v61  ;;  %v10252_v28 = vld [vmem:[%s8805_s12 + $0x130] sm:$0xff]   ;;  %v8137_v58 = vld [vmem:[%s8776_s22 + $0x138] sm:$0xff]  }
 0x1c9   : > { %v6406_v2 = vunpack.c.l.bf16 %v8136_v62  ;;  %v5117_v15 = vpack.c.bf16 %v5005_v5, %v5005_v5  ;;  %v3886_v16 = vmax.f32 %v3326_v6, %v7522_v55  ;;  %v2207_v17 = vmax.f32 %v1647_v8, %v6851_v57  ;;  %v8082_v57 = vld [vmem:[%s8771_s14 + $0x138] sm:$0xff]  }
 0x1ca   : > { %v5460_v14 = vadd.f32 %v9971_v36, %v5344_v4  ;;  %5796 = vst.msk [vmem:[%s8934_s0 + $0x11c] sm:$0xf] %vm5724_vm0, %v5683_v10  ;;  %v7523_v19 = vunpack.c.h.bf16 %v10215_v42  ;;  %v6630_v11 = vunpack.c.l.bf16 %v8191_v7  ;;  %v6854_v21 = vunpack.c.l.bf16 %v8246_v9  ;;  %v10272_v4 = vld [vmem:[%s8786_s29 + $0x138] sm:$0xff]  }
 0x1cb   : > { %v1088_v20 = vmax.f32 %v6182_v13, %v6406_v2  ;;  %v5229_v24 = vunpack.c.l.bf16 %v5117_v15  ;;  %v4446_v25 = vmax.f32 %v3886_v16, %v7746_v0  ;;  %v2767_v35 = vmax.f32 %v2207_v17, %v7075_v3  ;;  %v10279_v2 = vld [vmem:[%s8793_s15 + $0x138] sm:$0xff]  }
 0x1cc   : > { %v5572_v22 = vmax.f32 %v5460_v14, 0.0  ;;  %v7747_v29 = vunpack.c.h.bf16 %v10220_v51  ;;  %v7971_v23 = vunpack.c.h.bf16 %v10223_v52  ;;  %v7078_v31 = vunpack.c.l.bf16 %v10241_v18  ;;  %v10283_v17 = vld [vmem:[%s8798_s25 + $0x138] sm:$0xff]  }
 0x1cd   : > { %v1648_v30 = vmax.f32 %v1088_v20, %v6630_v11  ;;  %v5345_v44 = vmul.f32 %v9956_v26, %v5229_v24  ;;  %v5006_v33 = vmax.f32 %v4446_v25, %v7970_v1  ;;  %v3327_v34 = vmax.f32 %v2767_v35, %v7299_v12  ;;  %v10289_v25 = vld [vmem:[%s8805_s12 + $0x138] sm:$0xff]  }
 0x1ce   : > { %v5684_v32 = vpack.c.bf16 %v5572_v22, %v5572_v22  ;;  %v7302_v38 = vunpack.c.l.bf16 %v8356_v27  ;;  %v6183_v41 = vunpack.c.h.bf16 %v8081_v61  ;;  %v6407_v42 = vunpack.c.h.bf16 %v8136_v62  ;;  %v8192_v62 = vld [vmem:[%s8781_s26 + $0x138] sm:$0xff]  }
 0x1cf   : > { %v2208_v37 = vmax.f32 %v1648_v30, %v6854_v21  ;;  %v5461_v43 = vadd.f32 %v9971_v36, %v5345_v44  ;;  %v5118_v45 = vpack.c.bf16 %v5006_v33, %v5006_v33  ;;  %v3887_v46 = vmax.f32 %v3327_v34, %v7523_v19  ;;  %v10299_v33 = vld [vmem:[%s8810_s16 + $0x138] sm:$0xff]  }
 0x1d0   : > { %5797 = vst.msk [vmem:[%s8934_s0 + $0x120] sm:$0xf] %vm5724_vm0, %v5684_v32  ;;  %v6631_v48 = vunpack.c.h.bf16 %v8191_v7  ;;  %v7526_v49 = vunpack.c.l.bf16 %v10252_v28  ;;  %v1089_v51 = vmax.f32 %v6183_v41, %v6407_v42  ;;  %v6855_v52 = vunpack.c.h.bf16 %v8246_v9  ;;  %v10302_v34 = vld [vmem:[%s8818_s19 + $0x138] sm:$0xff]  }
 0x1d1   : > { %v2768_v39 = vmax.f32 %v2208_v37, %v7078_v31  ;;  %v5573_v53 = vmax.f32 %v5461_v43, 0.0  ;;  %v5230_v54 = vunpack.c.l.bf16 %v5118_v45  ;;  %v4447_v55 = vmax.f32 %v3887_v46, %v7747_v29  ;;  %v10309_v37 = vld [vmem:[%s10941_s10] ss:$0 sm:$0xff] }
 0x1d2   : > { %v7750_v56 = vunpack.c.l.bf16 %v10255_v40  ;;  %v7974_v50 = vunpack.c.l.bf16 %v10261_v47  ;;  %v1649_v60 = vmax.f32 %v1089_v51, %v6631_v48  ;;  %v7079_v61 = vunpack.c.h.bf16 %v10241_v18  ;;  %v8083_v48 = vld [vmem:[%s8771_s14 + $0x140] sm:$0xff]  }
 0x1d3   : > { %v3328_v59 = vmax.f32 %v2768_v39, %v7302_v38  ;;  %v5685_v63 = vpack.c.bf16 %v5573_v53, %v5573_v53  ;;  %v5346_v0 = vmul.f32 %v9956_v26, %v5230_v54  ;;  %v5007_v1 = vmax.f32 %v4447_v55, %v7971_v23  ;;  %v8138_v39 = vld [vmem:[%s8776_s22 + $0x140] sm:$0xff]  }
 0x1d4   : > { %v7303_v3 = vunpack.c.h.bf16 %v8356_v27  ;;  %v2209_v6 = vmax.f32 %v1649_v60, %v6855_v52  ;;  %v6186_v8 = vunpack.c.l.bf16 %v8082_v57  ;;  %v6410_v7 = vunpack.c.l.bf16 %v8137_v58  ;;  %v10294_v27 = vld [vmem:[%s10940_s9] ss:$0 sm:$0xff] }
 0x1d5   : > { %v3888_v5 = vmax.f32 %v3328_v59, %v7526_v49  ;;  %5798 = vst.msk [vmem:[%s8934_s0 + $0x124] sm:$0xf] %vm5724_vm0, %v5685_v63  ;;  %v5462_v9 = vadd.f32 %v9971_v36, %v5346_v0  ;;  %v5119_v10 = vpack.c.bf16 %v5007_v1, %v5007_v1  ;;  %v7527_v12 = vunpack.c.h.bf16 %v10252_v28  ;;  %v8248_v59 = vld [vmem:[%s8786_s29 + $0x140] sm:$0xff]  }
 0x1d6   : > { %v6634_v13 = vunpack.c.l.bf16 %v8192_v62  ;;  %v2769_v14 = vmax.f32 %v2209_v6, %v7079_v61  ;;  %v1090_v15 = vmax.f32 %v6186_v8, %v6410_v7  ;;  %v6858_v16 = vunpack.c.l.bf16 %v10272_v4 }
 0x1d7   : > { %v4448_v26 = vmax.f32 %v3888_v5, %v7750_v56  ;;  %v5574_v18 = vmax.f32 %v5462_v9, 0.0  ;;  %v5231_v19 = vunpack.c.l.bf16 %v5119_v10  ;;  %v7751_v20 = vunpack.c.h.bf16 %v10255_v40 }
 0x1d8   : > { %v7975_v36 = vunpack.c.h.bf16 %v10261_v47  ;;  %v3329_v21 = vmax.f32 %v2769_v14, %v7303_v3  ;;  %v1650_v22 = vmax.f32 %v1090_v15, %v6634_v13  ;;  %v7082_v24 = vunpack.c.l.bf16 %v10279_v2 }
 0x1d9   : > { %v5008_v11 = vmax.f32 %v4448_v26, %v7974_v50  ;;  %v5686_v35 = vpack.c.bf16 %v5574_v18, %v5574_v18  ;;  %v5347_v29 = vmul.f32 %v10294_v27, %v5231_v19  ;;  %v7306_v23 = vunpack.c.l.bf16 %v10283_v17 }
 0x1da   : > { %v6187_v30 = vunpack.c.h.bf16 %v8082_v57  ;;  %v3889_v32 = vmax.f32 %v3329_v21, %v7527_v12  ;;  %v2210_v44 = vmax.f32 %v1650_v22, %v6858_v16  ;;  %v6411_v28 = vunpack.c.h.bf16 %v8137_v58  ;;  %v8193_v58 = vld [vmem:[%s8781_s26 + $0x140] sm:$0xff]  }
 0x1db   : > { %v5120_v31 = vpack.c.bf16 %v5008_v11, %v5008_v11  ;;  %5799 = vst.msk [vmem:[%s8934_s0 + $0x128] sm:$0xf] %vm5724_vm0, %v5686_v35  ;;  %v5463_v38 = vadd.f32 %v10309_v37, %v5347_v29  ;;  %v7530_v40 = vunpack.c.l.bf16 %v10289_v25  ;;  %v6635_v41 = vunpack.c.h.bf16 %v8192_v62  ;;  %v10337_v22 = vld [vmem:[%s8810_s16 + $0x140] sm:$0xff]  }
 0x1dc   : > { %v6859_v42 = vunpack.c.h.bf16 %v10272_v4  ;;  %v4449_v45 = vmax.f32 %v3889_v32, %v7751_v20  ;;  %v2770_v46 = vmax.f32 %v2210_v44, %v7082_v24  ;;  %v1091_v47 = vmax.f32 %v6187_v30, %v6411_v28  ;;  %v10325_v4 = vld [vmem:[%s8793_s15 + $0x140] sm:$0xff]  }
 0x1dd   : > { %v5232_v43 = vunpack.c.l.bf16 %v5120_v31  ;;  %v5575_v49 = vmax.f32 %v5463_v38, 0.0  ;;  %v7754_v51 = vunpack.c.l.bf16 %v10299_v33  ;;  %v7978_v52 = vunpack.c.l.bf16 %v10302_v34  ;;  %v10343_v30 = vld [vmem:[%s8818_s19 + $0x140] sm:$0xff]  }
 0x1de   : > { %v7083_v53 = vunpack.c.h.bf16 %v10279_v2  ;;  %v5009_v55 = vmax.f32 %v4449_v45, %v7975_v36  ;;  %v3330_v56 = vmax.f32 %v2770_v46, %v7306_v23  ;;  %v1651_v57 = vmax.f32 %v1091_v47, %v6635_v41  ;;  %v8358_v2 = vld [vmem:[%s8798_s25 + $0x140] sm:$0xff]  }
 0x1df   : > { %v5348_v54 = vmul.f32 %v10294_v27, %v5232_v43  ;;  %v5687_v50 = vpack.c.bf16 %v5575_v49, %v5575_v49  ;;  %v7307_v60 = vunpack.c.h.bf16 %v10283_v17  ;;  %v6190_v61 = vunpack.c.l.bf16 %v8083_v48  ;;  %v8413_v36 = vld [vmem:[%s8805_s12 + $0x140] sm:$0xff]   ;;  %v8139_v43 = vld [vmem:[%s8776_s22 + $0x148] sm:$0xff]  }
 0x1e0   : > { %v6414_v62 = vunpack.c.l.bf16 %v8138_v39  ;;  %v5121_v0 = vpack.c.bf16 %v5009_v55, %v5009_v55  ;;  %v3890_v1 = vmax.f32 %v3330_v56, %v7530_v40  ;;  %v2211_v3 = vmax.f32 %v1651_v57, %v6859_v42  ;;  %v8084_v42 = vld [vmem:[%s8771_s14 + $0x148] sm:$0xff]  }
 0x1e1   : > { %v5464_v63 = vadd.f32 %v10309_v37, %v5348_v54  ;;  %5800 = vst.msk [vmem:[%s8934_s0 + $0x12c] sm:$0xf] %vm5724_vm0, %v5687_v50  ;;  %v7531_v5 = vunpack.c.h.bf16 %v10289_v25  ;;  %v6638_v8 = vunpack.c.l.bf16 %v8193_v58  ;;  %v6862_v7 = vunpack.c.l.bf16 %v8248_v59  ;;  %v10353_v54 = vld [vmem:[%s8786_s29 + $0x148] sm:$0xff]  }
 0x1e2   : > { %v1092_v6 = vmax.f32 %v6190_v61, %v6414_v62  ;;  %v5233_v10 = vunpack.c.l.bf16 %v5121_v0  ;;  %v4450_v12 = vmax.f32 %v3890_v1, %v7754_v51  ;;  %v2771_v13 = vmax.f32 %v2211_v3, %v7083_v53  ;;  %v10359_v62 = vld [vmem:[%s8793_s15 + $0x148] sm:$0xff]  }
 0x1e3   : > { %v5576_v9 = vmax.f32 %v5464_v63, 0.0  ;;  %v7755_v26 = vunpack.c.h.bf16 %v10299_v33  ;;  %v7979_v14 = vunpack.c.h.bf16 %v10302_v34  ;;  %v7086_v16 = vunpack.c.l.bf16 %v10325_v4 }
 0x1e4   : > { %v1652_v15 = vmax.f32 %v1092_v6, %v6638_v8  ;;  %v5349_v18 = vmul.f32 %v10294_v27, %v5233_v10  ;;  %v5010_v19 = vmax.f32 %v4450_v12, %v7978_v52  ;;  %v3331_v20 = vmax.f32 %v2771_v13, %v7307_v60 }
 0x1e5   : > { %v5688_v17 = vpack.c.bf16 %v5576_v9, %v5576_v9  ;;  %v7310_v21 = vunpack.c.l.bf16 %v8358_v2  ;;  %v6191_v24 = vunpack.c.h.bf16 %v8083_v48  ;;  %v6415_v25 = vunpack.c.h.bf16 %v8138_v39  ;;  %v8194_v39 = vld [vmem:[%s8781_s26 + $0x148] sm:$0xff]  }
 0x1e6   : > { %v2212_v11 = vmax.f32 %v1652_v15, %v6862_v7  ;;  %v5465_v35 = vadd.f32 %v10309_v37, %v5349_v18  ;;  %v5122_v29 = vpack.c.bf16 %v5010_v19, %v5010_v19  ;;  %v3891_v23 = vmax.f32 %v3331_v20, %v7531_v5  ;;  %v10374_v20 = vld [vmem:[%s8810_s16 + $0x148] sm:$0xff]  }
 0x1e7   : > { %5801 = vst.msk [vmem:[%s8934_s0 + $0x130] sm:$0xf] %vm5724_vm0, %v5688_v17  ;;  %v6639_v31 = vunpack.c.h.bf16 %v8193_v58  ;;  %v7534_v44 = vunpack.c.l.bf16 %v8413_v36  ;;  %v1093_v33 = vmax.f32 %v6191_v24, %v6415_v25  ;;  %v6863_v34 = vunpack.c.h.bf16 %v8248_v59 }
 0x1e8   : > { %v2772_v32 = vmax.f32 %v2212_v11, %v7086_v16  ;;  %v5577_v28 = vmax.f32 %v5465_v35, 0.0  ;;  %v5234_v38 = vunpack.c.l.bf16 %v5122_v29  ;;  %v4451_v40 = vmax.f32 %v3891_v23, %v7755_v26 }
 0x1e9   : > { %v7758_v41 = vunpack.c.l.bf16 %v10337_v22  ;;  %v7982_v46 = vunpack.c.l.bf16 %v10343_v30  ;;  %v1653_v47 = vmax.f32 %v1093_v33, %v6639_v31  ;;  %v7087_v48 = vunpack.c.h.bf16 %v10325_v4  ;;  %v10363_v4 = vld [vmem:[%s8798_s25 + $0x148] sm:$0xff]   ;;  %v8085_v31 = vld [vmem:[%s8771_s14 + $0x150] sm:$0xff]  }
 0x1ea   : > { %v3332_v45 = vmax.f32 %v2772_v32, %v7310_v21  ;;  %v5689_v49 = vpack.c.bf16 %v5577_v28, %v5577_v28  ;;  %v5350_v51 = vmul.f32 %v10294_v27, %v5234_v38  ;;  %v5011_v52 = vmax.f32 %v4451_v40, %v7979_v14  ;;  %v8140_v32 = vld [vmem:[%s8776_s22 + $0x150] sm:$0xff]  }
 0x1eb   : > { %v7311_v53 = vunpack.c.h.bf16 %v8358_v2  ;;  %v2213_v56 = vmax.f32 %v1653_v47, %v6863_v34  ;;  %v6194_v57 = vunpack.c.l.bf16 %v8084_v42  ;;  %v6418_v58 = vunpack.c.l.bf16 %v8139_v43  ;;  %v10369_v2 = vld [vmem:[%s8805_s12 + $0x148] sm:$0xff]  }
 0x1ec   : > { %v3892_v55 = vmax.f32 %v3332_v45, %v7534_v44  ;;  %5802 = vst.msk [vmem:[%s8934_s0 + $0x134] sm:$0xf] %vm5724_vm0, %v5689_v49  ;;  %v5466_v59 = vadd.f32 %v10309_v37, %v5350_v51  ;;  %v5123_v50 = vpack.c.bf16 %v5011_v52, %v5011_v52  ;;  %v7535_v60 = vunpack.c.h.bf16 %v8413_v36  ;;  %v10377_v36 = vld [vmem:[%s8818_s19 + $0x148] sm:$0xff]   ;;  %v8250_v45 = vld [vmem:[%s8786_s29 + $0x150] sm:$0xff]  }
 0x1ed   : > { %v6642_v61 = vunpack.c.l.bf16 %v8194_v39  ;;  %v2773_v0 = vmax.f32 %v2213_v56, %v7087_v48  ;;  %v1094_v1 = vmax.f32 %v6194_v57, %v6418_v58  ;;  %v6866_v3 = vunpack.c.l.bf16 %v10353_v54 }
 0x1ee   : > { %v4452_v63 = vmax.f32 %v3892_v55, %v7758_v41  ;;  %v5578_v5 = vmax.f32 %v5466_v59, 0.0  ;;  %v5235_v6 = vunpack.c.l.bf16 %v5123_v50  ;;  %v7759_v8 = vunpack.c.h.bf16 %v10337_v22 }
 0x1ef   : > { %v7983_v7 = vunpack.c.h.bf16 %v10343_v30  ;;  %v3333_v10 = vmax.f32 %v2773_v0, %v7311_v53  ;;  %v1654_v12 = vmax.f32 %v1094_v1, %v6642_v61  ;;  %v7090_v13 = vunpack.c.l.bf16 %v10359_v62 }
 0x1f0   : > { %v5012_v9 = vmax.f32 %v4452_v63, %v7982_v46  ;;  %v5690_v26 = vpack.c.bf16 %v5578_v5, %v5578_v5  ;;  %v5351_v14 = vmul.f32 %v10294_v27, %v5235_v6  ;;  %v7314_v15 = vunpack.c.l.bf16 %v10363_v4 }
 0x1f1   : > { %v6195_v16 = vunpack.c.h.bf16 %v8084_v42  ;;  %v3893_v18 = vmax.f32 %v3333_v10, %v7535_v60  ;;  %v2214_v19 = vmax.f32 %v1654_v12, %v6866_v3  ;;  %v6419_v11 = vunpack.c.h.bf16 %v8139_v43  ;;  %v8195_v43 = vld [vmem:[%s8781_s26 + $0x150] sm:$0xff]  }
 0x1f2   : > { %v5124_v17 = vpack.c.bf16 %v5012_v9, %v5012_v9  ;;  %5803 = vst.msk [vmem:[%s8934_s0 + $0x138] sm:$0xf] %vm5724_vm0, %v5690_v26  ;;  %v5467_v21 = vadd.f32 %v10309_v37, %v5351_v14  ;;  %v7538_v22 = vunpack.c.l.bf16 %v10369_v2  ;;  %v6643_v24 = vunpack.c.h.bf16 %v8194_v39  ;;  %v10407_v12 = vld [vmem:[%s8810_s16 + $0x150] sm:$0xff]  }
 0x1f3   : > { %v6867_v25 = vunpack.c.h.bf16 %v10353_v54  ;;  %v4453_v29 = vmax.f32 %v3893_v18, %v7759_v8  ;;  %v2774_v23 = vmax.f32 %v2214_v19, %v7090_v13  ;;  %v1095_v30 = vmax.f32 %v6195_v16, %v6419_v11  ;;  %v10395_v54 = vld [vmem:[%s8793_s15 + $0x150] sm:$0xff]  }
 0x1f4   : > { %v5236_v35 = vunpack.c.l.bf16 %v5124_v17  ;;  %v5579_v44 = vmax.f32 %v5467_v21, 0.0  ;;  %v7762_v33 = vunpack.c.l.bf16 %v10374_v20  ;;  %v7986_v34 = vunpack.c.l.bf16 %v10377_v36  ;;  %v10413_v16 = vld [vmem:[%s8818_s19 + $0x150] sm:$0xff]  }
 0x1f5   : > { %v7091_v28 = vunpack.c.h.bf16 %v10359_v62  ;;  %v5013_v40 = vmax.f32 %v4453_v29, %v7983_v7  ;;  %v3334_v41 = vmax.f32 %v2774_v23, %v7314_v15  ;;  %v1655_v42 = vmax.f32 %v1095_v30, %v6643_v24  ;;  %v8360_v62 = vld [vmem:[%s8798_s25 + $0x150] sm:$0xff]  }
 0x1f6   : > { %v5352_v38 = vmul.f32 %v10294_v27, %v5236_v35  ;;  %v5691_v46 = vpack.c.bf16 %v5579_v44, %v5579_v44  ;;  %v7315_v47 = vunpack.c.h.bf16 %v10363_v4  ;;  %v6198_v48 = vunpack.c.l.bf16 %v8085_v31  ;;  %v8415_v7 = vld [vmem:[%s8805_s12 + $0x150] sm:$0xff]   ;;  %v8141_v35 = vld [vmem:[%s8776_s22 + $0x158] sm:$0xff]  }
 0x1f7   : > { %v6422_v39 = vunpack.c.l.bf16 %v8140_v32  ;;  %v5125_v51 = vpack.c.bf16 %v5013_v40, %v5013_v40  ;;  %v3894_v52 = vmax.f32 %v3334_v41, %v7538_v22  ;;  %v2215_v53 = vmax.f32 %v1655_v42, %v6867_v25  ;;  %v8086_v25 = vld [vmem:[%s8771_s14 + $0x158] sm:$0xff]  }
 0x1f8   : > { %v5468_v49 = vadd.f32 %v10309_v37, %v5352_v38  ;;  %5804 = vst.msk [vmem:[%s8934_s0 + $0x13c] sm:$0xf] %vm5724_vm0, %v5691_v46  ;;  %v7539_v55 = vunpack.c.h.bf16 %v10369_v2  ;;  %v6646_v57 = vunpack.c.l.bf16 %v8195_v43  ;;  %v6870_v58 = vunpack.c.l.bf16 %v8250_v45  ;;  %v10423_v38 = vld [vmem:[%s8786_s29 + $0x158] sm:$0xff]  }
 0x1f9   : > { %v1096_v56 = vmax.f32 %v6198_v48, %v6422_v39  ;;  %v5237_v50 = vunpack.c.l.bf16 %v5125_v51  ;;  %v4454_v60 = vmax.f32 %v3894_v52, %v7762_v33  ;;  %v2775_v61 = vmax.f32 %v2215_v53, %v7091_v28  ;;  %v10429_v39 = vld [vmem:[%s8793_s15 + $0x158] sm:$0xff]  }
 0x1fa   : > { %v5580_v59 = vmax.f32 %v5468_v49, 0.0  ;;  %v7763_v63 = vunpack.c.h.bf16 %v10374_v20  ;;  %v7987_v0 = vunpack.c.h.bf16 %v10377_v36  ;;  %v7094_v3 = vunpack.c.l.bf16 %v10395_v54 }
 0x1fb   : > { %v1656_v1 = vmax.f32 %v1096_v56, %v6646_v57  ;;  %v5353_v5 = vmul.f32 %v10294_v27, %v5237_v50  ;;  %v5014_v6 = vmax.f32 %v4454_v60, %v7986_v34  ;;  %v3335_v8 = vmax.f32 %v2775_v61, %v7315_v47 }
 0x1fc   : > { %v5692_v4 = vpack.c.bf16 %v5580_v59, %v5580_v59  ;;  %v7318_v10 = vunpack.c.l.bf16 %v8360_v62  ;;  %v6199_v13 = vunpack.c.h.bf16 %v8085_v31  ;;  %v6423_v2 = vunpack.c.h.bf16 %v8140_v32  ;;  %v8196_v32 = vld [vmem:[%s8781_s26 + $0x158] sm:$0xff]  }
 0x1fd   : > { %v2216_v9 = vmax.f32 %v1656_v1, %v6870_v58  ;;  %v5469_v26 = vadd.f32 %v10309_v37, %v5353_v5  ;;  %v5126_v14 = vpack.c.bf16 %v5014_v6, %v5014_v6  ;;  %v3895_v15 = vmax.f32 %v3335_v8, %v7539_v55  ;;  %v10444_v8 = vld [vmem:[%s8810_s16 + $0x158] sm:$0xff]  }
 0x1fe   : > { %5805 = vst.msk [vmem:[%s8934_s0 + $0x140] sm:$0xf] %vm5724_vm0, %v5692_v4  ;;  %v6647_v17 = vunpack.c.h.bf16 %v8195_v43  ;;  %v7542_v19 = vunpack.c.l.bf16 %v8415_v7  ;;  %v1097_v20 = vmax.f32 %v6199_v13, %v6423_v2  ;;  %v6871_v36 = vunpack.c.h.bf16 %v8250_v45 }
 0x1ff   : > { %v2776_v18 = vmax.f32 %v2216_v9, %v7094_v3  ;;  %v5581_v11 = vmax.f32 %v5469_v26, 0.0  ;;  %v5238_v21 = vunpack.c.l.bf16 %v5126_v14  ;;  %v4455_v22 = vmax.f32 %v3895_v15, %v7763_v63 }
 0x200   : > { %v7766_v24 = vunpack.c.l.bf16 %v10407_v12  ;;  %v7990_v23 = vunpack.c.l.bf16 %v10413_v16  ;;  %v1657_v30 = vmax.f32 %v1097_v20, %v6647_v17  ;;  %v7095_v31 = vunpack.c.h.bf16 %v10395_v54  ;;  %v10433_v54 = vld [vmem:[%s8798_s25 + $0x158] sm:$0xff]   ;;  %v8087_v17 = vld [vmem:[%s8771_s14 + $0x160] sm:$0xff]  }
 0x201   : > { %v3336_v29 = vmax.f32 %v2776_v18, %v7318_v10  ;;  %v5693_v44 = vpack.c.bf16 %v5581_v11, %v5581_v11  ;;  %v5354_v33 = vmul.f32 %v10294_v27, %v5238_v21  ;;  %v5015_v34 = vmax.f32 %v4455_v22, %v7987_v0  ;;  %v8142_v18 = vld [vmem:[%s8776_s22 + $0x160] sm:$0xff]  }
 0x202   : > { %v7319_v28 = vunpack.c.h.bf16 %v8360_v62  ;;  %v2217_v41 = vmax.f32 %v1657_v30, %v6871_v36  ;;  %v6202_v42 = vunpack.c.l.bf16 %v8086_v25  ;;  %v6426_v43 = vunpack.c.l.bf16 %v8141_v35  ;;  %v10439_v62 = vld [vmem:[%s8805_s12 + $0x158] sm:$0xff]  }
 0x203   : > { %v3896_v40 = vmax.f32 %v3336_v29, %v7542_v19  ;;  %5806 = vst.msk [vmem:[%s8934_s0 + $0x144] sm:$0xf] %vm5724_vm0, %v5693_v44  ;;  %v5470_v45 = vadd.f32 %v10309_v37, %v5354_v33  ;;  %v5127_v46 = vpack.c.bf16 %v5015_v34, %v5015_v34  ;;  %v7543_v47 = vunpack.c.h.bf16 %v8415_v7  ;;  %v10447_v7 = vld [vmem:[%s8818_s19 + $0x158] sm:$0xff]   ;;  %v8252_v29 = vld [vmem:[%s8786_s29 + $0x160] sm:$0xff]  }
 0x204   : > { %v6650_v48 = vunpack.c.l.bf16 %v8196_v32  ;;  %v2777_v51 = vmax.f32 %v2217_v41, %v7095_v31  ;;  %v1098_v52 = vmax.f32 %v6202_v42, %v6426_v43  ;;  %v6874_v53 = vunpack.c.l.bf16 %v10423_v38 }
 0x205   : > { %v4456_v49 = vmax.f32 %v3896_v40, %v7766_v24  ;;  %v5582_v55 = vmax.f32 %v5470_v45, 0.0  ;;  %v5239_v56 = vunpack.c.l.bf16 %v5127_v46  ;;  %v7767_v57 = vunpack.c.h.bf16 %v10407_v12 }
 0x206   : > { %v7991_v58 = vunpack.c.h.bf16 %v10413_v16  ;;  %v3337_v50 = vmax.f32 %v2777_v51, %v7319_v28  ;;  %v1658_v60 = vmax.f32 %v1098_v52, %v6650_v48  ;;  %v7098_v61 = vunpack.c.l.bf16 %v10429_v39 }
 0x207   : > { %v5016_v59 = vmax.f32 %v4456_v49, %v7990_v23  ;;  %v5694_v63 = vpack.c.bf16 %v5582_v55, %v5582_v55  ;;  %v5355_v0 = vmul.f32 %v10294_v27, %v5239_v56  ;;  %v7322_v1 = vunpack.c.l.bf16 %v10433_v54 }
 0x208   : > { %v6203_v3 = vunpack.c.h.bf16 %v8086_v25  ;;  %v3897_v5 = vmax.f32 %v3337_v50, %v7543_v47  ;;  %v2218_v6 = vmax.f32 %v1658_v60, %v6874_v53  ;;  %v6427_v9 = vunpack.c.h.bf16 %v8141_v35  ;;  %v8197_v35 = vld [vmem:[%s8781_s26 + $0x160] sm:$0xff]  }
 0x209   : > { %v5128_v4 = vpack.c.bf16 %v5016_v59, %v5016_v59  ;;  %5807 = vst.msk [vmem:[%s8934_s0 + $0x148] sm:$0xf] %vm5724_vm0, %v5694_v63  ;;  %v5471_v10 = vadd.f32 %v10309_v37, %v5355_v0  ;;  %v7546_v12 = vunpack.c.l.bf16 %v10439_v62  ;;  %v6651_v13 = vunpack.c.h.bf16 %v8196_v32  ;;  %v10477_v60 = vld [vmem:[%s8810_s16 + $0x160] sm:$0xff]  }
 0x20a   : > { %v6875_v2 = vunpack.c.h.bf16 %v10423_v38  ;;  %v4457_v14 = vmax.f32 %v3897_v5, %v7767_v57  ;;  %v2778_v15 = vmax.f32 %v2218_v6, %v7098_v61  ;;  %v1099_v16 = vmax.f32 %v6203_v3, %v6427_v9  ;;  %v10465_v38 = vld [vmem:[%s8793_s15 + $0x160] sm:$0xff]  }
 0x20b   : > { %v5240_v26 = vunpack.c.l.bf16 %v5128_v4  ;;  %v5583_v19 = vmax.f32 %v5471_v10, 0.0  ;;  %v7770_v20 = vunpack.c.l.bf16 %v10444_v8  ;;  %v7994_v36 = vunpack.c.l.bf16 %v10447_v7  ;;  %v10483_v3 = vld [vmem:[%s8818_s19 + $0x160] sm:$0xff]  }
 0x20c   : > { %v7099_v11 = vunpack.c.h.bf16 %v10429_v39  ;;  %v5017_v22 = vmax.f32 %v4457_v14, %v7991_v58  ;;  %v3338_v24 = vmax.f32 %v2778_v15, %v7322_v1  ;;  %v1659_v25 = vmax.f32 %v1099_v16, %v6651_v13  ;;  %v8362_v39 = vld [vmem:[%s8798_s25 + $0x160] sm:$0xff]  }
 0x20d   : > { %v5356_v21 = vmul.f32 %v10294_v27, %v5240_v26  ;;  %v5695_v23 = vpack.c.bf16 %v5583_v19, %v5583_v19  ;;  %v7323_v30 = vunpack.c.h.bf16 %v10433_v54  ;;  %v6206_v31 = vunpack.c.l.bf16 %v8087_v17  ;;  %v8417_v58 = vld [vmem:[%s8805_s12 + $0x160] sm:$0xff]   ;;  %v8143_v26 = vld [vmem:[%s8776_s22 + $0x168] sm:$0xff]  }
 0x20e   : > { %v6430_v32 = vunpack.c.l.bf16 %v8142_v18  ;;  %v5129_v33 = vpack.c.bf16 %v5017_v22, %v5017_v22  ;;  %v3898_v34 = vmax.f32 %v3338_v24, %v7546_v12  ;;  %v2219_v28 = vmax.f32 %v1659_v25, %v6875_v2  ;;  %v8088_v2 = vld [vmem:[%s8771_s14 + $0x168] sm:$0xff]  }
 0x20f   : > { %v5472_v44 = vadd.f32 %v10309_v37, %v5356_v21  ;;  %5808 = vst.msk [vmem:[%s8934_s0 + $0x14c] sm:$0xf] %vm5724_vm0, %v5695_v23  ;;  %v7547_v40 = vunpack.c.h.bf16 %v10439_v62  ;;  %v6654_v42 = vunpack.c.l.bf16 %v8197_v35  ;;  %v6878_v43 = vunpack.c.l.bf16 %v8252_v29  ;;  %v10493_v21 = vld [vmem:[%s8786_s29 + $0x168] sm:$0xff]  }
 0x210   : > { %v1100_v41 = vmax.f32 %v6206_v31, %v6430_v32  ;;  %v5241_v46 = vunpack.c.l.bf16 %v5129_v33  ;;  %v4458_v47 = vmax.f32 %v3898_v34, %v7770_v20  ;;  %v2779_v48 = vmax.f32 %v2219_v28, %v7099_v11  ;;  %v10499_v32 = vld [vmem:[%s8793_s15 + $0x168] sm:$0xff]  }
 0x211   : > { %v5584_v45 = vmax.f32 %v5472_v44, 0.0  ;;  %v7771_v49 = vunpack.c.h.bf16 %v10444_v8  ;;  %v7995_v51 = vunpack.c.h.bf16 %v10447_v7  ;;  %v7102_v53 = vunpack.c.l.bf16 %v10465_v38 }
 0x212   : > { %v1660_v52 = vmax.f32 %v1100_v41, %v6654_v42  ;;  %v5357_v55 = vmul.f32 %v10294_v27, %v5241_v46  ;;  %v5018_v56 = vmax.f32 %v4458_v47, %v7994_v36  ;;  %v3339_v57 = vmax.f32 %v2779_v48, %v7323_v30 }
 0x213   : > { %v5696_v54 = vpack.c.bf16 %v5584_v45, %v5584_v45  ;;  %v7326_v50 = vunpack.c.l.bf16 %v8362_v39  ;;  %v6207_v61 = vunpack.c.h.bf16 %v8087_v17  ;;  %v6431_v62 = vunpack.c.h.bf16 %v8142_v18  ;;  %v8198_v18 = vld [vmem:[%s8781_s26 + $0x168] sm:$0xff]  }
 0x214   : > { %v2220_v59 = vmax.f32 %v1660_v52, %v6878_v43  ;;  %v5473_v63 = vadd.f32 %v10309_v37, %v5357_v55  ;;  %v5130_v0 = vpack.c.bf16 %v5018_v56, %v5018_v56  ;;  %v3899_v1 = vmax.f32 %v3339_v57, %v7547_v40  ;;  %v10514_v57 = vld [vmem:[%s8810_s16 + $0x168] sm:$0xff]  }
 0x215   : > { %5809 = vst.msk [vmem:[%s8934_s0 + $0x150] sm:$0xf] %vm5724_vm0, %v5696_v54  ;;  %v6655_v4 = vunpack.c.h.bf16 %v8197_v35  ;;  %v7550_v6 = vunpack.c.l.bf16 %v8417_v58  ;;  %v1101_v8 = vmax.f32 %v6207_v61, %v6431_v62  ;;  %v6879_v7 = vunpack.c.h.bf16 %v8252_v29 }
 0x216   : > { %v2780_v5 = vmax.f32 %v2220_v59, %v7102_v53  ;;  %v5585_v9 = vmax.f32 %v5473_v63, 0.0  ;;  %v5242_v10 = vunpack.c.l.bf16 %v5130_v0  ;;  %v4459_v12 = vmax.f32 %v3899_v1, %v7771_v49 }
 0x217   : > { %v7774_v13 = vunpack.c.l.bf16 %v10477_v60  ;;  %v7998_v15 = vunpack.c.l.bf16 %v10483_v3  ;;  %v1661_v16 = vmax.f32 %v1101_v8, %v6655_v4  ;;  %v7103_v17 = vunpack.c.h.bf16 %v10465_v38  ;;  %v10503_v38 = vld [vmem:[%s8798_s25 + $0x168] sm:$0xff]   ;;  %v8089_v4 = vld [vmem:[%s8771_s14 + $0x170] sm:$0xff]  }
 0x218   : > { %v3340_v14 = vmax.f32 %v2780_v5, %v7326_v50  ;;  %v5697_v19 = vpack.c.bf16 %v5585_v9, %v5585_v9  ;;  %v5358_v20 = vmul.f32 %v10294_v27, %v5242_v10  ;;  %v5019_v36 = vmax.f32 %v4459_v12, %v7995_v51  ;;  %v8144_v5 = vld [vmem:[%s8776_s22 + $0x170] sm:$0xff]  }
 0x219   : > { %v7327_v11 = vunpack.c.h.bf16 %v8362_v39  ;;  %v2221_v24 = vmax.f32 %v1661_v16, %v6879_v7  ;;  %v6210_v25 = vunpack.c.l.bf16 %v8088_v2  ;;  %v6434_v35 = vunpack.c.l.bf16 %v8143_v26  ;;  %v10509_v39 = vld [vmem:[%s8805_s12 + $0x168] sm:$0xff]  }
 0x21a   : > { %v3900_v22 = vmax.f32 %v3340_v14, %v7550_v6  ;;  %5810 = vst.msk [vmem:[%s8934_s0 + $0x154] sm:$0xf] %vm5724_vm0, %v5697_v19  ;;  %v5474_v29 = vadd.f32 %v10309_v37, %v5358_v20  ;;  %v5131_v23 = vpack.c.bf16 %v5019_v36, %v5019_v36  ;;  %v7551_v30 = vunpack.c.h.bf16 %v8417_v58  ;;  %v10517_v58 = vld [vmem:[%s8818_s19 + $0x168] sm:$0xff]   ;;  %v8254_v14 = vld [vmem:[%s8786_s29 + $0x170] sm:$0xff]  }
 0x21b   : > { %v6658_v31 = vunpack.c.l.bf16 %v8198_v18  ;;  %v2781_v33 = vmax.f32 %v2221_v24, %v7103_v17  ;;  %v1102_v34 = vmax.f32 %v6210_v25, %v6434_v35  ;;  %v6882_v28 = vunpack.c.l.bf16 %v10493_v21 }
 0x21c   : > { %v4460_v44 = vmax.f32 %v3900_v22, %v7774_v13  ;;  %v5586_v40 = vmax.f32 %v5474_v29, 0.0  ;;  %v5243_v41 = vunpack.c.l.bf16 %v5131_v23  ;;  %v7775_v42 = vunpack.c.h.bf16 %v10477_v60 }
 0x21d   : > { %v7999_v43 = vunpack.c.h.bf16 %v10483_v3  ;;  %v3341_v46 = vmax.f32 %v2781_v33, %v7327_v11  ;;  %v1662_v47 = vmax.f32 %v1102_v34, %v6658_v31  ;;  %v7106_v48 = vunpack.c.l.bf16 %v10499_v32 }
 0x21e   : > { %v5020_v45 = vmax.f32 %v4460_v44, %v7998_v15  ;;  %v5698_v49 = vpack.c.bf16 %v5586_v40, %v5586_v40  ;;  %v5359_v51 = vmul.f32 %v10294_v27, %v5243_v41  ;;  %v7330_v52 = vunpack.c.l.bf16 %v10503_v38 }
 0x21f   : > { %v6211_v53 = vunpack.c.h.bf16 %v8088_v2  ;;  %v3901_v55 = vmax.f32 %v3341_v46, %v7551_v30  ;;  %v2222_v56 = vmax.f32 %v1662_v47, %v6882_v28  ;;  %v6435_v59 = vunpack.c.h.bf16 %v8143_v26  ;;  %v8199_v26 = vld [vmem:[%s8781_s26 + $0x170] sm:$0xff]  }
 0x220   : > { %v5132_v54 = vpack.c.bf16 %v5020_v45, %v5020_v45  ;;  %5811 = vst.msk [vmem:[%s8934_s0 + $0x158] sm:$0xf] %vm5724_vm0, %v5698_v49  ;;  %v5475_v50 = vadd.f32 %v10309_v37, %v5359_v51  ;;  %v7554_v60 = vunpack.c.l.bf16 %v10509_v39  ;;  %v6659_v61 = vunpack.c.h.bf16 %v8198_v18  ;;  %v10547_v47 = vld [vmem:[%s8810_s16 + $0x170] sm:$0xff]  }
 0x221   : > { %v6883_v62 = vunpack.c.h.bf16 %v10493_v21  ;;  %v4461_v0 = vmax.f32 %v3901_v55, %v7775_v42  ;;  %v2782_v1 = vmax.f32 %v2222_v56, %v7106_v48  ;;  %v1103_v3 = vmax.f32 %v6211_v53, %v6435_v59  ;;  %v10535_v21 = vld [vmem:[%s8793_s15 + $0x170] sm:$0xff]  }
 0x222   : > { %v5244_v63 = vunpack.c.l.bf16 %v5132_v54  ;;  %v5587_v6 = vmax.f32 %v5475_v50, 0.0  ;;  %v7778_v8 = vunpack.c.l.bf16 %v10514_v57  ;;  %v8002_v7 = vunpack.c.l.bf16 %v10517_v58  ;;  %v10553_v53 = vld [vmem:[%s8818_s19 + $0x170] sm:$0xff]  }
 0x223   : > { %v7107_v9 = vunpack.c.h.bf16 %v10499_v32  ;;  %v5021_v12 = vmax.f32 %v4461_v0, %v7999_v43  ;;  %v3342_v13 = vmax.f32 %v2782_v1, %v7330_v52  ;;  %v1663_v2 = vmax.f32 %v1103_v3, %v6659_v61  ;;  %v8364_v32 = vld [vmem:[%s8798_s25 + $0x170] sm:$0xff]  }
 0x224   : > { %v5360_v10 = vmul.f32 %v10294_v27, %v5244_v63  ;;  %v5699_v15 = vpack.c.bf16 %v5587_v6, %v5587_v6  ;;  %v7331_v16 = vunpack.c.h.bf16 %v10503_v38  ;;  %v6214_v17 = vunpack.c.l.bf16 %v8089_v4  ;;  %v8419_v43 = vld [vmem:[%s8805_s12 + $0x170] sm:$0xff]   ;;  %v8145_v63 = vld [vmem:[%s8776_s22 + $0x178] sm:$0xff]  }
 0x225   : > { %v6438_v18 = vunpack.c.l.bf16 %v8144_v5  ;;  %v5133_v20 = vpack.c.bf16 %v5021_v12, %v5021_v12  ;;  %v3902_v36 = vmax.f32 %v3342_v13, %v7554_v60  ;;  %v2223_v11 = vmax.f32 %v1663_v2, %v6883_v62  ;;  %v8090_v62 = vld [vmem:[%s8771_s14 + $0x178] sm:$0xff]  }
 0x226   : > { %v5476_v19 = vadd.f32 %v10309_v37, %v5360_v10  ;;  %5812 = vst.msk [vmem:[%s8934_s0 + $0x15c] sm:$0xf] %vm5724_vm0, %v5699_v15  ;;  %v7555_v22 = vunpack.c.h.bf16 %v10509_v39  ;;  %v6662_v25 = vunpack.c.l.bf16 %v8199_v26  ;;  %v6886_v35 = vunpack.c.l.bf16 %v8254_v14  ;;  %v10563_v10 = vld [vmem:[%s8786_s29 + $0x178] sm:$0xff]  }
 0x227   : > { %v1104_v24 = vmax.f32 %v6214_v17, %v6438_v18  ;;  %v5245_v23 = vunpack.c.l.bf16 %v5133_v20  ;;  %v4462_v30 = vmax.f32 %v3902_v36, %v7778_v8  ;;  %v2783_v31 = vmax.f32 %v2223_v11, %v7107_v9  ;;  %v10569_v18 = vld [vmem:[%s8793_s15 + $0x178] sm:$0xff]  }
 0x228   : > { %v5588_v29 = vmax.f32 %v5476_v19, 0.0  ;;  %v7779_v44 = vunpack.c.h.bf16 %v10514_v57  ;;  %v8003_v33 = vunpack.c.h.bf16 %v10517_v58  ;;  %v7110_v28 = vunpack.c.l.bf16 %v10535_v21 }
 0x229   : > { %v1664_v34 = vmax.f32 %v1104_v24, %v6662_v25  ;;  %v5361_v40 = vmul.f32 %v10294_v27, %v5245_v23  ;;  %v5022_v41 = vmax.f32 %v4462_v30, %v8002_v7  ;;  %v3343_v42 = vmax.f32 %v2783_v31, %v7331_v16 }
 0x22a   : > { %v5700_v38 = vpack.c.bf16 %v5588_v29, %v5588_v29  ;;  %v7334_v46 = vunpack.c.l.bf16 %v8364_v32  ;;  %v6215_v48 = vunpack.c.h.bf16 %v8089_v4  ;;  %v6439_v39 = vunpack.c.h.bf16 %v8144_v5  ;;  %v8200_v5 = vld [vmem:[%s8781_s26 + $0x178] sm:$0xff]  }
 0x22b   : > { %v2224_v45 = vmax.f32 %v1664_v34, %v6886_v35  ;;  %v5477_v49 = vadd.f32 %v10309_v37, %v5361_v40  ;;  %v5134_v51 = vpack.c.bf16 %v5022_v41, %v5022_v41  ;;  %v3903_v52 = vmax.f32 %v3343_v42, %v7555_v22  ;;  %v10584_v42 = vld [vmem:[%s8810_s16 + $0x178] sm:$0xff]  }
 0x22c   : > { %5813 = vst.msk [vmem:[%s8934_s0 + $0x160] sm:$0xf] %vm5724_vm0, %v5700_v38  ;;  %v6663_v54 = vunpack.c.h.bf16 %v8199_v26  ;;  %v7558_v56 = vunpack.c.l.bf16 %v8419_v43  ;;  %v1105_v57 = vmax.f32 %v6215_v48, %v6439_v39  ;;  %v6887_v58 = vunpack.c.h.bf16 %v8254_v14 }
 0x22d   : > { %v2784_v55 = vmax.f32 %v2224_v45, %v7110_v28  ;;  %v5589_v59 = vmax.f32 %v5477_v49, 0.0  ;;  %v5246_v50 = vunpack.c.l.bf16 %v5134_v51  ;;  %v4463_v60 = vmax.f32 %v3903_v52, %v7779_v44 }
 0x22e   : > { %v7782_v61 = vunpack.c.l.bf16 %v10547_v47  ;;  %v8006_v1 = vunpack.c.l.bf16 %v10553_v53  ;;  %v1665_v3 = vmax.f32 %v1105_v57, %v6663_v54  ;;  %v7111_v4 = vunpack.c.h.bf16 %v10535_v21  ;;  %v10573_v21 = vld [vmem:[%s8798_s25 + $0x178] sm:$0xff]   ;;  %v8091_v54 = vld [vmem:[%s8771_s14 + $0x180] sm:$0xff]  }
 0x22f   : > { %v3344_v0 = vmax.f32 %v2784_v55, %v7334_v46  ;;  %v5701_v6 = vpack.c.bf16 %v5589_v59, %v5589_v59  ;;  %v5362_v8 = vmul.f32 %v10294_v27, %v5246_v50  ;;  %v5023_v7 = vmax.f32 %v4463_v60, %v8003_v33  ;;  %v8146_v55 = vld [vmem:[%s8776_s22 + $0x180] sm:$0xff]  }
 0x230   : > { %v7335_v9 = vunpack.c.h.bf16 %v8364_v32  ;;  %v2225_v13 = vmax.f32 %v1665_v3, %v6887_v58  ;;  %v6218_v2 = vunpack.c.l.bf16 %v8090_v62  ;;  %v6442_v26 = vunpack.c.l.bf16 %v8145_v63  ;;  %v10579_v32 = vld [vmem:[%s8805_s12 + $0x178] sm:$0xff]  }
 0x231   : > { %v3904_v12 = vmax.f32 %v3344_v0, %v7558_v56  ;;  %5814 = vst.msk [vmem:[%s8934_s0 + $0x164] sm:$0xf] %vm5724_vm0, %v5701_v6  ;;  %v5478_v14 = vadd.f32 %v10309_v37, %v5362_v8  ;;  %v5135_v15 = vpack.c.bf16 %v5023_v7, %v5023_v7  ;;  %v7559_v16 = vunpack.c.h.bf16 %v8419_v43  ;;  %v10587_v43 = vld [vmem:[%s8818_s19 + $0x178] sm:$0xff]   ;;  %v10602_v0 = vld [vmem:[%s8786_s29 + $0x180] sm:$0xff]  }
 0x232   : > { %v6666_v17 = vunpack.c.l.bf16 %v8200_v5  ;;  %v2785_v20 = vmax.f32 %v2225_v13, %v7111_v4  ;;  %v1106_v36 = vmax.f32 %v6218_v2, %v6442_v26  ;;  %v6890_v11 = vunpack.c.l.bf16 %v10563_v10 }
 0x233   : > { %v4464_v19 = vmax.f32 %v3904_v12, %v7782_v61  ;;  %v5590_v22 = vmax.f32 %v5478_v14, 0.0  ;;  %v5247_v24 = vunpack.c.l.bf16 %v5135_v15  ;;  %v7783_v25 = vunpack.c.h.bf16 %v10547_v47 }
 0x234   : > { %v8007_v35 = vunpack.c.h.bf16 %v10553_v53  ;;  %v3345_v23 = vmax.f32 %v2785_v20, %v7335_v9  ;;  %v1666_v30 = vmax.f32 %v1106_v36, %v6666_v17  ;;  %v7114_v31 = vunpack.c.l.bf16 %v10569_v18 }
 0x235   : > { %v5024_v29 = vmax.f32 %v4464_v19, %v8006_v1  ;;  %v5702_v44 = vpack.c.bf16 %v5590_v22, %v5590_v22  ;;  %v5363_v33 = vmul.f32 %v10294_v27, %v5247_v24  ;;  %v7338_v34 = vunpack.c.l.bf16 %v10573_v21 }
 0x236   : > { %v6219_v28 = vunpack.c.h.bf16 %v8090_v62  ;;  %v3905_v40 = vmax.f32 %v3345_v23, %v7559_v16  ;;  %v2226_v41 = vmax.f32 %v1666_v30, %v6890_v11  ;;  %v6443_v45 = vunpack.c.h.bf16 %v8145_v63  ;;  %v8201_v63 = vld [vmem:[%s8781_s26 + $0x180] sm:$0xff]  }
 0x237   : > { %v5136_v38 = vpack.c.bf16 %v5024_v29, %v5024_v29  ;;  %5815 = vst.msk [vmem:[%s8934_s0 + $0x168] sm:$0xf] %vm5724_vm0, %v5702_v44  ;;  %v5479_v46 = vadd.f32 %v10309_v37, %v5363_v33  ;;  %v7562_v47 = vunpack.c.l.bf16 %v10579_v32  ;;  %v6667_v48 = vunpack.c.h.bf16 %v8200_v5  ;;  %v10625_v30 = vld [vmem:[%s8810_s16 + $0x180] sm:$0xff]  }
 0x238   : > { %v6891_v39 = vunpack.c.h.bf16 %v10563_v10  ;;  %v4465_v51 = vmax.f32 %v3905_v40, %v7783_v25  ;;  %v2786_v52 = vmax.f32 %v2226_v41, %v7114_v31  ;;  %v1107_v53 = vmax.f32 %v6219_v28, %v6443_v45  ;;  %v10607_v10 = vld [vmem:[%s8793_s15 + $0x180] sm:$0xff]  }
 0x239   : > { %v5248_v49 = vunpack.c.l.bf16 %v5136_v38  ;;  %v5591_v56 = vmax.f32 %v5479_v46, 0.0  ;;  %v7786_v57 = vunpack.c.l.bf16 %v10584_v42  ;;  %v8010_v58 = vunpack.c.l.bf16 %v10587_v43 }
 0x23a   : > { %v7115_v59 = vunpack.c.h.bf16 %v10569_v18  ;;  %v5025_v60 = vmax.f32 %v4465_v51, %v8007_v35  ;;  %v3346_v61 = vmax.f32 %v2786_v52, %v7338_v34  ;;  %v1667_v62 = vmax.f32 %v1107_v53, %v6667_v48  ;;  %v10614_v18 = vld [vmem:[%s8798_s25 + $0x180] sm:$0xff]   ;;  %v8092_v48 = vld [vmem:[%s8771_s14 + $0x188] sm:$0xff]  }
 0x23b   : > { %v5364_v50 = vmul.f32 %v10294_v27, %v5248_v49  ;;  %v5703_v1 = vpack.c.bf16 %v5591_v56, %v5591_v56  ;;  %v7339_v3 = vunpack.c.h.bf16 %v10573_v21  ;;  %v6222_v4 = vunpack.c.l.bf16 %v8091_v54  ;;  %v10621_v35 = vld [vmem:[%s8805_s12 + $0x180] sm:$0xff]   ;;  %v8202_v53 = vld [vmem:[%s8781_s26 + $0x188] sm:$0xff]  }
 0x23c   : > { %v6446_v5 = vunpack.c.l.bf16 %v8146_v55  ;;  %v5137_v8 = vpack.c.bf16 %v5025_v60, %v5025_v60  ;;  %v3906_v7 = vmax.f32 %v3346_v61, %v7562_v47  ;;  %v2227_v9 = vmax.f32 %v1667_v62, %v6891_v39 }
 0x23d   : > { %v5480_v6 = vadd.f32 %v10309_v37, %v5364_v50  ;;  %5816 = vst.msk [vmem:[%s8934_s0 + $0x16c] sm:$0xf] %vm5724_vm0, %v5703_v1  ;;  %v7563_v12 = vunpack.c.h.bf16 %v10579_v32  ;;  %v6670_v2 = vunpack.c.l.bf16 %v8201_v63  ;;  %v6894_v26 = vunpack.c.l.bf16 %v10602_v0 }
 0x23e   : > { %v1108_v13 = vmax.f32 %v6222_v4, %v6446_v5  ;;  %v5249_v15 = vunpack.c.l.bf16 %v5137_v8  ;;  %v4466_v16 = vmax.f32 %v3906_v7, %v7786_v57  ;;  %v2787_v17 = vmax.f32 %v2227_v9, %v7115_v59  ;;  %v10649_v59 = vld [vmem:[%s8786_s29 + $0x188] sm:$0xff]  }
 0x23f   : > { %v5592_v14 = vmax.f32 %v5480_v6, 0.0  ;;  %v7787_v19 = vunpack.c.h.bf16 %v10584_v42  ;;  %v8011_v20 = vunpack.c.h.bf16 %v10587_v43  ;;  %v7118_v11 = vunpack.c.l.bf16 %v10607_v10  ;;  %v10661_v5 = vld [vmem:[%s8793_s15 + $0x188] sm:$0xff]  }
 0x240   : > { %v1668_v36 = vmax.f32 %v1108_v13, %v6670_v2  ;;  %v5365_v22 = vmul.f32 %v10294_v27, %v5249_v15  ;;  %v5026_v24 = vmax.f32 %v4466_v16, %v8010_v58  ;;  %v3347_v25 = vmax.f32 %v2787_v17, %v7339_v3  ;;  %v10631_v27 = vld [vmem:[%s8818_s19 + $0x180] sm:$0xff]  }
 0x241   : > { %v5704_v21 = vpack.c.bf16 %v5592_v14, %v5592_v14  ;;  %v7342_v23 = vunpack.c.l.bf16 %v10614_v18  ;;  %v6223_v31 = vunpack.c.h.bf16 %v8091_v54  ;;  %v6447_v32 = vunpack.c.h.bf16 %v8146_v55  ;;  %v10644_v55 = vld [vmem:[%s10940_s9] ss:$0 sm:$0xff] }
 0x242   : > { %v2228_v29 = vmax.f32 %v1668_v36, %v6894_v26  ;;  %v5481_v44 = vadd.f32 %v10309_v37, %v5365_v22  ;;  %v5138_v33 = vpack.c.bf16 %v5026_v24, %v5026_v24  ;;  %v3907_v34 = vmax.f32 %v3347_v25, %v7563_v12  ;;  %v8147_v37 = vld [vmem:[%s8776_s22 + $0x188] sm:$0xff]  }
 0x243   : > { %5817 = vst.msk [vmem:[%s8934_s0 + $0x170] sm:$0xf] %vm5724_vm0, %v5704_v21  ;;  %v6671_v28 = vunpack.c.h.bf16 %v8201_v63  ;;  %v7566_v40 = vunpack.c.l.bf16 %v10621_v35  ;;  %v1109_v41 = vmax.f32 %v6223_v31, %v6447_v32  ;;  %v6895_v42 = vunpack.c.h.bf16 %v10602_v0  ;;  %v10656_v63 = vld [vmem:[%s10941_s10] ss:$0 sm:$0xff]  ;;  %v10676_v25 = vld [vmem:[%s8810_s16 + $0x188] sm:$0xff]  }
 0x244   : > { %v2788_v38 = vmax.f32 %v2228_v29, %v7118_v11  ;;  %v5593_v43 = vmax.f32 %v5481_v44, 0.0  ;;  %v5250_v45 = vunpack.c.l.bf16 %v5138_v33  ;;  %v4467_v46 = vmax.f32 %v3907_v34, %v7787_v19 }
 0x245   : > { %v7790_v47 = vunpack.c.l.bf16 %v10625_v30  ;;  %v8014_v49 = vunpack.c.l.bf16 %v10631_v27  ;;  %v1669_v51 = vmax.f32 %v1109_v41, %v6671_v28  ;;  %v7119_v52 = vunpack.c.h.bf16 %v10607_v10  ;;  %v10665_v10 = vld [vmem:[%s8798_s25 + $0x188] sm:$0xff]   ;;  %v8093_v28 = vld [vmem:[%s8771_s14 + $0x190] sm:$0xff]  }
 0x246   : > { %v3348_v39 = vmax.f32 %v2788_v38, %v7342_v23  ;;  %v5705_v54 = vpack.c.bf16 %v5593_v43, %v5593_v43  ;;  %v5366_v56 = vmul.f32 %v10644_v55, %v5250_v45  ;;  %v5027_v57 = vmax.f32 %v4467_v46, %v8011_v20  ;;  %v8148_v38 = vld [vmem:[%s8776_s22 + $0x190] sm:$0xff]  }
 0x247   : > { %v7343_v58 = vunpack.c.h.bf16 %v10614_v18  ;;  %v2229_v60 = vmax.f32 %v1669_v51, %v6895_v42  ;;  %v6226_v61 = vunpack.c.l.bf16 %v8092_v48  ;;  %v6450_v62 = vunpack.c.l.bf16 %v8147_v37  ;;  %v10671_v18 = vld [vmem:[%s8805_s12 + $0x188] sm:$0xff]  }
 0x248   : > { %v3908_v50 = vmax.f32 %v3348_v39, %v7566_v40  ;;  %5818 = vst.msk [vmem:[%s8934_s0 + $0x174] sm:$0xf] %vm5724_vm0, %v5705_v54  ;;  %v5482_v0 = vadd.f32 %v10656_v63, %v5366_v56  ;;  %v5139_v1 = vpack.c.bf16 %v5027_v57, %v5027_v57  ;;  %v7567_v3 = vunpack.c.h.bf16 %v10621_v35  ;;  %v10679_v35 = vld [vmem:[%s8818_s19 + $0x188] sm:$0xff]   ;;  %v8258_v39 = vld [vmem:[%s8786_s29 + $0x190] sm:$0xff]  }
 0x249   : > { %v6674_v4 = vunpack.c.l.bf16 %v8202_v53  ;;  %v2789_v8 = vmax.f32 %v2229_v60, %v7119_v52  ;;  %v1110_v7 = vmax.f32 %v6226_v61, %v6450_v62  ;;  %v6898_v9 = vunpack.c.l.bf16 %v10649_v59 }
 0x24a   : > { %v4468_v6 = vmax.f32 %v3908_v50, %v7790_v47  ;;  %v5594_v12 = vmax.f32 %v5482_v0, 0.0  ;;  %v5251_v13 = vunpack.c.l.bf16 %v5139_v1  ;;  %v7791_v2 = vunpack.c.h.bf16 %v10625_v30 }
 0x24b   : > { %v8015_v26 = vunpack.c.h.bf16 %v10631_v27  ;;  %v3349_v15 = vmax.f32 %v2789_v8, %v7343_v58  ;;  %v1670_v16 = vmax.f32 %v1110_v7, %v6674_v4  ;;  %v7122_v17 = vunpack.c.l.bf16 %v10661_v5 }
 0x24c   : > { %v5028_v14 = vmax.f32 %v4468_v6, %v8014_v49  ;;  %v5706_v19 = vpack.c.bf16 %v5594_v12, %v5594_v12  ;;  %v5367_v20 = vmul.f32 %v10644_v55, %v5251_v13  ;;  %v7346_v36 = vunpack.c.l.bf16 %v10665_v10 }
 0x24d   : > { %v6227_v11 = vunpack.c.h.bf16 %v8092_v48  ;;  %v3909_v22 = vmax.f32 %v3349_v15, %v7567_v3  ;;  %v2230_v24 = vmax.f32 %v1670_v16, %v6898_v9  ;;  %v6451_v29 = vunpack.c.h.bf16 %v8147_v37  ;;  %v8203_v37 = vld [vmem:[%s8781_s26 + $0x190] sm:$0xff]  }
 0x24e   : > { %v5140_v21 = vpack.c.bf16 %v5028_v14, %v5028_v14  ;;  %5819 = vst.msk [vmem:[%s8934_s0 + $0x178] sm:$0xf] %vm5724_vm0, %v5706_v19  ;;  %v5483_v23 = vadd.f32 %v10656_v63, %v5367_v20  ;;  %v7570_v30 = vunpack.c.l.bf16 %v10671_v18  ;;  %v6675_v31 = vunpack.c.h.bf16 %v8202_v53  ;;  %v10709_v16 = vld [vmem:[%s8810_s16 + $0x190] sm:$0xff]  }
 0x24f   : > { %v6899_v32 = vunpack.c.h.bf16 %v10649_v59  ;;  %v4469_v33 = vmax.f32 %v3909_v22, %v7791_v2  ;;  %v2790_v34 = vmax.f32 %v2230_v24, %v7122_v17  ;;  %v1111_v27 = vmax.f32 %v6227_v11, %v6451_v29  ;;  %v10697_v59 = vld [vmem:[%s8793_s15 + $0x190] sm:$0xff]  }
 0x250   : > { %v5252_v44 = vunpack.c.l.bf16 %v5140_v21  ;;  %v5595_v40 = vmax.f32 %v5483_v23, 0.0  ;;  %v7794_v41 = vunpack.c.l.bf16 %v10676_v25  ;;  %v8018_v42 = vunpack.c.l.bf16 %v10679_v35  ;;  %v10715_v11 = vld [vmem:[%s8818_s19 + $0x190] sm:$0xff]  }
 0x251   : > { %v7123_v43 = vunpack.c.h.bf16 %v10661_v5  ;;  %v5029_v46 = vmax.f32 %v4469_v33, %v8015_v26  ;;  %v3350_v47 = vmax.f32 %v2790_v34, %v7346_v36  ;;  %v1671_v48 = vmax.f32 %v1111_v27, %v6675_v31  ;;  %v8368_v5 = vld [vmem:[%s8798_s25 + $0x190] sm:$0xff]  }
 0x252   : > { %v5368_v45 = vmul.f32 %v10644_v55, %v5252_v44  ;;  %v5707_v49 = vpack.c.bf16 %v5595_v40, %v5595_v40  ;;  %v7347_v51 = vunpack.c.h.bf16 %v10665_v10  ;;  %v6230_v52 = vunpack.c.l.bf16 %v8093_v28  ;;  %v8423_v26 = vld [vmem:[%s8805_s12 + $0x190] sm:$0xff]   ;;  %v8149_v44 = vld [vmem:[%s8776_s22 + $0x198] sm:$0xff]  }
 0x253   : > { %v6454_v53 = vunpack.c.l.bf16 %v8148_v38  ;;  %v5141_v56 = vpack.c.bf16 %v5029_v46, %v5029_v46  ;;  %v3910_v57 = vmax.f32 %v3350_v47, %v7570_v30  ;;  %v2231_v58 = vmax.f32 %v1671_v48, %v6899_v32  ;;  %v8094_v32 = vld [vmem:[%s8771_s14 + $0x198] sm:$0xff]  }
 0x254   : > { %v5484_v54 = vadd.f32 %v10656_v63, %v5368_v45  ;;  %5820 = vst.msk [vmem:[%s8934_s0 + $0x17c] sm:$0xf] %vm5724_vm0, %v5707_v49  ;;  %v7571_v50 = vunpack.c.h.bf16 %v10671_v18  ;;  %v6678_v61 = vunpack.c.l.bf16 %v8203_v37  ;;  %v6902_v62 = vunpack.c.l.bf16 %v8258_v39  ;;  %v10725_v45 = vld [vmem:[%s8786_s29 + $0x198] sm:$0xff]  }
 0x255   : > { %v1112_v60 = vmax.f32 %v6230_v52, %v6454_v53  ;;  %v5253_v1 = vunpack.c.l.bf16 %v5141_v56  ;;  %v4470_v3 = vmax.f32 %v3910_v57, %v7794_v41  ;;  %v2791_v4 = vmax.f32 %v2231_v58, %v7123_v43  ;;  %v10731_v53 = vld [vmem:[%s8793_s15 + $0x198] sm:$0xff]  }
 0x256   : > { %v5596_v0 = vmax.f32 %v5484_v54, 0.0  ;;  %v7795_v6 = vunpack.c.h.bf16 %v10676_v25  ;;  %v8019_v8 = vunpack.c.h.bf16 %v10679_v35  ;;  %v7126_v9 = vunpack.c.l.bf16 %v10697_v59 }
 0x257   : > { %v1672_v7 = vmax.f32 %v1112_v60, %v6678_v61  ;;  %v5369_v12 = vmul.f32 %v10644_v55, %v5253_v1  ;;  %v5030_v13 = vmax.f32 %v4470_v3, %v8018_v42  ;;  %v3351_v2 = vmax.f32 %v2791_v4, %v7347_v51 }
 0x258   : > { %v5708_v10 = vpack.c.bf16 %v5596_v0, %v5596_v0  ;;  %v7350_v15 = vunpack.c.l.bf16 %v8368_v5  ;;  %v6231_v17 = vunpack.c.h.bf16 %v8093_v28  ;;  %v6455_v18 = vunpack.c.h.bf16 %v8148_v38  ;;  %v8204_v38 = vld [vmem:[%s8781_s26 + $0x198] sm:$0xff]  }
 0x259   : > { %v2232_v14 = vmax.f32 %v1672_v7, %v6902_v62  ;;  %v5485_v19 = vadd.f32 %v10656_v63, %v5369_v12  ;;  %v5142_v20 = vpack.c.bf16 %v5030_v13, %v5030_v13  ;;  %v3911_v36 = vmax.f32 %v3351_v2, %v7571_v50  ;;  %v10746_v2 = vld [vmem:[%s8810_s16 + $0x198] sm:$0xff]  }
 0x25a   : > { %5821 = vst.msk [vmem:[%s8934_s0 + $0x180] sm:$0xf] %vm5724_vm0, %v5708_v10  ;;  %v6679_v21 = vunpack.c.h.bf16 %v8203_v37  ;;  %v7574_v24 = vunpack.c.l.bf16 %v8423_v26  ;;  %v1113_v25 = vmax.f32 %v6231_v17, %v6455_v18  ;;  %v6903_v35 = vunpack.c.h.bf16 %v8258_v39 }
 0x25b   : > { %v2792_v22 = vmax.f32 %v2232_v14, %v7126_v9  ;;  %v5597_v29 = vmax.f32 %v5485_v19, 0.0  ;;  %v5254_v23 = vunpack.c.l.bf16 %v5142_v20  ;;  %v4471_v30 = vmax.f32 %v3911_v36, %v7795_v6 }
 0x25c   : > { %v7798_v31 = vunpack.c.l.bf16 %v10709_v16  ;;  %v8022_v34 = vunpack.c.l.bf16 %v10715_v11  ;;  %v1673_v27 = vmax.f32 %v1113_v25, %v6679_v21  ;;  %v7127_v28 = vunpack.c.h.bf16 %v10697_v59  ;;  %v10735_v59 = vld [vmem:[%s8798_s25 + $0x198] sm:$0xff]   ;;  %v8095_v21 = vld [vmem:[%s8771_s14 + $0x1a0] sm:$0xff]  }
 0x25d   : > { %v3352_v33 = vmax.f32 %v2792_v22, %v7350_v15  ;;  %v5709_v40 = vpack.c.bf16 %v5597_v29, %v5597_v29  ;;  %v5370_v41 = vmul.f32 %v10644_v55, %v5254_v23  ;;  %v5031_v42 = vmax.f32 %v4471_v30, %v8019_v8  ;;  %v8150_v22 = vld [vmem:[%s8776_s22 + $0x1a0] sm:$0xff]  }
 0x25e   : > { %v7351_v43 = vunpack.c.h.bf16 %v8368_v5  ;;  %v2233_v47 = vmax.f32 %v1673_v27, %v6903_v35  ;;  %v6234_v48 = vunpack.c.l.bf16 %v8094_v32  ;;  %v6458_v37 = vunpack.c.l.bf16 %v8149_v44  ;;  %v10741_v5 = vld [vmem:[%s8805_s12 + $0x198] sm:$0xff]  }
 0x25f   : > { %v3912_v46 = vmax.f32 %v3352_v33, %v7574_v24  ;;  %5822 = vst.msk [vmem:[%s8934_s0 + $0x184] sm:$0xf] %vm5724_vm0, %v5709_v40  ;;  %v5486_v39 = vadd.f32 %v10656_v63, %v5370_v41  ;;  %v5143_v49 = vpack.c.bf16 %v5031_v42, %v5031_v42  ;;  %v7575_v51 = vunpack.c.h.bf16 %v8423_v26  ;;  %v10749_v26 = vld [vmem:[%s8818_s19 + $0x198] sm:$0xff]   ;;  %v8260_v33 = vld [vmem:[%s8786_s29 + $0x1a0] sm:$0xff]  }
 0x260   : > { %v6682_v52 = vunpack.c.l.bf16 %v8204_v38  ;;  %v2793_v56 = vmax.f32 %v2233_v47, %v7127_v28  ;;  %v1114_v57 = vmax.f32 %v6234_v48, %v6458_v37  ;;  %v6906_v58 = vunpack.c.l.bf16 %v10725_v45 }
 0x261   : > { %v4472_v54 = vmax.f32 %v3912_v46, %v7798_v31  ;;  %v5598_v50 = vmax.f32 %v5486_v39, 0.0  ;;  %v5255_v60 = vunpack.c.l.bf16 %v5143_v49  ;;  %v7799_v61 = vunpack.c.h.bf16 %v10709_v16 }
 0x262   : > { %v8023_v62 = vunpack.c.h.bf16 %v10715_v11  ;;  %v3353_v1 = vmax.f32 %v2793_v56, %v7351_v43  ;;  %v1674_v3 = vmax.f32 %v1114_v57, %v6682_v52  ;;  %v7130_v4 = vunpack.c.l.bf16 %v10731_v53 }
 0x263   : > { %v5032_v0 = vmax.f32 %v4472_v54, %v8022_v34  ;;  %v5710_v6 = vpack.c.bf16 %v5598_v50, %v5598_v50  ;;  %v5371_v8 = vmul.f32 %v10644_v55, %v5255_v60  ;;  %v7354_v7 = vunpack.c.l.bf16 %v10735_v59 }
 0x264   : > { %v6235_v9 = vunpack.c.h.bf16 %v8094_v32  ;;  %v3913_v12 = vmax.f32 %v3353_v1, %v7575_v51  ;;  %v2234_v13 = vmax.f32 %v1674_v3, %v6906_v58  ;;  %v6459_v14 = vunpack.c.h.bf16 %v8149_v44  ;;  %v8205_v44 = vld [vmem:[%s8781_s26 + $0x1a0] sm:$0xff]  }
 0x265   : > { %v5144_v10 = vpack.c.bf16 %v5032_v0, %v5032_v0  ;;  %5823 = vst.msk [vmem:[%s8934_s0 + $0x188] sm:$0xf] %vm5724_vm0, %v5710_v6  ;;  %v5487_v15 = vadd.f32 %v10656_v63, %v5371_v8  ;;  %v7578_v16 = vunpack.c.l.bf16 %v10741_v5  ;;  %v6683_v17 = vunpack.c.h.bf16 %v8204_v38  ;;  %v10779_v3 = vld [vmem:[%s8810_s16 + $0x1a0] sm:$0xff]  }
 0x266   : > { %v6907_v18 = vunpack.c.h.bf16 %v10725_v45  ;;  %v4473_v20 = vmax.f32 %v3913_v12, %v7799_v61  ;;  %v2794_v36 = vmax.f32 %v2234_v13, %v7130_v4  ;;  %v1115_v11 = vmax.f32 %v6235_v9, %v6459_v14  ;;  %v10767_v45 = vld [vmem:[%s8793_s15 + $0x1a0] sm:$0xff]  }
 0x267   : > { %v5256_v19 = vunpack.c.l.bf16 %v5144_v10  ;;  %v5599_v24 = vmax.f32 %v5487_v15, 0.0  ;;  %v7802_v25 = vunpack.c.l.bf16 %v10746_v2  ;;  %v8026_v35 = vunpack.c.l.bf16 %v10749_v26  ;;  %v10785_v9 = vld [vmem:[%s8818_s19 + $0x1a0] sm:$0xff]  }
 0x268   : > { %v7131_v29 = vunpack.c.h.bf16 %v10731_v53  ;;  %v5033_v30 = vmax.f32 %v4473_v20, %v8023_v62  ;;  %v3354_v31 = vmax.f32 %v2794_v36, %v7354_v7  ;;  %v1675_v32 = vmax.f32 %v1115_v11, %v6683_v17  ;;  %v8370_v53 = vld [vmem:[%s8798_s25 + $0x1a0] sm:$0xff]  }
 0x269   : > { %v5372_v23 = vmul.f32 %v10644_v55, %v5256_v19  ;;  %v5711_v34 = vpack.c.bf16 %v5599_v24, %v5599_v24  ;;  %v7355_v27 = vunpack.c.h.bf16 %v10735_v59  ;;  %v6238_v28 = vunpack.c.l.bf16 %v8095_v21  ;;  %v8425_v62 = vld [vmem:[%s8805_s12 + $0x1a0] sm:$0xff]   ;;  %v8151_v19 = vld [vmem:[%s8776_s22 + $0x1a8] sm:$0xff]  }
 0x26a   : > { %v6462_v38 = vunpack.c.l.bf16 %v8150_v22  ;;  %v5145_v41 = vpack.c.bf16 %v5033_v30, %v5033_v30  ;;  %v3914_v42 = vmax.f32 %v3354_v31, %v7578_v16  ;;  %v2235_v43 = vmax.f32 %v1675_v32, %v6907_v18  ;;  %v8096_v18 = vld [vmem:[%s8771_s14 + $0x1a8] sm:$0xff]  }
 0x26b   : > { %v5488_v40 = vadd.f32 %v10656_v63, %v5372_v23  ;;  %5824 = vst.msk [vmem:[%s8934_s0 + $0x18c] sm:$0xf] %vm5724_vm0, %v5711_v34  ;;  %v7579_v46 = vunpack.c.h.bf16 %v10741_v5  ;;  %v6686_v48 = vunpack.c.l.bf16 %v8205_v44  ;;  %v6910_v37 = vunpack.c.l.bf16 %v8260_v33  ;;  %v10795_v23 = vld [vmem:[%s8786_s29 + $0x1a8] sm:$0xff]  }
 0x26c   : > { %v1116_v47 = vmax.f32 %v6238_v28, %v6462_v38  ;;  %v5257_v49 = vunpack.c.l.bf16 %v5145_v41  ;;  %v4474_v51 = vmax.f32 %v3914_v42, %v7802_v25  ;;  %v2795_v52 = vmax.f32 %v2235_v43, %v7131_v29  ;;  %v10801_v38 = vld [vmem:[%s8793_s15 + $0x1a8] sm:$0xff]  }
 0x26d   : > { %v5600_v39 = vmax.f32 %v5488_v40, 0.0  ;;  %v7803_v54 = vunpack.c.h.bf16 %v10746_v2  ;;  %v8027_v56 = vunpack.c.h.bf16 %v10749_v26  ;;  %v7134_v58 = vunpack.c.l.bf16 %v10767_v45 }
 0x26e   : > { %v1676_v57 = vmax.f32 %v1116_v47, %v6686_v48  ;;  %v5373_v50 = vmul.f32 %v10644_v55, %v5257_v49  ;;  %v5034_v60 = vmax.f32 %v4474_v51, %v8026_v35  ;;  %v3355_v61 = vmax.f32 %v2795_v52, %v7355_v27 }
 0x26f   : > { %v5712_v59 = vpack.c.bf16 %v5600_v39, %v5600_v39  ;;  %v7358_v1 = vunpack.c.l.bf16 %v8370_v53  ;;  %v6239_v4 = vunpack.c.h.bf16 %v8095_v21  ;;  %v6463_v5 = vunpack.c.h.bf16 %v8150_v22  ;;  %v8206_v22 = vld [vmem:[%s8781_s26 + $0x1a8] sm:$0xff]  }
 0x270   : > { %v2236_v0 = vmax.f32 %v1676_v57, %v6910_v37  ;;  %v5489_v6 = vadd.f32 %v10656_v63, %v5373_v50  ;;  %v5146_v8 = vpack.c.bf16 %v5034_v60, %v5034_v60  ;;  %v3915_v7 = vmax.f32 %v3355_v61, %v7579_v46  ;;  %v10816_v61 = vld [vmem:[%s8810_s16 + $0x1a8] sm:$0xff]  }
 0x271   : > { %5825 = vst.msk [vmem:[%s8934_s0 + $0x190] sm:$0xf] %vm5724_vm0, %v5712_v59  ;;  %v6687_v10 = vunpack.c.h.bf16 %v8205_v44  ;;  %v7582_v13 = vunpack.c.l.bf16 %v8425_v62  ;;  %v1117_v2 = vmax.f32 %v6239_v4, %v6463_v5  ;;  %v6911_v26 = vunpack.c.h.bf16 %v8260_v33 }
 0x272   : > { %v2796_v12 = vmax.f32 %v2236_v0, %v7134_v58  ;;  %v5601_v14 = vmax.f32 %v5489_v6, 0.0  ;;  %v5258_v15 = vunpack.c.l.bf16 %v5146_v8  ;;  %v4475_v16 = vmax.f32 %v3915_v7, %v7803_v54 }
 0x273   : > { %v7806_v17 = vunpack.c.l.bf16 %v10779_v3  ;;  %v8030_v36 = vunpack.c.l.bf16 %v10785_v9  ;;  %v1677_v11 = vmax.f32 %v1117_v2, %v6687_v10  ;;  %v7135_v21 = vunpack.c.h.bf16 %v10767_v45  ;;  %v10805_v45 = vld [vmem:[%s8798_s25 + $0x1a8] sm:$0xff]   ;;  %v8097_v10 = vld [vmem:[%s8771_s14 + $0x1b0] sm:$0xff]  }
 0x274   : > { %v3356_v20 = vmax.f32 %v2796_v12, %v7358_v1  ;;  %v5713_v24 = vpack.c.bf16 %v5601_v14, %v5601_v14  ;;  %v5374_v25 = vmul.f32 %v10644_v55, %v5258_v15  ;;  %v5035_v35 = vmax.f32 %v4475_v16, %v8027_v56  ;;  %v8152_v12 = vld [vmem:[%s8776_s22 + $0x1b0] sm:$0xff]  }
 0x275   : > { %v7359_v29 = vunpack.c.h.bf16 %v8370_v53  ;;  %v2237_v31 = vmax.f32 %v1677_v11, %v6911_v26  ;;  %v6242_v32 = vunpack.c.l.bf16 %v8096_v18  ;;  %v6466_v44 = vunpack.c.l.bf16 %v8151_v19  ;;  %v10811_v53 = vld [vmem:[%s8805_s12 + $0x1a8] sm:$0xff]  }
 0x276   : > { %v3916_v30 = vmax.f32 %v3356_v20, %v7582_v13  ;;  %5826 = vst.msk [vmem:[%s8934_s0 + $0x194] sm:$0xf] %vm5724_vm0, %v5713_v24  ;;  %v5490_v33 = vadd.f32 %v10656_v63, %v5374_v25  ;;  %v5147_v34 = vpack.c.bf16 %v5035_v35, %v5035_v35  ;;  %v7583_v27 = vunpack.c.h.bf16 %v8425_v62  ;;  %v10819_v62 = vld [vmem:[%s8818_s19 + $0x1a8] sm:$0xff]   ;;  %v8262_v20 = vld [vmem:[%s8786_s29 + $0x1b0] sm:$0xff]  }
 0x277   : > { %v6690_v28 = vunpack.c.l.bf16 %v8206_v22  ;;  %v2797_v41 = vmax.f32 %v2237_v31, %v7135_v21  ;;  %v1118_v42 = vmax.f32 %v6242_v32, %v6466_v44  ;;  %v6914_v43 = vunpack.c.l.bf16 %v10795_v23 }
 0x278   : > { %v4476_v40 = vmax.f32 %v3916_v30, %v7806_v17  ;;  %v5602_v46 = vmax.f32 %v5490_v33, 0.0  ;;  %v5259_v47 = vunpack.c.l.bf16 %v5147_v34  ;;  %v7807_v48 = vunpack.c.h.bf16 %v10779_v3 }
 0x279   : > { %v8031_v37 = vunpack.c.h.bf16 %v10785_v9  ;;  %v3357_v49 = vmax.f32 %v2797_v41, %v7359_v29  ;;  %v1678_v51 = vmax.f32 %v1118_v42, %v6690_v28  ;;  %v7138_v52 = vunpack.c.l.bf16 %v10801_v38 }
 0x27a   : > { %v5036_v39 = vmax.f32 %v4476_v40, %v8030_v36  ;;  %v5714_v54 = vpack.c.bf16 %v5602_v46, %v5602_v46  ;;  %v5375_v56 = vmul.f32 %v10644_v55, %v5259_v47  ;;  %v7362_v57 = vunpack.c.l.bf16 %v10805_v45 }
 0x27b   : > { %v6243_v58 = vunpack.c.h.bf16 %v8096_v18  ;;  %v3917_v50 = vmax.f32 %v3357_v49, %v7583_v27  ;;  %v2238_v60 = vmax.f32 %v1678_v51, %v6914_v43  ;;  %v6467_v0 = vunpack.c.h.bf16 %v8151_v19  ;;  %v8207_v19 = vld [vmem:[%s8781_s26 + $0x1b0] sm:$0xff]  }
 0x27c   : > { %v5148_v59 = vpack.c.bf16 %v5036_v39, %v5036_v39  ;;  %5827 = vst.msk [vmem:[%s8934_s0 + $0x198] sm:$0xf] %vm5724_vm0, %v5714_v54  ;;  %v5491_v1 = vadd.f32 %v10656_v63, %v5375_v56  ;;  %v7586_v3 = vunpack.c.l.bf16 %v10811_v53  ;;  %v6691_v4 = vunpack.c.h.bf16 %v8206_v22  ;;  %v10849_v51 = vld [vmem:[%s8810_s16 + $0x1b0] sm:$0xff]  }
 0x27d   : > { %v6915_v5 = vunpack.c.h.bf16 %v10795_v23  ;;  %v4477_v8 = vmax.f32 %v3917_v50, %v7807_v48  ;;  %v2798_v7 = vmax.f32 %v2238_v60, %v7138_v52  ;;  %v1119_v9 = vmax.f32 %v6243_v58, %v6467_v0  ;;  %v10837_v23 = vld [vmem:[%s8793_s15 + $0x1b0] sm:$0xff]  }
 0x27e   : > { %v5260_v6 = vunpack.c.l.bf16 %v5148_v59  ;;  %v5603_v13 = vmax.f32 %v5491_v1, 0.0  ;;  %v7810_v2 = vunpack.c.l.bf16 %v10816_v61  ;;  %v8034_v26 = vunpack.c.l.bf16 %v10819_v62  ;;  %v10855_v58 = vld [vmem:[%s8818_s19 + $0x1b0] sm:$0xff]  }
 0x27f   : > { %v7139_v14 = vunpack.c.h.bf16 %v10801_v38  ;;  %v5037_v16 = vmax.f32 %v4477_v8, %v8031_v37  ;;  %v3358_v17 = vmax.f32 %v2798_v7, %v7362_v57  ;;  %v1679_v18 = vmax.f32 %v1119_v9, %v6691_v4  ;;  %v8372_v38 = vld [vmem:[%s8798_s25 + $0x1b0] sm:$0xff]  }
 0x280   : > { %v5376_v15 = vmul.f32 %v10644_v55, %v5260_v6  ;;  %v5715_v36 = vpack.c.bf16 %v5603_v13, %v5603_v13  ;;  %v7363_v11 = vunpack.c.h.bf16 %v10805_v45  ;;  %v6246_v21 = vunpack.c.l.bf16 %v8097_v10  ;;  %v8427_v37 = vld [vmem:[%s8805_s12 + $0x1b0] sm:$0xff]   ;;  %v8153_v6 = vld [vmem:[%s8776_s22 + $0x1b8] sm:$0xff]  }
 0x281   : > { %v6470_v22 = vunpack.c.l.bf16 %v8152_v12  ;;  %v5149_v25 = vpack.c.bf16 %v5037_v16, %v5037_v16  ;;  %v3918_v35 = vmax.f32 %v3358_v17, %v7586_v3  ;;  %v2239_v29 = vmax.f32 %v1679_v18, %v6915_v5  ;;  %v8098_v5 = vld [vmem:[%s8771_s14 + $0x1b8] sm:$0xff]  }
 0x282   : > { %v5492_v24 = vadd.f32 %v10656_v63, %v5376_v15  ;;  %5828 = vst.msk [vmem:[%s8934_s0 + $0x19c] sm:$0xf] %vm5724_vm0, %v5715_v36  ;;  %v7587_v30 = vunpack.c.h.bf16 %v10811_v53  ;;  %v6694_v32 = vunpack.c.l.bf16 %v8207_v19  ;;  %v6918_v44 = vunpack.c.l.bf16 %v8262_v20  ;;  %v8263_v15 = vld [vmem:[%s8786_s29 + $0x1b8] sm:$0xff]  }
 0x283   : > { %v1120_v31 = vmax.f32 %v6246_v21, %v6470_v22  ;;  %v5261_v34 = vunpack.c.l.bf16 %v5149_v25  ;;  %v4478_v27 = vmax.f32 %v3918_v35, %v7810_v2  ;;  %v2799_v28 = vmax.f32 %v2239_v29, %v7139_v14  ;;  %v8318_v22 = vld [vmem:[%s8793_s15 + $0x1b8] sm:$0xff]  }
 0x284   : > { %v5604_v33 = vmax.f32 %v5492_v24, 0.0  ;;  %v7811_v40 = vunpack.c.h.bf16 %v10816_v61  ;;  %v8035_v41 = vunpack.c.h.bf16 %v10819_v62  ;;  %v7142_v43 = vunpack.c.l.bf16 %v10837_v23 }
 0x285   : > { %v1680_v42 = vmax.f32 %v1120_v31, %v6694_v32  ;;  %v5377_v46 = vmul.f32 %v10644_v55, %v5261_v34  ;;  %v5038_v47 = vmax.f32 %v4478_v27, %v8034_v26  ;;  %v3359_v48 = vmax.f32 %v2799_v28, %v7363_v11 }
 0x286   : > { %v5716_v45 = vpack.c.bf16 %v5604_v33, %v5604_v33  ;;  %v7366_v49 = vunpack.c.l.bf16 %v8372_v38  ;;  %v6247_v52 = vunpack.c.h.bf16 %v8097_v10  ;;  %v6471_v53 = vunpack.c.h.bf16 %v8152_v12  ;;  %v8208_v12 = vld [vmem:[%s8781_s26 + $0x1b8] sm:$0xff]   ;;  %s6027_s26 = smul.u32 448, %s8740_s21  ;;  %s5850_s21 = sshll.u32 %s8934_s0, 4  ;;  %s5851_s21 = int_to_ptr.vmem [resolvable:$true] %s5850_s21 }
 0x287   : > { %v2240_v39 = vmax.f32 %v1680_v42, %v6918_v44  ;;  %v5493_v54 = vadd.f32 %v10656_v63, %v5377_v46  ;;  %v5150_v56 = vpack.c.bf16 %v5038_v47, %v5038_v47  ;;  %v3919_v57 = vmax.f32 %v3359_v48, %v7587_v30  ;;  %v8483_v48 = vld [vmem:[%s8810_s16 + $0x1b8] sm:$0xff]  }
 0x288   : > { %5829 = vst.msk [vmem:[%s8934_s0 + $0x1a0] sm:$0xf] %vm5724_vm0, %v5716_v45  ;;  %v6695_v59 = vunpack.c.h.bf16 %v8207_v19  ;;  %v7590_v60 = vunpack.c.l.bf16 %v8427_v37  ;;  %v1121_v61 = vmax.f32 %v6247_v52, %v6471_v53  ;;  %v6919_v62 = vunpack.c.h.bf16 %v8262_v20  ;;  %s5849_s29 = scalar_lea.hbm %s10942_s11, %s6027_s26 }
 0x289   : > { %v2800_v50 = vmax.f32 %v2240_v39, %v7142_v43  ;;  %v5605_v0 = vmax.f32 %v5493_v54, 0.0  ;;  %v5262_v1 = vunpack.c.l.bf16 %v5150_v56  ;;  %v4479_v3 = vmax.f32 %v3919_v57, %v7811_v40  ;;  %v8538_v57 = vld [vmem:[%s8818_s19 + $0x1b8] sm:$0xff]   ;;  %s5852_s15 = sshll.u32 %s5849_s29, 4  ;;  %s5853_s15 = int_to_ptr.hbm [resolvable:$true] %s5852_s15 }
 0x28a   : > { %v7814_v4 = vunpack.c.l.bf16 %v10849_v51  ;;  %v8038_v7 = vunpack.c.l.bf16 %v10855_v58  ;;  %v1681_v9 = vmax.f32 %v1121_v61, %v6695_v59  ;;  %v7143_v10 = vunpack.c.h.bf16 %v10837_v23  ;;  %v8373_v23 = vld [vmem:[%s8798_s25 + $0x1b8] sm:$0xff]   ;;  %s5838_s25 = scalar_lea.sflag [#allocation3], %s506_s30 }
 0x28b   : > { %v3360_v8 = vmax.f32 %v2800_v50, %v7366_v49  ;;  %v5717_v13 = vpack.c.bf16 %v5605_v0, %v5605_v0  ;;  %v5378_v2 = vmul.f32 %v10644_v55, %v5262_v1  ;;  %v5039_v26 = vmax.f32 %v4479_v3, %v8035_v41 }
 0x28c   : > { %v7367_v14 = vunpack.c.h.bf16 %v8372_v38  ;;  %v2241_v17 = vmax.f32 %v1681_v9, %v6919_v62  ;;  %v6250_v18 = vunpack.c.l.bf16 %v8098_v5  ;;  %v6474_v19 = vunpack.c.l.bf16 %v8153_v6  ;;  %v8428_v38 = vld [vmem:[%s8805_s12 + $0x1b8] sm:$0xff]   ;;  %s8607_s12 = sshra.s32 %s5853_s15, 4  ;;  %s8608_s12 = int_to_ptr.hbm [resolvable:$true] %s8607_s12 }
 0x28d   : > { %v3920_v16 = vmax.f32 %v3360_v8, %v7590_v60  ;;  %5830 = vst.msk [vmem:[%s8934_s0 + $0x1a4] sm:$0xf] %vm5724_vm0, %v5717_v13  ;;  %v5494_v20 = vadd.f32 %v10656_v63, %v5378_v2  ;;  %v5151_v36 = vpack.c.bf16 %v5039_v26, %v5039_v26  ;;  %v7591_v11 = vunpack.c.h.bf16 %v8427_v37  ;;  %s8609_s16 = scalar_lea.hbm %s8608_s12, 448  ;;  %p8614_p0 = scmp.lt.s32.totalorder %s8608_s12, %s10942_s11 }
 0x28e   : > { %v6698_v21 = vunpack.c.l.bf16 %v8208_v12  ;;  %v2801_v25 = vmax.f32 %v2241_v17, %v7143_v10  ;;  %v1122_v35 = vmax.f32 %v6250_v18, %v6474_v19  ;;  %v6922_v29 = vunpack.c.l.bf16 %v8263_v15  ;;  %p8610_p11 = scmp.ne.s32.totalorder %s8608_s12, %s8609_s16  ;;  %p8615_p1 = scmp.lt.s32.totalorder %s8613_s23, %s8609_s16 }
 0x28f   : > { %v4480_v24 = vmax.f32 %v3920_v16, %v7814_v4  ;;  %v5606_v30 = vmax.f32 %v5494_v20, 0.0  ;;  %v5263_v31 = vunpack.c.l.bf16 %v5151_v36  ;;  %v7815_v32 = vunpack.c.h.bf16 %v10849_v51 }
 0x290   : > { %v8039_v44 = vunpack.c.h.bf16 %v10855_v58  ;;  %v3361_v34 = vmax.f32 %v2801_v25, %v7367_v14  ;;  %v1682_v27 = vmax.f32 %v1122_v35, %v6698_v21  ;;  %v7146_v28 = vunpack.c.l.bf16 %v8318_v22  ;;  %p8611_p12 = pnand %p8610_p11, %p8757_p5  ;;  %p8616_p2 = por %p8615_p1, %p8614_p0 }
 0x291   : > { %v5040_v33 = vmax.f32 %v4480_v24, %v8038_v7  ;;  %v5718_v40 = vpack.c.bf16 %v5606_v30, %v5606_v30  ;;  %v5379_v41 = vmul.f32 %v10644_v55, %v5263_v31  ;;  %v7370_v42 = vunpack.c.l.bf16 %v8373_v23 }
 0x292   : > { %v6251_v43 = vunpack.c.h.bf16 %v8098_v5  ;;  %v3921_v46 = vmax.f32 %v3361_v34, %v7591_v11  ;;  %v2242_v47 = vmax.f32 %v1682_v27, %v6922_v29  ;;  %v6475_v37 = vunpack.c.h.bf16 %v8153_v6  ;;  %p8612_p13 = pneg %p8611_p12 }
 0x293   : > { %v5152_v45 = vpack.c.bf16 %v5040_v33, %v5040_v33  ;;  %5831 = vst.msk [vmem:[%s8934_s0 + $0x1a8] sm:$0xf] %vm5724_vm0, %v5718_v40  ;;  %v5495_v39 = vadd.f32 %v10656_v63, %v5379_v41  ;;  %v7594_v49 = vunpack.c.l.bf16 %v8428_v38  ;;  %v6699_v51 = vunpack.c.h.bf16 %v8208_v12 }
 0x294   : > { %v6923_v52 = vunpack.c.h.bf16 %v8263_v15  ;;  %v4481_v54 = vmax.f32 %v3921_v46, %v7815_v32  ;;  %v2802_v56 = vmax.f32 %v2242_v47, %v7146_v28  ;;  %v1123_v58 = vmax.f32 %v6251_v43, %v6475_v37  ;;  %p8617_p3 = pnand %p8616_p2, %p8612_p13 }
 0x295   : > { %v5264_v53 = vunpack.c.l.bf16 %v5152_v45  ;;  %v5607_v59 = vmax.f32 %v5495_v39, 0.0  ;;  %v7818_v50 = vunpack.c.l.bf16 %v8483_v48  ;;  %v7147_v60 = vunpack.c.h.bf16 %v8318_v22 }
 0x296   : > { %v5041_v62 = vmax.f32 %v4481_v54, %v8039_v44  ;;  %v3362_v0 = vmax.f32 %v2802_v56, %v7370_v42  ;;  %v1683_v1 = vmax.f32 %v1123_v58, %v6699_v51  ;;  %v8042_v4 = vunpack.c.l.bf16 %v8538_v57 }
 0x297   : > { %v5380_v61 = vmul.f32 %v10644_v55, %v5264_v53  ;;  %v5719_v3 = vpack.c.bf16 %v5607_v59, %v5607_v59  ;;  %v7371_v5 = vunpack.c.h.bf16 %v8373_v23  ;;  %v7595_v10 = vunpack.c.h.bf16 %v8428_v38 }
 0x298   : > { %v5153_v8 = vpack.c.bf16 %v5041_v62, %v5041_v62  ;;  %v3922_v7 = vmax.f32 %v3362_v0, %v7594_v49  ;;  %v2243_v9 = vmax.f32 %v1683_v1, %v6923_v52  ;;  %v7819_v14 = vunpack.c.h.bf16 %v8483_v48 }
 0x299   : > { %v5496_v6 = vadd.f32 %v10656_v63, %v5380_v61  ;;  %5832 = vst.msk [vmem:[%s8934_s0 + $0x1ac] sm:$0xf] %vm5724_vm0, %v5719_v3  ;;  %v8043_v11 = vunpack.c.h.bf16 %v8538_v57 }
 0x29a   : > { %v5265_v13 = vunpack.c.l.bf16 %v5153_v8  ;;  %v4482_v2 = vmax.f32 %v3922_v7, %v7818_v50  ;;  %v2803_v26 = vmax.f32 %v2243_v9, %v7147_v60 }
 0x29b   : > { %v5608_v12 = vmax.f32 %v5496_v6, 0.0 }
 0x29c   : > { %v5381_v16 = vmul.f32 %v10644_v55, %v5265_v13  ;;  %v5042_v17 = vmax.f32 %v4482_v2, %v8042_v4  ;;  %v3363_v18 = vmax.f32 %v2803_v26, %v7371_v5 }
 0x29d   : > { %v5720_v15 = vpack.c.bf16 %v5608_v12, %v5608_v12 }
 0x29e   : > { %v5497_v19 = vadd.f32 %v10656_v63, %v5381_v16  ;;  %v5154_v20 = vpack.c.bf16 %v5042_v17, %v5042_v17  ;;  %v3923_v36 = vmax.f32 %v3363_v18, %v7595_v10 }
 0x29f   : > { %5833 = vst.msk [vmem:[%s8934_s0 + $0x1b0] sm:$0xf] %vm5724_vm0, %v5720_v15 }
 0x2a0   : > { %v5609_v21 = vmax.f32 %v5497_v19, 0.0  ;;  %v5266_v22 = vunpack.c.l.bf16 %v5154_v20  ;;  %v4483_v24 = vmax.f32 %v3923_v36, %v7819_v14 }
 0x2a2   : > { %v5721_v25 = vpack.c.bf16 %v5609_v21, %v5609_v21  ;;  %v5382_v35 = vmul.f32 %v10644_v55, %v5266_v22  ;;  %v5043_v29 = vmax.f32 %v4483_v24, %v8043_v11 }
 0x2a4   : > { %5834 = vst.msk [vmem:[%s8934_s0 + $0x1b4] sm:$0xf] %vm5724_vm0, %v5721_v25  ;;  %v5498_v23 = vadd.f32 %v10656_v63, %v5382_v35  ;;  %v5155_v30 = vpack.c.bf16 %v5043_v29, %v5043_v29 }
 0x2a6   : > { %v5610_v31 = vmax.f32 %v5498_v23, 0.0  ;;  %v5267_v32 = vunpack.c.l.bf16 %v5155_v30 }
 0x2a8   : > { %v5722_v44 = vpack.c.bf16 %v5610_v31, %v5610_v31  ;;  %v5383_v33 = vmul.f32 %v10644_v55, %v5267_v32 }
 0x2aa   : > { %5835 = vst.msk [vmem:[%s8934_s0 + $0x1b8] sm:$0xf] %vm5724_vm0, %v5722_v44  ;;  %v5499_v34 = vadd.f32 %v10656_v63, %v5383_v33 }
 0x2ac   : > { %v5611_v27 = vmax.f32 %v5499_v34, 0.0 }
 0x2ae   : > { %v5723_v28 = vpack.c.bf16 %v5611_v27, %v5611_v27 }
 0x2b0   : > { %5836 = vst.msk [vmem:[%s8934_s0 + $0x1bc] sm:$0xf] %vm5724_vm0, %v5723_v28 }
 0x2b1   : > { %8620 = shalt.err (!%p8617_p3)
}
 0x2b2   : > { %s8657_s30 = smov 64   ;;  %s8658_s0 = smov 4  }
 0x2b3   : > { %8540 = dma.vmem_to_hbm [thread:$0]  (%p8757_p5), %s5851_s21, 7168, %s5853_s15, %s5838_s25, %s8657_s30, %s8657_s30, %s8658_s0  }
 0x2b4 PF: > { %p8546_p4 = scmp.ge.s32.totalorder %s8655_s20, 2  ;;  %s5867_s26 = sand.u32 1, %s8643_s17  }
 0x2b5   : > { %s5868_s14 = scalar_lea.sflag [#allocation3], %s5867_s26 }
 0x2b6   : > { %p8543_p7 = pnand %p8546_p4, %p8761_p6 }
 0x2b8   : > { %p8544_p8 = pneg %p8543_p7 }
 0x2ba   : > { %8638 = dma.done.wait (%p8544_p8), %s5868_s14, 7168  }
 0x2bb   : > { %8640 = vsyncadd (%p8544_p8), %s5868_s14, 4294960128  ;;  %s10955_s20 = sld [smem:[#allocation6_spill]]  ;;  %s10958_s17 = smov %s8647_s18 }
 0x2bc   : > { %s10956_s22 = sld [smem:[#allocation5_spill]] }
 0x2bd   : > { %s10957_s19 = sld [smem:[#allocation7_spill]] }
 0x2c1   : > { %p21_p9 = scmp.ge.s32.totalorder %s10955_s20, 9  }
 0x2c2   : > { %s10959_s18 = smov %s10956_s22 }
 0x2c3   :  { %23 = sbr.rel (!%p21_p9) target bundleno = 6 (0x6), region = 123 }
 0x2c8   :  { %5874 = vsyncpa [#allocation3], 1 }
 0x2c9   :  { %5876 = vsyncpa [#allocation3 + $0x1], 1 }

</bundles_post_ra>
